<compile_context>
chip_gen: v7x
topology: tpu7x:2x2x1
jax: 0.10.0
libtpu: 0.0.40
codegen_flags: <defaults>
</compile_context>

<pallas_src>
import functools
import math

import jax
import jax.numpy as jnp
from jax.experimental import pallas as pl
from jax.experimental.pallas import tpu as pltpu


def _cdiv(a, b):
    return -(-a // b)


def _pick_tm(m):
    """Row-tile: single minimally padded block for small M; <=256 tiles otherwise (v7x VMEM)."""
    if m <= 256:
        return max(8, _cdiv(m, 8) * 8)
    for cand in (256, 128):
        if m % cand == 0:
            return cand
    return 256


# ---------------------------------------------------------------------------
# Pallas kernels
# ---------------------------------------------------------------------------

def _mm_kernel(a_ref, w_ref, sc_ref, sh_ref, o_ref, *, n_hswish, relu):
    """(tm,K)@(K,N) with fused per-channel affine (bias/BN) and relu / hardswish epilogue."""
    acc = jnp.dot(a_ref[...], w_ref[...], preferred_element_type=jnp.float32)
    y = acc * sc_ref[...] + sh_ref[...]
    if relu:
        y = jnp.maximum(y, 0.0)
    for _ in range(n_hswish):
        y = y * jnp.clip(y + 3.0, 0.0, 6.0) * (1.0 / 6.0)
    o_ref[...] = y.astype(o_ref.dtype)


def matmul_fused(a, w, scale, shift, *, n_hswish=0, relu=False, out_dtype=jnp.bfloat16):
    """a: (M,K) bf16, w: (K,N) bf16, scale/shift: (1,N) f32 -> (M,N) out_dtype (lane-dense)."""
    M, K = a.shape
    N = w.shape[1]
    a = a.astype(jnp.bfloat16)                      # no-op when already bf16
    tm = _pick_tm(M)
    Mp = _cdiv(M, tm) * tm
    if Mp != M:                                     # skip pad entirely when M already tiles
        a = jnp.pad(a, ((0, Mp - M), (0, 0)))
    out = pl.pallas_call(
        functools.partial(_mm_kernel, n_hswish=n_hswish, relu=relu),
        out_shape=jax.ShapeDtypeStruct((Mp, N), out_dtype),
        grid=(Mp // tm,),
        in_specs=[
            pl.BlockSpec((tm, K), lambda i: (i, 0)),
            pl.BlockSpec((K, N), lambda i: (0, 0)),     # weight resident across M tiles
            pl.BlockSpec((1, N), lambda i: (0, 0)),
            pl.BlockSpec((1, N), lambda i: (0, 0)),
        ],
        out_specs=pl.BlockSpec((tm, N), lambda i: (i, 0)),
        compiler_params=pltpu.CompilerParams(
            dimension_semantics=("parallel",),
            vmem_limit_bytes=48 * 1024 * 1024),
    )(a, w, scale, shift)
    return out if Mp == M else out[:M]


def _attn_kernel(q_ref, k_ref, v_ref, o_ref):
    """All (B,H) attention heads in one step; bf16 q/k/v, f32 accumulation, approx recip."""
    B, H, S, Dh = q_ref.shape
    q = q_ref[...].reshape(B * H, S, Dh)
    k = k_ref[...].reshape(B * H, S, Dh)
    v = v_ref[...].reshape(B * H, S, Dh)
    # 1/sqrt(Dh) is pre-folded into the q projection weights -> no per-score multiply here.
    s = jnp.einsum('hqd,hkd->hqk', q, k, preferred_element_type=jnp.float32)
    s = s - jnp.max(s, axis=-1, keepdims=True)
    p = jnp.exp(s)
    p = p * pl.reciprocal(jnp.sum(p, axis=-1, keepdims=True), approx=True)
    o = jnp.einsum('hqk,hkd->hqd', p.astype(jnp.bfloat16), v,
                   preferred_element_type=jnp.float32)
    o_ref[...] = o.reshape(B, H, S, Dh).astype(o_ref.dtype)


def multihead_attention(q, k, v):
    """q,k,v: (B,nhead,S,Dh) bf16 -> (B,nhead,S,Dh) bf16; single grid step (one launch)."""
    B, H, S, Dh = q.shape
    spec = pl.BlockSpec((B, H, S, Dh), lambda i: (0, 0, 0, 0))
    return pl.pallas_call(
        _attn_kernel,
        out_shape=jax.ShapeDtypeStruct((B, H, S, Dh), jnp.bfloat16),
        grid=(1,),
        in_specs=[spec, spec, spec],
        out_specs=spec,
        compiler_params=pltpu.CompilerParams(dimension_semantics=("arbitrary",)),
    )(q, k, v)


def _ln_res_kernel(x_ref, r_ref, g_ref, b_ref, o_ref, *, eps):
    x = x_ref[...].astype(jnp.float32) + r_ref[...].astype(jnp.float32)   # fused residual
    mu = jnp.mean(x, axis=-1, keepdims=True)
    xc = x - mu
    var = jnp.mean(xc * xc, axis=-1, keepdims=True)
    y = xc * jax.lax.rsqrt(var + eps) * g_ref[...] + b_ref[...]
    o_ref[...] = y.astype(o_ref.dtype)


def layernorm_residual(x2d, res2d, gamma_1e, beta_1e, eps=1e-5):
    """LN(x + res) over rows; bf16 in/out, f32 stats; gamma/beta pre-shaped (1,E)."""
    M, E = x2d.shape
    tm = _pick_tm(M)
    Mp = _cdiv(M, tm) * tm
    if Mp != M:
        x2d = jnp.pad(x2d, ((0, Mp - M), (0, 0)))
        res2d = jnp.pad(res2d, ((0, Mp - M), (0, 0)))
    out = pl.pallas_call(
        functools.partial(_ln_res_kernel, eps=eps),
        out_shape=jax.ShapeDtypeStruct((Mp, E), jnp.bfloat16),
        grid=(Mp // tm,),
        in_specs=[pl.BlockSpec((tm, E), lambda i: (i, 0)),
                  pl.BlockSpec((tm, E), lambda i: (i, 0)),
                  pl.BlockSpec((1, E), lambda i: (0, 0)),
                  pl.BlockSpec((1, E), lambda i: (0, 0))],
        out_specs=pl.BlockSpec((tm, E), lambda i: (i, 0)),
        compiler_params=pltpu.CompilerParams(dimension_semantics=("parallel",)),
    )(x2d, res2d, gamma_1e, beta_1e)
    return out if Mp == M else out[:M]


# ---------------------------------------------------------------------------
# Conv plumbing (im2col + fused matmul), pixel-shuffle, transformer layer
# ---------------------------------------------------------------------------

def _im2col(x, kh, kw, stride, pad):
    """NHWC (already bf16) -> single (B*Ho*Wo, kh*kw*Cin) patch buffer; (tap, channel) order."""
    B, H, W, C = x.shape
    Ho = (H + 2 * pad - kh) // stride + 1
    Wo = (W + 2 * pad - kw) // stride + 1
    if kh == 1 and kw == 1 and stride == 1 and pad == 0:
        return x.reshape(B * H * W, C), Ho, Wo
    xp = x if pad == 0 else jnp.pad(x, ((0, 0), (pad, pad), (pad, pad), (0, 0)))
    # TODO(synk): in-kernel tap reduction (kh*kw grid axis with shifted Element index_maps)
    #             would avoid materializing this buffer entirely; kept as one XLA fusion.
    cols = [xp[:, dy:dy + stride * Ho:stride, dx:dx + stride * Wo:stride, :]
            for dy in range(kh) for dx in range(kw)]
    a = jnp.concatenate(cols, axis=-1)              # (B,Ho,Wo,kh*kw*Cin), bf16
    return a.reshape(B * Ho * Wo, kh * kw * C), Ho, Wo


def conv2d_fused(x, cw, *, kh, kw, stride, pad, n_hswish=0):
    """x NHWC bf16; cw = folded weights dict (block-diagonal for grouped convs)."""
    B = x.shape[0]
    a, Ho, Wo = _im2col(x, kh, kw, stride, pad)
    y = matmul_fused(a, cw["w"], cw["scale"], cw["shift"], n_hswish=n_hswish)
    return y.reshape(B, Ho, Wo, -1)


def pixel_shuffle(x, r):
    """NHWC pixel shuffle matching PyTorch NCHW PixelShuffle channel ordering."""
    B, H, W, C = x.shape
    c = C // (r * r)
    x = x.reshape(B, H, W, c, r, r)
    x = jnp.transpose(x, (0, 1, 4, 2, 5, 3))
    return x.reshape(B, H * r, W * r, c)


def transformer_layer(x, lp, nhead):
    """nn.TransformerEncoderLayer (post-norm, relu, dim_ff = d_model), eval mode."""
    B, S, E = x.shape
    Dh = E // nhead
    xf = x.reshape(B * S, E)

    qkv = matmul_fused(xf, lp["qkv_w"], lp["qkv_scale"], lp["qkv_shift"])   # bf16 (B*S,3E)
    qkv = qkv.reshape(B, S, 3, nhead, Dh)
    q = jnp.transpose(qkv[:, :, 0], (0, 2, 1, 3))                           # (B,nhead,S,Dh)
    k = jnp.transpose(qkv[:, :, 1], (0, 2, 1, 3))
    v = jnp.transpose(qkv[:, :, 2], (0, 2, 1, 3))

    o = multihead_attention(q, k, v)
    o = jnp.transpose(o, (0, 2, 1, 3)).reshape(B * S, E)
    o = matmul_fused(o, lp["out_w"], lp["out_scale"], lp["out_shift"])

    x1 = layernorm_residual(o, xf, lp["ln1_g"], lp["ln1_b"])                # LN(xf + attn)
    h = matmul_fused(x1, lp["lin1_w"], lp["lin1_scale"], lp["lin1_shift"], relu=True)
    h = matmul_fused(h, lp["lin2_w"], lp["lin2_scale"], lp["lin2_shift"])
    x2 = layernorm_residual(h, x1, lp["ln2_g"], lp["ln2_b"])                # LN(x1 + ff)
    return x2.reshape(B, S, E)


# ---------------------------------------------------------------------------
# One-time weight folding (done OUTSIDE the jitted forward)
# ---------------------------------------------------------------------------

def _fold_conv(w, b, groups, bn=None, bn_expand=1, eps=1e-5):
    """PyTorch conv weight (Cout,Cin//g,kh,kw) -> block-diagonal (kh*kw*Cin, Cout) bf16 matrix
    plus fused per-output-channel affine (bias + BN, BN expanded pre-PixelShuffle)."""
    Cout, Cg, kh, kw = w.shape
    Cin = Cg * groups
    Cog = Cout // groups
    wt = jnp.transpose(w, (2, 3, 1, 0))                       # (kh,kw,Cg,Cout)
    wbd = jnp.zeros((kh, kw, Cin, Cout), jnp.float32)
    for g in range(groups):
        wbd = wbd.at[:, :, g * Cg:(g + 1) * Cg, g * Cog:(g + 1) * Cog].set(
            wt[:, :, :, g * Cog:(g + 1) * Cog])
    wbd = wbd.reshape(kh * kw * Cin, Cout).astype(jnp.bfloat16)
    if bn is not None:
        s = bn["g"] * jax.lax.rsqrt(bn["v"] + eps)
        t = bn["b"] - bn["m"] * s
        s = jnp.repeat(s, bn_expand)                          # pre-shuffle channel expansion
        t = jnp.repeat(t, bn_expand)
        scale = s
        shift = s * b + t
    else:
        scale = jnp.ones((Cout,), jnp.float32)
        shift = b
    return dict(w=wbd,
                scale=scale.reshape(1, Cout).astype(jnp.float32),
                shift=shift.reshape(1, Cout).astype(jnp.float32))


def _fold_dense(w, b):
    """PyTorch linear (out,in)/(out,) -> (in,out) bf16 weight, unit scale, bias shift."""
    N = w.shape[0]
    return dict(w=jnp.transpose(w).astype(jnp.bfloat16),
                scale=jnp.ones((1, N), jnp.float32),
                shift=b.reshape(1, N).astype(jnp.float32))


def prepare_params(params, cfg):
    E, nhead = cfg["emb_size"], cfg["nhead"]
    Dh = E // nhead
    fp = dict(
        c1=_fold_conv(params["c1_w"], params["c1_b"], 1, bn=params["bn1"]),
        c2=_fold_conv(params["c2_w"], params["c2_b"], 4, bn=params["bn2"]),
        patch=_fold_conv(params["patch_w"], params["patch_b"], 4),
        pos=params["pos"].astype(jnp.bfloat16),
        d0=_fold_conv(params["d0_w"], params["d0_b"], 8, bn=params["dbn0"], bn_expand=16),
        d1=_fold_conv(params["d1_w"], params["d1_b"], 4, bn=params["dbn1"], bn_expand=4),
        d2=_fold_conv(params["d2_w"], params["d2_b"], 1, bn=params["dbn2"], bn_expand=4),
        out_w=params["out_w"].reshape(cfg["num_class"], -1).T.astype(jnp.bfloat16),
        out_b=params["out_b"].reshape(1, -1).astype(jnp.float32),
        layers=[],
    )
    qscale = 1.0 / math.sqrt(Dh)
    for lp in params["layers"]:
        in_w = lp["in_w"].at[:E].multiply(qscale)     # fold attention score scale into q proj
        in_b = lp["in_b"].at[:E].multiply(qscale)
        qkv = _fold_dense(in_w, in_b)
        opr = _fold_dense(lp["out_w"], lp["out_b"])
        l1 = _fold_dense(lp["lin1_w"], lp["lin1_b"])
        l2 = _fold_dense(lp["lin2_w"], lp["lin2_b"])
        fp["layers"].append(dict(
            qkv_w=qkv["w"], qkv_scale=qkv["scale"], qkv_shift=qkv["shift"],
            out_w=opr["w"], out_scale=opr["scale"], out_shift=opr["shift"],
            lin1_w=l1["w"], lin1_scale=l1["scale"], lin1_shift=l1["shift"],
            lin2_w=l2["w"], lin2_scale=l2["scale"], lin2_shift=l2["shift"],
            ln1_g=lp["ln1_g"].reshape(1, E).astype(jnp.float32),
            ln1_b=lp["ln1_b"].reshape(1, E).astype(jnp.float32),
            ln2_g=lp["ln2_g"].reshape(1, E).astype(jnp.float32),
            ln2_b=lp["ln2_b"].reshape(1, E).astype(jnp.float32),
        ))
    return fp


# ---------------------------------------------------------------------------
# SegVT forward (eval mode)
# ---------------------------------------------------------------------------

def segvt_forward(fp, x_nchw, cfg):
    N, E, nhead = cfg["N"], cfg["emb_size"], cfg["nhead"]
    patch = (cfg["img_size"] // 4) // N
    x = jnp.transpose(x_nchw, (0, 2, 3, 1)).astype(jnp.bfloat16)   # NCHW->NHWC, cast ONCE
    B = x.shape[0]

    # pre_encoder[0]: conv(3->64,k7,s2,p3) + BN + Hswish + Block + Hswish + Block
    # TODO(synk): `Block` is undefined in the provided source; treated as identity.
    e1 = conv2d_fused(x, fp["c1"], kh=7, kw=7, stride=2, pad=3, n_hswish=2)
    # pre_encoder[1]: conv(64->128,k3,s2,p1,g4) + BN + Hswish x2
    e2 = conv2d_fused(e1, fp["c2"], kh=3, kw=3, stride=2, pad=1, n_hswish=2)

    # ViT encoder: Image2Seq (grouped patch conv, merged block-diagonally) + pos + 3 layers
    seq = conv2d_fused(e2, fp["patch"], kh=patch, kw=patch, stride=patch, pad=0)
    seq = seq.reshape(B, N * N, E) + fp["pos"]
    for lp in fp["layers"]:
        seq = transformer_layer(seq, lp, nhead)
    y = seq.reshape(B, N, N, E)                                    # NHWC view of NCHW permute

    # decoder[:4]: conv(g8) -> [BN(x16)+Hswish folded pre-shuffle] -> PixelShuffle(4), + e2
    y = conv2d_fused(y, fp["d0"], kh=3, kw=3, stride=1, pad=1, n_hswish=1)
    y = pixel_shuffle(y, 4) + e2
    # decoder[4:8]
    y = conv2d_fused(y, fp["d1"], kh=3, kw=3, stride=1, pad=1, n_hswish=1)
    y = pixel_shuffle(y, 2) + e1
    # decoder[8:]
    y = conv2d_fused(y, fp["d2"], kh=3, kw=3, stride=1, pad=1, n_hswish=1)
    y = pixel_shuffle(y, 2)

    # output 1x1 conv: num_class (=3) output lanes are too narrow for a useful Pallas store.
    Bo, Ho, Wo, Ci = y.shape
    out = jnp.dot(y.reshape(Bo * Ho * Wo, Ci), fp["out_w"],
                  preferred_element_type=jnp.float32) + fp["out_b"]
    out = out.reshape(Bo, Ho, Wo, -1)
    return jnp.transpose(out, (0, 3, 1, 2))                        # NHWC -> NCHW


# ---------------------------------------------------------------------------
# Deterministic synthetic parameters (PyTorch layouts)
# ---------------------------------------------------------------------------

def init_params(key, cfg):
    C, E, N = cfg["channels"], cfg["emb_size"], cfg["N"]
    nc = cfg["num_class"]
    patch = (cfg["img_size"] // 4) // N
    keys = iter(jax.random.split(key, 128))

    def nrm(shape, s=0.05):
        return (s * jax.random.normal(next(keys), shape)).astype(jnp.float32)

    def bn(c):
        return dict(g=1.0 + nrm((c,)), b=nrm((c,)),
                    m=jnp.zeros((c,), jnp.float32), v=jnp.ones((c,), jnp.float32))

    def tlayer():
        return dict(
            in_w=nrm((3 * E, E)), in_b=nrm((3 * E,)),
            out_w=nrm((E, E)), out_b=nrm((E,)),
            lin1_w=nrm((E, E)), lin1_b=nrm((E,)),
            lin2_w=nrm((E, E)), lin2_b=nrm((E,)),
            ln1_g=1.0 + nrm((E,)), ln1_b=nrm((E,)),
            ln2_g=1.0 + nrm((E,)), ln2_b=nrm((E,)),
        )

    return dict(
        c1_w=nrm((64, C, 7, 7)), c1_b=nrm((64,)), bn1=bn(64),
        c2_w=nrm((128, 64 // 4, 3, 3)), c2_b=nrm((128,)), bn2=bn(128),
        patch_w=nrm((E, 128 // 4, patch, patch)), patch_b=nrm((E,)),
        pos=nrm((1, N * N, E), s=1.0),
        layers=[tlayer() for _ in range(3)],
        d0_w=nrm((128 * 16, E // 8, 3, 3)), d0_b=nrm((128 * 16,)), dbn0=bn(128),
        d1_w=nrm((64 * 4, 128 // 4, 3, 3)), d1_b=nrm((64 * 4,)), dbn1=bn(64),
        d2_w=nrm((32 * 4, 64, 3, 3)), d2_b=nrm((32 * 4,)), dbn2=bn(32),
        out_w=nrm((nc, 32, 1, 1)), out_b=nrm((nc,)),
    )


if __name__ == "__main__":
    # Small but structurally consistent config: img_size = 16*N so decoder skip-adds line up.
    cfg = dict(batch=2, channels=3, img_size=32, N=2, emb_size=32, nhead=4, num_class=3)
    key = jax.random.PRNGKey(0)
    pkey, xkey = jax.random.split(key)
    params = init_params(pkey, cfg)
    folded = prepare_params(params, cfg)      # one-time weight folding, outside the jit
    x = jax.random.normal(
        xkey, (cfg["batch"], cfg["channels"], cfg["img_size"], cfg["img_size"]), jnp.float32)

    fwd = jax.jit(lambda fp, inp: segvt_forward(fp, inp, cfg))
    y = fwd(folded, x)
    jax.block_until_ready(y)
    assert y.shape == (cfg["batch"], cfg["num_class"], cfg["img_size"], cfg["img_size"]), y.shape
    assert bool(jnp.all(jnp.isfinite(y)))
    print("KERNEL_OK")
</pallas_src>

<mosaic_0001>
module attributes {stable_mosaic.version = 11 : i64} {
  func.func @_mm_kernel(%arg0: i32, %arg1: memref<256x147xbf16, #tpu.memory_space<vmem>>, %arg2: memref<147x64xbf16, #tpu.memory_space<vmem>>, %arg3: memref<1x64xf32, #tpu.memory_space<vmem>>, %arg4: memref<1x64xf32, #tpu.memory_space<vmem>>, %arg5: memref<256x64xbf16, #tpu.memory_space<vmem>>) attributes {dimension_semantics = [#tpu.dimension_semantics<parallel>], iteration_bounds = array<i64: 2>, scalar_prefetch = 0 : i64, scratch_operands = 0 : i64, tpu.core_type = #tpu.core_type<tc>, window_params = [{transform_indices = @transform_0, window_bounds = array<i64: 256, 147>}, {pipeline_mode = #tpu.pipeline_mode<synchronous>, transform_indices = @transform_1, window_bounds = array<i64: 147, 64>}, {pipeline_mode = #tpu.pipeline_mode<synchronous>, transform_indices = @transform_2, window_bounds = array<i64: 1, 64>}, {pipeline_mode = #tpu.pipeline_mode<synchronous>, transform_indices = @transform_3, window_bounds = array<i64: 1, 64>}, {transform_indices = @transform_4, window_bounds = array<i64: 256, 64>}]} {
    %c0 = arith.constant 0 : index
    %c0_0 = arith.constant 0 : index
    %0 = vector.load %arg1[%c0, %c0_0] : memref<256x147xbf16, #tpu.memory_space<vmem>>, vector<256x147xbf16>
    %c0_1 = arith.constant 0 : index
    %c0_2 = arith.constant 0 : index
    %1 = vector.load %arg2[%c0_1, %c0_2] : memref<147x64xbf16, #tpu.memory_space<vmem>>, vector<147x64xbf16>
    %cst = arith.constant dense<0.000000e+00> : vector<256x64xf32>
    %2 = tpu.matmul %0, %1, %cst {dimension_numbers = #tpu.dot_dimension_numbers<[1], [0], [0], [1], [0, 0, 1, 1], [], []>} : vector<256x147xbf16>, vector<147x64xbf16>, vector<256x64xf32> -> vector<256x64xf32>
    %c0_3 = arith.constant 0 : index
    %c0_4 = arith.constant 0 : index
    %3 = vector.load %arg3[%c0_3, %c0_4] : memref<1x64xf32, #tpu.memory_space<vmem>>, vector<1x64xf32>
    %4 = vector.broadcast %3 : vector<1x64xf32> to vector<256x64xf32>
    %5 = arith.mulf %2, %4 : vector<256x64xf32>
    %c0_5 = arith.constant 0 : index
    %c0_6 = arith.constant 0 : index
    %6 = vector.load %arg4[%c0_5, %c0_6] : memref<1x64xf32, #tpu.memory_space<vmem>>, vector<1x64xf32>
    %7 = vector.broadcast %6 : vector<1x64xf32> to vector<256x64xf32>
    %8 = arith.addf %5, %7 : vector<256x64xf32>
    %cst_7 = arith.constant 3.000000e+00 : f32
    %9 = vector.broadcast %cst_7 : f32 to vector<256x64xf32>
    %10 = arith.addf %8, %9 : vector<256x64xf32>
    %cst_8 = arith.constant 0.000000e+00 : f32
    %cst_9 = arith.constant 6.000000e+00 : f32
    %11 = vector.broadcast %cst_8 : f32 to vector<256x64xf32>
    %12 = arith.maximumf %11, %10 : vector<256x64xf32>
    %13 = vector.broadcast %cst_9 : f32 to vector<256x64xf32>
    %14 = arith.minimumf %13, %12 : vector<256x64xf32>
    %15 = arith.mulf %8, %14 : vector<256x64xf32>
    %cst_10 = arith.constant 0.166666672 : f32
    %16 = vector.broadcast %cst_10 : f32 to vector<256x64xf32>
    %17 = arith.mulf %15, %16 : vector<256x64xf32>
    %cst_11 = arith.constant 3.000000e+00 : f32
    %18 = vector.broadcast %cst_11 : f32 to vector<256x64xf32>
    %19 = arith.addf %17, %18 : vector<256x64xf32>
    %cst_12 = arith.constant 0.000000e+00 : f32
    %cst_13 = arith.constant 6.000000e+00 : f32
    %20 = vector.broadcast %cst_12 : f32 to vector<256x64xf32>
    %21 = arith.maximumf %20, %19 : vector<256x64xf32>
    %22 = vector.broadcast %cst_13 : f32 to vector<256x64xf32>
    %23 = arith.minimumf %22, %21 : vector<256x64xf32>
    %24 = arith.mulf %17, %23 : vector<256x64xf32>
    %cst_14 = arith.constant 0.166666672 : f32
    %25 = vector.broadcast %cst_14 : f32 to vector<256x64xf32>
    %26 = arith.mulf %24, %25 : vector<256x64xf32>
    %27 = arith.truncf %26 : vector<256x64xf32> to vector<256x64xbf16>
    %c0_15 = arith.constant 0 : index
    %c0_16 = arith.constant 0 : index
    %28 = vector.load %arg5[%c0_15, %c0_16] : memref<256x64xbf16, #tpu.memory_space<vmem>>, vector<256x64xbf16>
    tpu.vector_store %arg5[%c0_15, %c0_16], %27 {strides = array<i32>} : memref<256x64xbf16, #tpu.memory_space<vmem>>, vector<256x64xbf16>,
    return
  }
  func.func @transform_0(%arg0: i32) -> (i32, i32) {
    %c0_i32 = arith.constant 0 : i32
    %c0_i32_0 = arith.constant 0 : i32
    return %arg0, %c0_i32 : i32, i32
  }
  func.func @transform_1(%arg0: i32) -> (i32, i32) {
    %c0_i32 = arith.constant 0 : i32
    %c0_i32_0 = arith.constant 0 : i32
    %c0_i32_1 = arith.constant 0 : i32
    return %c0_i32, %c0_i32_0 : i32, i32
  }
  func.func @transform_2(%arg0: i32) -> (i32, i32) {
    %c0_i32 = arith.constant 0 : i32
    %c0_i32_0 = arith.constant 0 : i32
    %c0_i32_1 = arith.constant 0 : i32
    return %c0_i32, %c0_i32_0 : i32, i32
  }
  func.func @transform_3(%arg0: i32) -> (i32, i32) {
    %c0_i32 = arith.constant 0 : i32
    %c0_i32_0 = arith.constant 0 : i32
    %c0_i32_1 = arith.constant 0 : i32
    return %c0_i32, %c0_i32_0 : i32, i32
  }
  func.func @transform_4(%arg0: i32) -> (i32, i32) {
    %c0_i32 = arith.constant 0 : i32
    %c0_i32_0 = arith.constant 0 : i32
    return %arg0, %c0_i32 : i32, i32
  }
}

module attributes {stable_mosaic.version = 11 : i64} {
  func.func @_mm_kernel(%arg0: i32, %arg1: memref<128x576xbf16, #tpu.memory_space<vmem>>, %arg2: memref<576x128xbf16, #tpu.memory_space<vmem>>, %arg3: memref<1x128xf32, #tpu.memory_space<vmem>>, %arg4: memref<1x128xf32, #tpu.memory_space<vmem>>, %arg5: memref<128x128xbf16, #tpu.memory_space<vmem>>) attributes {dimension_semantics = [#tpu.dimension_semantics<parallel>], iteration_bounds = array<i64: 1>, scalar_prefetch = 0 : i64, scratch_operands = 0 : i64, tpu.core_type = #tpu.core_type<tc>, window_params = [{transform_indices = @transform_0, window_bounds = array<i64: 128, 576>}, {pipeline_mode = #tpu.pipeline_mode<synchronous>, transform_indices = @transform_1, window_bounds = array<i64: 576, 128>}, {pipeline_mode = #tpu.pipeline_mode<synchronous>, transform_indices = @transform_2, window_bounds = array<i64: 1, 128>}, {pipeline_mode = #tpu.pipeline_mode<synchronous>, transform_indices = @transform_3, window_bounds = array<i64: 1, 128>}, {transform_indices = @transform_4, window_bounds = array<i64: 128, 128>}]} {
    %c0 = arith.constant 0 : index
    %c0_0 = arith.constant 0 : index
    %0 = vector.load %arg1[%c0, %c0_0] : memref<128x576xbf16, #tpu.memory_space<vmem>>, vector<128x576xbf16>
    %c0_1 = arith.constant 0 : index
    %c0_2 = arith.constant 0 : index
    %1 = vector.load %arg2[%c0_1, %c0_2] : memref<576x128xbf16, #tpu.memory_space<vmem>>, vector<576x128xbf16>
    %cst = arith.constant dense<0.000000e+00> : vector<128x128xf32>
    %2 = tpu.matmul %0, %1, %cst {dimension_numbers = #tpu.dot_dimension_numbers<[1], [0], [0], [1], [0, 0, 1, 1], [], []>} : vector<128x576xbf16>, vector<576x128xbf16>, vector<128x128xf32> -> vector<128x128xf32>
    %c0_3 = arith.constant 0 : index
    %c0_4 = arith.constant 0 : index
    %3 = vector.load %arg3[%c0_3, %c0_4] : memref<1x128xf32, #tpu.memory_space<vmem>>, vector<1x128xf32>
    %4 = vector.broadcast %3 : vector<1x128xf32> to vector<128x128xf32>
    %5 = arith.mulf %2, %4 : vector<128x128xf32>
    %c0_5 = arith.constant 0 : index
    %c0_6 = arith.constant 0 : index
    %6 = vector.load %arg4[%c0_5, %c0_6] : memref<1x128xf32, #tpu.memory_space<vmem>>, vector<1x128xf32>
    %7 = vector.broadcast %6 : vector<1x128xf32> to vector<128x128xf32>
    %8 = arith.addf %5, %7 : vector<128x128xf32>
    %cst_7 = arith.constant 3.000000e+00 : f32
    %9 = vector.broadcast %cst_7 : f32 to vector<128x128xf32>
    %10 = arith.addf %8, %9 : vector<128x128xf32>
    %cst_8 = arith.constant 0.000000e+00 : f32
    %cst_9 = arith.constant 6.000000e+00 : f32
    %11 = vector.broadcast %cst_8 : f32 to vector<128x128xf32>
    %12 = arith.maximumf %11, %10 : vector<128x128xf32>
    %13 = vector.broadcast %cst_9 : f32 to vector<128x128xf32>
    %14 = arith.minimumf %13, %12 : vector<128x128xf32>
    %15 = arith.mulf %8, %14 : vector<128x128xf32>
    %cst_10 = arith.constant 0.166666672 : f32
    %16 = vector.broadcast %cst_10 : f32 to vector<128x128xf32>
    %17 = arith.mulf %15, %16 : vector<128x128xf32>
    %cst_11 = arith.constant 3.000000e+00 : f32
    %18 = vector.broadcast %cst_11 : f32 to vector<128x128xf32>
    %19 = arith.addf %17, %18 : vector<128x128xf32>
    %cst_12 = arith.constant 0.000000e+00 : f32
    %cst_13 = arith.constant 6.000000e+00 : f32
    %20 = vector.broadcast %cst_12 : f32 to vector<128x128xf32>
    %21 = arith.maximumf %20, %19 : vector<128x128xf32>
    %22 = vector.broadcast %cst_13 : f32 to vector<128x128xf32>
    %23 = arith.minimumf %22, %21 : vector<128x128xf32>
    %24 = arith.mulf %17, %23 : vector<128x128xf32>
    %cst_14 = arith.constant 0.166666672 : f32
    %25 = vector.broadcast %cst_14 : f32 to vector<128x128xf32>
    %26 = arith.mulf %24, %25 : vector<128x128xf32>
    %27 = arith.truncf %26 : vector<128x128xf32> to vector<128x128xbf16>
    %c0_15 = arith.constant 0 : index
    %c0_16 = arith.constant 0 : index
    %28 = vector.load %arg5[%c0_15, %c0_16] : memref<128x128xbf16, #tpu.memory_space<vmem>>, vector<128x128xbf16>
    tpu.vector_store %arg5[%c0_15, %c0_16], %27 {strides = array<i32>} : memref<128x128xbf16, #tpu.memory_space<vmem>>, vector<128x128xbf16>,
    return
  }
  func.func @transform_0(%arg0: i32) -> (i32, i32) {
    %c0_i32 = arith.constant 0 : i32
    %c0_i32_0 = arith.constant 0 : i32
    return %arg0, %c0_i32 : i32, i32
  }
  func.func @transform_1(%arg0: i32) -> (i32, i32) {
    %c0_i32 = arith.constant 0 : i32
    %c0_i32_0 = arith.constant 0 : i32
    %c0_i32_1 = arith.constant 0 : i32
    return %c0_i32, %c0_i32_0 : i32, i32
  }
  func.func @transform_2(%arg0: i32) -> (i32, i32) {
    %c0_i32 = arith.constant 0 : i32
    %c0_i32_0 = arith.constant 0 : i32
    %c0_i32_1 = arith.constant 0 : i32
    return %c0_i32, %c0_i32_0 : i32, i32
  }
  func.func @transform_3(%arg0: i32) -> (i32, i32) {
    %c0_i32 = arith.constant 0 : i32
    %c0_i32_0 = arith.constant 0 : i32
    %c0_i32_1 = arith.constant 0 : i32
    return %c0_i32, %c0_i32_0 : i32, i32
  }
  func.func @transform_4(%arg0: i32) -> (i32, i32) {
    %c0_i32 = arith.constant 0 : i32
    %c0_i32_0 = arith.constant 0 : i32
    return %arg0, %c0_i32 : i32, i32
  }
}

module attributes {stable_mosaic.version = 11 : i64} {
  func.func @_mm_kernel(%arg0: i32, %arg1: memref<8x2048xbf16, #tpu.memory_space<vmem>>, %arg2: memref<2048x32xbf16, #tpu.memory_space<vmem>>, %arg3: memref<1x32xf32, #tpu.memory_space<vmem>>, %arg4: memref<1x32xf32, #tpu.memory_space<vmem>>, %arg5: memref<8x32xbf16, #tpu.memory_space<vmem>>) attributes {dimension_semantics = [#tpu.dimension_semantics<parallel>], iteration_bounds = array<i64: 1>, scalar_prefetch = 0 : i64, scratch_operands = 0 : i64, tpu.core_type = #tpu.core_type<tc>, window_params = [{transform_indices = @transform_0, window_bounds = array<i64: 8, 2048>}, {pipeline_mode = #tpu.pipeline_mode<synchronous>, transform_indices = @transform_1, window_bounds = array<i64: 2048, 32>}, {pipeline_mode = #tpu.pipeline_mode<synchronous>, transform_indices = @transform_2, window_bounds = array<i64: 1, 32>}, {pipeline_mode = #tpu.pipeline_mode<synchronous>, transform_indices = @transform_3, window_bounds = array<i64: 1, 32>}, {transform_indices = @transform_4, window_bounds = array<i64: 8, 32>}]} {
    %c0 = arith.constant 0 : index
    %c0_0 = arith.constant 0 : index
    %0 = vector.load %arg1[%c0, %c0_0] : memref<8x2048xbf16, #tpu.memory_space<vmem>>, vector<8x2048xbf16>
    %c0_1 = arith.constant 0 : index
    %c0_2 = arith.constant 0 : index
    %1 = vector.load %arg2[%c0_1, %c0_2] : memref<2048x32xbf16, #tpu.memory_space<vmem>>, vector<2048x32xbf16>
    %cst = arith.constant dense<0.000000e+00> : vector<8x32xf32>
    %2 = tpu.matmul %0, %1, %cst {dimension_numbers = #tpu.dot_dimension_numbers<[1], [0], [0], [1], [0, 0, 1, 1], [], []>} : vector<8x2048xbf16>, vector<2048x32xbf16>, vector<8x32xf32> -> vector<8x32xf32>
    %c0_3 = arith.constant 0 : index
    %c0_4 = arith.constant 0 : index
    %3 = vector.load %arg3[%c0_3, %c0_4] : memref<1x32xf32, #tpu.memory_space<vmem>>, vector<1x32xf32>
    %4 = vector.broadcast %3 : vector<1x32xf32> to vector<8x32xf32>
    %5 = arith.mulf %2, %4 : vector<8x32xf32>
    %c0_5 = arith.constant 0 : index
    %c0_6 = arith.constant 0 : index
    %6 = vector.load %arg4[%c0_5, %c0_6] : memref<1x32xf32, #tpu.memory_space<vmem>>, vector<1x32xf32>
    %7 = vector.broadcast %6 : vector<1x32xf32> to vector<8x32xf32>
    %8 = arith.addf %5, %7 : vector<8x32xf32>
    %9 = arith.truncf %8 : vector<8x32xf32> to vector<8x32xbf16>
    %c0_7 = arith.constant 0 : index
    %c0_8 = arith.constant 0 : index
    %10 = vector.load %arg5[%c0_7, %c0_8] : memref<8x32xbf16, #tpu.memory_space<vmem>>, vector<8x32xbf16>
    tpu.vector_store %arg5[%c0_7, %c0_8], %9 {strides = array<i32>} : memref<8x32xbf16, #tpu.memory_space<vmem>>, vector<8x32xbf16>,
    return
  }
  func.func @transform_0(%arg0: i32) -> (i32, i32) {
    %c0_i32 = arith.constant 0 : i32
    %c0_i32_0 = arith.constant 0 : i32
    return %arg0, %c0_i32 : i32, i32
  }
  func.func @transform_1(%arg0: i32) -> (i32, i32) {
    %c0_i32 = arith.constant 0 : i32
    %c0_i32_0 = arith.constant 0 : i32
    %c0_i32_1 = arith.constant 0 : i32
    return %c0_i32, %c0_i32_0 : i32, i32
  }
  func.func @transform_2(%arg0: i32) -> (i32, i32) {
    %c0_i32 = arith.constant 0 : i32
    %c0_i32_0 = arith.constant 0 : i32
    %c0_i32_1 = arith.constant 0 : i32
    return %c0_i32, %c0_i32_0 : i32, i32
  }
  func.func @transform_3(%arg0: i32) -> (i32, i32) {
    %c0_i32 = arith.constant 0 : i32
    %c0_i32_0 = arith.constant 0 : i32
    %c0_i32_1 = arith.constant 0 : i32
    return %c0_i32, %c0_i32_0 : i32, i32
  }
  func.func @transform_4(%arg0: i32) -> (i32, i32) {
    %c0_i32 = arith.constant 0 : i32
    %c0_i32_0 = arith.constant 0 : i32
    return %arg0, %c0_i32 : i32, i32
  }
}

module attributes {stable_mosaic.version = 11 : i64} {
  func.func @_mm_kernel(%arg0: i32, %arg1: memref<8x32xbf16, #tpu.memory_space<vmem>>, %arg2: memref<32x96xbf16, #tpu.memory_space<vmem>>, %arg3: memref<1x96xf32, #tpu.memory_space<vmem>>, %arg4: memref<1x96xf32, #tpu.memory_space<vmem>>, %arg5: memref<8x96xbf16, #tpu.memory_space<vmem>>) attributes {dimension_semantics = [#tpu.dimension_semantics<parallel>], iteration_bounds = array<i64: 1>, scalar_prefetch = 0 : i64, scratch_operands = 0 : i64, tpu.core_type = #tpu.core_type<tc>, window_params = [{transform_indices = @transform_0, window_bounds = array<i64: 8, 32>}, {pipeline_mode = #tpu.pipeline_mode<synchronous>, transform_indices = @transform_1, window_bounds = array<i64: 32, 96>}, {pipeline_mode = #tpu.pipeline_mode<synchronous>, transform_indices = @transform_2, window_bounds = array<i64: 1, 96>}, {pipeline_mode = #tpu.pipeline_mode<synchronous>, transform_indices = @transform_3, window_bounds = array<i64: 1, 96>}, {transform_indices = @transform_4, window_bounds = array<i64: 8, 96>}]} {
    %c0 = arith.constant 0 : index
    %c0_0 = arith.constant 0 : index
    %0 = vector.load %arg1[%c0, %c0_0] : memref<8x32xbf16, #tpu.memory_space<vmem>>, vector<8x32xbf16>
    %c0_1 = arith.constant 0 : index
    %c0_2 = arith.constant 0 : index
    %1 = vector.load %arg2[%c0_1, %c0_2] : memref<32x96xbf16, #tpu.memory_space<vmem>>, vector<32x96xbf16>
    %cst = arith.constant dense<0.000000e+00> : vector<8x96xf32>
    %2 = tpu.matmul %0, %1, %cst {dimension_numbers = #tpu.dot_dimension_numbers<[1], [0], [0], [1], [0, 0, 1, 1], [], []>} : vector<8x32xbf16>, vector<32x96xbf16>, vector<8x96xf32> -> vector<8x96xf32>
    %c0_3 = arith.constant 0 : index
    %c0_4 = arith.constant 0 : index
    %3 = vector.load %arg3[%c0_3, %c0_4] : memref<1x96xf32, #tpu.memory_space<vmem>>, vector<1x96xf32>
    %4 = vector.broadcast %3 : vector<1x96xf32> to vector<8x96xf32>
    %5 = arith.mulf %2, %4 : vector<8x96xf32>
    %c0_5 = arith.constant 0 : index
    %c0_6 = arith.constant 0 : index
    %6 = vector.load %arg4[%c0_5, %c0_6] : memref<1x96xf32, #tpu.memory_space<vmem>>, vector<1x96xf32>
    %7 = vector.broadcast %6 : vector<1x96xf32> to vector<8x96xf32>
    %8 = arith.addf %5, %7 : vector<8x96xf32>
    %9 = arith.truncf %8 : vector<8x96xf32> to vector<8x96xbf16>
    %c0_7 = arith.constant 0 : index
    %c0_8 = arith.constant 0 : index
    %10 = vector.load %arg5[%c0_7, %c0_8] : memref<8x96xbf16, #tpu.memory_space<vmem>>, vector<8x96xbf16>
    tpu.vector_store %arg5[%c0_7, %c0_8], %9 {strides = array<i32>} : memref<8x96xbf16, #tpu.memory_space<vmem>>, vector<8x96xbf16>,
    return
  }
  func.func @transform_0(%arg0: i32) -> (i32, i32) {
    %c0_i32 = arith.constant 0 : i32
    %c0_i32_0 = arith.constant 0 : i32
    return %arg0, %c0_i32 : i32, i32
  }
  func.func @transform_1(%arg0: i32) -> (i32, i32) {
    %c0_i32 = arith.constant 0 : i32
    %c0_i32_0 = arith.constant 0 : i32
    %c0_i32_1 = arith.constant 0 : i32
    return %c0_i32, %c0_i32_0 : i32, i32
  }
  func.func @transform_2(%arg0: i32) -> (i32, i32) {
    %c0_i32 = arith.constant 0 : i32
    %c0_i32_0 = arith.constant 0 : i32
    %c0_i32_1 = arith.constant 0 : i32
    return %c0_i32, %c0_i32_0 : i32, i32
  }
  func.func @transform_3(%arg0: i32) -> (i32, i32) {
    %c0_i32 = arith.constant 0 : i32
    %c0_i32_0 = arith.constant 0 : i32
    %c0_i32_1 = arith.constant 0 : i32
    return %c0_i32, %c0_i32_0 : i32, i32
  }
  func.func @transform_4(%arg0: i32) -> (i32, i32) {
    %c0_i32 = arith.constant 0 : i32
    %c0_i32_0 = arith.constant 0 : i32
    return %arg0, %c0_i32 : i32, i32
  }
}

module attributes {stable_mosaic.version = 11 : i64} {
  func.func @_attn_kernel(%arg0: i32, %arg1: memref<2x4x4x8xbf16, #tpu.memory_space<vmem>>, %arg2: memref<2x4x4x8xbf16, #tpu.memory_space<vmem>>, %arg3: memref<2x4x4x8xbf16, #tpu.memory_space<vmem>>, %arg4: memref<2x4x4x8xbf16, #tpu.memory_space<vmem>>) attributes {dimension_semantics = [#tpu.dimension_semantics<arbitrary>], iteration_bounds = array<i64: 1>, scalar_prefetch = 0 : i64, scratch_operands = 0 : i64, tpu.core_type = #tpu.core_type<tc>, window_params = [{pipeline_mode = #tpu.pipeline_mode<synchronous>, transform_indices = @transform_0, window_bounds = array<i64: 2, 4, 4, 8>}, {pipeline_mode = #tpu.pipeline_mode<synchronous>, transform_indices = @transform_1, window_bounds = array<i64: 2, 4, 4, 8>}, {pipeline_mode = #tpu.pipeline_mode<synchronous>, transform_indices = @transform_2, window_bounds = array<i64: 2, 4, 4, 8>}, {pipeline_mode = #tpu.pipeline_mode<synchronous>, transform_indices = @transform_3, window_bounds = array<i64: 2, 4, 4, 8>}]} {
    %c0 = arith.constant 0 : index
    %c0_0 = arith.constant 0 : index
    %c0_1 = arith.constant 0 : index
    %c0_2 = arith.constant 0 : index
    %0 = vector.load %arg1[%c0, %c0_0, %c0_1, %c0_2] : memref<2x4x4x8xbf16, #tpu.memory_space<vmem>>, vector<2x4x4x8xbf16>
    %1 = vector.shape_cast %0 : vector<2x4x4x8xbf16> to vector<8x4x8xbf16>
    %c0_3 = arith.constant 0 : index
    %c0_4 = arith.constant 0 : index
    %c0_5 = arith.constant 0 : index
    %c0_6 = arith.constant 0 : index
    %2 = vector.load %arg2[%c0_3, %c0_4, %c0_5, %c0_6] : memref<2x4x4x8xbf16, #tpu.memory_space<vmem>>, vector<2x4x4x8xbf16>
    %3 = vector.shape_cast %2 : vector<2x4x4x8xbf16> to vector<8x4x8xbf16>
    %c0_7 = arith.constant 0 : index
    %c0_8 = arith.constant 0 : index
    %c0_9 = arith.constant 0 : index
    %c0_10 = arith.constant 0 : index
    %4 = vector.load %arg3[%c0_7, %c0_8, %c0_9, %c0_10] : memref<2x4x4x8xbf16, #tpu.memory_space<vmem>>, vector<2x4x4x8xbf16>
    %5 = vector.shape_cast %4 : vector<2x4x4x8xbf16> to vector<8x4x8xbf16>
    "tpu.trace_start"() <{level = 10 : i32, message = "hqd,hkd->hqk"}> : () -> ()
    %cst = arith.constant dense<0.000000e+00> : vector<8x4x4xf32>
    %6 = tpu.matmul %1, %3, %cst {dimension_numbers = #tpu.dot_dimension_numbers<[2], [2], [1], [1], [0, 0, 0, 1, 1, 1], [0], [0]>} : vector<8x4x8xbf16>, vector<8x4x8xbf16>, vector<8x4x4xf32> -> vector<8x4x4xf32>
    "tpu.trace_stop"() : () -> ()
    %cst_11 = arith.constant dense<0xFF800000> : vector<8x4xf32>
    %7 = vector.multi_reduction <maximumf>, %6, %cst_11 [2] : vector<8x4x4xf32> to vector<8x4xf32>
    %8 = vector.shape_cast %7 : vector<8x4xf32> to vector<8x4x1xf32>
    %9 = vector.broadcast %8 : vector<8x4x1xf32> to vector<8x4x4xf32>
    %10 = arith.subf %6, %9 : vector<8x4x4xf32>
    %11 = math.exp %10 : vector<8x4x4xf32>
    %cst_12 = arith.constant dense<0.000000e+00> : vector<8x4xf32>
    %12 = vector.multi_reduction <add>, %11, %cst_12 [2] : vector<8x4x4xf32> to vector<8x4xf32>
    %13 = vector.shape_cast %12 : vector<8x4xf32> to vector<8x4x1xf32>
    %14 = tpu.reciprocal %13 {approx = true} : vector<8x4x1xf32> -> vector<8x4x1xf32>
    %15 = vector.broadcast %14 : vector<8x4x1xf32> to vector<8x4x4xf32>
    %16 = arith.mulf %11, %15 : vector<8x4x4xf32>
    %17 = arith.truncf %16 : vector<8x4x4xf32> to vector<8x4x4xbf16>
    "tpu.trace_start"() <{level = 10 : i32, message = "hqk,hkd->hqd"}> : () -> ()
    %cst_13 = arith.constant dense<0.000000e+00> : vector<8x4x8xf32>
    %18 = tpu.matmul %17, %5, %cst_13 {dimension_numbers = #tpu.dot_dimension_numbers<[2], [1], [1], [2], [0, 0, 0, 1, 1, 2], [0], [0]>} : vector<8x4x4xbf16>, vector<8x4x8xbf16>, vector<8x4x8xf32> -> vector<8x4x8xf32>
    "tpu.trace_stop"() : () -> ()
    %19 = vector.shape_cast %18 : vector<8x4x8xf32> to vector<2x4x4x8xf32>
    %20 = arith.truncf %19 : vector<2x4x4x8xf32> to vector<2x4x4x8xbf16>
    %c0_14 = arith.constant 0 : index
    %c0_15 = arith.constant 0 : index
    %c0_16 = arith.constant 0 : index
    %c0_17 = arith.constant 0 : index
    %21 = vector.load %arg4[%c0_14, %c0_15, %c0_16, %c0_17] : memref<2x4x4x8xbf16, #tpu.memory_space<vmem>>, vector<2x4x4x8xbf16>
    tpu.vector_store %arg4[%c0_14, %c0_15, %c0_16, %c0_17], %20 {strides = array<i32>} : memref<2x4x4x8xbf16, #tpu.memory_space<vmem>>, vector<2x4x4x8xbf16>,
    return
  }
  func.func @transform_0(%arg0: i32) -> (i32, i32, i32, i32) {
    %c0_i32 = arith.constant 0 : i32
    %c0_i32_0 = arith.constant 0 : i32
    %c0_i32_1 = arith.constant 0 : i32
    %c0_i32_2 = arith.constant 0 : i32
    %c0_i32_3 = arith.constant 0 : i32
    return %c0_i32, %c0_i32_0, %c0_i32_1, %c0_i32_2 : i32, i32, i32, i32
  }
  func.func @transform_1(%arg0: i32) -> (i32, i32, i32, i32) {
    %c0_i32 = arith.constant 0 : i32
    %c0_i32_0 = arith.constant 0 : i32
    %c0_i32_1 = arith.constant 0 : i32
    %c0_i32_2 = arith.constant 0 : i32
    %c0_i32_3 = arith.constant 0 : i32
    return %c0_i32, %c0_i32_0, %c0_i32_1, %c0_i32_2 : i32, i32, i32, i32
  }
  func.func @transform_2(%arg0: i32) -> (i32, i32, i32, i32) {
    %c0_i32 = arith.constant 0 : i32
    %c0_i32_0 = arith.constant 0 : i32
    %c0_i32_1 = arith.constant 0 : i32
    %c0_i32_2 = arith.constant 0 : i32
    %c0_i32_3 = arith.constant 0 : i32
    return %c0_i32, %c0_i32_0, %c0_i32_1, %c0_i32_2 : i32, i32, i32, i32
  }
  func.func @transform_3(%arg0: i32) -> (i32, i32, i32, i32) {
    %c0_i32 = arith.constant 0 : i32
    %c0_i32_0 = arith.constant 0 : i32
    %c0_i32_1 = arith.constant 0 : i32
    %c0_i32_2 = arith.constant 0 : i32
    %c0_i32_3 = arith.constant 0 : i32
    return %c0_i32, %c0_i32_0, %c0_i32_1, %c0_i32_2 : i32, i32, i32, i32
  }
}

module attributes {stable_mosaic.version = 11 : i64} {
  func.func @_mm_kernel(%arg0: i32, %arg1: memref<8x32xbf16, #tpu.memory_space<vmem>>, %arg2: memref<32x32xbf16, #tpu.memory_space<vmem>>, %arg3: memref<1x32xf32, #tpu.memory_space<vmem>>, %arg4: memref<1x32xf32, #tpu.memory_space<vmem>>, %arg5: memref<8x32xbf16, #tpu.memory_space<vmem>>) attributes {dimension_semantics = [#tpu.dimension_semantics<parallel>], iteration_bounds = array<i64: 1>, scalar_prefetch = 0 : i64, scratch_operands = 0 : i64, tpu.core_type = #tpu.core_type<tc>, window_params = [{transform_indices = @transform_0, window_bounds = array<i64: 8, 32>}, {pipeline_mode = #tpu.pipeline_mode<synchronous>, transform_indices = @transform_1, window_bounds = array<i64: 32, 32>}, {pipeline_mode = #tpu.pipeline_mode<synchronous>, transform_indices = @transform_2, window_bounds = array<i64: 1, 32>}, {pipeline_mode = #tpu.pipeline_mode<synchronous>, transform_indices = @transform_3, window_bounds = array<i64: 1, 32>}, {transform_indices = @transform_4, window_bounds = array<i64: 8, 32>}]} {
    %c0 = arith.constant 0 : index
    %c0_0 = arith.constant 0 : index
    %0 = vector.load %arg1[%c0, %c0_0] : memref<8x32xbf16, #tpu.memory_space<vmem>>, vector<8x32xbf16>
    %c0_1 = arith.constant 0 : index
    %c0_2 = arith.constant 0 : index
    %1 = vector.load %arg2[%c0_1, %c0_2] : memref<32x32xbf16, #tpu.memory_space<vmem>>, vector<32x32xbf16>
    %cst = arith.constant dense<0.000000e+00> : vector<8x32xf32>
    %2 = tpu.matmul %0, %1, %cst {dimension_numbers = #tpu.dot_dimension_numbers<[1], [0], [0], [1], [0, 0, 1, 1], [], []>} : vector<8x32xbf16>, vector<32x32xbf16>, vector<8x32xf32> -> vector<8x32xf32>
    %c0_3 = arith.constant 0 : index
    %c0_4 = arith.constant 0 : index
    %3 = vector.load %arg3[%c0_3, %c0_4] : memref<1x32xf32, #tpu.memory_space<vmem>>, vector<1x32xf32>
    %4 = vector.broadcast %3 : vector<1x32xf32> to vector<8x32xf32>
    %5 = arith.mulf %2, %4 : vector<8x32xf32>
    %c0_5 = arith.constant 0 : index
    %c0_6 = arith.constant 0 : index
    %6 = vector.load %arg4[%c0_5, %c0_6] : memref<1x32xf32, #tpu.memory_space<vmem>>, vector<1x32xf32>
    %7 = vector.broadcast %6 : vector<1x32xf32> to vector<8x32xf32>
    %8 = arith.addf %5, %7 : vector<8x32xf32>
    %9 = arith.truncf %8 : vector<8x32xf32> to vector<8x32xbf16>
    %c0_7 = arith.constant 0 : index
    %c0_8 = arith.constant 0 : index
    %10 = vector.load %arg5[%c0_7, %c0_8] : memref<8x32xbf16, #tpu.memory_space<vmem>>, vector<8x32xbf16>
    tpu.vector_store %arg5[%c0_7, %c0_8], %9 {strides = array<i32>} : memref<8x32xbf16, #tpu.memory_space<vmem>>, vector<8x32xbf16>,
    return
  }
  func.func @transform_0(%arg0: i32) -> (i32, i32) {
    %c0_i32 = arith.constant 0 : i32
    %c0_i32_0 = arith.constant 0 : i32
    return %arg0, %c0_i32 : i32, i32
  }
  func.func @transform_1(%arg0: i32) -> (i32, i32) {
    %c0_i32 = arith.constant 0 : i32
    %c0_i32_0 = arith.constant 0 : i32
    %c0_i32_1 = arith.constant 0 : i32
    return %c0_i32, %c0_i32_0 : i32, i32
  }
  func.func @transform_2(%arg0: i32) -> (i32, i32) {
    %c0_i32 = arith.constant 0 : i32
    %c0_i32_0 = arith.constant 0 : i32
    %c0_i32_1 = arith.constant 0 : i32
    return %c0_i32, %c0_i32_0 : i32, i32
  }
  func.func @transform_3(%arg0: i32) -> (i32, i32) {
    %c0_i32 = arith.constant 0 : i32
    %c0_i32_0 = arith.constant 0 : i32
    %c0_i32_1 = arith.constant 0 : i32
    return %c0_i32, %c0_i32_0 : i32, i32
  }
  func.func @transform_4(%arg0: i32) -> (i32, i32) {
    %c0_i32 = arith.constant 0 : i32
    %c0_i32_0 = arith.constant 0 : i32
    return %arg0, %c0_i32 : i32, i32
  }
}

module attributes {stable_mosaic.version = 11 : i64} {
  func.func @_ln_res_kernel(%arg0: i32, %arg1: memref<8x32xbf16, #tpu.memory_space<vmem>>, %arg2: memref<8x32xbf16, #tpu.memory_space<vmem>>, %arg3: memref<1x32xf32, #tpu.memory_space<vmem>>, %arg4: memref<1x32xf32, #tpu.memory_space<vmem>>, %arg5: memref<8x32xbf16, #tpu.memory_space<vmem>>) attributes {dimension_semantics = [#tpu.dimension_semantics<parallel>], iteration_bounds = array<i64: 1>, scalar_prefetch = 0 : i64, scratch_operands = 0 : i64, tpu.core_type = #tpu.core_type<tc>, window_params = [{transform_indices = @transform_0, window_bounds = array<i64: 8, 32>}, {transform_indices = @transform_1, window_bounds = array<i64: 8, 32>}, {pipeline_mode = #tpu.pipeline_mode<synchronous>, transform_indices = @transform_2, window_bounds = array<i64: 1, 32>}, {pipeline_mode = #tpu.pipeline_mode<synchronous>, transform_indices = @transform_3, window_bounds = array<i64: 1, 32>}, {transform_indices = @transform_4, window_bounds = array<i64: 8, 32>}]} {
    %c0 = arith.constant 0 : index
    %c0_0 = arith.constant 0 : index
    %0 = vector.load %arg1[%c0, %c0_0] : memref<8x32xbf16, #tpu.memory_space<vmem>>, vector<8x32xbf16>
    %1 = arith.extf %0 : vector<8x32xbf16> to vector<8x32xf32>
    %c0_1 = arith.constant 0 : index
    %c0_2 = arith.constant 0 : index
    %2 = vector.load %arg2[%c0_1, %c0_2] : memref<8x32xbf16, #tpu.memory_space<vmem>>, vector<8x32xbf16>
    %3 = arith.extf %2 : vector<8x32xbf16> to vector<8x32xf32>
    %4 = arith.addf %1, %3 : vector<8x32xf32>
    %cst = arith.constant dense<0.000000e+00> : vector<8xf32>
    %5 = vector.multi_reduction <add>, %4, %cst [1] : vector<8x32xf32> to vector<8xf32>
    %6 = vector.shape_cast %5 : vector<8xf32> to vector<8x1xf32>
    %cst_3 = arith.constant 3.200000e+01 : f32
    %7 = vector.broadcast %cst_3 : f32 to vector<8x1xf32>
    %8 = arith.divf %6, %7 : vector<8x1xf32>
    %9 = vector.broadcast %8 : vector<8x1xf32> to vector<8x32xf32>
    %10 = arith.subf %4, %9 : vector<8x32xf32>
    %11 = arith.mulf %10, %10 : vector<8x32xf32>
    %cst_4 = arith.constant dense<0.000000e+00> : vector<8xf32>
    %12 = vector.multi_reduction <add>, %11, %cst_4 [1] : vector<8x32xf32> to vector<8xf32>
    %13 = vector.shape_cast %12 : vector<8xf32> to vector<8x1xf32>
    %cst_5 = arith.constant 3.200000e+01 : f32
    %14 = vector.broadcast %cst_5 : f32 to vector<8x1xf32>
    %15 = arith.divf %13, %14 : vector<8x1xf32>
    %cst_6 = arith.constant 9.99999974E-6 : f32
    %16 = vector.broadcast %cst_6 : f32 to vector<8x1xf32>
    %17 = arith.addf %15, %16 : vector<8x1xf32>
    %18 = math.rsqrt %17 : vector<8x1xf32>
    %19 = vector.broadcast %18 : vector<8x1xf32> to vector<8x32xf32>
    %20 = arith.mulf %10, %19 : vector<8x32xf32>
    %c0_7 = arith.constant 0 : index
    %c0_8 = arith.constant 0 : index
    %21 = vector.load %arg3[%c0_7, %c0_8] : memref<1x32xf32, #tpu.memory_space<vmem>>, vector<1x32xf32>
    %22 = vector.broadcast %21 : vector<1x32xf32> to vector<8x32xf32>
    %23 = arith.mulf %20, %22 : vector<8x32xf32>
    %c0_9 = arith.constant 0 : index
    %c0_10 = arith.constant 0 : index
    %24 = vector.load %arg4[%c0_9, %c0_10] : memref<1x32xf32, #tpu.memory_space<vmem>>, vector<1x32xf32>
    %25 = vector.broadcast %24 : vector<1x32xf32> to vector<8x32xf32>
    %26 = arith.addf %23, %25 : vector<8x32xf32>
    %27 = arith.truncf %26 : vector<8x32xf32> to vector<8x32xbf16>
    %c0_11 = arith.constant 0 : index
    %c0_12 = arith.constant 0 : index
    %28 = vector.load %arg5[%c0_11, %c0_12] : memref<8x32xbf16, #tpu.memory_space<vmem>>, vector<8x32xbf16>
    tpu.vector_store %arg5[%c0_11, %c0_12], %27 {strides = array<i32>} : memref<8x32xbf16, #tpu.memory_space<vmem>>, vector<8x32xbf16>,
    return
  }
  func.func @transform_0(%arg0: i32) -> (i32, i32) {
    %c0_i32 = arith.constant 0 : i32
    %c0_i32_0 = arith.constant 0 : i32
    return %arg0, %c0_i32 : i32, i32
  }
  func.func @transform_1(%arg0: i32) -> (i32, i32) {
    %c0_i32 = arith.constant 0 : i32
    %c0_i32_0 = arith.constant 0 : i32
    return %arg0, %c0_i32 : i32, i32
  }
  func.func @transform_2(%arg0: i32) -> (i32, i32) {
    %c0_i32 = arith.constant 0 : i32
    %c0_i32_0 = arith.constant 0 : i32
    %c0_i32_1 = arith.constant 0 : i32
    return %c0_i32, %c0_i32_0 : i32, i32
  }
  func.func @transform_3(%arg0: i32) -> (i32, i32) {
    %c0_i32 = arith.constant 0 : i32
    %c0_i32_0 = arith.constant 0 : i32
    %c0_i32_1 = arith.constant 0 : i32
    return %c0_i32, %c0_i32_0 : i32, i32
  }
  func.func @transform_4(%arg0: i32) -> (i32, i32) {
    %c0_i32 = arith.constant 0 : i32
    %c0_i32_0 = arith.constant 0 : i32
    return %arg0, %c0_i32 : i32, i32
  }
}

module attributes {stable_mosaic.version = 11 : i64} {
  func.func @_mm_kernel(%arg0: i32, %arg1: memref<8x32xbf16, #tpu.memory_space<vmem>>, %arg2: memref<32x32xbf16, #tpu.memory_space<vmem>>, %arg3: memref<1x32xf32, #tpu.memory_space<vmem>>, %arg4: memref<1x32xf32, #tpu.memory_space<vmem>>, %arg5: memref<8x32xbf16, #tpu.memory_space<vmem>>) attributes {dimension_semantics = [#tpu.dimension_semantics<parallel>], iteration_bounds = array<i64: 1>, scalar_prefetch = 0 : i64, scratch_operands = 0 : i64, tpu.core_type = #tpu.core_type<tc>, window_params = [{transform_indices = @transform_0, window_bounds = array<i64: 8, 32>}, {pipeline_mode = #tpu.pipeline_mode<synchronous>, transform_indices = @transform_1, window_bounds = array<i64: 32, 32>}, {pipeline_mode = #tpu.pipeline_mode<synchronous>, transform_indices = @transform_2, window_bounds = array<i64: 1, 32>}, {pipeline_mode = #tpu.pipeline_mode<synchronous>, transform_indices = @transform_3, window_bounds = array<i64: 1, 32>}, {transform_indices = @transform_4, window_bounds = array<i64: 8, 32>}]} {
    %c0 = arith.constant 0 : index
    %c0_0 = arith.constant 0 : index
    %0 = vector.load %arg1[%c0, %c0_0] : memref<8x32xbf16, #tpu.memory_space<vmem>>, vector<8x32xbf16>
    %c0_1 = arith.constant 0 : index
    %c0_2 = arith.constant 0 : index
    %1 = vector.load %arg2[%c0_1, %c0_2] : memref<32x32xbf16, #tpu.memory_space<vmem>>, vector<32x32xbf16>
    %cst = arith.constant dense<0.000000e+00> : vector<8x32xf32>
    %2 = tpu.matmul %0, %1, %cst {dimension_numbers = #tpu.dot_dimension_numbers<[1], [0], [0], [1], [0, 0, 1, 1], [], []>} : vector<8x32xbf16>, vector<32x32xbf16>, vector<8x32xf32> -> vector<8x32xf32>
    %c0_3 = arith.constant 0 : index
    %c0_4 = arith.constant 0 : index
    %3 = vector.load %arg3[%c0_3, %c0_4] : memref<1x32xf32, #tpu.memory_space<vmem>>, vector<1x32xf32>
    %4 = vector.broadcast %3 : vector<1x32xf32> to vector<8x32xf32>
    %5 = arith.mulf %2, %4 : vector<8x32xf32>
    %c0_5 = arith.constant 0 : index
    %c0_6 = arith.constant 0 : index
    %6 = vector.load %arg4[%c0_5, %c0_6] : memref<1x32xf32, #tpu.memory_space<vmem>>, vector<1x32xf32>
    %7 = vector.broadcast %6 : vector<1x32xf32> to vector<8x32xf32>
    %8 = arith.addf %5, %7 : vector<8x32xf32>
    %cst_7 = arith.constant 0.000000e+00 : f32
    %9 = vector.broadcast %cst_7 : f32 to vector<8x32xf32>
    %10 = arith.maximumf %8, %9 : vector<8x32xf32>
    %11 = arith.truncf %10 : vector<8x32xf32> to vector<8x32xbf16>
    %c0_8 = arith.constant 0 : index
    %c0_9 = arith.constant 0 : index
    %12 = vector.load %arg5[%c0_8, %c0_9] : memref<8x32xbf16, #tpu.memory_space<vmem>>, vector<8x32xbf16>
    tpu.vector_store %arg5[%c0_8, %c0_9], %11 {strides = array<i32>} : memref<8x32xbf16, #tpu.memory_space<vmem>>, vector<8x32xbf16>,
    return
  }
  func.func @transform_0(%arg0: i32) -> (i32, i32) {
    %c0_i32 = arith.constant 0 : i32
    %c0_i32_0 = arith.constant 0 : i32
    return %arg0, %c0_i32 : i32, i32
  }
  func.func @transform_1(%arg0: i32) -> (i32, i32) {
    %c0_i32 = arith.constant 0 : i32
    %c0_i32_0 = arith.constant 0 : i32
    %c0_i32_1 = arith.constant 0 : i32
    return %c0_i32, %c0_i32_0 : i32, i32
  }
  func.func @transform_2(%arg0: i32) -> (i32, i32) {
    %c0_i32 = arith.constant 0 : i32
    %c0_i32_0 = arith.constant 0 : i32
    %c0_i32_1 = arith.constant 0 : i32
    return %c0_i32, %c0_i32_0 : i32, i32
  }
  func.func @transform_3(%arg0: i32) -> (i32, i32) {
    %c0_i32 = arith.constant 0 : i32
    %c0_i32_0 = arith.constant 0 : i32
    %c0_i32_1 = arith.constant 0 : i32
    return %c0_i32, %c0_i32_0 : i32, i32
  }
  func.func @transform_4(%arg0: i32) -> (i32, i32) {
    %c0_i32 = arith.constant 0 : i32
    %c0_i32_0 = arith.constant 0 : i32
    return %arg0, %c0_i32 : i32, i32
  }
}

module attributes {stable_mosaic.version = 11 : i64} {
  func.func @_mm_kernel(%arg0: i32, %arg1: memref<8x32xbf16, #tpu.memory_space<vmem>>, %arg2: memref<32x32xbf16, #tpu.memory_space<vmem>>, %arg3: memref<1x32xf32, #tpu.memory_space<vmem>>, %arg4: memref<1x32xf32, #tpu.memory_space<vmem>>, %arg5: memref<8x32xbf16, #tpu.memory_space<vmem>>) attributes {dimension_semantics = [#tpu.dimension_semantics<parallel>], iteration_bounds = array<i64: 1>, scalar_prefetch = 0 : i64, scratch_operands = 0 : i64, tpu.core_type = #tpu.core_type<tc>, window_params = [{transform_indices = @transform_0, window_bounds = array<i64: 8, 32>}, {pipeline_mode = #tpu.pipeline_mode<synchronous>, transform_indices = @transform_1, window_bounds = array<i64: 32, 32>}, {pipeline_mode = #tpu.pipeline_mode<synchronous>, transform_indices = @transform_2, window_bounds = array<i64: 1, 32>}, {pipeline_mode = #tpu.pipeline_mode<synchronous>, transform_indices = @transform_3, window_bounds = array<i64: 1, 32>}, {transform_indices = @transform_4, window_bounds = array<i64: 8, 32>}]} {
    %c0 = arith.constant 0 : index
    %c0_0 = arith.constant 0 : index
    %0 = vector.load %arg1[%c0, %c0_0] : memref<8x32xbf16, #tpu.memory_space<vmem>>, vector<8x32xbf16>
    %c0_1 = arith.constant 0 : index
    %c0_2 = arith.constant 0 : index
    %1 = vector.load %arg2[%c0_1, %c0_2] : memref<32x32xbf16, #tpu.memory_space<vmem>>, vector<32x32xbf16>
    %cst = arith.constant dense<0.000000e+00> : vector<8x32xf32>
    %2 = tpu.matmul %0, %1, %cst {dimension_numbers = #tpu.dot_dimension_numbers<[1], [0], [0], [1], [0, 0, 1, 1], [], []>} : vector<8x32xbf16>, vector<32x32xbf16>, vector<8x32xf32> -> vector<8x32xf32>
    %c0_3 = arith.constant 0 : index
    %c0_4 = arith.constant 0 : index
    %3 = vector.load %arg3[%c0_3, %c0_4] : memref<1x32xf32, #tpu.memory_space<vmem>>, vector<1x32xf32>
    %4 = vector.broadcast %3 : vector<1x32xf32> to vector<8x32xf32>
    %5 = arith.mulf %2, %4 : vector<8x32xf32>
    %c0_5 = arith.constant 0 : index
    %c0_6 = arith.constant 0 : index
    %6 = vector.load %arg4[%c0_5, %c0_6] : memref<1x32xf32, #tpu.memory_space<vmem>>, vector<1x32xf32>
    %7 = vector.broadcast %6 : vector<1x32xf32> to vector<8x32xf32>
    %8 = arith.addf %5, %7 : vector<8x32xf32>
    %cst_7 = arith.constant 0.000000e+00 : f32
    %9 = vector.broadcast %cst_7 : f32 to vector<8x32xf32>
    %10 = arith.maximumf %8, %9 : vector<8x32xf32>
    %11 = arith.truncf %10 : vector<8x32xf32> to vector<8x32xbf16>
    %c0_8 = arith.constant 0 : index
    %c0_9 = arith.constant 0 : index
    %12 = vector.load %arg5[%c0_8, %c0_9] : memref<8x32xbf16, #tpu.memory_space<vmem>>, vector<8x32xbf16>
    tpu.vector_store %arg5[%c0_8, %c0_9], %11 {strides = array<i32>} : memref<8x32xbf16, #tpu.memory_space<vmem>>, vector<8x32xbf16>,
    return
  }
  func.func @transform_0(%arg0: i32) -> (i32, i32) {
    %c0_i32 = arith.constant 0 : i32
    %c0_i32_0 = arith.constant 0 : i32
    return %arg0, %c0_i32 : i32, i32
  }
  func.func @transform_1(%arg0: i32) -> (i32, i32) {
    %c0_i32 = arith.constant 0 : i32
    %c0_i32_0 = arith.constant 0 : i32
    %c0_i32_1 = arith.constant 0 : i32
    return %c0_i32, %c0_i32_0 : i32, i32
  }
  func.func @transform_2(%arg0: i32) -> (i32, i32) {
    %c0_i32 = arith.constant 0 : i32
    %c0_i32_0 = arith.constant 0 : i32
    %c0_i32_1 = arith.constant 0 : i32
    return %c0_i32, %c0_i32_0 : i32, i32
  }
  func.func @transform_3(%arg0: i32) -> (i32, i32) {
    %c0_i32 = arith.constant 0 : i32
    %c0_i32_0 = arith.constant 0 : i32
    %c0_i32_1 = arith.constant 0 : i32
    return %c0_i32, %c0_i32_0 : i32, i32
  }
  func.func @transform_4(%arg0: i32) -> (i32, i32) {
    %c0_i32 = arith.constant 0 : i32
    %c0_i32_0 = arith.constant 0 : i32
    return %arg0, %c0_i32 : i32, i32
  }
}

module attributes {stable_mosaic.version = 11 : i64} {
  func.func @_mm_kernel(%arg0: i32, %arg1: memref<8x32xbf16, #tpu.memory_space<vmem>>, %arg2: memref<32x96xbf16, #tpu.memory_space<vmem>>, %arg3: memref<1x96xf32, #tpu.memory_space<vmem>>, %arg4: memref<1x96xf32, #tpu.memory_space<vmem>>, %arg5: memref<8x96xbf16, #tpu.memory_space<vmem>>) attributes {dimension_semantics = [#tpu.dimension_semantics<parallel>], iteration_bounds = array<i64: 1>, scalar_prefetch = 0 : i64, scratch_operands = 0 : i64, tpu.core_type = #tpu.core_type<tc>, window_params = [{transform_indices = @transform_0, window_bounds = array<i64: 8, 32>}, {pipeline_mode = #tpu.pipeline_mode<synchronous>, transform_indices = @transform_1, window_bounds = array<i64: 32, 96>}, {pipeline_mode = #tpu.pipeline_mode<synchronous>, transform_indices = @transform_2, window_bounds = array<i64: 1, 96>}, {pipeline_mode = #tpu.pipeline_mode<synchronous>, transform_indices = @transform_3, window_bounds = array<i64: 1, 96>}, {transform_indices = @transform_4, window_bounds = array<i64: 8, 96>}]} {
    %c0 = arith.constant 0 : index
    %c0_0 = arith.constant 0 : index
    %0 = vector.load %arg1[%c0, %c0_0] : memref<8x32xbf16, #tpu.memory_space<vmem>>, vector<8x32xbf16>
    %c0_1 = arith.constant 0 : index
    %c0_2 = arith.constant 0 : index
    %1 = vector.load %arg2[%c0_1, %c0_2] : memref<32x96xbf16, #tpu.memory_space<vmem>>, vector<32x96xbf16>
    %cst = arith.constant dense<0.000000e+00> : vector<8x96xf32>
    %2 = tpu.matmul %0, %1, %cst {dimension_numbers = #tpu.dot_dimension_numbers<[1], [0], [0], [1], [0, 0, 1, 1], [], []>} : vector<8x32xbf16>, vector<32x96xbf16>, vector<8x96xf32> -> vector<8x96xf32>
    %c0_3 = arith.constant 0 : index
    %c0_4 = arith.constant 0 : index
    %3 = vector.load %arg3[%c0_3, %c0_4] : memref<1x96xf32, #tpu.memory_space<vmem>>, vector<1x96xf32>
    %4 = vector.broadcast %3 : vector<1x96xf32> to vector<8x96xf32>
    %5 = arith.mulf %2, %4 : vector<8x96xf32>
    %c0_5 = arith.constant 0 : index
    %c0_6 = arith.constant 0 : index
    %6 = vector.load %arg4[%c0_5, %c0_6] : memref<1x96xf32, #tpu.memory_space<vmem>>, vector<1x96xf32>
    %7 = vector.broadcast %6 : vector<1x96xf32> to vector<8x96xf32>
    %8 = arith.addf %5, %7 : vector<8x96xf32>
    %9 = arith.truncf %8 : vector<8x96xf32> to vector<8x96xbf16>
    %c0_7 = arith.constant 0 : index
    %c0_8 = arith.constant 0 : index
    %10 = vector.load %arg5[%c0_7, %c0_8] : memref<8x96xbf16, #tpu.memory_space<vmem>>, vector<8x96xbf16>
    tpu.vector_store %arg5[%c0_7, %c0_8], %9 {strides = array<i32>} : memref<8x96xbf16, #tpu.memory_space<vmem>>, vector<8x96xbf16>,
    return
  }
  func.func @transform_0(%arg0: i32) -> (i32, i32) {
    %c0_i32 = arith.constant 0 : i32
    %c0_i32_0 = arith.constant 0 : i32
    return %arg0, %c0_i32 : i32, i32
  }
  func.func @transform_1(%arg0: i32) -> (i32, i32) {
    %c0_i32 = arith.constant 0 : i32
    %c0_i32_0 = arith.constant 0 : i32
    %c0_i32_1 = arith.constant 0 : i32
    return %c0_i32, %c0_i32_0 : i32, i32
  }
  func.func @transform_2(%arg0: i32) -> (i32, i32) {
    %c0_i32 = arith.constant 0 : i32
    %c0_i32_0 = arith.constant 0 : i32
    %c0_i32_1 = arith.constant 0 : i32
    return %c0_i32, %c0_i32_0 : i32, i32
  }
  func.func @transform_3(%arg0: i32) -> (i32, i32) {
    %c0_i32 = arith.constant 0 : i32
    %c0_i32_0 = arith.constant 0 : i32
    %c0_i32_1 = arith.constant 0 : i32
    return %c0_i32, %c0_i32_0 : i32, i32
  }
  func.func @transform_4(%arg0: i32) -> (i32, i32) {
    %c0_i32 = arith.constant 0 : i32
    %c0_i32_0 = arith.constant 0 : i32
    return %arg0, %c0_i32 : i32, i32
  }
}

module attributes {stable_mosaic.version = 11 : i64} {
  func.func @_mm_kernel(%arg0: i32, %arg1: memref<8x32xbf16, #tpu.memory_space<vmem>>, %arg2: memref<32x32xbf16, #tpu.memory_space<vmem>>, %arg3: memref<1x32xf32, #tpu.memory_space<vmem>>, %arg4: memref<1x32xf32, #tpu.memory_space<vmem>>, %arg5: memref<8x32xbf16, #tpu.memory_space<vmem>>) attributes {dimension_semantics = [#tpu.dimension_semantics<parallel>], iteration_bounds = array<i64: 1>, scalar_prefetch = 0 : i64, scratch_operands = 0 : i64, tpu.core_type = #tpu.core_type<tc>, window_params = [{transform_indices = @transform_0, window_bounds = array<i64: 8, 32>}, {pipeline_mode = #tpu.pipeline_mode<synchronous>, transform_indices = @transform_1, window_bounds = array<i64: 32, 32>}, {pipeline_mode = #tpu.pipeline_mode<synchronous>, transform_indices = @transform_2, window_bounds = array<i64: 1, 32>}, {pipeline_mode = #tpu.pipeline_mode<synchronous>, transform_indices = @transform_3, window_bounds = array<i64: 1, 32>}, {transform_indices = @transform_4, window_bounds = array<i64: 8, 32>}]} {
    %c0 = arith.constant 0 : index
    %c0_0 = arith.constant 0 : index
    %0 = vector.load %arg1[%c0, %c0_0] : memref<8x32xbf16, #tpu.memory_space<vmem>>, vector<8x32xbf16>
    %c0_1 = arith.constant 0 : index
    %c0_2 = arith.constant 0 : index
    %1 = vector.load %arg2[%c0_1, %c0_2] : memref<32x32xbf16, #tpu.memory_space<vmem>>, vector<32x32xbf16>
    %cst = arith.constant dense<0.000000e+00> : vector<8x32xf32>
    %2 = tpu.matmul %0, %1, %cst {dimension_numbers = #tpu.dot_dimension_numbers<[1], [0], [0], [1], [0, 0, 1, 1], [], []>} : vector<8x32xbf16>, vector<32x32xbf16>, vector<8x32xf32> -> vector<8x32xf32>
    %c0_3 = arith.constant 0 : index
    %c0_4 = arith.constant 0 : index
    %3 = vector.load %arg3[%c0_3, %c0_4] : memref<1x32xf32, #tpu.memory_space<vmem>>, vector<1x32xf32>
    %4 = vector.broadcast %3 : vector<1x32xf32> to vector<8x32xf32>
    %5 = arith.mulf %2, %4 : vector<8x32xf32>
    %c0_5 = arith.constant 0 : index
    %c0_6 = arith.constant 0 : index
    %6 = vector.load %arg4[%c0_5, %c0_6] : memref<1x32xf32, #tpu.memory_space<vmem>>, vector<1x32xf32>
    %7 = vector.broadcast %6 : vector<1x32xf32> to vector<8x32xf32>
    %8 = arith.addf %5, %7 : vector<8x32xf32>
    %9 = arith.truncf %8 : vector<8x32xf32> to vector<8x32xbf16>
    %c0_7 = arith.constant 0 : index
    %c0_8 = arith.constant 0 : index
    %10 = vector.load %arg5[%c0_7, %c0_8] : memref<8x32xbf16, #tpu.memory_space<vmem>>, vector<8x32xbf16>
    tpu.vector_store %arg5[%c0_7, %c0_8], %9 {strides = array<i32>} : memref<8x32xbf16, #tpu.memory_space<vmem>>, vector<8x32xbf16>,
    return
  }
  func.func @transform_0(%arg0: i32) -> (i32, i32) {
    %c0_i32 = arith.constant 0 : i32
    %c0_i32_0 = arith.constant 0 : i32
    return %arg0, %c0_i32 : i32, i32
  }
  func.func @transform_1(%arg0: i32) -> (i32, i32) {
    %c0_i32 = arith.constant 0 : i32
    %c0_i32_0 = arith.constant 0 : i32
    %c0_i32_1 = arith.constant 0 : i32
    return %c0_i32, %c0_i32_0 : i32, i32
  }
  func.func @transform_2(%arg0: i32) -> (i32, i32) {
    %c0_i32 = arith.constant 0 : i32
    %c0_i32_0 = arith.constant 0 : i32
    %c0_i32_1 = arith.constant 0 : i32
    return %c0_i32, %c0_i32_0 : i32, i32
  }
  func.func @transform_3(%arg0: i32) -> (i32, i32) {
    %c0_i32 = arith.constant 0 : i32
    %c0_i32_0 = arith.constant 0 : i32
    %c0_i32_1 = arith.constant 0 : i32
    return %c0_i32, %c0_i32_0 : i32, i32
  }
  func.func @transform_4(%arg0: i32) -> (i32, i32) {
    %c0_i32 = arith.constant 0 : i32
    %c0_i32_0 = arith.constant 0 : i32
    return %arg0, %c0_i32 : i32, i32
  }
}

module attributes {stable_mosaic.version = 11 : i64} {
  func.func @_mm_kernel(%arg0: i32, %arg1: memref<8x288xbf16, #tpu.memory_space<vmem>>, %arg2: memref<288x2048xbf16, #tpu.memory_space<vmem>>, %arg3: memref<1x2048xf32, #tpu.memory_space<vmem>>, %arg4: memref<1x2048xf32, #tpu.memory_space<vmem>>, %arg5: memref<8x2048xbf16, #tpu.memory_space<vmem>>) attributes {dimension_semantics = [#tpu.dimension_semantics<parallel>], iteration_bounds = array<i64: 1>, scalar_prefetch = 0 : i64, scratch_operands = 0 : i64, tpu.core_type = #tpu.core_type<tc>, window_params = [{transform_indices = @transform_0, window_bounds = array<i64: 8, 288>}, {pipeline_mode = #tpu.pipeline_mode<synchronous>, transform_indices = @transform_1, window_bounds = array<i64: 288, 2048>}, {pipeline_mode = #tpu.pipeline_mode<synchronous>, transform_indices = @transform_2, window_bounds = array<i64: 1, 2048>}, {pipeline_mode = #tpu.pipeline_mode<synchronous>, transform_indices = @transform_3, window_bounds = array<i64: 1, 2048>}, {transform_indices = @transform_4, window_bounds = array<i64: 8, 2048>}]} {
    %c0 = arith.constant 0 : index
    %c0_0 = arith.constant 0 : index
    %0 = vector.load %arg1[%c0, %c0_0] : memref<8x288xbf16, #tpu.memory_space<vmem>>, vector<8x288xbf16>
    %c0_1 = arith.constant 0 : index
    %c0_2 = arith.constant 0 : index
    %1 = vector.load %arg2[%c0_1, %c0_2] : memref<288x2048xbf16, #tpu.memory_space<vmem>>, vector<288x2048xbf16>
    %cst = arith.constant dense<0.000000e+00> : vector<8x2048xf32>
    %2 = tpu.matmul %0, %1, %cst {dimension_numbers = #tpu.dot_dimension_numbers<[1], [0], [0], [1], [0, 0, 1, 1], [], []>} : vector<8x288xbf16>, vector<288x2048xbf16>, vector<8x2048xf32> -> vector<8x2048xf32>
    %c0_3 = arith.constant 0 : index
    %c0_4 = arith.constant 0 : index
    %3 = vector.load %arg3[%c0_3, %c0_4] : memref<1x2048xf32, #tpu.memory_space<vmem>>, vector<1x2048xf32>
    %4 = vector.broadcast %3 : vector<1x2048xf32> to vector<8x2048xf32>
    %5 = arith.mulf %2, %4 : vector<8x2048xf32>
    %c0_5 = arith.constant 0 : index
    %c0_6 = arith.constant 0 : index
    %6 = vector.load %arg4[%c0_5, %c0_6] : memref<1x2048xf32, #tpu.memory_space<vmem>>, vector<1x2048xf32>
    %7 = vector.broadcast %6 : vector<1x2048xf32> to vector<8x2048xf32>
    %8 = arith.addf %5, %7 : vector<8x2048xf32>
    %cst_7 = arith.constant 3.000000e+00 : f32
    %9 = vector.broadcast %cst_7 : f32 to vector<8x2048xf32>
    %10 = arith.addf %8, %9 : vector<8x2048xf32>
    %cst_8 = arith.constant 0.000000e+00 : f32
    %cst_9 = arith.constant 6.000000e+00 : f32
    %11 = vector.broadcast %cst_8 : f32 to vector<8x2048xf32>
    %12 = arith.maximumf %11, %10 : vector<8x2048xf32>
    %13 = vector.broadcast %cst_9 : f32 to vector<8x2048xf32>
    %14 = arith.minimumf %13, %12 : vector<8x2048xf32>
    %15 = arith.mulf %8, %14 : vector<8x2048xf32>
    %cst_10 = arith.constant 0.166666672 : f32
    %16 = vector.broadcast %cst_10 : f32 to vector<8x2048xf32>
    %17 = arith.mulf %15, %16 : vector<8x2048xf32>
    %18 = arith.truncf %17 : vector<8x2048xf32> to vector<8x2048xbf16>
    %c0_11 = arith.constant 0 : index
    %c0_12 = arith.constant 0 : index
    %19 = vector.load %arg5[%c0_11, %c0_12] : memref<8x2048xbf16, #tpu.memory_space<vmem>>, vector<8x2048xbf16>
    tpu.vector_store %arg5[%c0_11, %c0_12], %18 {strides = array<i32>} : memref<8x2048xbf16, #tpu.memory_space<vmem>>, vector<8x2048xbf16>,
    return
  }
  func.func @transform_0(%arg0: i32) -> (i32, i32) {
    %c0_i32 = arith.constant 0 : i32
    %c0_i32_0 = arith.constant 0 : i32
    return %arg0, %c0_i32 : i32, i32
  }
  func.func @transform_1(%arg0: i32) -> (i32, i32) {
    %c0_i32 = arith.constant 0 : i32
    %c0_i32_0 = arith.constant 0 : i32
    %c0_i32_1 = arith.constant 0 : i32
    return %c0_i32, %c0_i32_0 : i32, i32
  }
  func.func @transform_2(%arg0: i32) -> (i32, i32) {
    %c0_i32 = arith.constant 0 : i32
    %c0_i32_0 = arith.constant 0 : i32
    %c0_i32_1 = arith.constant 0 : i32
    return %c0_i32, %c0_i32_0 : i32, i32
  }
  func.func @transform_3(%arg0: i32) -> (i32, i32) {
    %c0_i32 = arith.constant 0 : i32
    %c0_i32_0 = arith.constant 0 : i32
    %c0_i32_1 = arith.constant 0 : i32
    return %c0_i32, %c0_i32_0 : i32, i32
  }
  func.func @transform_4(%arg0: i32) -> (i32, i32) {
    %c0_i32 = arith.constant 0 : i32
    %c0_i32_0 = arith.constant 0 : i32
    return %arg0, %c0_i32 : i32, i32
  }
}

module attributes {stable_mosaic.version = 11 : i64} {
  func.func @_mm_kernel(%arg0: i32, %arg1: memref<128x1152xbf16, #tpu.memory_space<vmem>>, %arg2: memref<1152x256xbf16, #tpu.memory_space<vmem>>, %arg3: memref<1x256xf32, #tpu.memory_space<vmem>>, %arg4: memref<1x256xf32, #tpu.memory_space<vmem>>, %arg5: memref<128x256xbf16, #tpu.memory_space<vmem>>) attributes {dimension_semantics = [#tpu.dimension_semantics<parallel>], iteration_bounds = array<i64: 1>, scalar_prefetch = 0 : i64, scratch_operands = 0 : i64, tpu.core_type = #tpu.core_type<tc>, window_params = [{transform_indices = @transform_0, window_bounds = array<i64: 128, 1152>}, {pipeline_mode = #tpu.pipeline_mode<synchronous>, transform_indices = @transform_1, window_bounds = array<i64: 1152, 256>}, {pipeline_mode = #tpu.pipeline_mode<synchronous>, transform_indices = @transform_2, window_bounds = array<i64: 1, 256>}, {pipeline_mode = #tpu.pipeline_mode<synchronous>, transform_indices = @transform_3, window_bounds = array<i64: 1, 256>}, {transform_indices = @transform_4, window_bounds = array<i64: 128, 256>}]} {
    %c0 = arith.constant 0 : index
    %c0_0 = arith.constant 0 : index
    %0 = vector.load %arg1[%c0, %c0_0] : memref<128x1152xbf16, #tpu.memory_space<vmem>>, vector<128x1152xbf16>
    %c0_1 = arith.constant 0 : index
    %c0_2 = arith.constant 0 : index
    %1 = vector.load %arg2[%c0_1, %c0_2] : memref<1152x256xbf16, #tpu.memory_space<vmem>>, vector<1152x256xbf16>
    %cst = arith.constant dense<0.000000e+00> : vector<128x256xf32>
    %2 = tpu.matmul %0, %1, %cst {dimension_numbers = #tpu.dot_dimension_numbers<[1], [0], [0], [1], [0, 0, 1, 1], [], []>} : vector<128x1152xbf16>, vector<1152x256xbf16>, vector<128x256xf32> -> vector<128x256xf32>
    %c0_3 = arith.constant 0 : index
    %c0_4 = arith.constant 0 : index
    %3 = vector.load %arg3[%c0_3, %c0_4] : memref<1x256xf32, #tpu.memory_space<vmem>>, vector<1x256xf32>
    %4 = vector.broadcast %3 : vector<1x256xf32> to vector<128x256xf32>
    %5 = arith.mulf %2, %4 : vector<128x256xf32>
    %c0_5 = arith.constant 0 : index
    %c0_6 = arith.constant 0 : index
    %6 = vector.load %arg4[%c0_5, %c0_6] : memref<1x256xf32, #tpu.memory_space<vmem>>, vector<1x256xf32>
    %7 = vector.broadcast %6 : vector<1x256xf32> to vector<128x256xf32>
    %8 = arith.addf %5, %7 : vector<128x256xf32>
    %cst_7 = arith.constant 3.000000e+00 : f32
    %9 = vector.broadcast %cst_7 : f32 to vector<128x256xf32>
    %10 = arith.addf %8, %9 : vector<128x256xf32>
    %cst_8 = arith.constant 0.000000e+00 : f32
    %cst_9 = arith.constant 6.000000e+00 : f32
    %11 = vector.broadcast %cst_8 : f32 to vector<128x256xf32>
    %12 = arith.maximumf %11, %10 : vector<128x256xf32>
    %13 = vector.broadcast %cst_9 : f32 to vector<128x256xf32>
    %14 = arith.minimumf %13, %12 : vector<128x256xf32>
    %15 = arith.mulf %8, %14 : vector<128x256xf32>
    %cst_10 = arith.constant 0.166666672 : f32
    %16 = vector.broadcast %cst_10 : f32 to vector<128x256xf32>
    %17 = arith.mulf %15, %16 : vector<128x256xf32>
    %18 = arith.truncf %17 : vector<128x256xf32> to vector<128x256xbf16>
    %c0_11 = arith.constant 0 : index
    %c0_12 = arith.constant 0 : index
    %19 = vector.load %arg5[%c0_11, %c0_12] : memref<128x256xbf16, #tpu.memory_space<vmem>>, vector<128x256xbf16>
    tpu.vector_store %arg5[%c0_11, %c0_12], %18 {strides = array<i32>} : memref<128x256xbf16, #tpu.memory_space<vmem>>, vector<128x256xbf16>,
    return
  }
  func.func @transform_0(%arg0: i32) -> (i32, i32) {
    %c0_i32 = arith.constant 0 : i32
    %c0_i32_0 = arith.constant 0 : i32
    return %arg0, %c0_i32 : i32, i32
  }
  func.func @transform_1(%arg0: i32) -> (i32, i32) {
    %c0_i32 = arith.constant 0 : i32
    %c0_i32_0 = arith.constant 0 : i32
    %c0_i32_1 = arith.constant 0 : i32
    return %c0_i32, %c0_i32_0 : i32, i32
  }
  func.func @transform_2(%arg0: i32) -> (i32, i32) {
    %c0_i32 = arith.constant 0 : i32
    %c0_i32_0 = arith.constant 0 : i32
    %c0_i32_1 = arith.constant 0 : i32
    return %c0_i32, %c0_i32_0 : i32, i32
  }
  func.func @transform_3(%arg0: i32) -> (i32, i32) {
    %c0_i32 = arith.constant 0 : i32
    %c0_i32_0 = arith.constant 0 : i32
    %c0_i32_1 = arith.constant 0 : i32
    return %c0_i32, %c0_i32_0 : i32, i32
  }
  func.func @transform_4(%arg0: i32) -> (i32, i32) {
    %c0_i32 = arith.constant 0 : i32
    %c0_i32_0 = arith.constant 0 : i32
    return %arg0, %c0_i32 : i32, i32
  }
}

module attributes {stable_mosaic.version = 11 : i64} {
  func.func @_mm_kernel(%arg0: i32, %arg1: memref<256x576xbf16, #tpu.memory_space<vmem>>, %arg2: memref<576x128xbf16, #tpu.memory_space<vmem>>, %arg3: memref<1x128xf32, #tpu.memory_space<vmem>>, %arg4: memref<1x128xf32, #tpu.memory_space<vmem>>, %arg5: memref<256x128xbf16, #tpu.memory_space<vmem>>) attributes {dimension_semantics = [#tpu.dimension_semantics<parallel>], iteration_bounds = array<i64: 2>, scalar_prefetch = 0 : i64, scratch_operands = 0 : i64, tpu.core_type = #tpu.core_type<tc>, window_params = [{transform_indices = @transform_0, window_bounds = array<i64: 256, 576>}, {pipeline_mode = #tpu.pipeline_mode<synchronous>, transform_indices = @transform_1, window_bounds = array<i64: 576, 128>}, {pipeline_mode = #tpu.pipeline_mode<synchronous>, transform_indices = @transform_2, window_bounds = array<i64: 1, 128>}, {pipeline_mode = #tpu.pipeline_mode<synchronous>, transform_indices = @transform_3, window_bounds = array<i64: 1, 128>}, {transform_indices = @transform_4, window_bounds = array<i64: 256, 128>}]} {
    %c0 = arith.constant 0 : index
    %c0_0 = arith.constant 0 : index
    %0 = vector.load %arg1[%c0, %c0_0] : memref<256x576xbf16, #tpu.memory_space<vmem>>, vector<256x576xbf16>
    %c0_1 = arith.constant 0 : index
    %c0_2 = arith.constant 0 : index
    %1 = vector.load %arg2[%c0_1, %c0_2] : memref<576x128xbf16, #tpu.memory_space<vmem>>, vector<576x128xbf16>
    %cst = arith.constant dense<0.000000e+00> : vector<256x128xf32>
    %2 = tpu.matmul %0, %1, %cst {dimension_numbers = #tpu.dot_dimension_numbers<[1], [0], [0], [1], [0, 0, 1, 1], [], []>} : vector<256x576xbf16>, vector<576x128xbf16>, vector<256x128xf32> -> vector<256x128xf32>
    %c0_3 = arith.constant 0 : index
    %c0_4 = arith.constant 0 : index
    %3 = vector.load %arg3[%c0_3, %c0_4] : memref<1x128xf32, #tpu.memory_space<vmem>>, vector<1x128xf32>
    %4 = vector.broadcast %3 : vector<1x128xf32> to vector<256x128xf32>
    %5 = arith.mulf %2, %4 : vector<256x128xf32>
    %c0_5 = arith.constant 0 : index
    %c0_6 = arith.constant 0 : index
    %6 = vector.load %arg4[%c0_5, %c0_6] : memref<1x128xf32, #tpu.memory_space<vmem>>, vector<1x128xf32>
    %7 = vector.broadcast %6 : vector<1x128xf32> to vector<256x128xf32>
    %8 = arith.addf %5, %7 : vector<256x128xf32>
    %cst_7 = arith.constant 3.000000e+00 : f32
    %9 = vector.broadcast %cst_7 : f32 to vector<256x128xf32>
    %10 = arith.addf %8, %9 : vector<256x128xf32>
    %cst_8 = arith.constant 0.000000e+00 : f32
    %cst_9 = arith.constant 6.000000e+00 : f32
    %11 = vector.broadcast %cst_8 : f32 to vector<256x128xf32>
    %12 = arith.maximumf %11, %10 : vector<256x128xf32>
    %13 = vector.broadcast %cst_9 : f32 to vector<256x128xf32>
    %14 = arith.minimumf %13, %12 : vector<256x128xf32>
    %15 = arith.mulf %8, %14 : vector<256x128xf32>
    %cst_10 = arith.constant 0.166666672 : f32
    %16 = vector.broadcast %cst_10 : f32 to vector<256x128xf32>
    %17 = arith.mulf %15, %16 : vector<256x128xf32>
    %18 = arith.truncf %17 : vector<256x128xf32> to vector<256x128xbf16>
    %c0_11 = arith.constant 0 : index
    %c0_12 = arith.constant 0 : index
    %19 = vector.load %arg5[%c0_11, %c0_12] : memref<256x128xbf16, #tpu.memory_space<vmem>>, vector<256x128xbf16>
    tpu.vector_store %arg5[%c0_11, %c0_12], %18 {strides = array<i32>} : memref<256x128xbf16, #tpu.memory_space<vmem>>, vector<256x128xbf16>,
    return
  }
  func.func @transform_0(%arg0: i32) -> (i32, i32) {
    %c0_i32 = arith.constant 0 : i32
    %c0_i32_0 = arith.constant 0 : i32
    return %arg0, %c0_i32 : i32, i32
  }
  func.func @transform_1(%arg0: i32) -> (i32, i32) {
    %c0_i32 = arith.constant 0 : i32
    %c0_i32_0 = arith.constant 0 : i32
    %c0_i32_1 = arith.constant 0 : i32
    return %c0_i32, %c0_i32_0 : i32, i32
  }
  func.func @transform_2(%arg0: i32) -> (i32, i32) {
    %c0_i32 = arith.constant 0 : i32
    %c0_i32_0 = arith.constant 0 : i32
    %c0_i32_1 = arith.constant 0 : i32
    return %c0_i32, %c0_i32_0 : i32, i32
  }
  func.func @transform_3(%arg0: i32) -> (i32, i32) {
    %c0_i32 = arith.constant 0 : i32
    %c0_i32_0 = arith.constant 0 : i32
    %c0_i32_1 = arith.constant 0 : i32
    return %c0_i32, %c0_i32_0 : i32, i32
  }
  func.func @transform_4(%arg0: i32) -> (i32, i32) {
    %c0_i32 = arith.constant 0 : i32
    %c0_i32_0 = arith.constant 0 : i32
    return %arg0, %c0_i32 : i32, i32
  }
}

</mosaic_0001>

<bundles_post_ra>
// kernel: _lambda_.27
= control target key start
LH: loop header
LB: loop body
LE: loop exit
PB: predicated region body
PF: predicated region fallthrough
CT: control target
= control target key end

     0   :  { %s1549_s15 = smov 0   ;;  %s1844_s0 = inlined_call_operand.vmem [shape: bf16[512,147], index: 0, kind: input, shape index: {}]   ;;  %s1845_s1 = inlined_call_operand.vmem [shape: bf16[147,64], index: 1, kind: input, shape index: {}]   ;;  %s1846_s2 = inlined_call_operand.vmem [shape: f32[1,64], index: 2, kind: input, shape index: {}]   ;;  %s1847_s3 = inlined_call_operand.vmem [shape: f32[1,64], index: 3, kind: input, shape index: {}]   ;;  %s1848_s4 = inlined_call_operand.vmem [shape: bf16[512,64], index: 4, kind: output, shape index: {}]  }
   0x1 LB: > { %s1289_s16 = sadd.s32 4294967295, %s1520_s15   ;;  %p1293_p0 = scmp.ge.s32.totalorder %s1520_s15, 1  ;;  %s1520_s15 = sphi %s1549_s15, %s14_s15  }
   0x2   : > { %p164_p1 = scmp.lt.s32.totalorder %s1520_s15, 3 }
   0x4   : > { %p165_p2 = pnand %p1293_p0, %p164_p1 }
   0x5   : > { %v1456_v0 = vld [vmem:[%s1845_s1] sm:$0xff] (!%p165_p2)   ;;  %v1522_v1 = vmov (!%p165_p2), 0   ;;  %v1457_v2 = vld [vmem:[%s1845_s1 + $0x8] sm:$0xff] (!%p165_p2)   ;;  %v1458_v3 = vld [vmem:[%s1845_s1 + $0x10] sm:$0xff] (!%p165_p2)   ;;  %s1294_s23 = sshll.u32 (!%p165_p2), %s1289_s16, 5  ;;  %vm457_vm0 = vcmask (!%p165_p2), 154624  }
   0x6   : > { %168 = sbr.rel (%p165_p2) target bundleno = 375 (0x177), region = 36  ;;  %513 = vmatprep.subr.bf16.mxu0 (!%p165_p2), %v1522_v1  ;;  %1426 = vmatprep.subr.bf16.mxu1 (!%p165_p2), %v1522_v1  ;;  %p192_p3 = scmp.lt.s32.totalorder (!%p165_p2), %s1294_s23, 63  ;;  %v1459_v4 = vld [vmem:[%s1845_s1 + $0x18] sm:$0xff] (!%p165_p2)   ;;  %v1460_v5 = vld [vmem:[%s1845_s1 + $0x20] sm:$0xff] (!%p165_p2)   ;;  %v1461_v8 = vld [vmem:[%s1845_s1 + $0x28] sm:$0xff] (!%p165_p2)   ;;  %vm506_vm1 = vcmask (!%p165_p2), 1040384  }
   0x7   : > { %514 = vmatpush1.bf16.msra.mxu0 (!%p165_p2), %v1456_v0  ;;  %1436 = vmatpush1.bf16.msra.mxu1 (!%p165_p2), %v1456_v0  ;;  %v1462_v9 = vld [vmem:[%s1845_s1 + $0x30] sm:$0xff] (!%p165_p2)   ;;  %v1463_v10 = vld [vmem:[%s1845_s1 + $0x38] sm:$0xff] (!%p165_p2)   ;;  %vm507_vm2 = vcmask (!%p165_p2), 1041408   ;;  %v1523_v11 = vmov (!%p165_p2), 65535   ;;  %v1464_v13 = vld [vmem:[%s1845_s1 + $0x40] sm:$0xff] (!%p165_p2)   ;;  %vm1200_vm3 = vcmask (!%p165_p2), 519168  }
   0x8   : > { %515 = vmatprep.subr.bf16.mxu0 (!%p165_p2), %v1522_v1  ;;  %1427 = vmatprep.subr.bf16.mxu1 (!%p165_p2), %v1522_v1  ;;  %v508_v12 = vsel (!%p165_p2), %vm506_vm1, 4294967295, %v1523_v11  ;;  %v1465_v14 = vld [vmem:[%s1845_s1 + $0x48] ss:$0 sps:$4 sm:$0x33] (!%p165_p2)   ;;  %v1646_v47 = vld [vmem:[%s1846_s2] ss:$0 sm:$0xff] (!%p165_p2) }
   0x9   : > { %v509_v15 = vsel (!%p165_p2), %vm507_vm2, %v508_v12, 0  ;;  %v1651_v49 = vld [vmem:[%s1847_s3] ss:$0 sm:$0xff] (!%p165_p2) }
   0xa   : > { %v511_v16 = vand.u32 (!%p165_p2), %v1465_v14, %v509_v15 }
   0xb   : > { %516 = vmatpush1.bf16.msra.mxu0 (!%p165_p2), %v1457_v2  ;;  %1437 = vmatpush1.bf16.msra.mxu1 (!%p165_p2), %v1457_v2 }
   0xc   : > { %517 = vmatprep.subr.bf16.mxu0 (!%p165_p2), %v1522_v1  ;;  %1428 = vmatprep.subr.bf16.mxu1 (!%p165_p2), %v1522_v1 }
   0xd   : > { %s1850_s23 = smov (!%p192_p3, %s1294_s23), 63 }
   0xe   : > { %s1393_s26 = sshll.u32 %s1850_s23, 3  ;;  %s1298_s21 = sshll.u32 %s1850_s23, 2 }
   0xf   : > { %518 = vmatpush1.bf16.msra.mxu0 %v1458_v3  ;;  %1438 = vmatpush1.bf16.msra.mxu1 %v1458_v3  ;;  %s1575_s29 = scalar_lea.vmem %s1844_s0, %s1393_s26  ;;  %s1673_s25 = scalar_lea.vmem %s1848_s4, %s1298_s21 }
  0x10   : > { %519 = vmatprep.subr.bf16.mxu0 %v1522_v1  ;;  %1429 = vmatprep.subr.bf16.mxu1 %v1522_v1  ;;  %v1468_v6 = vld [vmem:[%s1575_s29 + $0x4] ss:$8 sps:$4 sm:$0xff]   ;;  %v1466_v17 = vld [vmem:[%s1575_s29] ss:$8 sps:$4 sm:$0xff]   ;;  %v1472_v19 = vld [vmem:[%s1575_s29 + $0x14] ss:$8 sps:$4 sm:$0xff]  }
  0x11   : > { %v1471_v7 = vld [vmem:[%s1575_s29 + $0x84] ss:$8 sps:$4 sm:$0xff]   ;;  %1341 = vmatprep.mubr.msk.bf16.mxu0 %vm457_vm0, %v1468_v6  ;;  %v1469_v18 = vld [vmem:[%s1575_s29 + $0x80] ss:$8 sps:$4 sm:$0xff]   ;;  %v1474_v20 = vld [vmem:[%s1575_s29 + $0x94] ss:$8 sps:$4 sm:$0xff]  }
  0x12   : > { %1349 = vmatprep.mubr.msk.bf16.mxu1 %vm457_vm0, %v1471_v7  ;;  %v1476_v21 = vld [vmem:[%s1575_s29 + $0x10] ss:$8 sps:$4 sm:$0xff]   ;;  %v1478_v23 = vld [vmem:[%s1575_s29 + $0x24] ss:$8 sps:$4 sm:$0xff]   ;;  %v1482_v25 = vld [vmem:[%s1575_s29 + $0x20] ss:$8 sps:$4 sm:$0xff]  }
  0x13   : > { %520 = vmatpush1.bf16.msra.mxu0 %v1459_v4  ;;  %1439 = vmatpush1.bf16.msra.mxu1 %v1459_v4  ;;  %v1477_v22 = vld [vmem:[%s1575_s29 + $0x90] ss:$8 sps:$4 sm:$0xff]   ;;  %v1480_v24 = vld [vmem:[%s1575_s29 + $0xa4] ss:$8 sps:$4 sm:$0xff]   ;;  %v1483_v26 = vld [vmem:[%s1575_s29 + $0xa0] ss:$8 sps:$4 sm:$0xff]  }
  0x14   : > { %521 = vmatprep.subr.bf16.mxu0 %v1522_v1  ;;  %1430 = vmatprep.subr.bf16.mxu1 %v1522_v1  ;;  %v1484_v27 = vld [vmem:[%s1575_s29 + $0x34] ss:$8 sps:$4 sm:$0xff]   ;;  %v1488_v29 = vld [vmem:[%s1575_s29 + $0x30] ss:$8 sps:$4 sm:$0xff]   ;;  %v1490_v31 = vld [vmem:[%s1575_s29 + $0x44] ss:$8 sps:$4 sm:$0xff]  }
  0x15   : > { %v1486_v28 = vld [vmem:[%s1575_s29 + $0xb4] ss:$8 sps:$4 sm:$0xff]   ;;  %v1489_v30 = vld [vmem:[%s1575_s29 + $0xb0] ss:$8 sps:$4 sm:$0xff]   ;;  %v1492_v32 = vld [vmem:[%s1575_s29 + $0xc4] ss:$8 sps:$4 sm:$0xff]  }
  0x16   : > { %v1494_v33 = vld [vmem:[%s1575_s29 + $0x40] ss:$8 sps:$4 sm:$0xff]   ;;  %v1496_v35 = vld [vmem:[%s1575_s29 + $0x54] ss:$8 sps:$4 sm:$0xff]   ;;  %v1500_v37 = vld [vmem:[%s1575_s29 + $0x50] ss:$8 sps:$4 sm:$0xff]  }
  0x17   : > { %522 = vmatpush1.bf16.msra.mxu0 %v1460_v5  ;;  %1440 = vmatpush1.bf16.msra.mxu1 %v1460_v5  ;;  %v1495_v34 = vld [vmem:[%s1575_s29 + $0xc0] ss:$8 sps:$4 sm:$0xff]   ;;  %v1498_v36 = vld [vmem:[%s1575_s29 + $0xd4] ss:$8 sps:$4 sm:$0xff]   ;;  %v1501_v38 = vld [vmem:[%s1575_s29 + $0xd0] ss:$8 sps:$4 sm:$0xff]  }
  0x18   : > { %523 = vmatprep.subr.bf16.mxu0 %v1522_v1  ;;  %1431 = vmatprep.subr.bf16.mxu1 %v1522_v1  ;;  %v1502_v39 = vld [vmem:[%s1575_s29 + $0x64] ss:$8 sps:$4 sm:$0xff]   ;;  %v1506_v41 = vld [vmem:[%s1575_s29 + $0x60] ss:$8 sps:$4 sm:$0xff]   ;;  %v1508_v43 = vld [vmem:[%s1575_s29 + $0x74] ss:$8 sps:$4 sm:$0xff]  }
  0x19   : > { %v1504_v40 = vld [vmem:[%s1575_s29 + $0xe4] ss:$8 sps:$4 sm:$0xff]   ;;  %v1507_v42 = vld [vmem:[%s1575_s29 + $0xe0] ss:$8 sps:$4 sm:$0xff]   ;;  %v1510_v44 = vld [vmem:[%s1575_s29 + $0xf4] ss:$8 sps:$4 sm:$0xff]  }
  0x1a   : > { %v1512_v45 = vld [vmem:[%s1575_s29 + $0x70] ss:$8 sps:$4 sm:$0xff]  }
  0x1b   : > { %524 = vmatpush1.bf16.msra.mxu0 %v1461_v8  ;;  %1441 = vmatpush1.bf16.msra.mxu1 %v1461_v8  ;;  %v1513_v46 = vld [vmem:[%s1575_s29 + $0xf0] ss:$8 sps:$4 sm:$0xff]  }
  0x1c   : > { %525 = vmatprep.subr.bf16.mxu0 %v1522_v1  ;;  %1432 = vmatprep.subr.bf16.mxu1 %v1522_v1 }
  0x1f   : > { %526 = vmatpush1.bf16.msra.mxu0 %v1462_v9  ;;  %1442 = vmatpush1.bf16.msra.mxu1 %v1462_v9 }
  0x20   : > { %527 = vmatprep.subr.bf16.mxu0 %v1522_v1  ;;  %1433 = vmatprep.subr.bf16.mxu1 %v1522_v1 }
  0x23   : > { %528 = vmatpush1.bf16.msra.mxu0 %v1463_v10  ;;  %1443 = vmatpush1.bf16.msra.mxu1 %v1463_v10 }
  0x24   : > { %529 = vmatprep.subr.bf16.mxu0 %v1522_v1  ;;  %1434 = vmatprep.subr.bf16.mxu1 %v1522_v1 }
  0x27   : > { %530 = vmatpush1.bf16.msra.mxu0 %v1464_v13  ;;  %1444 = vmatpush1.bf16.msra.mxu1 %v1464_v13 }
  0x28   : > { %531 = vmatprep.subr.bf16.mxu0 %v1522_v1  ;;  %1435 = vmatprep.subr.bf16.mxu1 %v1522_v1 }
  0x2b   : > { %532 = vmatpush1.bf16.msra.mxu0 %v511_v16  ;;  %1445 = vmatpush1.bf16.msra.mxu1 %v511_v16 }
  0x2e   : > { %546 = vmatmul.mubr.bf16.vlgmr.msra.gmra.mrb[0].mxu0 %v1466_v17  ;;  %610 = vmatmul.mubr.bf16.vlgmr.msra.gmra.mrb[0].mxu1 %v1469_v18 }
  0x2f   : > { %1342 = vmatprep.mubr.msk.bf16.mxu0 %vm457_vm0, %v1472_v19  ;;  %1350 = vmatprep.mubr.msk.bf16.mxu1 %vm457_vm0, %v1474_v20 }
  0x36   : > { %554 = vmatmul.mubr.bf16.gmra.mrb[4].mxu0 %v1476_v21  ;;  %618 = vmatmul.mubr.bf16.gmra.mrb[4].mxu1 %v1477_v22 }
  0x37   : > { %1343 = vmatprep.mubr.msk.bf16.mxu0 %vm457_vm0, %v1478_v23  ;;  %1351 = vmatprep.mubr.msk.bf16.mxu1 %vm457_vm0, %v1480_v24 }
  0x3e   : > { %562 = vmatmul.mubr.bf16.gmra.mrb[8].mxu0 %v1482_v25  ;;  %626 = vmatmul.mubr.bf16.gmra.mrb[8].mxu1 %v1483_v26 }
  0x3f   : > { %1344 = vmatprep.mubr.msk.bf16.mxu0 %vm457_vm0, %v1484_v27  ;;  %1352 = vmatprep.mubr.msk.bf16.mxu1 %vm457_vm0, %v1486_v28 }
  0x46   : > { %570 = vmatmul.mubr.bf16.gmra.mrb[12].mxu0 %v1488_v29  ;;  %634 = vmatmul.mubr.bf16.gmra.mrb[12].mxu1 %v1489_v30 }
  0x47   : > { %1345 = vmatprep.mubr.msk.bf16.mxu0 %vm457_vm0, %v1490_v31  ;;  %1353 = vmatprep.mubr.msk.bf16.mxu1 %vm457_vm0, %v1492_v32 }
  0x4e   : > { %578 = vmatmul.mubr.bf16.gmra.mrb[16].mxu0 %v1494_v33  ;;  %642 = vmatmul.mubr.bf16.gmra.mrb[16].mxu1 %v1495_v34 }
  0x4f   : > { %1346 = vmatprep.mubr.msk.bf16.mxu0 %vm457_vm0, %v1496_v35  ;;  %1354 = vmatprep.mubr.msk.bf16.mxu1 %vm457_vm0, %v1498_v36 }
  0x56   : > { %586 = vmatmul.mubr.bf16.gmra.mrb[20].mxu0 %v1500_v37  ;;  %650 = vmatmul.mubr.bf16.gmra.mrb[20].mxu1 %v1501_v38 }
  0x57   : > { %1347 = vmatprep.mubr.msk.bf16.mxu0 %vm457_vm0, %v1502_v39  ;;  %1355 = vmatprep.mubr.msk.bf16.mxu1 %vm457_vm0, %v1504_v40 }
  0x5e   : > { %594 = vmatmul.mubr.bf16.gmra.mrb[24].mxu0 %v1506_v41  ;;  %658 = vmatmul.mubr.bf16.gmra.mrb[24].mxu1 %v1507_v42 }
  0x5f   : > { %1348 = vmatprep.mubr.msk.bf16.mxu0 %vm457_vm0, %v1508_v43  ;;  %1356 = vmatprep.mubr.msk.bf16.mxu1 %vm457_vm0, %v1510_v44 }
  0x66   : > { %602 = vmatmul.mubr.bf16.gmra.mrb[28].mxu0 %v1512_v45  ;;  %666 = vmatmul.mubr.bf16.gmra.mrb[28].mxu1 %v1513_v46 }
 0x101   : > { %v547_v48 = vpop.f32.mrb[0].mxu0  ;;  %v611_v50 = vpop.f32.mrb[0].mxu1 }
 0x102   : > { %v681_v51 = vmul.f32 %v1646_v47, %v547_v48  ;;  %v697_v52 = vmul.f32 %v1646_v47, %v611_v50  ;;  %v549_v53 = vpop.f32.mrb[1].mxu0  ;;  %v613_v54 = vpop.f32.mrb[1].mxu1 }
 0x103   : > { %v550_v55 = vpop.f32.mrb[2].mxu0  ;;  %v614_v56 = vpop.f32.mrb[2].mxu1 }
 0x104   : > { %v720_v57 = vadd.f32 %v1651_v49, %v681_v51  ;;  %v736_v58 = vadd.f32 %v1651_v49, %v697_v52  ;;  %v682_v59 = vmul.f32 %v1646_v47, %v550_v55  ;;  %v698_v60 = vmul.f32 %v1646_v47, %v614_v56  ;;  %v552_v61 = vpop.f32.mrb[3].mxu0  ;;  %v616_v62 = vpop.f32.mrb[3].mxu1 }
 0x106   : > { %v752_v63 = vadd.f32 3.0, %v720_v57  ;;  %v768_v0 = vadd.f32 3.0, %v736_v58  ;;  %v721_v1 = vadd.f32 %v1651_v49, %v682_v59  ;;  %v737_v2 = vadd.f32 %v1651_v49, %v698_v60 }
 0x108   : > { %v784_v3 = vmax.f32 %v752_v63, 0.0  ;;  %v800_v4 = vmax.f32 %v768_v0, 0.0  ;;  %v753_v5 = vadd.f32 3.0, %v721_v1  ;;  %v769_v6 = vadd.f32 3.0, %v737_v2 }
 0x109   : > { %v555_v7 = vpop.f32.mrb[4].mxu0  ;;  %v619_v8 = vpop.f32.mrb[4].mxu1 }
 0x10a   : > { %v816_v9 = vmin.f32 %v784_v3, 6.0  ;;  %v832_v10 = vmin.f32 %v800_v4, 6.0  ;;  %v785_v11 = vmax.f32 %v753_v5, 0.0  ;;  %v801_v12 = vmax.f32 %v769_v6, 0.0  ;;  %v557_v13 = vpop.f32.mrb[5].mxu0  ;;  %v621_v14 = vpop.f32.mrb[5].mxu1 }
 0x10b   : > { %v683_v15 = vmul.f32 %v1646_v47, %v555_v7  ;;  %v699_v16 = vmul.f32 %v1646_v47, %v619_v8  ;;  %v558_v17 = vpop.f32.mrb[6].mxu0  ;;  %v622_v18 = vpop.f32.mrb[6].mxu1 }
 0x10c   : > { %v848_v19 = vmul.f32 %v816_v9, %v720_v57  ;;  %v864_v20 = vmul.f32 %v832_v10, %v736_v58  ;;  %v817_v21 = vmin.f32 %v785_v11, 6.0  ;;  %v833_v22 = vmin.f32 %v801_v12, 6.0  ;;  %v560_v23 = vpop.f32.mrb[7].mxu0  ;;  %v624_v24 = vpop.f32.mrb[7].mxu1 }
 0x10d   : > { %v722_v25 = vadd.f32 %v1651_v49, %v683_v15  ;;  %v738_v26 = vadd.f32 %v1651_v49, %v699_v16  ;;  %v684_v27 = vmul.f32 %v1646_v47, %v558_v17  ;;  %v700_v28 = vmul.f32 %v1646_v47, %v622_v18 }
 0x10e   : > { %v880_v29 = vmul.f32 0.16666667, %v848_v19  ;;  %v896_v30 = vmul.f32 0.16666667, %v864_v20  ;;  %v849_v31 = vmul.f32 %v817_v21, %v721_v1  ;;  %v865_v32 = vmul.f32 %v833_v22, %v737_v2 }
 0x10f   : > { %v754_v33 = vadd.f32 3.0, %v722_v25  ;;  %v770_v34 = vadd.f32 3.0, %v738_v26  ;;  %v723_v35 = vadd.f32 %v1651_v49, %v684_v27  ;;  %v739_v36 = vadd.f32 %v1651_v49, %v700_v28 }
 0x110   : > { %v912_v37 = vadd.f32 3.0, %v880_v29  ;;  %v928_v38 = vadd.f32 3.0, %v896_v30  ;;  %v881_v39 = vmul.f32 0.16666667, %v849_v31  ;;  %v897_v40 = vmul.f32 0.16666667, %v865_v32 }
 0x111   : > { %v786_v41 = vmax.f32 %v754_v33, 0.0  ;;  %v802_v42 = vmax.f32 %v770_v34, 0.0  ;;  %v755_v43 = vadd.f32 3.0, %v723_v35  ;;  %v771_v44 = vadd.f32 3.0, %v739_v36  ;;  %v563_v45 = vpop.f32.mrb[8].mxu0  ;;  %v627_v46 = vpop.f32.mrb[8].mxu1 }
 0x112   : > { %v944_v48 = vmax.f32 %v912_v37, 0.0  ;;  %v960_v50 = vmax.f32 %v928_v38, 0.0  ;;  %v913_v51 = vadd.f32 3.0, %v881_v39  ;;  %v929_v52 = vadd.f32 3.0, %v897_v40  ;;  %v565_v53 = vpop.f32.mrb[9].mxu0  ;;  %v629_v54 = vpop.f32.mrb[9].mxu1 }
 0x113   : > { %v818_v55 = vmin.f32 %v786_v41, 6.0  ;;  %v834_v56 = vmin.f32 %v802_v42, 6.0  ;;  %v787_v57 = vmax.f32 %v755_v43, 0.0  ;;  %v803_v58 = vmax.f32 %v771_v44, 0.0  ;;  %v566_v59 = vpop.f32.mrb[10].mxu0  ;;  %v630_v60 = vpop.f32.mrb[10].mxu1 }
 0x114   : > { %v976_v61 = vmin.f32 %v944_v48, 6.0  ;;  %v992_v62 = vmin.f32 %v960_v50, 6.0  ;;  %v945_v63 = vmax.f32 %v913_v51, 0.0  ;;  %v961_v0 = vmax.f32 %v929_v52, 0.0  ;;  %v568_v1 = vpop.f32.mrb[11].mxu0  ;;  %v632_v2 = vpop.f32.mrb[11].mxu1 }
 0x115   : > { %v850_v3 = vmul.f32 %v818_v55, %v722_v25  ;;  %v866_v4 = vmul.f32 %v834_v56, %v738_v26  ;;  %v819_v5 = vmin.f32 %v787_v57, 6.0  ;;  %v835_v6 = vmin.f32 %v803_v58, 6.0 }
 0x116   : > { %v1008_v7 = vmul.f32 %v976_v61, %v880_v29  ;;  %v1024_v8 = vmul.f32 %v992_v62, %v896_v30  ;;  %v977_v9 = vmin.f32 %v945_v63, 6.0  ;;  %v993_v10 = vmin.f32 %v961_v0, 6.0 }
 0x117   : > { %v882_v11 = vmul.f32 0.16666667, %v850_v3  ;;  %v898_v12 = vmul.f32 0.16666667, %v866_v4  ;;  %v851_v13 = vmul.f32 %v819_v5, %v723_v35  ;;  %v867_v14 = vmul.f32 %v835_v6, %v739_v36 }
 0x118   : > { %v1040_v15 = vmul.f32 0.16666667, %v1008_v7  ;;  %v1056_v16 = vmul.f32 0.16666667, %v1024_v8  ;;  %v1009_v17 = vmul.f32 %v977_v9, %v881_v39  ;;  %v1025_v18 = vmul.f32 %v993_v10, %v897_v40 }
 0x119   : > { %v914_v19 = vadd.f32 3.0, %v882_v11  ;;  %v930_v20 = vadd.f32 3.0, %v898_v12  ;;  %v883_v21 = vmul.f32 0.16666667, %v851_v13  ;;  %v899_v22 = vmul.f32 0.16666667, %v867_v14 }
 0x11a   : > { %v1394_v23 = vpack.c.bf16 %v1040_v15, %v1040_v15  ;;  %v1410_v24 = vpack.c.bf16 %v1056_v16, %v1056_v16  ;;  %v1041_v25 = vmul.f32 0.16666667, %v1009_v17  ;;  %v1057_v26 = vmul.f32 0.16666667, %v1025_v18  ;;  %v1675_v27 = vpop.f32.mrb[12].mxu0  ;;  %v1677_v28 = vpop.f32.mrb[12].mxu1 }
 0x11b   : > { %v946_v29 = vmax.f32 %v914_v19, 0.0  ;;  %v962_v30 = vmax.f32 %v930_v20, 0.0  ;;  %v915_v31 = vadd.f32 3.0, %v883_v21  ;;  %v931_v32 = vadd.f32 3.0, %v899_v22  ;;  %v573_v33 = vpop.f32.mrb[13].mxu0  ;;  %v637_v34 = vpop.f32.mrb[13].mxu1 }
 0x11c   : > { %1201 = vst.msk [vmem:[%s1673_s25] sm:$0xf] %vm1200_vm3, %v1394_v23  ;;  %1217 = vst.msk [vmem:[%s1673_s25 + $0x40] sm:$0xf] %vm1200_vm3, %v1410_v24  ;;  %v1395_v35 = vpack.c.bf16 %v1041_v25, %v1041_v25  ;;  %v1411_v36 = vpack.c.bf16 %v1057_v26, %v1057_v26  ;;  %v685_v37 = vmul.f32 %v1646_v47, %v563_v45  ;;  %v574_v39 = vpop.f32.mrb[14].mxu0  ;;  %v638_v40 = vpop.f32.mrb[14].mxu1 }
 0x11d   : > { %v701_v38 = vmul.f32 %v1646_v47, %v627_v46  ;;  %v978_v41 = vmin.f32 %v946_v29, 6.0  ;;  %v994_v42 = vmin.f32 %v962_v30, 6.0  ;;  %v947_v43 = vmax.f32 %v915_v31, 0.0  ;;  %v576_v48 = vpop.f32.mrb[15].mxu0  ;;  %v640_v50 = vpop.f32.mrb[15].mxu1 }
 0x11e   : > { %v963_v44 = vmax.f32 %v931_v32, 0.0  ;;  %1202 = vst.msk [vmem:[%s1673_s25 + $0x4] sm:$0xf] %vm1200_vm3, %v1395_v35  ;;  %1218 = vst.msk [vmem:[%s1673_s25 + $0x44] sm:$0xf] %vm1200_vm3, %v1411_v36  ;;  %v724_v51 = vadd.f32 %v1651_v49, %v685_v37  ;;  %v686_v45 = vmul.f32 %v1646_v47, %v566_v59  ;;  %v702_v46 = vmul.f32 %v1646_v47, %v630_v60 }
 0x11f   : > { %v740_v52 = vadd.f32 %v1651_v49, %v701_v38  ;;  %v1010_v53 = vmul.f32 %v978_v41, %v882_v11  ;;  %v1026_v54 = vmul.f32 %v994_v42, %v898_v12  ;;  %v979_v55 = vmin.f32 %v947_v43, 6.0 }
 0x120   : > { %v995_v56 = vmin.f32 %v963_v44, 6.0  ;;  %v756_v57 = vadd.f32 3.0, %v724_v51  ;;  %v725_v61 = vadd.f32 %v1651_v49, %v686_v45  ;;  %v741_v62 = vadd.f32 %v1651_v49, %v702_v46 }
 0x121   : > { %v772_v58 = vadd.f32 3.0, %v740_v52  ;;  %v1042_v63 = vmul.f32 0.16666667, %v1010_v53  ;;  %v1058_v0 = vmul.f32 0.16666667, %v1026_v54  ;;  %v1011_v1 = vmul.f32 %v979_v55, %v883_v21  ;;  %v1695_v3 = vpop.f32.mrb[16].mxu0 }
 0x122   : > { %v1027_v2 = vmul.f32 %v995_v56, %v899_v22  ;;  %v1697_v4 = vpop.f32.mrb[16].mxu1  ;;  %v788_v59 = vmax.f32 %v756_v57, 0.0  ;;  %v757_v5 = vadd.f32 3.0, %v725_v61  ;;  %v773_v6 = vadd.f32 3.0, %v741_v62  ;;  %v581_v7 = vpop.f32.mrb[17].mxu0 }
 0x123   : > { %v804_v60 = vmax.f32 %v772_v58, 0.0  ;;  %v645_v8 = vpop.f32.mrb[17].mxu1  ;;  %v1396_v9 = vpack.c.bf16 %v1042_v63, %v1042_v63  ;;  %v1412_v10 = vpack.c.bf16 %v1058_v0, %v1058_v0  ;;  %v1043_v11 = vmul.f32 0.16666667, %v1011_v1  ;;  %v1699_v13 = vpop.f32.mrb[18].mxu0 }
 0x124   : > { %v1059_v12 = vmul.f32 0.16666667, %v1027_v2  ;;  %v1701_v14 = vpop.f32.mrb[18].mxu1  ;;  %v820_v15 = vmin.f32 %v788_v59, 6.0  ;;  %v789_v17 = vmax.f32 %v757_v5, 0.0  ;;  %v805_v18 = vmax.f32 %v773_v6, 0.0 }
 0x125   : > { %v836_v16 = vmin.f32 %v804_v60, 6.0  ;;  %v584_v19 = vpop.f32.mrb[19].mxu0  ;;  %v648_v20 = vpop.f32.mrb[19].mxu1  ;;  %1203 = vst.msk [vmem:[%s1673_s25 + $0x8] sm:$0xf] %vm1200_vm3, %v1396_v9  ;;  %v1397_v21 = vpack.c.bf16 %v1043_v11, %v1043_v11  ;;  %v687_v23 = vmul.f32 %v1646_v47, %v1675_v27  ;;  %v703_v24 = vmul.f32 %v1646_v47, %v1677_v28 }
 0x126   : > { %1219 = vst.msk [vmem:[%s1673_s25 + $0x48] sm:$0xf] %vm1200_vm3, %v1412_v10  ;;  %v1413_v22 = vpack.c.bf16 %v1059_v12, %v1059_v12  ;;  %v852_v25 = vmul.f32 %v820_v15, %v724_v51  ;;  %v821_v29 = vmin.f32 %v789_v17, 6.0  ;;  %v837_v30 = vmin.f32 %v805_v18, 6.0 }
 0x127   : > { %v868_v26 = vmul.f32 %v836_v16, %v740_v52  ;;  %1204 = vst.msk [vmem:[%s1673_s25 + $0xc] sm:$0xf] %vm1200_vm3, %v1397_v21  ;;  %v726_v31 = vadd.f32 %v1651_v49, %v687_v23  ;;  %v742_v32 = vadd.f32 %v1651_v49, %v703_v24  ;;  %v688_v33 = vmul.f32 %v1646_v47, %v574_v39 }
 0x128   : > { %1220 = vst.msk [vmem:[%s1673_s25 + $0x4c] sm:$0xf] %vm1200_vm3, %v1413_v22  ;;  %v704_v34 = vmul.f32 %v1646_v47, %v638_v40  ;;  %v884_v27 = vmul.f32 0.16666667, %v852_v25  ;;  %v853_v36 = vmul.f32 %v821_v29, %v725_v61  ;;  %v869_v28 = vmul.f32 %v837_v30, %v741_v62 }
 0x129   : > { %v900_v35 = vmul.f32 0.16666667, %v868_v26  ;;  %v758_v37 = vadd.f32 3.0, %v726_v31  ;;  %v774_v38 = vadd.f32 3.0, %v742_v32  ;;  %v727_v41 = vadd.f32 %v1651_v49, %v688_v33  ;;  %v1721_v43 = vpop.f32.mrb[20].mxu0  ;;  %v1723_v44 = vpop.f32.mrb[20].mxu1 }
 0x12a   : > { %v743_v42 = vadd.f32 %v1651_v49, %v704_v34  ;;  %v916_v48 = vadd.f32 3.0, %v884_v27  ;;  %v885_v51 = vmul.f32 0.16666667, %v853_v36  ;;  %v901_v39 = vmul.f32 0.16666667, %v869_v28  ;;  %v589_v53 = vpop.f32.mrb[21].mxu0 }
 0x12b   : > { %v932_v50 = vadd.f32 3.0, %v900_v35  ;;  %v790_v52 = vmax.f32 %v758_v37, 0.0  ;;  %v806_v40 = vmax.f32 %v774_v38, 0.0  ;;  %v759_v45 = vadd.f32 3.0, %v727_v41  ;;  %v653_v54 = vpop.f32.mrb[21].mxu1  ;;  %v1725_v61 = vpop.f32.mrb[22].mxu0 }
 0x12c   : > { %v775_v46 = vadd.f32 3.0, %v743_v42  ;;  %v948_v55 = vmax.f32 %v916_v48, 0.0  ;;  %v917_v57 = vadd.f32 3.0, %v885_v51  ;;  %v933_v58 = vadd.f32 3.0, %v901_v39  ;;  %v1727_v62 = vpop.f32.mrb[22].mxu1  ;;  %v592_v59 = vpop.f32.mrb[23].mxu0 }
 0x12d   : > { %v964_v56 = vmax.f32 %v932_v50, 0.0  ;;  %v822_v63 = vmin.f32 %v790_v52, 6.0  ;;  %v838_v0 = vmin.f32 %v806_v40, 6.0  ;;  %v791_v1 = vmax.f32 %v759_v45, 0.0  ;;  %v656_v60 = vpop.f32.mrb[23].mxu1 }
 0x12e   : > { %v807_v2 = vmax.f32 %v775_v46, 0.0  ;;  %v980_v5 = vmin.f32 %v948_v55, 6.0  ;;  %v949_v7 = vmax.f32 %v917_v57, 0.0  ;;  %v965_v8 = vmax.f32 %v933_v58, 0.0 }
 0x12f   : > { %v996_v6 = vmin.f32 %v964_v56, 6.0  ;;  %v854_v9 = vmul.f32 %v822_v63, %v726_v31  ;;  %v870_v10 = vmul.f32 %v838_v0, %v742_v32  ;;  %v823_v11 = vmin.f32 %v791_v1, 6.0 }
 0x130   : > { %v839_v12 = vmin.f32 %v807_v2, 6.0  ;;  %v1012_v15 = vmul.f32 %v980_v5, %v884_v27  ;;  %v981_v17 = vmin.f32 %v949_v7, 6.0  ;;  %v997_v18 = vmin.f32 %v965_v8, 6.0 }
 0x131   : > { %v1028_v16 = vmul.f32 %v996_v6, %v900_v35  ;;  %v886_v19 = vmul.f32 0.16666667, %v854_v9  ;;  %v902_v20 = vmul.f32 0.16666667, %v870_v10  ;;  %v855_v21 = vmul.f32 %v823_v11, %v727_v41  ;;  %v1729_v23 = vpop.f32.mrb[24].mxu0  ;;  %v1731_v24 = vpop.f32.mrb[24].mxu1 }
 0x132   : > { %v871_v22 = vmul.f32 %v839_v12, %v743_v42  ;;  %v1044_v25 = vmul.f32 0.16666667, %v1012_v15  ;;  %v1013_v29 = vmul.f32 %v981_v17, %v885_v51  ;;  %v1029_v30 = vmul.f32 %v997_v18, %v901_v39  ;;  %v597_v31 = vpop.f32.mrb[25].mxu0  ;;  %v661_v32 = vpop.f32.mrb[25].mxu1 }
 0x133   : > { %v1060_v26 = vmul.f32 0.16666667, %v1028_v16  ;;  %v918_v33 = vadd.f32 3.0, %v886_v19  ;;  %v934_v34 = vadd.f32 3.0, %v902_v20  ;;  %v887_v27 = vmul.f32 0.16666667, %v855_v21 }
 0x134   : > { %v903_v35 = vmul.f32 0.16666667, %v871_v22  ;;  %v1398_v36 = vpack.c.bf16 %v1044_v25, %v1044_v25  ;;  %v1045_v37 = vmul.f32 0.16666667, %v1013_v29  ;;  %v1061_v38 = vmul.f32 0.16666667, %v1029_v30 }
 0x135   : > { %v1414_v28 = vpack.c.bf16 %v1060_v26, %v1060_v26  ;;  %v1733_v41 = vpop.f32.mrb[26].mxu0  ;;  %v1735_v42 = vpop.f32.mrb[26].mxu1  ;;  %v950_v48 = vmax.f32 %v918_v33, 0.0  ;;  %v966_v50 = vmax.f32 %v934_v34, 0.0  ;;  %v919_v51 = vadd.f32 3.0, %v887_v27 }
 0x136   : > { %v935_v39 = vadd.f32 3.0, %v903_v35  ;;  %v600_v52 = vpop.f32.mrb[27].mxu0  ;;  %v664_v40 = vpop.f32.mrb[27].mxu1  ;;  %1205 = vst.msk [vmem:[%s1673_s25 + $0x10] sm:$0xf] %vm1200_vm3, %v1398_v36  ;;  %v1399_v45 = vpack.c.bf16 %v1045_v37, %v1045_v37  ;;  %v1415_v46 = vpack.c.bf16 %v1061_v38, %v1061_v38  ;;  %v689_v53 = vmul.f32 %v1646_v47, %v1695_v3 }
 0x137   : > { %1221 = vst.msk [vmem:[%s1673_s25 + $0x50] sm:$0xf] %vm1200_vm3, %v1414_v28  ;;  %v705_v54 = vmul.f32 %v1646_v47, %v1697_v4  ;;  %v982_v55 = vmin.f32 %v950_v48, 6.0  ;;  %v998_v56 = vmin.f32 %v966_v50, 6.0  ;;  %v951_v57 = vmax.f32 %v919_v51, 0.0 }
 0x138   : > { %v967_v58 = vmax.f32 %v935_v39, 0.0  ;;  %1206 = vst.msk [vmem:[%s1673_s25 + $0x14] sm:$0xf] %vm1200_vm3, %v1399_v45  ;;  %1222 = vst.msk [vmem:[%s1673_s25 + $0x54] sm:$0xf] %vm1200_vm3, %v1415_v46  ;;  %v728_v63 = vadd.f32 %v1651_v49, %v689_v53  ;;  %v690_v1 = vmul.f32 %v1646_v47, %v1699_v13  ;;  %v706_v3 = vmul.f32 %v1646_v47, %v1701_v14 }
 0x139   : > { %v744_v0 = vadd.f32 %v1651_v49, %v705_v54  ;;  %v1014_v2 = vmul.f32 %v982_v55, %v886_v19  ;;  %v1030_v4 = vmul.f32 %v998_v56, %v902_v20  ;;  %v983_v59 = vmin.f32 %v951_v57, 6.0  ;;  %v1755_v5 = vpop.f32.mrb[28].mxu0  ;;  %v1757_v6 = vpop.f32.mrb[28].mxu1 }
 0x13a   : > { %v999_v60 = vmin.f32 %v967_v58, 6.0  ;;  %v760_v7 = vadd.f32 3.0, %v728_v63  ;;  %v729_v9 = vadd.f32 %v1651_v49, %v690_v1  ;;  %v745_v10 = vadd.f32 %v1651_v49, %v706_v3  ;;  %v605_v11 = vpop.f32.mrb[29].mxu0  ;;  %v669_v12 = vpop.f32.mrb[29].mxu1 }
 0x13b   : > { %v776_v8 = vadd.f32 3.0, %v744_v0  ;;  %v1046_v13 = vmul.f32 0.16666667, %v1014_v2  ;;  %v1062_v15 = vmul.f32 0.16666667, %v1030_v4  ;;  %v1015_v16 = vmul.f32 %v983_v59, %v887_v27  ;;  %v1761_v17 = vpop.f32.mrb[30].mxu0 }
 0x13c   : > { %v1031_v14 = vmul.f32 %v999_v60, %v903_v35  ;;  %v1763_v18 = vpop.f32.mrb[30].mxu1  ;;  %v792_v19 = vmax.f32 %v760_v7, 0.0  ;;  %v761_v21 = vadd.f32 3.0, %v729_v9  ;;  %v777_v22 = vadd.f32 3.0, %v745_v10  ;;  %v608_v25 = vpop.f32.mrb[31].mxu0 }
 0x13d   : > { %v808_v20 = vmax.f32 %v776_v8, 0.0  ;;  %v672_v26 = vpop.f32.mrb[31].mxu1  ;;  %v1400_v29 = vpack.c.bf16 %v1046_v13, %v1046_v13  ;;  %v1416_v30 = vpack.c.bf16 %v1062_v15, %v1062_v15  ;;  %v1047_v31 = vmul.f32 0.16666667, %v1015_v16 }
 0x13e   : > { %v1063_v32 = vmul.f32 0.16666667, %v1031_v14  ;;  %v824_v33 = vmin.f32 %v792_v19, 6.0  ;;  %v793_v27 = vmax.f32 %v761_v21, 0.0  ;;  %v809_v35 = vmax.f32 %v777_v22, 0.0 }
 0x13f   : > { %v840_v34 = vmin.f32 %v808_v20, 6.0  ;;  %1207 = vst.msk [vmem:[%s1673_s25 + $0x18] sm:$0xf] %vm1200_vm3, %v1400_v29  ;;  %1223 = vst.msk [vmem:[%s1673_s25 + $0x58] sm:$0xf] %vm1200_vm3, %v1416_v30  ;;  %v1401_v36 = vpack.c.bf16 %v1047_v31, %v1047_v31  ;;  %v691_v37 = vmul.f32 %v1646_v47, %v1721_v43  ;;  %v707_v38 = vmul.f32 %v1646_v47, %v1723_v44 }
 0x140   : > { %v1417_v28 = vpack.c.bf16 %v1063_v32, %v1063_v32  ;;  %v856_v48 = vmul.f32 %v824_v33, %v728_v63  ;;  %v825_v51 = vmin.f32 %v793_v27, 6.0  ;;  %v841_v39 = vmin.f32 %v809_v35, 6.0 }
 0x141   : > { %v872_v50 = vmul.f32 %v840_v34, %v744_v0  ;;  %1208 = vst.msk [vmem:[%s1673_s25 + $0x1c] sm:$0xf] %vm1200_vm3, %v1401_v36  ;;  %v730_v52 = vadd.f32 %v1651_v49, %v691_v37  ;;  %v746_v40 = vadd.f32 %v1651_v49, %v707_v38  ;;  %v692_v45 = vmul.f32 %v1646_v47, %v1725_v61 }
 0x142   : > { %1224 = vst.msk [vmem:[%s1673_s25 + $0x5c] sm:$0xf] %vm1200_vm3, %v1417_v28  ;;  %v708_v43 = vmul.f32 %v1646_v47, %v1727_v62  ;;  %v888_v46 = vmul.f32 0.16666667, %v856_v48  ;;  %v857_v53 = vmul.f32 %v825_v51, %v729_v9  ;;  %v873_v54 = vmul.f32 %v841_v39, %v745_v10 }
 0x143   : > { %v904_v44 = vmul.f32 0.16666667, %v872_v50  ;;  %v762_v55 = vadd.f32 3.0, %v730_v52  ;;  %v778_v56 = vadd.f32 3.0, %v746_v40  ;;  %v731_v57 = vadd.f32 %v1651_v49, %v692_v45 }
 0x144   : > { %v747_v58 = vadd.f32 %v1651_v49, %v708_v43  ;;  %v920_v63 = vadd.f32 3.0, %v888_v46  ;;  %v889_v1 = vmul.f32 0.16666667, %v857_v53  ;;  %v905_v3 = vmul.f32 0.16666667, %v873_v54 }
 0x145   : > { %v936_v0 = vadd.f32 3.0, %v904_v44  ;;  %v794_v2 = vmax.f32 %v762_v55, 0.0  ;;  %v810_v4 = vmax.f32 %v778_v56, 0.0  ;;  %v763_v61 = vadd.f32 3.0, %v731_v57 }
 0x146   : > { %v779_v59 = vadd.f32 3.0, %v747_v58  ;;  %v952_v60 = vmax.f32 %v920_v63, 0.0  ;;  %v921_v7 = vadd.f32 3.0, %v889_v1  ;;  %v937_v8 = vadd.f32 3.0, %v905_v3 }
 0x147   : > { %v968_v62 = vmax.f32 %v936_v0, 0.0  ;;  %v826_v9 = vmin.f32 %v794_v2, 6.0  ;;  %v842_v10 = vmin.f32 %v810_v4, 6.0  ;;  %v795_v11 = vmax.f32 %v763_v61, 0.0 }
 0x148   : > { %v811_v12 = vmax.f32 %v779_v59, 0.0  ;;  %v984_v13 = vmin.f32 %v952_v60, 6.0  ;;  %v953_v16 = vmax.f32 %v921_v7, 0.0  ;;  %v969_v14 = vmax.f32 %v937_v8, 0.0 }
 0x149   : > { %v1000_v15 = vmin.f32 %v968_v62, 6.0  ;;  %v858_v19 = vmul.f32 %v826_v9, %v730_v52  ;;  %v874_v20 = vmul.f32 %v842_v10, %v746_v40  ;;  %v827_v21 = vmin.f32 %v795_v11, 6.0 }
 0x14a   : > { %v843_v22 = vmin.f32 %v811_v12, 6.0  ;;  %v1016_v25 = vmul.f32 %v984_v13, %v888_v46  ;;  %v985_v29 = vmin.f32 %v953_v16, 6.0  ;;  %v1001_v30 = vmin.f32 %v969_v14, 6.0 }
 0x14b   : > { %v1032_v26 = vmul.f32 %v1000_v15, %v904_v44  ;;  %v890_v31 = vmul.f32 0.16666667, %v858_v19  ;;  %v906_v32 = vmul.f32 0.16666667, %v874_v20  ;;  %v859_v33 = vmul.f32 %v827_v21, %v731_v57 }
 0x14c   : > { %v875_v34 = vmul.f32 %v843_v22, %v747_v58  ;;  %v1048_v27 = vmul.f32 0.16666667, %v1016_v25  ;;  %v1017_v36 = vmul.f32 %v985_v29, %v889_v1  ;;  %v1033_v28 = vmul.f32 %v1001_v30, %v905_v3 }
 0x14d   : > { %v1064_v35 = vmul.f32 0.16666667, %v1032_v26  ;;  %v922_v37 = vadd.f32 3.0, %v890_v31  ;;  %v938_v38 = vadd.f32 3.0, %v906_v32  ;;  %v891_v48 = vmul.f32 0.16666667, %v859_v33 }
 0x14e   : > { %v907_v50 = vmul.f32 0.16666667, %v875_v34  ;;  %v1402_v51 = vpack.c.bf16 %v1048_v27, %v1048_v27  ;;  %v1049_v52 = vmul.f32 0.16666667, %v1017_v36  ;;  %v1065_v40 = vmul.f32 0.16666667, %v1033_v28 }
 0x14f   : > { %v1418_v39 = vpack.c.bf16 %v1064_v35, %v1064_v35  ;;  %v954_v45 = vmax.f32 %v922_v37, 0.0  ;;  %v970_v43 = vmax.f32 %v938_v38, 0.0  ;;  %v923_v46 = vadd.f32 3.0, %v891_v48 }
 0x150   : > { %v939_v44 = vadd.f32 3.0, %v907_v50  ;;  %1209 = vst.msk [vmem:[%s1673_s25 + $0x20] sm:$0xf] %vm1200_vm3, %v1402_v51  ;;  %v1403_v53 = vpack.c.bf16 %v1049_v52, %v1049_v52  ;;  %v1419_v54 = vpack.c.bf16 %v1065_v40, %v1065_v40  ;;  %v693_v55 = vmul.f32 %v1646_v47, %v1729_v23 }
 0x151   : > { %1225 = vst.msk [vmem:[%s1673_s25 + $0x60] sm:$0xf] %vm1200_vm3, %v1418_v39  ;;  %v709_v56 = vmul.f32 %v1646_v47, %v1731_v24  ;;  %v986_v57 = vmin.f32 %v954_v45, 6.0  ;;  %v1002_v58 = vmin.f32 %v970_v43, 6.0  ;;  %v955_v63 = vmax.f32 %v923_v46, 0.0 }
 0x152   : > { %v971_v0 = vmax.f32 %v939_v44, 0.0  ;;  %1210 = vst.msk [vmem:[%s1673_s25 + $0x24] sm:$0xf] %vm1200_vm3, %v1403_v53  ;;  %1226 = vst.msk [vmem:[%s1673_s25 + $0x64] sm:$0xf] %vm1200_vm3, %v1419_v54  ;;  %v732_v1 = vadd.f32 %v1651_v49, %v693_v55  ;;  %v694_v2 = vmul.f32 %v1646_v47, %v1733_v41  ;;  %v710_v23 = vmul.f32 %v1646_v47, %v1735_v42 }
 0x153   : > { %v748_v3 = vadd.f32 %v1651_v49, %v709_v56  ;;  %v1018_v4 = vmul.f32 %v986_v57, %v890_v31  ;;  %v1034_v24 = vmul.f32 %v1002_v58, %v906_v32  ;;  %v987_v61 = vmin.f32 %v955_v63, 6.0 }
 0x154   : > { %v1003_v59 = vmin.f32 %v971_v0, 6.0  ;;  %v764_v60 = vadd.f32 3.0, %v732_v1  ;;  %v733_v7 = vadd.f32 %v1651_v49, %v694_v2  ;;  %v749_v8 = vadd.f32 %v1651_v49, %v710_v23 }
 0x155   : > { %v780_v62 = vadd.f32 3.0, %v748_v3  ;;  %v1050_v9 = vmul.f32 0.16666667, %v1018_v4  ;;  %v1066_v10 = vmul.f32 0.16666667, %v1034_v24  ;;  %v1019_v11 = vmul.f32 %v987_v61, %v891_v48 }
 0x156   : > { %v1035_v12 = vmul.f32 %v1003_v59, %v907_v50  ;;  %v796_v41 = vmax.f32 %v764_v60, 0.0  ;;  %v765_v15 = vadd.f32 3.0, %v733_v7  ;;  %v781_v42 = vadd.f32 3.0, %v749_v8 }
 0x157   : > { %v812_v13 = vmax.f32 %v780_v62, 0.0  ;;  %v1404_v16 = vpack.c.bf16 %v1050_v9, %v1050_v9  ;;  %v1420_v14 = vpack.c.bf16 %v1066_v10, %v1066_v10  ;;  %v1051_v19 = vmul.f32 0.16666667, %v1019_v11 }
 0x158   : > { %v1067_v20 = vmul.f32 0.16666667, %v1035_v12  ;;  %v828_v21 = vmin.f32 %v796_v41, 6.0  ;;  %v797_v25 = vmax.f32 %v765_v15, 0.0  ;;  %v813_v26 = vmax.f32 %v781_v42, 0.0 }
 0x159   : > { %v844_v22 = vmin.f32 %v812_v13, 6.0  ;;  %1211 = vst.msk [vmem:[%s1673_s25 + $0x28] sm:$0xf] %vm1200_vm3, %v1404_v16  ;;  %1227 = vst.msk [vmem:[%s1673_s25 + $0x68] sm:$0xf] %vm1200_vm3, %v1420_v14  ;;  %v1405_v29 = vpack.c.bf16 %v1051_v19, %v1051_v19  ;;  %v695_v31 = vmul.f32 %v1646_v47, %v1755_v5  ;;  %v711_v32 = vmul.f32 %v1646_v47, %v1757_v6 }
 0x15a   : > { %v1421_v30 = vpack.c.bf16 %v1067_v20, %v1067_v20  ;;  %v860_v33 = vmul.f32 %v828_v21, %v732_v1  ;;  %v829_v27 = vmin.f32 %v797_v25, 6.0  ;;  %v845_v35 = vmin.f32 %v813_v26, 6.0 }
 0x15b   : > { %v876_v34 = vmul.f32 %v844_v22, %v748_v3  ;;  %1212 = vst.msk [vmem:[%s1673_s25 + $0x2c] sm:$0xf] %vm1200_vm3, %v1405_v29  ;;  %v734_v36 = vadd.f32 %v1651_v49, %v695_v31  ;;  %v750_v28 = vadd.f32 %v1651_v49, %v711_v32  ;;  %v696_v37 = vmul.f32 %v1646_v47, %v1761_v17 }
 0x15c   : > { %1228 = vst.msk [vmem:[%s1673_s25 + $0x6c] sm:$0xf] %vm1200_vm3, %v1421_v30  ;;  %v712_v5 = vmul.f32 %v1646_v47, %v1763_v18  ;;  %v892_v38 = vmul.f32 0.16666667, %v860_v33  ;;  %v861_v48 = vmul.f32 %v829_v27, %v733_v7  ;;  %v877_v50 = vmul.f32 %v845_v35, %v749_v8 }
 0x15d   : > { %v908_v6 = vmul.f32 0.16666667, %v876_v34  ;;  %v766_v51 = vadd.f32 3.0, %v734_v36  ;;  %v782_v39 = vadd.f32 3.0, %v750_v28  ;;  %v735_v52 = vadd.f32 %v1651_v49, %v696_v37 }
 0x15e   : > { %v751_v40 = vadd.f32 %v1651_v49, %v712_v5  ;;  %v924_v45 = vadd.f32 3.0, %v892_v38  ;;  %v893_v46 = vmul.f32 0.16666667, %v861_v48  ;;  %v909_v44 = vmul.f32 0.16666667, %v877_v50 }
 0x15f   : > { %v940_v43 = vadd.f32 3.0, %v908_v6  ;;  %v798_v53 = vmax.f32 %v766_v51, 0.0  ;;  %v814_v54 = vmax.f32 %v782_v39, 0.0  ;;  %v767_v17 = vadd.f32 3.0, %v735_v52 }
 0x160   : > { %v783_v55 = vadd.f32 3.0, %v751_v40  ;;  %v956_v56 = vmax.f32 %v924_v45, 0.0  ;;  %v925_v18 = vadd.f32 3.0, %v893_v46  ;;  %v941_v57 = vadd.f32 3.0, %v909_v44 }
 0x161   : > { %v972_v47 = vmax.f32 %v940_v43, 0.0  ;;  %v830_v58 = vmin.f32 %v798_v53, 6.0  ;;  %v846_v63 = vmin.f32 %v814_v54, 6.0  ;;  %v799_v0 = vmax.f32 %v767_v17, 0.0 }
 0x162   : > { %v815_v1 = vmax.f32 %v783_v55, 0.0  ;;  %v988_v3 = vmin.f32 %v956_v56, 6.0  ;;  %v957_v23 = vmax.f32 %v925_v18, 0.0  ;;  %v973_v49 = vmax.f32 %v941_v57, 0.0 }
 0x163   : > { %v1004_v2 = vmin.f32 %v972_v47, 6.0  ;;  %v862_v4 = vmul.f32 %v830_v58, %v734_v36  ;;  %v878_v24 = vmul.f32 %v846_v63, %v750_v28  ;;  %v831_v61 = vmin.f32 %v799_v0, 6.0 }
 0x164   : > { %v847_v59 = vmin.f32 %v815_v1, 6.0  ;;  %v1020_v60 = vmul.f32 %v988_v3, %v892_v38  ;;  %v989_v7 = vmin.f32 %v957_v23, 6.0  ;;  %v1005_v8 = vmin.f32 %v973_v49, 6.0 }
 0x165   : > { %v1036_v62 = vmul.f32 %v1004_v2, %v908_v6  ;;  %v894_v9 = vmul.f32 0.16666667, %v862_v4  ;;  %v910_v10 = vmul.f32 0.16666667, %v878_v24  ;;  %v863_v11 = vmul.f32 %v831_v61, %v735_v52 }
 0x166   : > { %v879_v12 = vmul.f32 %v847_v59, %v751_v40  ;;  %v1052_v41 = vmul.f32 0.16666667, %v1020_v60  ;;  %v1021_v15 = vmul.f32 %v989_v7, %v893_v46  ;;  %v1037_v42 = vmul.f32 %v1005_v8, %v909_v44 }
 0x167   : > { %v1068_v13 = vmul.f32 0.16666667, %v1036_v62  ;;  %v926_v16 = vadd.f32 3.0, %v894_v9  ;;  %v942_v14 = vadd.f32 3.0, %v910_v10  ;;  %v895_v19 = vmul.f32 0.16666667, %v863_v11 }
 0x168   : > { %v911_v20 = vmul.f32 0.16666667, %v879_v12  ;;  %v1406_v21 = vpack.c.bf16 %v1052_v41, %v1052_v41  ;;  %v1053_v25 = vmul.f32 0.16666667, %v1021_v15  ;;  %v1069_v26 = vmul.f32 0.16666667, %v1037_v42 }
 0x169   : > { %v1422_v22 = vpack.c.bf16 %v1068_v13, %v1068_v13  ;;  %v958_v29 = vmax.f32 %v926_v16, 0.0  ;;  %v974_v30 = vmax.f32 %v942_v14, 0.0  ;;  %v927_v31 = vadd.f32 3.0, %v895_v19 }
 0x16a   : > { %v943_v32 = vadd.f32 3.0, %v911_v20  ;;  %1213 = vst.msk [vmem:[%s1673_s25 + $0x30] sm:$0xf] %vm1200_vm3, %v1406_v21  ;;  %v1407_v33 = vpack.c.bf16 %v1053_v25, %v1053_v25  ;;  %v1423_v34 = vpack.c.bf16 %v1069_v26, %v1069_v26 }
 0x16b   : > { %1229 = vst.msk [vmem:[%s1673_s25 + $0x70] sm:$0xf] %vm1200_vm3, %v1422_v22  ;;  %v990_v27 = vmin.f32 %v958_v29, 6.0  ;;  %v1006_v35 = vmin.f32 %v974_v30, 6.0  ;;  %v959_v36 = vmax.f32 %v927_v31, 0.0 }
 0x16c   : > { %v975_v28 = vmax.f32 %v943_v32, 0.0  ;;  %1214 = vst.msk [vmem:[%s1673_s25 + $0x34] sm:$0xf] %vm1200_vm3, %v1407_v33  ;;  %1230 = vst.msk [vmem:[%s1673_s25 + $0x74] sm:$0xf] %vm1200_vm3, %v1423_v34 }
 0x16d   : > { %v1022_v37 = vmul.f32 %v990_v27, %v894_v9  ;;  %v1038_v5 = vmul.f32 %v1006_v35, %v910_v10  ;;  %v991_v38 = vmin.f32 %v959_v36, 6.0 }
 0x16e   : > { %v1007_v6 = vmin.f32 %v975_v28, 6.0 }
 0x16f   : > { %v1054_v48 = vmul.f32 0.16666667, %v1022_v37  ;;  %v1070_v50 = vmul.f32 0.16666667, %v1038_v5  ;;  %v1023_v51 = vmul.f32 %v991_v38, %v895_v19 }
 0x170   : > { %v1039_v39 = vmul.f32 %v1007_v6, %v911_v20 }
 0x171   : > { %v1408_v52 = vpack.c.bf16 %v1054_v48, %v1054_v48  ;;  %v1424_v40 = vpack.c.bf16 %v1070_v50, %v1070_v50  ;;  %v1055_v45 = vmul.f32 0.16666667, %v1023_v51 }
 0x172   : > { %v1071_v43 = vmul.f32 0.16666667, %v1039_v39 }
 0x173   : > { %1215 = vst.msk [vmem:[%s1673_s25 + $0x38] sm:$0xf] %vm1200_vm3, %v1408_v52  ;;  %1231 = vst.msk [vmem:[%s1673_s25 + $0x78] sm:$0xf] %vm1200_vm3, %v1424_v40  ;;  %v1409_v46 = vpack.c.bf16 %v1055_v45, %v1055_v45 }
 0x174   : > { %v1425_v44 = vpack.c.bf16 %v1071_v43, %v1071_v43 }
 0x175   : > { %1216 = vst.msk [vmem:[%s1673_s25 + $0x3c] sm:$0xf] %vm1200_vm3, %v1409_v46 }
 0x176   : > { %1232 = vst.msk [vmem:[%s1673_s25 + $0x7c] sm:$0xf] %vm1200_vm3, %v1425_v44 }
 0x177 PF: > { %s14_s15 = sadd.s32 1, %s1520_s15  }
 0x178   : > { %p11_p4 = scmp.ge.s32.totalorder %s14_s15, 4  }
 0x17a   :  { %13 = sbr.rel (!%p11_p4) target bundleno = 1 (0x1), region = 66 }

// kernel: _lambda_.28
= control target key start
LH: loop header
LB: loop body
LE: loop exit
PB: predicated region body
PF: predicated region fallthrough
CT: control target
= control target key end

     0   :  { %vm554_vm0 = vcmask 523264   ;;  %s1979_s1 = inlined_call_operand.vmem [shape: bf16[576,128], index: 1, kind: input, shape index: {}]   ;;  %s1980_s0 = inlined_call_operand.vmem [shape: bf16[128,576], index: 0, kind: input, shape index: {}]   ;;  %s1981_s2 = inlined_call_operand.vmem [shape: f32[1,128], index: 2, kind: input, shape index: {}]   ;;  %s1982_s3 = inlined_call_operand.vmem [shape: f32[1,128], index: 3, kind: input, shape index: {}]   ;;  %s1983_s4 = inlined_call_operand.vmem [shape: bf16[128,128], index: 4, kind: output, shape index: {}]  }
   0x1   :  { %v1497_v0 = vld [vmem:[%s1979_s1 + $0x40] sm:$0xff]   ;;  %v1501_v4 = vld [vmem:[%s1979_s1 + $0x48] sm:$0xff]   ;;  %v1505_v8 = vld [vmem:[%s1979_s1 + $0x50] sm:$0xff]  }
   0x2   :  { %v1498_v1 = vld [vmem:[%s1979_s1 + $0xc0] sm:$0xff]   ;;  %1325 = vmatprep.subr.bf16.mxu0 %v1497_v0  ;;  %v1502_v5 = vld [vmem:[%s1979_s1 + $0xc8] sm:$0xff]   ;;  %v1506_v9 = vld [vmem:[%s1979_s1 + $0xd0] sm:$0xff]  }
   0x3   :  { %v1499_v2 = vld [vmem:[%s1979_s1] sm:$0xff]   ;;  %1389 = vmatprep.subr.bf16.mxu1 %v1498_v1  ;;  %v1503_v6 = vld [vmem:[%s1979_s1 + $0x8] sm:$0xff]   ;;  %v1507_v10 = vld [vmem:[%s1979_s1 + $0x10] sm:$0xff]  }
   0x4   :  { %v1500_v3 = vld [vmem:[%s1979_s1 + $0x80] sm:$0xff]   ;;  %1326 = vmatpush3.bf16.msra.mxu0 %v1499_v2  ;;  %v1504_v7 = vld [vmem:[%s1979_s1 + $0x88] sm:$0xff]   ;;  %v1508_v11 = vld [vmem:[%s1979_s1 + $0x90] sm:$0xff]  }
   0x5   :  { %1390 = vmatpush3.bf16.msra.mxu1 %v1500_v3  ;;  %1327 = vmatprep.subr.bf16.mxu0 %v1501_v4  ;;  %v1509_v12 = vld [vmem:[%s1979_s1 + $0x58] sm:$0xff]   ;;  %v1513_v16 = vld [vmem:[%s1979_s1 + $0x60] sm:$0xff]   ;;  %v1517_v20 = vld [vmem:[%s1979_s1 + $0x68] sm:$0xff]  }
   0x6   :  { %1391 = vmatprep.subr.bf16.mxu1 %v1502_v5  ;;  %v1510_v13 = vld [vmem:[%s1979_s1 + $0xd8] sm:$0xff]   ;;  %v1514_v17 = vld [vmem:[%s1979_s1 + $0xe0] sm:$0xff]   ;;  %v1518_v21 = vld [vmem:[%s1979_s1 + $0xe8] sm:$0xff]  }
   0x7   :  { %v1511_v14 = vld [vmem:[%s1979_s1 + $0x18] sm:$0xff]   ;;  %v1515_v18 = vld [vmem:[%s1979_s1 + $0x20] sm:$0xff]   ;;  %v1519_v22 = vld [vmem:[%s1979_s1 + $0x28] sm:$0xff]  }
   0x8   :  { %1328 = vmatpush3.bf16.msra.mxu0 %v1503_v6  ;;  %v1512_v15 = vld [vmem:[%s1979_s1 + $0x98] sm:$0xff]   ;;  %v1516_v19 = vld [vmem:[%s1979_s1 + $0xa0] sm:$0xff]   ;;  %v1520_v23 = vld [vmem:[%s1979_s1 + $0xa8] sm:$0xff]  }
   0x9   :  { %1392 = vmatpush3.bf16.msra.mxu1 %v1504_v7  ;;  %1329 = vmatprep.subr.bf16.mxu0 %v1505_v8  ;;  %v1521_v24 = vld [vmem:[%s1979_s1 + $0x70] sm:$0xff]   ;;  %v1525_v28 = vld [vmem:[%s1979_s1 + $0x78] sm:$0xff]   ;;  %v1534_v35 = vld [vmem:[%s1980_s0 + $0xc] ss:$20 sps:$4 sm:$0xff]  }
   0xa   :  { %1393 = vmatprep.subr.bf16.mxu1 %v1506_v9  ;;  %v1522_v25 = vld [vmem:[%s1979_s1 + $0xf0] sm:$0xff]   ;;  %v1526_v29 = vld [vmem:[%s1979_s1 + $0xf8] sm:$0xff]   ;;  %v1535_v36 = vld [vmem:[%s1979_s1 + $0x100] sm:$0xff]   ;;  %708 = vmatprep.mubr.bf16.mxu1 %v1534_v35 }
   0xb   :  { %v1523_v26 = vld [vmem:[%s1979_s1 + $0x30] sm:$0xff]   ;;  %v1527_v30 = vld [vmem:[%s1979_s1 + $0x38] sm:$0xff]   ;;  %v1536_v37 = vld [vmem:[%s1980_s0 + $0x2c] ss:$20 sps:$4 sm:$0xff]  }
   0xc   :  { %1330 = vmatpush3.bf16.msra.mxu0 %v1507_v10  ;;  %v1524_v27 = vld [vmem:[%s1979_s1 + $0xb0] sm:$0xff]   ;;  %v1528_v31 = vld [vmem:[%s1979_s1 + $0xb8] sm:$0xff]   ;;  %v1548_v42 = vld [vmem:[%s1979_s1 + $0x108] sm:$0xff]  }
   0xd   :  { %1394 = vmatpush3.bf16.msra.mxu1 %v1508_v11  ;;  %1331 = vmatprep.subr.bf16.mxu0 %v1509_v12  ;;  %v1529_v32 = vld [vmem:[%s1980_s0] ss:$20 sps:$4 sm:$0xff]   ;;  %v1531_v33 = vld [vmem:[%s1980_s0 + $0x4] ss:$20 sps:$4 sm:$0xff]   ;;  %v1532_v34 = vld [vmem:[%s1980_s0 + $0x8] ss:$20 sps:$4 sm:$0xff]  }
   0xe   :  { %1395 = vmatprep.subr.bf16.mxu1 %v1510_v13  ;;  %611 = vmatprep.mubr.bf16.mxu0 %v1531_v33  ;;  %v1538_v38 = vld [vmem:[%s1980_s0 + $0x34] ss:$20 sps:$4 sm:$0xff]   ;;  %v1541_v40 = vld [vmem:[%s1980_s0 + $0x30] ss:$20 sps:$4 sm:$0xff]   ;;  %v1547_v45 = vld [vmem:[%s1980_s0 + $0x58] ss:$20 sps:$4 sm:$0xff]  }
   0xf   :  { %v1540_v39 = vld [vmem:[%s1980_s0 + $0x28] ss:$20 sps:$4 sm:$0xff]   ;;  %v1546_v44 = vld [vmem:[%s1980_s0 + $0x50] ss:$20 sps:$4 sm:$0xff]   ;;  %v1553_v50 = vld [vmem:[%s1980_s0 + $0x78] ss:$20 sps:$4 sm:$0xff]  }
  0x10   :  { %1332 = vmatpush3.bf16.msra.mxu0 %v1511_v14  ;;  %v1542_v41 = vld [vmem:[%s1980_s0 + $0x54] ss:$20 sps:$4 sm:$0xff]   ;;  %v1544_v43 = vld [vmem:[%s1980_s0 + $0x5c] ss:$20 sps:$4 sm:$0xff]   ;;  %v1551_v48 = vld [vmem:[%s1980_s0 + $0x84] ss:$20 sps:$4 sm:$0xff]  }
  0x11   :  { %1396 = vmatpush3.bf16.msra.mxu1 %v1512_v15  ;;  %1333 = vmatprep.subr.bf16.mxu0 %v1513_v16  ;;  %v1561_v46 = vld [vmem:[%s1979_s1 + $0x110] sm:$0xff]   ;;  %v1574_v49 = vld [vmem:[%s1979_s1 + $0x118] sm:$0xff]   ;;  %v1557_v53 = vld [vmem:[%s1980_s0 + $0xac] ss:$20 sps:$4 sm:$0xff]  }
  0x12   :  { %1397 = vmatprep.subr.bf16.mxu1 %v1514_v17  ;;  %v1549_v47 = vld [vmem:[%s1980_s0 + $0x7c] ss:$20 sps:$4 sm:$0xff]   ;;  %v1554_v51 = vld [vmem:[%s1980_s0 + $0x80] ss:$20 sps:$4 sm:$0xff]   ;;  %v1555_v52 = vld [vmem:[%s1980_s0 + $0xa4] ss:$20 sps:$4 sm:$0xff]  }
  0x13   :  { %v1559_v54 = vld [vmem:[%s1980_s0 + $0xa0] ss:$20 sps:$4 sm:$0xff]   ;;  %v1560_v55 = vld [vmem:[%s1980_s0 + $0xa8] ss:$20 sps:$4 sm:$0xff]   ;;  %v1567_v59 = vld [vmem:[%s1980_s0 + $0xd0] ss:$20 sps:$4 sm:$0xff]  }
  0x14   :  { %1334 = vmatpush3.bf16.msra.mxu0 %v1515_v18  ;;  %v1562_v56 = vld [vmem:[%s1980_s0 + $0xcc] ss:$20 sps:$4 sm:$0xff]   ;;  %v1564_v57 = vld [vmem:[%s1980_s0 + $0xd4] ss:$20 sps:$4 sm:$0xff]   ;;  %v1570_v61 = vld [vmem:[%s1980_s0 + $0xfc] ss:$20 sps:$4 sm:$0xff]  }
  0x15   :  { %1398 = vmatpush3.bf16.msra.mxu1 %v1516_v19  ;;  %1335 = vmatprep.subr.bf16.mxu0 %v1517_v20  ;;  %v1566_v58 = vld [vmem:[%s1980_s0 + $0xc8] ss:$20 sps:$4 sm:$0xff]   ;;  %v1572_v62 = vld [vmem:[%s1980_s0 + $0xf0] ss:$20 sps:$4 sm:$0xff]   ;;  %v1573_v63 = vld [vmem:[%s1980_s0 + $0xf8] ss:$20 sps:$4 sm:$0xff]  }
  0x16   :  { %1399 = vmatprep.subr.bf16.mxu1 %v1518_v21  ;;  %v1568_v60 = vld [vmem:[%s1980_s0 + $0xf4] ss:$20 sps:$4 sm:$0xff]   ;;  %v1575_v0 = vld [vmem:[%s1980_s0 + $0x11c] ss:$20 sps:$4 sm:$0xff]   ;;  %v1577_v1 = vld [vmem:[%s1980_s0 + $0x124] ss:$20 sps:$4 sm:$0xff]  }
  0x17   :  { %v1579_v2 = vld [vmem:[%s1980_s0 + $0x118] ss:$20 sps:$4 sm:$0xff]   ;;  %v1580_v3 = vld [vmem:[%s1980_s0 + $0x120] ss:$20 sps:$4 sm:$0xff]   ;;  %v1581_v4 = vld [vmem:[%s1980_s0 + $0x10] ss:$20 sps:$4 sm:$0xff]  }
  0x18   :  { %1336 = vmatpush3.bf16.msra.mxu0 %v1519_v22  ;;  %v1582_v5 = vld [vmem:[%s1980_s0 + $0xb0] ss:$20 sps:$4 sm:$0xff]   ;;  %v1583_v6 = vld [vmem:[%s1980_s0 + $0x38] ss:$20 sps:$4 sm:$0xff]   ;;  %v1585_v8 = vld [vmem:[%s1980_s0 + $0x60] ss:$20 sps:$4 sm:$0xff]  }
  0x19   :  { %1400 = vmatpush3.bf16.msra.mxu1 %v1520_v23  ;;  %1337 = vmatprep.subr.bf16.mxu0 %v1521_v24  ;;  %v1584_v7 = vld [vmem:[%s1980_s0 + $0xd8] ss:$20 sps:$4 sm:$0xff]   ;;  %v1586_v9 = vld [vmem:[%s1980_s0 + $0x100] ss:$20 sps:$4 sm:$0xff]   ;;  %v1587_v10 = vld [vmem:[%s1980_s0 + $0x88] ss:$20 sps:$4 sm:$0xff]  }
  0x1a   :  { %1401 = vmatprep.subr.bf16.mxu1 %v1522_v25  ;;  %v1588_v11 = vld [vmem:[%s1980_s0 + $0x128] ss:$20 sps:$4 sm:$0xff]  }
  0x1c   :  { %1338 = vmatpush3.bf16.msra.mxu0 %v1523_v26 }
  0x1d   :  { %1402 = vmatpush3.bf16.msra.mxu1 %v1524_v27  ;;  %1339 = vmatprep.subr.bf16.mxu0 %v1525_v28 }
  0x1e   :  { %1403 = vmatprep.subr.bf16.mxu1 %v1526_v29 }
  0x20   :  { %1340 = vmatpush3.bf16.msra.mxu0 %v1527_v30 }
  0x21   :  { %1404 = vmatpush3.bf16.msra.mxu1 %v1528_v31  ;;  %1465 = vmatprep.subr.bf16.mxu0 %v1535_v36 }
  0x22   :  { %1489 = vmatprep.subr.bf16.mxu1 %v1535_v36 }
  0x23   :  { %612 = vmatmul.mubr.bf16.vlgmr.msra.gmra.mrb[0].mxu0 %v1529_v32 }
  0x24   :  { %709 = vmatmul.mubr.bf16.vlgmr.msra.gmra.mrb[0].mxu1 %v1532_v34  ;;  %1466 = vmatpush3.bf16.msra.mxu0 %v1535_v36 }
  0x25   :  { %1493 = vmatpush3.bf16.msra.mxu1 %v1535_v36  ;;  %619 = vmatprep.mubr.bf16.mxu0 %v1536_v37 }
  0x26   :  { %716 = vmatprep.mubr.bf16.mxu1 %v1538_v38  ;;  %1467 = vmatprep.subr.bf16.mxu0 %v1548_v42 }
  0x27   :  { %1490 = vmatprep.subr.bf16.mxu1 %v1548_v42 }
  0x28   :  { %1468 = vmatpush3.bf16.msra.mxu0 %v1548_v42 }
  0x29   :  { %1494 = vmatpush3.bf16.msra.mxu1 %v1548_v42  ;;  %1469 = vmatprep.subr.bf16.mxu0 %v1561_v46 }
  0x2a   :  { %1491 = vmatprep.subr.bf16.mxu1 %v1561_v46 }
  0x2b   :  { %620 = vmatmul.mubr.bf16.gmra.mrb[4].mxu0 %v1540_v39 }
  0x2c   :  { %717 = vmatmul.mubr.bf16.gmra.mrb[4].mxu1 %v1541_v40  ;;  %627 = vmatprep.mubr.bf16.mxu0 %v1542_v41 }
  0x2d   :  { %724 = vmatprep.mubr.bf16.mxu1 %v1544_v43  ;;  %1470 = vmatpush3.bf16.msra.mxu0 %v1561_v46 }
  0x2e   :  { %1495 = vmatpush3.bf16.msra.mxu1 %v1561_v46  ;;  %1471 = vmatprep.subr.bf16.mxu0 %v1574_v49 }
  0x2f   :  { %1492 = vmatprep.subr.bf16.mxu1 %v1574_v49 }
  0x31   :  { %1472 = vmatpush3.bf16.msra.mxu0 %v1574_v49 }
  0x32   :  { %1496 = vmatpush3.bf16.msra.mxu1 %v1574_v49 }
  0x33   :  { %628 = vmatmul.mubr.bf16.gmra.mrb[8].mxu0 %v1546_v44 }
  0x34   :  { %725 = vmatmul.mubr.bf16.gmra.mrb[8].mxu1 %v1547_v45  ;;  %635 = vmatprep.mubr.bf16.mxu0 %v1549_v47 }
  0x35   :  { %732 = vmatprep.mubr.bf16.mxu1 %v1551_v48 }
  0x3b   :  { %636 = vmatmul.mubr.bf16.gmra.mrb[12].mxu0 %v1553_v50 }
  0x3c   :  { %733 = vmatmul.mubr.bf16.gmra.mrb[12].mxu1 %v1554_v51  ;;  %643 = vmatprep.mubr.bf16.mxu0 %v1555_v52 }
  0x3d   :  { %740 = vmatprep.mubr.bf16.mxu1 %v1557_v53 }
  0x43   :  { %644 = vmatmul.mubr.bf16.gmra.mrb[16].mxu0 %v1559_v54 }
  0x44   :  { %741 = vmatmul.mubr.bf16.gmra.mrb[16].mxu1 %v1560_v55  ;;  %651 = vmatprep.mubr.bf16.mxu0 %v1562_v56 }
  0x45   :  { %748 = vmatprep.mubr.bf16.mxu1 %v1564_v57 }
  0x4b   :  { %652 = vmatmul.mubr.bf16.gmra.mrb[20].mxu0 %v1566_v58 }
  0x4c   :  { %749 = vmatmul.mubr.bf16.gmra.mrb[20].mxu1 %v1567_v59  ;;  %659 = vmatprep.mubr.bf16.mxu0 %v1568_v60 }
  0x4d   :  { %756 = vmatprep.mubr.bf16.mxu1 %v1570_v61 }
  0x53   :  { %660 = vmatmul.mubr.bf16.gmra.mrb[24].mxu0 %v1572_v62 }
  0x54   :  { %757 = vmatmul.mubr.bf16.gmra.mrb[24].mxu1 %v1573_v63  ;;  %667 = vmatprep.mubr.bf16.mxu0 %v1575_v0 }
  0x55   :  { %764 = vmatprep.mubr.bf16.mxu1 %v1577_v1 }
  0x5b   :  { %668 = vmatmul.mubr.bf16.gmra.mrb[28].mxu0 %v1579_v2 }
  0x5c   :  { %765 = vmatmul.mubr.bf16.gmra.mrb[28].mxu1 %v1580_v3  ;;  %1473 = vmatprep.mubr.msk.bf16.mxu0 %vm554_vm0, %v1581_v4 }
  0x5d   :  { %1481 = vmatprep.mubr.msk.bf16.mxu1 %vm554_vm0, %v1582_v5 }
  0x63   :  { %1474 = vmatmul.mubr.msk.bf16.vlgmr.msra.gmra.mrb[32].mxu0 %vm554_vm0, %v1583_v6 }
  0x64   :  { %1482 = vmatmul.mubr.msk.bf16.vlgmr.msra.gmra.mrb[32].mxu1 %vm554_vm0, %v1584_v7  ;;  %1477 = vmatprep.mubr.msk.bf16.mxu0 %vm554_vm0, %v1585_v8 }
  0x65   :  { %1485 = vmatprep.mubr.msk.bf16.mxu1 %vm554_vm0, %v1586_v9 }
  0x6b   :  { %1478 = vmatmul.mubr.msk.bf16.gmra.mrb[36].mxu0 %vm554_vm0, %v1587_v10 }
  0x6c   :  { %1486 = vmatmul.mubr.msk.bf16.gmra.mrb[36].mxu1 %vm554_vm0, %v1588_v11 }
  0xf6   :  { %v1341_v12 = vpop.f32.mrb[0].mxu0 }
  0xf7   :  { %v1405_v13 = vpop.f32.mrb[0].mxu1  ;;  %v1342_v14 = vpop.f32.mrb[1].mxu0 }
  0xf8   :  { %v1343_v15 = vadd.f32 %v1342_v14, %v1341_v12  ;;  %v1406_v16 = vpop.f32.mrb[1].mxu1  ;;  %v1344_v17 = vpop.f32.mrb[2].mxu0 }
  0xf9   :  { %v1407_v18 = vadd.f32 %v1406_v16, %v1405_v13  ;;  %v1408_v19 = vpop.f32.mrb[2].mxu1  ;;  %v1345_v20 = vpop.f32.mrb[3].mxu0 }
  0xfa   :  { %v1346_v21 = vadd.f32 %v1345_v20, %v1344_v17  ;;  %v1409_v22 = vpop.f32.mrb[3].mxu1 }
  0xfb   :  { %v1410_v23 = vadd.f32 %v1409_v22, %v1408_v19  ;;  %v1850_v24 = vadd.f32 %v1407_v18, %v1343_v15 }
  0xfd   :  { %v1852_v25 = vadd.f32 %v1410_v23, %v1346_v21 }
  0xfe   :  { %v1347_v26 = vpop.f32.mrb[4].mxu0 }
  0xff   :  { %v1411_v27 = vpop.f32.mrb[4].mxu1  ;;  %v1348_v28 = vpop.f32.mrb[5].mxu0 }
 0x100   :  { %v1349_v29 = vadd.f32 %v1348_v28, %v1347_v26  ;;  %v1412_v30 = vpop.f32.mrb[5].mxu1  ;;  %v1350_v31 = vpop.f32.mrb[6].mxu0 }
 0x101   :  { %v1413_v32 = vadd.f32 %v1412_v30, %v1411_v27  ;;  %v1414_v33 = vpop.f32.mrb[6].mxu1  ;;  %v1351_v34 = vpop.f32.mrb[7].mxu0 }
 0x102   :  { %v1352_v35 = vadd.f32 %v1351_v34, %v1350_v31  ;;  %v1415_v36 = vpop.f32.mrb[7].mxu1 }
 0x103   :  { %v1416_v37 = vadd.f32 %v1415_v36, %v1414_v33  ;;  %v1854_v38 = vadd.f32 %v1413_v32, %v1349_v29 }
 0x105   :  { %v1856_v39 = vadd.f32 %v1416_v37, %v1352_v35 }
 0x106   :  { %v1353_v40 = vpop.f32.mrb[8].mxu0 }
 0x107   :  { %v1417_v41 = vpop.f32.mrb[8].mxu1  ;;  %v1354_v42 = vpop.f32.mrb[9].mxu0 }
 0x108   :  { %v1355_v43 = vadd.f32 %v1354_v42, %v1353_v40  ;;  %v1418_v44 = vpop.f32.mrb[9].mxu1  ;;  %v1356_v45 = vpop.f32.mrb[10].mxu0 }
 0x109   :  { %v1419_v46 = vadd.f32 %v1418_v44, %v1417_v41  ;;  %v1420_v47 = vpop.f32.mrb[10].mxu1  ;;  %v1357_v48 = vpop.f32.mrb[11].mxu0 }
 0x10a   :  { %v1358_v49 = vadd.f32 %v1357_v48, %v1356_v45  ;;  %v1421_v50 = vpop.f32.mrb[11].mxu1 }
 0x10b   :  { %v1422_v51 = vadd.f32 %v1421_v50, %v1420_v47  ;;  %v1858_v52 = vadd.f32 %v1419_v46, %v1355_v43 }
 0x10d   :  { %v1860_v53 = vadd.f32 %v1422_v51, %v1358_v49 }
 0x10e   :  { %v1359_v54 = vpop.f32.mrb[12].mxu0 }
 0x10f   :  { %v1423_v55 = vpop.f32.mrb[12].mxu1  ;;  %v1360_v56 = vpop.f32.mrb[13].mxu0 }
 0x110   :  { %v1361_v57 = vadd.f32 %v1360_v56, %v1359_v54  ;;  %v1424_v58 = vpop.f32.mrb[13].mxu1  ;;  %v1362_v59 = vpop.f32.mrb[14].mxu0 }
 0x111   :  { %v1425_v60 = vadd.f32 %v1424_v58, %v1423_v55  ;;  %v1426_v61 = vpop.f32.mrb[14].mxu1  ;;  %v1363_v62 = vpop.f32.mrb[15].mxu0 }
 0x112   :  { %v1364_v63 = vadd.f32 %v1363_v62, %v1362_v59  ;;  %v1427_v0 = vpop.f32.mrb[15].mxu1 }
 0x113   :  { %v1428_v1 = vadd.f32 %v1427_v0, %v1426_v61  ;;  %v1862_v2 = vadd.f32 %v1425_v60, %v1361_v57 }
 0x115   :  { %v1864_v3 = vadd.f32 %v1428_v1, %v1364_v63 }
 0x116   :  { %v1365_v4 = vpop.f32.mrb[16].mxu0 }
 0x117   :  { %v1429_v5 = vpop.f32.mrb[16].mxu1  ;;  %v1366_v6 = vpop.f32.mrb[17].mxu0 }
 0x118   :  { %v1367_v7 = vadd.f32 %v1366_v6, %v1365_v4  ;;  %v1430_v8 = vpop.f32.mrb[17].mxu1  ;;  %v1368_v9 = vpop.f32.mrb[18].mxu0 }
 0x119   :  { %v1431_v10 = vadd.f32 %v1430_v8, %v1429_v5  ;;  %v1432_v11 = vpop.f32.mrb[18].mxu1  ;;  %v1369_v12 = vpop.f32.mrb[19].mxu0  ;;  %v1879_v5 = vld [vmem:[%s1981_s2] ss:$0 sm:$0xff] }
 0x11a   :  { %v1370_v13 = vadd.f32 %v1369_v12, %v1368_v9  ;;  %v1433_v14 = vpop.f32.mrb[19].mxu1  ;;  %v1885_v9 = vld [vmem:[%s1982_s3] ss:$0 sm:$0xff] }
 0x11b   :  { %v1434_v15 = vadd.f32 %v1433_v14, %v1432_v11  ;;  %v743_v16 = vadd.f32 %v1431_v10, %v1367_v7 }
 0x11d   :  { %v1866_v17 = vadd.f32 %v1434_v15, %v1370_v13 }
 0x11e   :  { %v1371_v18 = vpop.f32.mrb[20].mxu0 }
 0x11f   :  { %v1435_v19 = vpop.f32.mrb[20].mxu1  ;;  %v1372_v20 = vpop.f32.mrb[21].mxu0 }
 0x120   :  { %v1373_v21 = vadd.f32 %v1372_v20, %v1371_v18  ;;  %v1436_v22 = vpop.f32.mrb[21].mxu1  ;;  %v1374_v23 = vpop.f32.mrb[22].mxu0 }
 0x121   :  { %v1437_v26 = vadd.f32 %v1436_v22, %v1435_v19  ;;  %v1438_v27 = vpop.f32.mrb[22].mxu1  ;;  %v1375_v28 = vpop.f32.mrb[23].mxu0 }
 0x122   :  { %v1376_v29 = vadd.f32 %v1375_v28, %v1374_v23  ;;  %v1439_v30 = vpop.f32.mrb[23].mxu1 }
 0x123   :  { %v1440_v31 = vadd.f32 %v1439_v30, %v1438_v27  ;;  %v751_v32 = vadd.f32 %v1437_v26, %v1373_v21 }
 0x125   :  { %v754_v33 = vadd.f32 %v1440_v31, %v1376_v29 }
 0x126   :  { %v1377_v34 = vpop.f32.mrb[24].mxu0 }
 0x127   :  { %v1441_v35 = vpop.f32.mrb[24].mxu1  ;;  %v1378_v36 = vpop.f32.mrb[25].mxu0 }
 0x128   :  { %v1379_v37 = vadd.f32 %v1378_v36, %v1377_v34  ;;  %v1442_v40 = vpop.f32.mrb[25].mxu1  ;;  %v1380_v41 = vpop.f32.mrb[26].mxu0 }
 0x129   :  { %v1443_v42 = vadd.f32 %v1442_v40, %v1441_v35  ;;  %v1444_v43 = vpop.f32.mrb[26].mxu1  ;;  %v1381_v44 = vpop.f32.mrb[27].mxu0 }
 0x12a   :  { %v1382_v45 = vadd.f32 %v1381_v44, %v1380_v41  ;;  %v1445_v46 = vpop.f32.mrb[27].mxu1 }
 0x12b   :  { %v1446_v47 = vadd.f32 %v1445_v46, %v1444_v43  ;;  %v1868_v48 = vadd.f32 %v1443_v42, %v1379_v37 }
 0x12d   :  { %v1870_v49 = vadd.f32 %v1446_v47, %v1382_v45 }
 0x12e   :  { %v1383_v50 = vpop.f32.mrb[28].mxu0 }
 0x12f   :  { %v1447_v51 = vpop.f32.mrb[28].mxu1  ;;  %v1384_v54 = vpop.f32.mrb[29].mxu0 }
 0x130   :  { %v1385_v55 = vadd.f32 %v1384_v54, %v1383_v50  ;;  %v1448_v56 = vpop.f32.mrb[29].mxu1  ;;  %v1386_v57 = vpop.f32.mrb[30].mxu0 }
 0x131   :  { %v1449_v58 = vadd.f32 %v1448_v56, %v1447_v51  ;;  %v1450_v59 = vpop.f32.mrb[30].mxu1  ;;  %v1387_v60 = vpop.f32.mrb[31].mxu0 }
 0x132   :  { %v1388_v61 = vadd.f32 %v1387_v60, %v1386_v57  ;;  %v1451_v62 = vpop.f32.mrb[31].mxu1 }
 0x133   :  { %v1452_v63 = vadd.f32 %v1451_v62, %v1450_v59  ;;  %v1872_v0 = vadd.f32 %v1449_v58, %v1385_v55 }
 0x135   :  { %v1874_v1 = vadd.f32 %v1452_v63, %v1388_v61 }
 0x136   :  { %v1475_v4 = vpop.f32.mrb[32].mxu0 }
 0x137   :  { %v816_v6 = vadd.f32 %v1475_v4, %v1854_v38  ;;  %v1483_v7 = vpop.f32.mrb[32].mxu1  ;;  %v807_v8 = vpop.f32.mrb[33].mxu0 }
 0x138   :  { %v848_v10 = vadd.f32 %v1483_v7, %v751_v32  ;;  %v808_v11 = vadd.f32 %v807_v8, %v1850_v24  ;;  %v839_v12 = vpop.f32.mrb[33].mxu1  ;;  %v1476_v13 = vpop.f32.mrb[34].mxu0 }
 0x139   :  { %v879_v14 = vmul.f32 %v1879_v5, %v816_v6  ;;  %v840_v15 = vadd.f32 %v839_v12, %v743_v16  ;;  %v819_v18 = vadd.f32 %v1476_v13, %v1856_v39  ;;  %v1484_v19 = vpop.f32.mrb[34].mxu1  ;;  %v810_v20 = vpop.f32.mrb[35].mxu0 }
 0x13a   :  { %v887_v38 = vmul.f32 %v1879_v5, %v848_v10  ;;  %v877_v21 = vmul.f32 %v1879_v5, %v808_v11  ;;  %v851_v22 = vadd.f32 %v1484_v19, %v754_v33  ;;  %v811_v23 = vadd.f32 %v810_v20, %v1852_v25  ;;  %v842_v26 = vpop.f32.mrb[35].mxu1 }
 0x13b   :  { %v902_v27 = vadd.f32 %v1885_v9, %v879_v14  ;;  %v885_v24 = vmul.f32 %v1879_v5, %v840_v15  ;;  %v880_v28 = vmul.f32 %v1879_v5, %v819_v18  ;;  %v843_v16 = vadd.f32 %v842_v26, %v1866_v17 }
 0x13c   :  { %v910_v39 = vadd.f32 %v1885_v9, %v887_v38  ;;  %v900_v29 = vadd.f32 %v1885_v9, %v877_v21  ;;  %v888_v30 = vmul.f32 %v1879_v5, %v851_v22  ;;  %v878_v31 = vmul.f32 %v1879_v5, %v811_v23 }
 0x13d   :  { %v918_v32 = vadd.f32 3.0, %v902_v27  ;;  %v908_v25 = vadd.f32 %v1885_v9, %v885_v24  ;;  %v903_v33 = vadd.f32 %v1885_v9, %v880_v28  ;;  %v886_v34 = vmul.f32 %v1879_v5, %v843_v16 }
 0x13e   :  { %v926_v35 = vadd.f32 3.0, %v910_v39  ;;  %v916_v36 = vadd.f32 3.0, %v900_v29  ;;  %v911_v37 = vadd.f32 %v1885_v9, %v888_v30  ;;  %v901_v17 = vadd.f32 %v1885_v9, %v878_v31  ;;  %v1906_v40 = vpop.f32.mrb[36].mxu0 }
 0x13f   :  { %v934_v41 = vmax.f32 %v918_v32, 0.0  ;;  %v924_v42 = vadd.f32 3.0, %v908_v25  ;;  %v919_v43 = vadd.f32 3.0, %v903_v33  ;;  %v909_v44 = vadd.f32 %v1885_v9, %v886_v34  ;;  %v1909_v45 = vpop.f32.mrb[36].mxu1  ;;  %v1911_v46 = vpop.f32.mrb[37].mxu0 }
 0x140   :  { %v942_v47 = vmax.f32 %v926_v35, 0.0  ;;  %v932_v50 = vmax.f32 %v916_v36, 0.0  ;;  %v927_v51 = vadd.f32 3.0, %v911_v37  ;;  %v917_v54 = vadd.f32 3.0, %v901_v17  ;;  %v1913_v55 = vpop.f32.mrb[37].mxu1  ;;  %v1915_v56 = vpop.f32.mrb[38].mxu0 }
 0x141   :  { %v950_v57 = vmin.f32 %v934_v41, 6.0  ;;  %v940_v58 = vmax.f32 %v924_v42, 0.0  ;;  %v935_v59 = vmax.f32 %v919_v43, 0.0  ;;  %v925_v60 = vadd.f32 3.0, %v909_v44  ;;  %v1917_v61 = vpop.f32.mrb[38].mxu1  ;;  %v1919_v62 = vpop.f32.mrb[39].mxu0 }
 0x142   :  { %v958_v63 = vmin.f32 %v942_v47, 6.0  ;;  %v948_v4 = vmin.f32 %v932_v50, 6.0  ;;  %v943_v6 = vmax.f32 %v927_v51, 0.0  ;;  %v933_v7 = vmax.f32 %v917_v54, 0.0  ;;  %v1921_v8 = vpop.f32.mrb[39].mxu1 }
 0x143   :  { %v966_v10 = vmul.f32 %v950_v57, %v902_v27  ;;  %v956_v11 = vmin.f32 %v940_v58, 6.0  ;;  %v951_v12 = vmin.f32 %v935_v59, 6.0  ;;  %v941_v13 = vmax.f32 %v925_v60, 0.0 }
 0x144   :  { %v974_v14 = vmul.f32 %v958_v63, %v910_v39  ;;  %v964_v15 = vmul.f32 %v948_v4, %v900_v29  ;;  %v959_v18 = vmin.f32 %v943_v6, 6.0  ;;  %v949_v19 = vmin.f32 %v933_v7, 6.0 }
 0x145   :  { %v982_v20 = vmul.f32 0.16666667, %v966_v10  ;;  %v972_v38 = vmul.f32 %v956_v11, %v908_v25  ;;  %v967_v21 = vmul.f32 %v951_v12, %v903_v33  ;;  %v957_v22 = vmin.f32 %v941_v13, 6.0 }
 0x146   :  { %v990_v23 = vmul.f32 0.16666667, %v974_v14  ;;  %v980_v26 = vmul.f32 0.16666667, %v964_v15  ;;  %v975_v24 = vmul.f32 %v959_v18, %v911_v37  ;;  %v965_v28 = vmul.f32 %v949_v19, %v901_v17 }
 0x147   :  { %v998_v16 = vadd.f32 3.0, %v982_v20  ;;  %v988_v30 = vmul.f32 0.16666667, %v972_v38  ;;  %v983_v31 = vmul.f32 0.16666667, %v967_v21  ;;  %v973_v32 = vmul.f32 %v957_v22, %v909_v44 }
 0x148   :  { %v1006_v27 = vadd.f32 3.0, %v990_v23  ;;  %v996_v34 = vadd.f32 3.0, %v980_v26  ;;  %v991_v35 = vmul.f32 0.16666667, %v975_v24  ;;  %v981_v36 = vmul.f32 0.16666667, %v965_v28 }
 0x149   :  { %v1014_v39 = vmax.f32 %v998_v16, 0.0  ;;  %v1004_v29 = vadd.f32 3.0, %v988_v30  ;;  %v999_v41 = vadd.f32 3.0, %v983_v31  ;;  %v989_v42 = vmul.f32 0.16666667, %v973_v32 }
 0x14a   :  { %v1022_v43 = vmax.f32 %v1006_v27, 0.0  ;;  %v1012_v25 = vmax.f32 %v996_v34, 0.0  ;;  %v1007_v33 = vadd.f32 3.0, %v991_v35  ;;  %v997_v47 = vadd.f32 3.0, %v981_v36 }
 0x14b   :  { %v1030_v50 = vmin.f32 %v1014_v39, 6.0  ;;  %v1020_v51 = vmax.f32 %v1004_v29, 0.0  ;;  %v1015_v37 = vmax.f32 %v999_v41, 0.0  ;;  %v1005_v17 = vadd.f32 3.0, %v989_v42 }
 0x14c   :  { %v1038_v54 = vmin.f32 %v1022_v43, 6.0  ;;  %v1028_v57 = vmin.f32 %v1012_v25, 6.0  ;;  %v1023_v58 = vmax.f32 %v1007_v33, 0.0  ;;  %v1013_v44 = vmax.f32 %v997_v47, 0.0 }
 0x14d   :  { %v1046_v59 = vmul.f32 %v1030_v50, %v982_v20  ;;  %v1036_v60 = vmin.f32 %v1020_v51, 6.0  ;;  %v1031_v63 = vmin.f32 %v1015_v37, 6.0  ;;  %v1021_v4 = vmax.f32 %v1005_v17, 0.0 }
 0x14e   :  { %v1054_v6 = vmul.f32 %v1038_v54, %v990_v23  ;;  %v1044_v7 = vmul.f32 %v1028_v57, %v980_v26  ;;  %v1039_v10 = vmin.f32 %v1023_v58, 6.0  ;;  %v1029_v11 = vmin.f32 %v1013_v44, 6.0 }
 0x14f   :  { %v1062_v12 = vmul.f32 0.16666667, %v1046_v59  ;;  %v1052_v13 = vmul.f32 %v1036_v60, %v988_v30  ;;  %v1047_v14 = vmul.f32 %v1031_v63, %v983_v31  ;;  %v1037_v15 = vmin.f32 %v1021_v4, 6.0 }
 0x150   :  { %v1070_v18 = vmul.f32 0.16666667, %v1054_v6  ;;  %v1060_v19 = vmul.f32 0.16666667, %v1044_v7  ;;  %v1055_v38 = vmul.f32 %v1039_v10, %v991_v35  ;;  %v1045_v21 = vmul.f32 %v1029_v11, %v981_v36 }
 0x151   :  { %v1068_v22 = vmul.f32 0.16666667, %v1052_v13  ;;  %v1063_v24 = vmul.f32 0.16666667, %v1047_v14  ;;  %v1053_v28 = vmul.f32 %v1037_v15, %v989_v42  ;;  %v832_v20 = vadd.f32 %v1906_v40, %v1862_v2 }
 0x152   :  { %v1071_v16 = vmul.f32 0.16666667, %v1055_v38  ;;  %v1061_v32 = vmul.f32 0.16666667, %v1045_v21  ;;  %v864_v23 = vadd.f32 %v1909_v45, %v1872_v0  ;;  %v824_v26 = vadd.f32 %v1911_v46, %v1858_v52 }
 0x153   :  { %v1286_v30 = vpack.c.bf16 %v1063_v24, %v1062_v12  ;;  %v1069_v31 = vmul.f32 0.16666667, %v1053_v28  ;;  %v883_v27 = vmul.f32 %v1879_v5, %v832_v20  ;;  %v856_v34 = vadd.f32 %v1913_v55, %v1868_v48 }
 0x154   :  { %v1306_v35 = vpack.c.bf16 %v1071_v16, %v1070_v18  ;;  %v1281_v36 = vpack.c.bf16 %v1061_v32, %v1060_v19  ;;  %v891_v39 = vmul.f32 %v1879_v5, %v864_v23  ;;  %v881_v2 = vmul.f32 %v1879_v5, %v824_v26 }
 0x155   :  { %1318 = vst [vmem:[%s1983_s4 + $0x8] sm:$0xff] %v1286_v30   ;;  %v1301_v0 = vpack.c.bf16 %v1069_v31, %v1068_v22  ;;  %v906_v52 = vadd.f32 %v1885_v9, %v883_v27  ;;  %v889_v40 = vmul.f32 %v1879_v5, %v856_v34  ;;  %v835_v45 = vadd.f32 %v1915_v56, %v1864_v3 }
 0x156   :  { %1322 = vst [vmem:[%s1983_s4 + $0x28] sm:$0xff] %v1306_v35   ;;  %1282 = vst [vmem:[%s1983_s4] sm:$0xff] %v1281_v36   ;;  %v914_v48 = vadd.f32 %v1885_v9, %v891_v39  ;;  %v904_v46 = vadd.f32 %v1885_v9, %v881_v2  ;;  %v867_v55 = vadd.f32 %v1917_v61, %v1874_v1 }
 0x157   :  { %v827_v29 = vadd.f32 %v1919_v62, %v1860_v53  ;;  %1321 = vst [vmem:[%s1983_s4 + $0x20] sm:$0xff] %v1301_v0   ;;  %v922_v3 = vadd.f32 3.0, %v906_v52  ;;  %v912_v56 = vadd.f32 %v1885_v9, %v889_v40  ;;  %v884_v41 = vmul.f32 %v1879_v5, %v835_v45 }
 0x158   :  { %v859_v42 = vadd.f32 %v1921_v8, %v1870_v49  ;;  %v930_v43 = vadd.f32 3.0, %v914_v48  ;;  %v920_v25 = vadd.f32 3.0, %v904_v46  ;;  %v892_v33 = vmul.f32 %v1879_v5, %v867_v55 }
 0x159   :  { %v882_v1 = vmul.f32 %v1879_v5, %v827_v29  ;;  %v938_v61 = vmax.f32 %v922_v3, 0.0  ;;  %v928_v53 = vadd.f32 3.0, %v912_v56  ;;  %v907_v62 = vadd.f32 %v1885_v9, %v884_v41 }
 0x15a   :  { %v890_v47 = vmul.f32 %v1879_v5, %v859_v42  ;;  %v946_v50 = vmax.f32 %v930_v43, 0.0  ;;  %v936_v51 = vmax.f32 %v920_v25, 0.0  ;;  %v915_v37 = vadd.f32 %v1885_v9, %v892_v33 }
 0x15b   :  { %v905_v17 = vadd.f32 %v1885_v9, %v882_v1  ;;  %v954_v54 = vmin.f32 %v938_v61, 6.0  ;;  %v944_v49 = vmax.f32 %v928_v53, 0.0  ;;  %v923_v8 = vadd.f32 3.0, %v907_v62 }
 0x15c   :  { %v913_v57 = vadd.f32 %v1885_v9, %v890_v47  ;;  %v962_v58 = vmin.f32 %v946_v50, 6.0  ;;  %v952_v44 = vmin.f32 %v936_v51, 6.0  ;;  %v931_v59 = vadd.f32 3.0, %v915_v37 }
 0x15d   :  { %v921_v60 = vadd.f32 3.0, %v905_v17  ;;  %v970_v63 = vmul.f32 %v954_v54, %v906_v52  ;;  %v960_v4 = vmin.f32 %v944_v49, 6.0  ;;  %v939_v6 = vmax.f32 %v923_v8, 0.0 }
 0x15e   :  { %v929_v7 = vadd.f32 3.0, %v913_v57  ;;  %v978_v5 = vmul.f32 %v962_v58, %v914_v48  ;;  %v968_v10 = vmul.f32 %v952_v44, %v904_v46  ;;  %v947_v11 = vmax.f32 %v931_v59, 0.0 }
 0x15f   :  { %v937_v12 = vmax.f32 %v921_v60, 0.0  ;;  %v986_v13 = vmul.f32 0.16666667, %v970_v63  ;;  %v976_v14 = vmul.f32 %v960_v4, %v912_v56  ;;  %v955_v15 = vmin.f32 %v939_v6, 6.0 }
 0x160   :  { %v945_v18 = vmax.f32 %v929_v7, 0.0  ;;  %v994_v19 = vmul.f32 0.16666667, %v978_v5  ;;  %v984_v38 = vmul.f32 0.16666667, %v968_v10  ;;  %v963_v21 = vmin.f32 %v947_v11, 6.0 }
 0x161   :  { %v953_v9 = vmin.f32 %v937_v12, 6.0  ;;  %v1002_v22 = vadd.f32 3.0, %v986_v13  ;;  %v992_v24 = vmul.f32 0.16666667, %v976_v14  ;;  %v971_v28 = vmul.f32 %v955_v15, %v907_v62 }
 0x162   :  { %v961_v20 = vmin.f32 %v945_v18, 6.0  ;;  %v1010_v16 = vadd.f32 3.0, %v994_v19  ;;  %v1000_v32 = vadd.f32 3.0, %v984_v38  ;;  %v979_v23 = vmul.f32 %v963_v21, %v915_v37 }
 0x163   :  { %v969_v26 = vmul.f32 %v953_v9, %v905_v17  ;;  %v1018_v30 = vmax.f32 %v1002_v22, 0.0  ;;  %v1008_v31 = vadd.f32 3.0, %v992_v24  ;;  %v987_v27 = vmul.f32 0.16666667, %v971_v28 }
 0x164   :  { %v977_v34 = vmul.f32 %v961_v20, %v913_v57  ;;  %v1026_v35 = vmax.f32 %v1010_v16, 0.0  ;;  %v1016_v36 = vmax.f32 %v1000_v32, 0.0  ;;  %v995_v39 = vmul.f32 0.16666667, %v979_v23 }
 0x165   :  { %v985_v2 = vmul.f32 0.16666667, %v969_v26  ;;  %v1034_v0 = vmin.f32 %v1018_v30, 6.0  ;;  %v1024_v52 = vmax.f32 %v1008_v31, 0.0  ;;  %v1003_v40 = vadd.f32 3.0, %v987_v27 }
 0x166   :  { %v993_v45 = vmul.f32 0.16666667, %v977_v34  ;;  %v1042_v48 = vmin.f32 %v1026_v35, 6.0  ;;  %v1032_v46 = vmin.f32 %v1016_v36, 6.0  ;;  %v1011_v55 = vadd.f32 3.0, %v995_v39 }
 0x167   :  { %v1001_v29 = vadd.f32 3.0, %v985_v2  ;;  %v1040_v3 = vmin.f32 %v1024_v52, 6.0  ;;  %v1019_v56 = vmax.f32 %v1003_v40, 0.0  ;;  %v1050_v25 = vmul.f32 %v1034_v0, %v986_v13 }
 0x168   :  { %v1009_v41 = vadd.f32 3.0, %v993_v45  ;;  %v1027_v42 = vmax.f32 %v1011_v55, 0.0  ;;  %v1058_v33 = vmul.f32 %v1042_v48, %v994_v19  ;;  %v1048_v53 = vmul.f32 %v1032_v46, %v984_v38 }
 0x169   :  { %v1017_v43 = vmax.f32 %v1001_v29, 0.0  ;;  %v1035_v1 = vmin.f32 %v1019_v56, 6.0  ;;  %v1056_v50 = vmul.f32 %v1040_v3, %v992_v24  ;;  %v1066_v49 = vmul.f32 0.16666667, %v1050_v25 }
 0x16a   :  { %v1025_v61 = vmax.f32 %v1009_v41, 0.0  ;;  %v1043_v62 = vmin.f32 %v1027_v42, 6.0  ;;  %v1074_v8 = vmul.f32 0.16666667, %v1058_v33  ;;  %v1064_v44 = vmul.f32 0.16666667, %v1048_v53 }
 0x16b   :  { %v1033_v47 = vmin.f32 %v1017_v43, 6.0  ;;  %v1051_v51 = vmul.f32 %v1035_v1, %v987_v27  ;;  %v1072_v63 = vmul.f32 0.16666667, %v1056_v50 }
 0x16c   :  { %v1041_v37 = vmin.f32 %v1025_v61, 6.0  ;;  %v1059_v17 = vmul.f32 %v1043_v62, %v995_v39 }
 0x16d   :  { %v1049_v54 = vmul.f32 %v1033_v47, %v985_v2  ;;  %v1067_v57 = vmul.f32 0.16666667, %v1051_v51 }
 0x16e   :  { %v1057_v58 = vmul.f32 %v1041_v37, %v993_v45  ;;  %v1075_v59 = vmul.f32 0.16666667, %v1059_v17 }
 0x16f   :  { %v1065_v60 = vmul.f32 0.16666667, %v1049_v54  ;;  %v1296_v4 = vpack.c.bf16 %v1067_v57, %v1066_v49 }
 0x170   :  { %v1073_v6 = vmul.f32 0.16666667, %v1057_v58  ;;  %v1316_v7 = vpack.c.bf16 %v1075_v59, %v1074_v8 }
 0x171   :  { %v1291_v5 = vpack.c.bf16 %v1065_v60, %v1064_v44  ;;  %1320 = vst [vmem:[%s1983_s4 + $0x18] sm:$0xff] %v1296_v4  }
 0x172   :  { %v1311_v10 = vpack.c.bf16 %v1073_v6, %v1072_v63  ;;  %1324 = vst [vmem:[%s1983_s4 + $0x38] sm:$0xff] %v1316_v7  }
 0x173   :  { %1319 = vst [vmem:[%s1983_s4 + $0x10] sm:$0xff] %v1291_v5  }
 0x174   :  { %1323 = vst [vmem:[%s1983_s4 + $0x30] sm:$0xff] %v1311_v10  }

// kernel: _lambda_.30
= control target key start
LH: loop header
LB: loop body
LE: loop exit
PB: predicated region body
PF: predicated region fallthrough
CT: control target
= control target key end

     0   :  { %v122_v0 = vmov 0.0   ;;  %vm123_vm0 = vmmov 0   ;;  %vm35_vm1 = vcmask 261120   ;;  %vm96_vm2 = vcmask 781312   ;;  %s167_s1 = inlined_call_operand.vmem [shape: bf16[32,96], index: 1, kind: input, shape index: {}]   ;;  %s168_s0 = inlined_call_operand.vmem [shape: bf16[8,32], index: 0, kind: input, shape index: {}]   ;;  %s169_s2 = inlined_call_operand.vmem [shape: f32[1,96], index: 2, kind: input, shape index: {}]   ;;  %s170_s3 = inlined_call_operand.vmem [shape: f32[1,96], index: 3, kind: input, shape index: {}]   ;;  %s171_s4 = inlined_call_operand.vmem [shape: bf16[8,96], index: 4, kind: output, shape index: {}]  }
   0x1   :  { %110 = vmatprep.subr.bf16.mxu0 %v122_v0  ;;  %v120_v1 = vld [vmem:[%s167_s1] sm:$0xff]   ;;  %114 = vmatprep.mubr.msk.bf16.mxu0 %vm123_vm0, %v122_v0  ;;  %v121_v2 = vld [vmem:[%s167_s1 + $0x8] sm:$0xff]  }
   0x2   :  { %111 = vmatpush3.bf16.msra.mxu0 %v120_v1  ;;  %v18_v3 = vld [vmem:[%s168_s0] sm:$0xf] }
   0x3   :  { %112 = vmatprep.subr.bf16.mxu0 %v122_v0  ;;  %v105_v4 = vld [vmem:[%s169_s2] ss:$0 sm:$0xff] }
   0x4   :  { %v106_v6 = vld [vmem:[%s170_s3] ss:$0 sm:$0xff] }
   0x6   :  { %113 = vmatpush3.bf16.msra.mxu0 %v121_v2 }
   0x9   :  { %115 = vmatmul.mubr.msk.bf16.vlgmr.msra.gmra.mrb[0].mxu0 %vm35_vm1, %v18_v3 }
  0xdc   :  { %v73_v5 = vpop.f32.mrb[0].mxu0 }
  0xdd   :  { %v86_v7 = vmul.f32 %v105_v4, %v73_v5  ;;  %v116_v8 = vpop.f32.mrb[1].mxu0 }
  0xde   :  { %v76_v9 = vpop.f32.mrb[2].mxu0 }
  0xdf   :  { %v94_v10 = vadd.f32 %v106_v6, %v86_v7  ;;  %v117_v11 = vpop.f32.mrb[3].mxu0 }
  0xe1   :  { %v95_v12 = vpack.c.bf16 %v94_v10, %v94_v10 }
  0xe3   :  { %97 = vst.msk [vmem:[%s171_s4] sm:$0xf] %vm96_vm2, %v95_v12 }

// kernel: _lambda_.32
= control target key start
LH: loop header
LB: loop body
LE: loop exit
PB: predicated region body
PF: predicated region fallthrough
CT: control target
= control target key end

     0   :  { %v122_v0 = vmov 0.0   ;;  %vm123_vm0 = vmmov 0   ;;  %vm35_vm1 = vcmask 261120   ;;  %vm96_vm2 = vcmask 257024   ;;  %s167_s1 = inlined_call_operand.vmem [shape: bf16[32,32], index: 1, kind: input, shape index: {}]   ;;  %s168_s0 = inlined_call_operand.vmem [shape: bf16[8,32], index: 0, kind: input, shape index: {}]   ;;  %s169_s2 = inlined_call_operand.vmem [shape: f32[1,32], index: 2, kind: input, shape index: {}]   ;;  %s170_s3 = inlined_call_operand.vmem [shape: f32[1,32], index: 3, kind: input, shape index: {}]   ;;  %s171_s4 = inlined_call_operand.vmem [shape: bf16[8,32], index: 4, kind: output, shape index: {}]  }
   0x1   :  { %110 = vmatprep.subr.bf16.mxu0 %v122_v0  ;;  %v120_v1 = vld [vmem:[%s167_s1] sm:$0xff]   ;;  %114 = vmatprep.mubr.msk.bf16.mxu0 %vm123_vm0, %v122_v0  ;;  %v121_v2 = vld [vmem:[%s167_s1 + $0x8] sm:$0xff]  }
   0x2   :  { %111 = vmatpush3.bf16.msra.mxu0 %v120_v1  ;;  %v18_v3 = vld [vmem:[%s168_s0] sm:$0xf] }
   0x3   :  { %112 = vmatprep.subr.bf16.mxu0 %v122_v0  ;;  %v105_v4 = vld [vmem:[%s169_s2] ss:$0 sm:$0xff] }
   0x4   :  { %v106_v6 = vld [vmem:[%s170_s3] ss:$0 sm:$0xff] }
   0x6   :  { %113 = vmatpush3.bf16.msra.mxu0 %v121_v2 }
   0x9   :  { %115 = vmatmul.mubr.msk.bf16.vlgmr.msra.gmra.mrb[0].mxu0 %vm35_vm1, %v18_v3 }
  0xdc   :  { %v73_v5 = vpop.f32.mrb[0].mxu0 }
  0xdd   :  { %v86_v7 = vmul.f32 %v105_v4, %v73_v5  ;;  %v116_v8 = vpop.f32.mrb[1].mxu0 }
  0xde   :  { %v76_v9 = vpop.f32.mrb[2].mxu0 }
  0xdf   :  { %v94_v10 = vadd.f32 %v106_v6, %v86_v7  ;;  %v117_v11 = vpop.f32.mrb[3].mxu0 }
  0xe1   :  { %v95_v12 = vpack.c.bf16 %v94_v10, %v94_v10 }
  0xe3   :  { %97 = vst.msk [vmem:[%s171_s4] sm:$0xf] %vm96_vm2, %v95_v12 }

// kernel: _lambda_.29
= control target key start
LH: loop header
LB: loop body
LE: loop exit
PB: predicated region body
PF: predicated region fallthrough
CT: control target
= control target key end

     0   :  { %9 = vsyncpa [#allocation3], 0  ;;  %s2453_s0 = inlined_call_operand.vmem [shape: bf16[8,2048], index: 0, kind: input, shape index: {}]   ;;  %s2454_s1 = inlined_call_operand.vmem [shape: bf16[2048,32], index: 1, kind: input, shape index: {}]   ;;  %s2455_s2 = inlined_call_operand.hbm [shape: f32[1,32], index: 2, kind: input, shape index: {}]   ;;  %s2456_s3 = inlined_call_operand.hbm [shape: f32[1,32], index: 3, kind: input, shape index: {}]   ;;  %s2457_s4 = inlined_call_operand.vmem [shape: bf16[8,32], index: 4, kind: output, shape index: {}]  }
   0x1   :  { %10 = vsyncpa [#allocation5], 0  ;;  %s1991_s15 = smov [#allocation2]   ;;  %s1992_s17 = smov [#allocation4]  }
   0x2   :  { %s21_s16 = sshll.u32 %s1991_s15, 4  ;;  %s31_s18 = sshll.u32 %s1992_s17, 4  ;;  %s22_s16 = int_to_ptr.vmem [resolvable:$true] %s21_s16  ;;  %s32_s18 = int_to_ptr.vmem [resolvable:$true] %s31_s18 }
   0x3   :  { %s1943_s21 = scalar_lea.hbm %s2455_s2, 16 }
   0x4   :  { %p1944_p0 = scmp.ne.s32.totalorder %s2455_s2, %s1943_s21  ;;  %p1947_p1 = scmp.lt.u32.totalorder %s1943_s21, %s2455_s2 }
   0x6   :  { %p1949_p2 = pnand %p1947_p1, %p1944_p0 }
   0x8   :  { %1952 = shalt.err (!%p1949_p2)
}
   0x9   :  { %s1953_s26 = scalar_lea.vmem %s22_s16, 16  ;;  %s1957_s27 = scalar_lea.vmem %s22_s16, 32 }
   0xa   :  { %p1954_p3 = scmp.ne.s32.totalorder %s22_s16, %s1953_s26  ;;  %p1958_p4 = scmp.lt.s32.totalorder %s22_s16, %s22_s16 }
   0xb   :  { %p1959_p5 = scmp.lt.s32.totalorder %s1957_s27, %s1953_s26 }
   0xd   :  { %p1960_p6 = por %p1959_p5, %p1958_p4 }
   0xf   :  { %p1961_p7 = pnand %p1960_p6, %p1954_p3 }
  0x11   :  { %1964 = shalt.err (!%p1961_p7)
}
  0x12   :  { %24 = dma.hbm_to_vmem [thread:$0]  %s2455_s2, 16, %s22_s16, [#allocation3]  }
  0x13   :  { %s1965_s6 = scalar_lea.hbm %s2456_s3, 16 }
  0x14   :  { %p1966_p8 = scmp.ne.s32.totalorder %s2456_s3, %s1965_s6  ;;  %p1969_p9 = scmp.lt.u32.totalorder %s1965_s6, %s2456_s3 }
  0x16   :  { %p1971_p10 = pnand %p1969_p9, %p1966_p8 }
  0x18   :  { %1974 = shalt.err (!%p1971_p10)
}
  0x19   :  { %s1975_s11 = scalar_lea.vmem %s32_s18, 16  ;;  %s1979_s12 = scalar_lea.vmem %s32_s18, 32 }
  0x1a   :  { %p1976_p11 = scmp.ne.s32.totalorder %s32_s18, %s1975_s11  ;;  %p1980_p12 = scmp.lt.s32.totalorder %s32_s18, %s32_s18 }
  0x1b   :  { %p1981_p13 = scmp.lt.s32.totalorder %s1979_s12, %s1975_s11 }
  0x1d   :  { %p1982_p0 = por %p1981_p13, %p1980_p12 }
  0x1f   :  { %p1983_p1 = pnand %p1982_p0, %p1976_p11 }
  0x21   :  { %1986 = shalt.err (!%p1983_p1)
}
  0x22   :  { %34 = dma.hbm_to_vmem [thread:$0]  %s2456_s3, 16, %s32_s18, [#allocation5]  }
  0x23   :  { %1987 = dma.done.wait [#allocation3], 16  }
  0x24   :  { %1988 = vsyncadd [#allocation3], 4294967280 }
  0x25   :  { %1989 = dma.done.wait [#allocation5], 16  }
  0x26   :  { %1990 = vsyncadd [#allocation5], 4294967280  ;;  %v1799_v0 = vld [vmem:[%s2454_s1 + $0x40] sm:$0xff]   ;;  %v1803_v4 = vld [vmem:[%s2454_s1 + $0x48] sm:$0xff]   ;;  %vm1467_vm0 = vcmask 257024  }
  0x27   :  { %v1800_v1 = vld [vmem:[%s2454_s1 + $0xc0] sm:$0xff]   ;;  %1621 = vmatprep.subr.bf16.mxu0 %v1799_v0  ;;  %v1804_v5 = vld [vmem:[%s2454_s1 + $0xc8] sm:$0xff]   ;;  %v1807_v8 = vld [vmem:[%s2454_s1 + $0x50] sm:$0xff]  }
  0x28   :  { %v1801_v2 = vld [vmem:[%s2454_s1] sm:$0xff]   ;;  %1643 = vmatprep.subr.bf16.mxu1 %v1800_v1  ;;  %v1805_v6 = vld [vmem:[%s2454_s1 + $0x8] sm:$0xff]   ;;  %v1808_v9 = vld [vmem:[%s2454_s1 + $0xd0] sm:$0xff]  }
  0x29   :  { %v1802_v3 = vld [vmem:[%s2454_s1 + $0x80] sm:$0xff]   ;;  %1622 = vmatpush3.bf16.msra.mxu0 %v1801_v2  ;;  %v1806_v7 = vld [vmem:[%s2454_s1 + $0x88] sm:$0xff]   ;;  %v1809_v10 = vld [vmem:[%s2454_s1 + $0x10] sm:$0xff]  }
  0x2a   :  { %1644 = vmatpush3.bf16.msra.mxu1 %v1802_v3  ;;  %1623 = vmatprep.subr.bf16.mxu0 %v1803_v4  ;;  %v1810_v11 = vld [vmem:[%s2454_s1 + $0x90] sm:$0xff]   ;;  %v1811_v12 = vld [vmem:[%s2454_s1 + $0x58] sm:$0xff]   ;;  %v1815_v16 = vld [vmem:[%s2454_s1 + $0x60] sm:$0xff]  }
  0x2b   :  { %1645 = vmatprep.subr.bf16.mxu1 %v1804_v5  ;;  %v1812_v13 = vld [vmem:[%s2454_s1 + $0xd8] sm:$0xff]   ;;  %v1816_v17 = vld [vmem:[%s2454_s1 + $0xe0] sm:$0xff]   ;;  %v1819_v20 = vld [vmem:[%s2454_s1 + $0x68] sm:$0xff]  }
  0x2c   :  { %v1813_v14 = vld [vmem:[%s2454_s1 + $0x18] sm:$0xff]   ;;  %v1817_v18 = vld [vmem:[%s2454_s1 + $0x20] sm:$0xff]   ;;  %v1820_v21 = vld [vmem:[%s2454_s1 + $0xe8] sm:$0xff]  }
  0x2d   :  { %1624 = vmatpush3.bf16.msra.mxu0 %v1805_v6  ;;  %v1814_v15 = vld [vmem:[%s2454_s1 + $0x98] sm:$0xff]   ;;  %v1818_v19 = vld [vmem:[%s2454_s1 + $0xa0] sm:$0xff]   ;;  %v1821_v22 = vld [vmem:[%s2454_s1 + $0x28] sm:$0xff]  }
  0x2e   :  { %1646 = vmatpush3.bf16.msra.mxu1 %v1806_v7  ;;  %1625 = vmatprep.subr.bf16.mxu0 %v1807_v8  ;;  %v1822_v23 = vld [vmem:[%s2454_s1 + $0xa8] sm:$0xff]   ;;  %v1823_v24 = vld [vmem:[%s2454_s1 + $0x70] sm:$0xff]   ;;  %v1827_v28 = vld [vmem:[%s2454_s1 + $0x78] sm:$0xff]  }
  0x2f   :  { %1647 = vmatprep.subr.bf16.mxu1 %v1808_v9  ;;  %v1824_v25 = vld [vmem:[%s2454_s1 + $0xf0] sm:$0xff]   ;;  %v1828_v29 = vld [vmem:[%s2454_s1 + $0xf8] sm:$0xff]   ;;  %v42_v32 = vld [vmem:[%s2453_s0] sm:$0xff] }
  0x30   :  { %v1825_v26 = vld [vmem:[%s2454_s1 + $0x30] sm:$0xff]   ;;  %v1829_v30 = vld [vmem:[%s2454_s1 + $0x38] sm:$0xff]   ;;  %v43_v33 = vld [vmem:[%s2453_s0 + $0x8] sm:$0xff]  ;;  %v1475_v34 = vcombine.low %v42_v32, %v42_v32  ;;  %v1476_v35 = vcombine.high %v42_v32, %v42_v32 }
  0x31   :  { %1626 = vmatpush3.bf16.msra.mxu0 %v1809_v10  ;;  %v1826_v27 = vld [vmem:[%s2454_s1 + $0xb0] sm:$0xff]   ;;  %v1830_v31 = vld [vmem:[%s2454_s1 + $0xb8] sm:$0xff]   ;;  %v1477_v36 = vcombine.low %v43_v33, %v43_v33  ;;  %v1478_v37 = vcombine.high %v43_v33, %v43_v33  ;;  %v1835_v38 = vld [vmem:[%s2454_s1 + $0x140] sm:$0xff]  }
  0x32   :  { %1648 = vmatpush3.bf16.msra.mxu1 %v1810_v11  ;;  %1627 = vmatprep.subr.bf16.mxu0 %v1811_v12  ;;  %v1836_v39 = vld [vmem:[%s2454_s1 + $0x1c0] sm:$0xff]   ;;  %v1839_v42 = vld [vmem:[%s2454_s1 + $0x148] sm:$0xff]   ;;  %v1843_v46 = vld [vmem:[%s2454_s1 + $0x150] sm:$0xff]  }
  0x33   :  { %1649 = vmatprep.subr.bf16.mxu1 %v1812_v13  ;;  %1162 = vmatprep.mubr.bf16.mxu0 %v1476_v35  ;;  %v1837_v40 = vld [vmem:[%s2454_s1 + $0x100] sm:$0xff]   ;;  %v1840_v43 = vld [vmem:[%s2454_s1 + $0x1c8] sm:$0xff]   ;;  %v1844_v47 = vld [vmem:[%s2454_s1 + $0x1d0] sm:$0xff]  }
  0x34   :  { %1202 = vmatprep.mubr.bf16.mxu1 %v1478_v37  ;;  %v1838_v41 = vld [vmem:[%s2454_s1 + $0x180] sm:$0xff]   ;;  %v1841_v44 = vld [vmem:[%s2454_s1 + $0x108] sm:$0xff]   ;;  %v1845_v48 = vld [vmem:[%s2454_s1 + $0x110] sm:$0xff]  }
  0x35   :  { %1628 = vmatpush3.bf16.msra.mxu0 %v1813_v14  ;;  %v1842_v45 = vld [vmem:[%s2454_s1 + $0x188] sm:$0xff]   ;;  %v1846_v49 = vld [vmem:[%s2454_s1 + $0x190] sm:$0xff]   ;;  %v1847_v50 = vld [vmem:[%s2454_s1 + $0x158] sm:$0xff]  }
  0x36   :  { %1650 = vmatpush3.bf16.msra.mxu1 %v1814_v15  ;;  %1629 = vmatprep.subr.bf16.mxu0 %v1815_v16  ;;  %v1848_v51 = vld [vmem:[%s2454_s1 + $0x1d8] sm:$0xff]   ;;  %v1851_v54 = vld [vmem:[%s2454_s1 + $0x160] sm:$0xff]   ;;  %v1855_v58 = vld [vmem:[%s2454_s1 + $0x168] sm:$0xff]  }
  0x37   :  { %1651 = vmatprep.subr.bf16.mxu1 %v1816_v17  ;;  %v1849_v52 = vld [vmem:[%s2454_s1 + $0x118] sm:$0xff]   ;;  %v1852_v55 = vld [vmem:[%s2454_s1 + $0x1e0] sm:$0xff]   ;;  %v1856_v59 = vld [vmem:[%s2454_s1 + $0x1e8] sm:$0xff]  }
  0x38   :  { %v1850_v53 = vld [vmem:[%s2454_s1 + $0x198] sm:$0xff]   ;;  %v1853_v56 = vld [vmem:[%s2454_s1 + $0x120] sm:$0xff]   ;;  %v1857_v60 = vld [vmem:[%s2454_s1 + $0x128] sm:$0xff]  }
  0x39   :  { %1630 = vmatpush3.bf16.msra.mxu0 %v1817_v18  ;;  %v1854_v57 = vld [vmem:[%s2454_s1 + $0x1a0] sm:$0xff]   ;;  %v1858_v61 = vld [vmem:[%s2454_s1 + $0x1a8] sm:$0xff]   ;;  %v1859_v62 = vld [vmem:[%s2454_s1 + $0x170] sm:$0xff]  }
  0x3a   :  { %1652 = vmatpush3.bf16.msra.mxu1 %v1818_v19  ;;  %1631 = vmatprep.subr.bf16.mxu0 %v1819_v20  ;;  %v1860_v63 = vld [vmem:[%s2454_s1 + $0x1f0] sm:$0xff]   ;;  %v1863_v2 = vld [vmem:[%s2454_s1 + $0x178] sm:$0xff]   ;;  %v1871_v12 = vld [vmem:[%s2454_s1 + $0x240] sm:$0xff]  }
  0x3b   :  { %1653 = vmatprep.subr.bf16.mxu1 %v1820_v21  ;;  %v1861_v0 = vld [vmem:[%s2454_s1 + $0x130] sm:$0xff]   ;;  %v1864_v3 = vld [vmem:[%s2454_s1 + $0x1f8] sm:$0xff]   ;;  %v1872_v13 = vld [vmem:[%s2454_s1 + $0x2c0] sm:$0xff]  }
  0x3c   :  { %v1862_v1 = vld [vmem:[%s2454_s1 + $0x1b0] sm:$0xff]   ;;  %v1865_v4 = vld [vmem:[%s2454_s1 + $0x138] sm:$0xff]   ;;  %v1873_v14 = vld [vmem:[%s2454_s1 + $0x200] sm:$0xff]  }
  0x3d   :  { %1632 = vmatpush3.bf16.msra.mxu0 %v1821_v22  ;;  %v1866_v5 = vld [vmem:[%s2454_s1 + $0x1b8] sm:$0xff]   ;;  %v44_v6 = vld [vmem:[%s2453_s0 + $0x10] sm:$0xff]  ;;  %v1874_v15 = vld [vmem:[%s2454_s1 + $0x280] sm:$0xff]  }
  0x3e   :  { %1654 = vmatpush3.bf16.msra.mxu1 %v1822_v23  ;;  %1633 = vmatprep.subr.bf16.mxu0 %v1823_v24  ;;  %v1479_v7 = vcombine.low %v44_v6, %v44_v6  ;;  %v1480_v8 = vcombine.high %v44_v6, %v44_v6  ;;  %v45_v9 = vld [vmem:[%s2453_s0 + $0x18] sm:$0xff]  ;;  %v1875_v16 = vld [vmem:[%s2454_s1 + $0x248] sm:$0xff]   ;;  %v1879_v20 = vld [vmem:[%s2454_s1 + $0x250] sm:$0xff]  }
  0x3f   :  { %1655 = vmatprep.subr.bf16.mxu1 %v1824_v25  ;;  %v1481_v10 = vcombine.low %v45_v9, %v45_v9  ;;  %v1482_v11 = vcombine.high %v45_v9, %v45_v9  ;;  %v1876_v17 = vld [vmem:[%s2454_s1 + $0x2c8] sm:$0xff]   ;;  %v1880_v21 = vld [vmem:[%s2454_s1 + $0x2d0] sm:$0xff]   ;;  %v1883_v24 = vld [vmem:[%s2454_s1 + $0x258] sm:$0xff]  }
  0x40   :  { %v1877_v18 = vld [vmem:[%s2454_s1 + $0x208] sm:$0xff]   ;;  %v1881_v22 = vld [vmem:[%s2454_s1 + $0x210] sm:$0xff]   ;;  %v1884_v25 = vld [vmem:[%s2454_s1 + $0x2d8] sm:$0xff]  }
  0x41   :  { %1634 = vmatpush3.bf16.msra.mxu0 %v1825_v26  ;;  %v1878_v19 = vld [vmem:[%s2454_s1 + $0x288] sm:$0xff]   ;;  %v1882_v23 = vld [vmem:[%s2454_s1 + $0x290] sm:$0xff]   ;;  %v1885_v26 = vld [vmem:[%s2454_s1 + $0x218] sm:$0xff]  }
  0x42   :  { %1656 = vmatpush3.bf16.msra.mxu1 %v1826_v27  ;;  %1635 = vmatprep.subr.bf16.mxu0 %v1827_v28  ;;  %v1886_v27 = vld [vmem:[%s2454_s1 + $0x298] sm:$0xff]   ;;  %v1887_v28 = vld [vmem:[%s2454_s1 + $0x260] sm:$0xff]   ;;  %v1891_v32 = vld [vmem:[%s2454_s1 + $0x268] sm:$0xff]  }
  0x43   :  { %1657 = vmatprep.subr.bf16.mxu1 %v1828_v29  ;;  %v1888_v29 = vld [vmem:[%s2454_s1 + $0x2e0] sm:$0xff]   ;;  %v1892_v33 = vld [vmem:[%s2454_s1 + $0x2e8] sm:$0xff]   ;;  %v1896_v37 = vld [vmem:[%s2454_s1 + $0x2f0] sm:$0xff]  }
  0x44   :  { %v1894_v35 = vld [vmem:[%s2454_s1 + $0x2a8] sm:$0xff]  }
  0x45   :  { %1636 = vmatpush3.bf16.msra.mxu0 %v1829_v30  ;;  %v1889_v30 = vld [vmem:[%s2454_s1 + $0x220] sm:$0xff]   ;;  %v1927_v6 = vld [vmem:[%s2454_s1 + $0x368] sm:$0xff]  }
  0x46   :  { %1658 = vmatpush3.bf16.msra.mxu1 %v1830_v31  ;;  %1665 = vmatprep.subr.bf16.mxu0 %v1835_v38  ;;  %v1890_v31 = vld [vmem:[%s2454_s1 + $0x2a0] sm:$0xff]   ;;  %v1897_v38 = vld [vmem:[%s2454_s1 + $0x230] sm:$0xff]   ;;  %v1930_v9 = vld [vmem:[%s2454_s1 + $0x3a8] sm:$0xff]  }
  0x47   :  { %1687 = vmatprep.subr.bf16.mxu1 %v1836_v39  ;;  %v1898_v39 = vld [vmem:[%s2454_s1 + $0x2b0] sm:$0xff]  }
  0x48   :  { %1163 = vmatmul.mubr.bf16.vlgmr.msra.gmra.mrb[0].mxu0 %v1475_v34  ;;  %v1893_v34 = vld [vmem:[%s2454_s1 + $0x228] sm:$0xff]  }
  0x49   :  { %1203 = vmatmul.mubr.bf16.vlgmr.msra.gmra.mrb[0].mxu1 %v1477_v36  ;;  %1666 = vmatpush3.bf16.msra.mxu0 %v1837_v40  ;;  %v1895_v36 = vld [vmem:[%s2454_s1 + $0x270] sm:$0xff]   ;;  %v1899_v40 = vld [vmem:[%s2454_s1 + $0x278] sm:$0xff]  }
  0x4a   :  { %1688 = vmatpush3.bf16.msra.mxu1 %v1838_v41  ;;  %1667 = vmatprep.subr.bf16.mxu0 %v1839_v42  ;;  %v1900_v41 = vld [vmem:[%s2454_s1 + $0x2f8] sm:$0xff]  }
  0x4b   :  { %1689 = vmatprep.subr.bf16.mxu1 %v1840_v43  ;;  %1242 = vmatprep.mubr.bf16.mxu0 %v1480_v8  ;;  %v1901_v42 = vld [vmem:[%s2454_s1 + $0x238] sm:$0xff]   ;;  %v1929_v8 = vld [vmem:[%s2454_s1 + $0x328] sm:$0xff]  }
  0x4c   :  { %1282 = vmatprep.mubr.bf16.mxu1 %v1482_v11  ;;  %v1902_v43 = vld [vmem:[%s2454_s1 + $0x2b8] sm:$0xff]   ;;  %v1932_v11 = vld [vmem:[%s2454_s1 + $0x3f0] sm:$0xff]  }
  0x4d   :  { %1668 = vmatpush3.bf16.msra.mxu0 %v1841_v44  ;;  %v46_v44 = vld [vmem:[%s2453_s0 + $0x20] sm:$0xff] }
  0x4e   :  { %1690 = vmatpush3.bf16.msra.mxu1 %v1842_v45  ;;  %1669 = vmatprep.subr.bf16.mxu0 %v1843_v46  ;;  %v47_v45 = vld [vmem:[%s2453_s0 + $0x28] sm:$0xff]  ;;  %v1483_v46 = vcombine.low %v46_v44, %v46_v44 }
  0x4f   :  { %1691 = vmatprep.subr.bf16.mxu1 %v1844_v47  ;;  %v1484_v47 = vcombine.high %v46_v44, %v46_v44 }
  0x51   :  { %1670 = vmatpush3.bf16.msra.mxu0 %v1845_v48  ;;  %v1485_v48 = vcombine.low %v47_v45, %v47_v45 }
  0x52   :  { %1692 = vmatpush3.bf16.msra.mxu1 %v1846_v49  ;;  %1671 = vmatprep.subr.bf16.mxu0 %v1847_v50  ;;  %v1486_v49 = vcombine.high %v47_v45, %v47_v45  ;;  %v1907_v50 = vld [vmem:[%s2454_s1 + $0x340] sm:$0xff]  }
  0x53   :  { %1693 = vmatprep.subr.bf16.mxu1 %v1848_v51  ;;  %v1908_v51 = vld [vmem:[%s2454_s1 + $0x3c0] sm:$0xff]  }
  0x55   :  { %1672 = vmatpush3.bf16.msra.mxu0 %v1849_v52  ;;  %v1909_v52 = vld [vmem:[%s2454_s1 + $0x300] sm:$0xff]  }
  0x56   :  { %1694 = vmatpush3.bf16.msra.mxu1 %v1850_v53  ;;  %1673 = vmatprep.subr.bf16.mxu0 %v1851_v54  ;;  %v1910_v53 = vld [vmem:[%s2454_s1 + $0x380] sm:$0xff]   ;;  %v1911_v54 = vld [vmem:[%s2454_s1 + $0x348] sm:$0xff]  }
  0x57   :  { %1695 = vmatprep.subr.bf16.mxu1 %v1852_v55  ;;  %v1912_v55 = vld [vmem:[%s2454_s1 + $0x3c8] sm:$0xff]  }
  0x59   :  { %1674 = vmatpush3.bf16.msra.mxu0 %v1853_v56  ;;  %v1913_v56 = vld [vmem:[%s2454_s1 + $0x308] sm:$0xff]  }
  0x5a   :  { %1696 = vmatpush3.bf16.msra.mxu1 %v1854_v57  ;;  %1675 = vmatprep.subr.bf16.mxu0 %v1855_v58  ;;  %v1914_v57 = vld [vmem:[%s2454_s1 + $0x388] sm:$0xff]   ;;  %v1915_v58 = vld [vmem:[%s2454_s1 + $0x350] sm:$0xff]  }
  0x5b   :  { %1697 = vmatprep.subr.bf16.mxu1 %v1856_v59  ;;  %v1916_v59 = vld [vmem:[%s2454_s1 + $0x3d0] sm:$0xff]  }
  0x5d   :  { %1676 = vmatpush3.bf16.msra.mxu0 %v1857_v60  ;;  %v1917_v60 = vld [vmem:[%s2454_s1 + $0x310] sm:$0xff]  }
  0x5e   :  { %1698 = vmatpush3.bf16.msra.mxu1 %v1858_v61  ;;  %1677 = vmatprep.subr.bf16.mxu0 %v1859_v62  ;;  %v1918_v61 = vld [vmem:[%s2454_s1 + $0x390] sm:$0xff]   ;;  %v1919_v62 = vld [vmem:[%s2454_s1 + $0x358] sm:$0xff]  }
  0x5f   :  { %1699 = vmatprep.subr.bf16.mxu1 %v1860_v63  ;;  %v1920_v63 = vld [vmem:[%s2454_s1 + $0x3d8] sm:$0xff]  }
  0x61   :  { %1678 = vmatpush3.bf16.msra.mxu0 %v1861_v0  ;;  %v1921_v0 = vld [vmem:[%s2454_s1 + $0x318] sm:$0xff]  }
  0x62   :  { %1700 = vmatpush3.bf16.msra.mxu1 %v1862_v1  ;;  %1679 = vmatprep.subr.bf16.mxu0 %v1863_v2  ;;  %v1922_v1 = vld [vmem:[%s2454_s1 + $0x398] sm:$0xff]   ;;  %v1923_v2 = vld [vmem:[%s2454_s1 + $0x360] sm:$0xff]  }
  0x63   :  { %1701 = vmatprep.subr.bf16.mxu1 %v1864_v3  ;;  %v1924_v3 = vld [vmem:[%s2454_s1 + $0x3e0] sm:$0xff]  }
  0x65   :  { %1680 = vmatpush3.bf16.msra.mxu0 %v1865_v4  ;;  %v1925_v4 = vld [vmem:[%s2454_s1 + $0x320] sm:$0xff]  }
  0x66   :  { %1702 = vmatpush3.bf16.msra.mxu1 %v1866_v5  ;;  %1709 = vmatprep.subr.bf16.mxu0 %v1871_v12  ;;  %v1926_v5 = vld [vmem:[%s2454_s1 + $0x3a0] sm:$0xff]   ;;  %v1933_v12 = vld [vmem:[%s2454_s1 + $0x330] sm:$0xff]  }
  0x67   :  { %1731 = vmatprep.subr.bf16.mxu1 %v1872_v13  ;;  %v1934_v13 = vld [vmem:[%s2454_s1 + $0x3b0] sm:$0xff]  }
  0x68   :  { %1243 = vmatmul.mubr.bf16.vlgmr.msra.gmra.mrb[4].mxu0 %v1479_v7  ;;  %v1928_v7 = vld [vmem:[%s2454_s1 + $0x3e8] sm:$0xff]  }
  0x69   :  { %1283 = vmatmul.mubr.bf16.vlgmr.msra.gmra.mrb[4].mxu1 %v1481_v10  ;;  %1710 = vmatpush3.bf16.msra.mxu0 %v1873_v14  ;;  %v1931_v10 = vld [vmem:[%s2454_s1 + $0x370] sm:$0xff]   ;;  %v1935_v14 = vld [vmem:[%s2454_s1 + $0x378] sm:$0xff]  }
  0x6a   :  { %1732 = vmatpush3.bf16.msra.mxu1 %v1874_v15  ;;  %1711 = vmatprep.subr.bf16.mxu0 %v1875_v16  ;;  %v1936_v15 = vld [vmem:[%s2454_s1 + $0x3f8] sm:$0xff]  }
  0x6b   :  { %1733 = vmatprep.subr.bf16.mxu1 %v1876_v17  ;;  %1322 = vmatprep.mubr.bf16.mxu0 %v1484_v47  ;;  %v1937_v16 = vld [vmem:[%s2454_s1 + $0x338] sm:$0xff]  }
  0x6c   :  { %1362 = vmatprep.mubr.bf16.mxu1 %v1486_v49  ;;  %v1938_v17 = vld [vmem:[%s2454_s1 + $0x3b8] sm:$0xff]  }
  0x6d   :  { %1712 = vmatpush3.bf16.msra.mxu0 %v1877_v18  ;;  %v48_v18 = vld [vmem:[%s2453_s0 + $0x30] sm:$0xff] }
  0x6e   :  { %1734 = vmatpush3.bf16.msra.mxu1 %v1878_v19  ;;  %1713 = vmatprep.subr.bf16.mxu0 %v1879_v20  ;;  %v49_v19 = vld [vmem:[%s2453_s0 + $0x38] sm:$0xff]  ;;  %v1487_v20 = vcombine.low %v48_v18, %v48_v18 }
  0x6f   :  { %1735 = vmatprep.subr.bf16.mxu1 %v1880_v21  ;;  %v1488_v21 = vcombine.high %v48_v18, %v48_v18 }
  0x71   :  { %1714 = vmatpush3.bf16.msra.mxu0 %v1881_v22  ;;  %v1489_v22 = vcombine.low %v49_v19, %v49_v19 }
  0x72   :  { %1736 = vmatpush3.bf16.msra.mxu1 %v1882_v23  ;;  %1715 = vmatprep.subr.bf16.mxu0 %v1883_v24  ;;  %v1490_v23 = vcombine.high %v49_v19, %v49_v19 }
  0x73   :  { %1737 = vmatprep.subr.bf16.mxu1 %v1884_v25 }
  0x75   :  { %1716 = vmatpush3.bf16.msra.mxu0 %v1885_v26 }
  0x76   :  { %1738 = vmatpush3.bf16.msra.mxu1 %v1886_v27  ;;  %1717 = vmatprep.subr.bf16.mxu0 %v1887_v28 }
  0x77   :  { %1739 = vmatprep.subr.bf16.mxu1 %v1888_v29 }
  0x79   :  { %1718 = vmatpush3.bf16.msra.mxu0 %v1889_v30 }
  0x7a   :  { %1740 = vmatpush3.bf16.msra.mxu1 %v1890_v31  ;;  %1719 = vmatprep.subr.bf16.mxu0 %v1891_v32 }
  0x7b   :  { %1741 = vmatprep.subr.bf16.mxu1 %v1892_v33 }
  0x7d   :  { %1720 = vmatpush3.bf16.msra.mxu0 %v1893_v34 }
  0x7e   :  { %1742 = vmatpush3.bf16.msra.mxu1 %v1894_v35  ;;  %1721 = vmatprep.subr.bf16.mxu0 %v1895_v36 }
  0x7f   :  { %1743 = vmatprep.subr.bf16.mxu1 %v1896_v37 }
  0x81   :  { %1722 = vmatpush3.bf16.msra.mxu0 %v1897_v38 }
  0x82   :  { %1744 = vmatpush3.bf16.msra.mxu1 %v1898_v39  ;;  %1723 = vmatprep.subr.bf16.mxu0 %v1899_v40 }
  0x83   :  { %1745 = vmatprep.subr.bf16.mxu1 %v1900_v41 }
  0x85   :  { %1724 = vmatpush3.bf16.msra.mxu0 %v1901_v42 }
  0x86   :  { %1746 = vmatpush3.bf16.msra.mxu1 %v1902_v43  ;;  %1753 = vmatprep.subr.bf16.mxu0 %v1907_v50 }
  0x87   :  { %1775 = vmatprep.subr.bf16.mxu1 %v1908_v51 }
  0x88   :  { %1323 = vmatmul.mubr.bf16.vlgmr.msra.gmra.mrb[8].mxu0 %v1483_v46 }
  0x89   :  { %1363 = vmatmul.mubr.bf16.vlgmr.msra.gmra.mrb[8].mxu1 %v1485_v48  ;;  %1754 = vmatpush3.bf16.msra.mxu0 %v1909_v52 }
  0x8a   :  { %1776 = vmatpush3.bf16.msra.mxu1 %v1910_v53  ;;  %1755 = vmatprep.subr.bf16.mxu0 %v1911_v54 }
  0x8b   :  { %1777 = vmatprep.subr.bf16.mxu1 %v1912_v55  ;;  %1402 = vmatprep.mubr.bf16.mxu0 %v1488_v21 }
  0x8c   :  { %1442 = vmatprep.mubr.bf16.mxu1 %v1490_v23 }
  0x8d   :  { %1756 = vmatpush3.bf16.msra.mxu0 %v1913_v56 }
  0x8e   :  { %1778 = vmatpush3.bf16.msra.mxu1 %v1914_v57  ;;  %1757 = vmatprep.subr.bf16.mxu0 %v1915_v58 }
  0x8f   :  { %1779 = vmatprep.subr.bf16.mxu1 %v1916_v59 }
  0x91   :  { %1758 = vmatpush3.bf16.msra.mxu0 %v1917_v60 }
  0x92   :  { %1780 = vmatpush3.bf16.msra.mxu1 %v1918_v61  ;;  %1759 = vmatprep.subr.bf16.mxu0 %v1919_v62 }
  0x93   :  { %1781 = vmatprep.subr.bf16.mxu1 %v1920_v63 }
  0x95   :  { %1760 = vmatpush3.bf16.msra.mxu0 %v1921_v0 }
  0x96   :  { %1782 = vmatpush3.bf16.msra.mxu1 %v1922_v1  ;;  %1761 = vmatprep.subr.bf16.mxu0 %v1923_v2 }
  0x97   :  { %1783 = vmatprep.subr.bf16.mxu1 %v1924_v3 }
  0x99   :  { %1762 = vmatpush3.bf16.msra.mxu0 %v1925_v4 }
  0x9a   :  { %1784 = vmatpush3.bf16.msra.mxu1 %v1926_v5  ;;  %1763 = vmatprep.subr.bf16.mxu0 %v1927_v6  ;;  %v1619_v6 = vld [vmem:[#allocation2] ss:$0 sm:$0xff] }
  0x9b   :  { %1785 = vmatprep.subr.bf16.mxu1 %v1928_v7 }
  0x9d   :  { %1764 = vmatpush3.bf16.msra.mxu0 %v1929_v8  ;;  %v1620_v8 = vld [vmem:[#allocation4] ss:$0 sm:$0xff] }
  0x9e   :  { %1786 = vmatpush3.bf16.msra.mxu1 %v1930_v9  ;;  %1765 = vmatprep.subr.bf16.mxu0 %v1931_v10 }
  0x9f   :  { %1787 = vmatprep.subr.bf16.mxu1 %v1932_v11 }
  0xa1   :  { %1766 = vmatpush3.bf16.msra.mxu0 %v1933_v12 }
  0xa2   :  { %1788 = vmatpush3.bf16.msra.mxu1 %v1934_v13  ;;  %1767 = vmatprep.subr.bf16.mxu0 %v1935_v14 }
  0xa3   :  { %1789 = vmatprep.subr.bf16.mxu1 %v1936_v15 }
  0xa5   :  { %1768 = vmatpush3.bf16.msra.mxu0 %v1937_v16 }
  0xa6   :  { %1790 = vmatpush3.bf16.msra.mxu1 %v1938_v17 }
  0xa8   :  { %1403 = vmatmul.mubr.bf16.vlgmr.msra.gmra.mrb[12].mxu0 %v1487_v20 }
  0xa9   :  { %1443 = vmatmul.mubr.bf16.vlgmr.msra.gmra.mrb[12].mxu1 %v1489_v22 }
 0x11b   :  { %v1637_v24 = vpop.f32.mrb[0].mxu0 }
 0x11c   :  { %v1659_v25 = vpop.f32.mrb[0].mxu1  ;;  %v1638_v26 = vpop.f32.mrb[1].mxu0 }
 0x11d   :  { %v1660_v27 = vpop.f32.mrb[1].mxu1  ;;  %v1639_v28 = vadd.f32 %v1638_v26, %v1637_v24  ;;  %v1640_v30 = vpop.f32.mrb[2].mxu0 }
 0x11e   :  { %v1661_v29 = vadd.f32 %v1660_v27, %v1659_v25  ;;  %v1662_v31 = vpop.f32.mrb[2].mxu1  ;;  %v1641_v32 = vpop.f32.mrb[3].mxu0 }
 0x11f   :  { %v1663_v33 = vpop.f32.mrb[3].mxu1 }
 0x120   :  { %v1205_v34 = vadd.f32 %v1661_v29, %v1639_v28 }
 0x13b   :  { %v1681_v35 = vpop.f32.mrb[4].mxu0 }
 0x13c   :  { %v1703_v36 = vpop.f32.mrb[4].mxu1  ;;  %v1682_v37 = vpop.f32.mrb[5].mxu0 }
 0x13d   :  { %v1704_v38 = vpop.f32.mrb[5].mxu1  ;;  %v1683_v39 = vadd.f32 %v1682_v37, %v1681_v35  ;;  %v1684_v41 = vpop.f32.mrb[6].mxu0 }
 0x13e   :  { %v1705_v40 = vadd.f32 %v1704_v38, %v1703_v36  ;;  %v1706_v42 = vpop.f32.mrb[6].mxu1  ;;  %v1685_v43 = vpop.f32.mrb[7].mxu0 }
 0x13f   :  { %v1707_v44 = vpop.f32.mrb[7].mxu1  ;;  %v1245_v45 = vadd.f32 %v1683_v39, %v1205_v34 }
 0x141   :  { %v1285_v46 = vadd.f32 %v1705_v40, %v1245_v45 }
 0x15b   :  { %v1725_v47 = vpop.f32.mrb[8].mxu0 }
 0x15c   :  { %v1747_v48 = vpop.f32.mrb[8].mxu1  ;;  %v1726_v49 = vpop.f32.mrb[9].mxu0 }
 0x15d   :  { %v1727_v50 = vadd.f32 %v1726_v49, %v1725_v47  ;;  %v1748_v51 = vpop.f32.mrb[9].mxu1  ;;  %v1728_v52 = vpop.f32.mrb[10].mxu0 }
 0x15e   :  { %v1749_v53 = vadd.f32 %v1748_v51, %v1747_v48  ;;  %v1750_v54 = vpop.f32.mrb[10].mxu1  ;;  %v1729_v55 = vpop.f32.mrb[11].mxu0 }
 0x15f   :  { %v1325_v56 = vadd.f32 %v1727_v50, %v1285_v46  ;;  %v1751_v57 = vpop.f32.mrb[11].mxu1 }
 0x161   :  { %v1365_v58 = vadd.f32 %v1749_v53, %v1325_v56 }
 0x17b   :  { %v1769_v59 = vpop.f32.mrb[12].mxu0 }
 0x17c   :  { %v1791_v60 = vpop.f32.mrb[12].mxu1  ;;  %v1770_v61 = vpop.f32.mrb[13].mxu0 }
 0x17d   :  { %v1771_v62 = vadd.f32 %v1770_v61, %v1769_v59  ;;  %v1792_v63 = vpop.f32.mrb[13].mxu1  ;;  %v1772_v0 = vpop.f32.mrb[14].mxu0 }
 0x17e   :  { %v1793_v1 = vadd.f32 %v1792_v63, %v1791_v60  ;;  %v1794_v2 = vpop.f32.mrb[14].mxu1  ;;  %v1773_v3 = vpop.f32.mrb[15].mxu0 }
 0x17f   :  { %v1405_v4 = vadd.f32 %v1771_v62, %v1365_v58  ;;  %v1795_v5 = vpop.f32.mrb[15].mxu1 }
 0x181   :  { %v1445_v7 = vadd.f32 %v1793_v1, %v1405_v4 }
 0x183   :  { %v1457_v9 = vmul.f32 %v1619_v6, %v1445_v7 }
 0x185   :  { %v1465_v10 = vadd.f32 %v1620_v8, %v1457_v9 }
 0x187   :  { %v1466_v11 = vpack.c.bf16 %v1465_v10, %v1465_v10 }
 0x189   :  { %1468 = vst.msk [vmem:[%s2457_s4] sm:$0xf] %vm1467_vm0, %v1466_v11 }
 0x18a   :  { %1473 = vsyncpa [#allocation3], 1 }
 0x18b   :  { %1474 = vsyncpa [#allocation5], 1 }

// kernel: _lambda_.31
= control target key start
LH: loop header
LB: loop body
LE: loop exit
PB: predicated region body
PF: predicated region fallthrough
CT: control target
= control target key end

     0   :  { %vm39_vm0 = vcmask 64512   ;;  %v1074_v0 = vmov 0.0   ;;  %vm1075_vm1 = vmmov 0   ;;  %vm408_vm2 = vcmask 27648   ;;  %s1328_s1 = inlined_call_operand.vmem [shape: bf16[2,4,4,8], index: 1, kind: input, shape index: {}]   ;;  %s1329_s0 = inlined_call_operand.vmem [shape: bf16[2,4,4,8], index: 0, kind: input, shape index: {}]   ;;  %s1330_s2 = inlined_call_operand.vmem [shape: bf16[2,4,4,8], index: 2, kind: input, shape index: {}]   ;;  %s1331_s3 = inlined_call_operand.vmem [shape: bf16[2,4,4,8], index: 3, kind: output, shape index: {}]  }
   0x1   :  { %944 = vmatprep.subr.bf16.mxu0 %v1074_v0  ;;  %950 = vmatprep.subr.bf16.mxu1 %v1074_v0  ;;  %v23_v1 = vld [vmem:[%s1328_s1] sm:$0x3]  ;;  %v24_v2 = vld [vmem:[%s1328_s1 + $0x2] sm:$0x3]  ;;  %v25_v5 = vld [vmem:[%s1328_s1 + $0x4] sm:$0x3] }
   0x2   :  { %v44_v3 = vsel %vm39_vm0, %v23_v1, 0  ;;  %v90_v4 = vsel %vm39_vm0, %v24_v2, 0  ;;  %946 = vmatprep.mubr.msk.bf16.mxu0 %vm1075_vm1, %v1074_v0  ;;  %952 = vmatprep.mubr.msk.bf16.mxu1 %vm1075_vm1, %v1074_v0  ;;  %v26_v6 = vld [vmem:[%s1328_s1 + $0x6] sm:$0x3]  ;;  %v15_v7 = vld [vmem:[%s1329_s0] sm:$0x3] }
   0x3   :  { %945 = vmatpush3.bf16.xpose.msra.mxu0 %v44_v3  ;;  %951 = vmatpush3.bf16.xpose.msra.mxu1 %v90_v4  ;;  %v16_v8 = vld [vmem:[%s1329_s0 + $0x2] sm:$0x3]  ;;  %v136_v9 = vsel %vm39_vm0, %v25_v5, 0  ;;  %v182_v10 = vsel %vm39_vm0, %v26_v6, 0  ;;  %v27_v11 = vld [vmem:[%s1328_s1 + $0x8] sm:$0x3] }
   0x4   :  { %956 = vmatprep.subr.bf16.mxu0 %v1074_v0  ;;  %962 = vmatprep.subr.bf16.mxu1 %v1074_v0  ;;  %v28_v12 = vld [vmem:[%s1328_s1 + $0xa] sm:$0x3]  ;;  %v17_v13 = vld [vmem:[%s1329_s0 + $0x4] sm:$0x3]  ;;  %v18_v14 = vld [vmem:[%s1329_s0 + $0x6] sm:$0x3] }
   0x5   :  { %v228_v15 = vsel %vm39_vm0, %v27_v11, 0  ;;  %v274_v16 = vsel %vm39_vm0, %v28_v12, 0  ;;  %v29_v17 = vld [vmem:[%s1328_s1 + $0xc] sm:$0x3]  ;;  %v30_v18 = vld [vmem:[%s1328_s1 + $0xe] sm:$0x3] }
   0x6   :  { %v19_v19 = vld [vmem:[%s1329_s0 + $0x8] sm:$0x3]  ;;  %v20_v20 = vld [vmem:[%s1329_s0 + $0xa] sm:$0x3]  ;;  %v320_v21 = vsel %vm39_vm0, %v29_v17, 0  ;;  %v366_v22 = vsel %vm39_vm0, %v30_v18, 0 }
   0x7   :  { %v21_v23 = vld [vmem:[%s1329_s0 + $0xc] sm:$0x3]  ;;  %v22_v24 = vld [vmem:[%s1329_s0 + $0xe] sm:$0x3]  ;;  %vm509_vm3 = vcmask 1041408   ;;  %vm505_vm4 = vcmask 31744  }
   0x8   :  { %vm883_vm5 = vcmask 58368  }
   0xa   :  { %947 = vmatmul.mubr.msk.bf16.vlgmr.msra.gmra.mrb[0].mxu0 %vm39_vm0, %v15_v7  ;;  %953 = vmatmul.mubr.msk.bf16.vlgmr.msra.gmra.mrb[0].mxu1 %vm39_vm0, %v16_v8 }
   0xb   :  { %957 = vmatpush3.bf16.xpose.msra.mxu0 %v136_v9  ;;  %963 = vmatpush3.bf16.xpose.msra.mxu1 %v182_v10 }
   0xc   :  { %958 = vmatprep.mubr.msk.bf16.mxu0 %vm1075_vm1, %v1074_v0  ;;  %964 = vmatprep.mubr.msk.bf16.mxu1 %vm1075_vm1, %v1074_v0 }
   0xd   :  { %968 = vmatprep.subr.bf16.mxu0 %v1074_v0  ;;  %974 = vmatprep.subr.bf16.mxu1 %v1074_v0 }
  0x12   :  { %959 = vmatmul.mubr.msk.bf16.vlgmr.msra.gmra.mrb[4].mxu0 %vm39_vm0, %v17_v13  ;;  %965 = vmatmul.mubr.msk.bf16.vlgmr.msra.gmra.mrb[4].mxu1 %vm39_vm0, %v18_v14 }
  0x13   :  { %969 = vmatpush3.bf16.xpose.msra.mxu0 %v228_v15  ;;  %975 = vmatpush3.bf16.xpose.msra.mxu1 %v274_v16 }
  0x14   :  { %970 = vmatprep.mubr.msk.bf16.mxu0 %vm1075_vm1, %v1074_v0  ;;  %976 = vmatprep.mubr.msk.bf16.mxu1 %vm1075_vm1, %v1074_v0 }
  0x15   :  { %980 = vmatprep.subr.bf16.mxu0 %v1074_v0  ;;  %986 = vmatprep.subr.bf16.mxu1 %v1074_v0 }
  0x1a   :  { %971 = vmatmul.mubr.msk.bf16.vlgmr.msra.gmra.mrb[8].mxu0 %vm39_vm0, %v19_v19  ;;  %977 = vmatmul.mubr.msk.bf16.vlgmr.msra.gmra.mrb[8].mxu1 %vm39_vm0, %v20_v20 }
  0x1b   :  { %981 = vmatpush3.bf16.xpose.msra.mxu0 %v320_v21  ;;  %987 = vmatpush3.bf16.xpose.msra.mxu1 %v366_v22 }
  0x1c   :  { %982 = vmatprep.mubr.msk.bf16.mxu0 %vm1075_vm1, %v1074_v0  ;;  %988 = vmatprep.mubr.msk.bf16.mxu1 %vm1075_vm1, %v1074_v0 }
  0x1d   :  { %992 = vmatprep.subr.bf16.mxu0 %v1074_v0  ;;  %998 = vmatprep.subr.bf16.mxu1 %v1074_v0 }
  0x22   :  { %983 = vmatmul.mubr.msk.bf16.vlgmr.msra.gmra.mrb[12].mxu0 %vm39_vm0, %v21_v23  ;;  %989 = vmatmul.mubr.msk.bf16.vlgmr.msra.gmra.mrb[12].mxu1 %vm39_vm0, %v22_v24 }
  0x23   :  { %994 = vmatprep.mubr.msk.bf16.mxu0 %vm1075_vm1, %v1074_v0  ;;  %1000 = vmatprep.mubr.msk.bf16.mxu1 %vm1075_vm1, %v1074_v0 }
  0xdd   :  { %v80_v25 = vpop.f32.mrb[0].mxu0  ;;  %v126_v26 = vpop.f32.mrb[0].mxu1 }
  0xde   :  { %v948_v27 = vpop.f32.mrb[1].mxu0  ;;  %v409_v28 = vsel %vm408_vm2, %v80_v25, -inf  ;;  %v954_v29 = vpop.f32.mrb[1].mxu1  ;;  %v412_v34 = vsel %vm408_vm2, %v126_v26, -inf }
  0xdf   :  { %410 = vmax.xlane.f32.xlu0 %v409_v28  ;;  %v83_v30 = vpop.f32.mrb[2].mxu0  ;;  %v129_v31 = vpop.f32.mrb[2].mxu1 }
  0xe0   :  { %v949_v32 = vpop.f32.mrb[3].mxu0  ;;  %v955_v33 = vpop.f32.mrb[3].mxu1 }
  0xe3   :  { %413 = vmax.xlane.f32.xlu0 %v412_v34 }
  0xe5   :  { %v172_v35 = vpop.f32.mrb[4].mxu0  ;;  %v218_v36 = vpop.f32.mrb[4].mxu1 }
  0xe6   :  { %v960_v37 = vpop.f32.mrb[5].mxu0  ;;  %v415_v38 = vsel %vm408_vm2, %v172_v35, -inf  ;;  %v966_v39 = vpop.f32.mrb[5].mxu1  ;;  %v418_v44 = vsel %vm408_vm2, %v218_v36, -inf }
  0xe7   :  { %416 = vmax.xlane.f32.xlu1 %v415_v38  ;;  %v175_v40 = vpop.f32.mrb[6].mxu0  ;;  %v221_v41 = vpop.f32.mrb[6].mxu1 }
  0xe8   :  { %v961_v42 = vpop.f32.mrb[7].mxu0  ;;  %v967_v43 = vpop.f32.mrb[7].mxu1 }
  0xe9   :  { %v31_v42 = vld [vmem:[%s1330_s2] sm:$0x3] }
  0xea   :  { %v511_v43 = vsel %vm509_vm3, %v31_v42, 0 }
  0xeb   :  { %419 = vmax.xlane.f32.xlu1 %v418_v44  ;;  %993 = vmatpush3.bf16.msra.mxu0 %v511_v43  ;;  %v32_v44 = vld [vmem:[%s1330_s2 + $0x2] sm:$0x3] }
  0xec   :  { %1004 = vmatprep.subr.bf16.mxu0 %v1074_v0 }
  0xed   :  { %v264_v45 = vpop.f32.mrb[8].mxu0  ;;  %v310_v46 = vpop.f32.mrb[8].mxu1 }
  0xee   :  { %v424_v47 = vsel %vm408_vm2, %v310_v46, -inf  ;;  %v421_v48 = vsel %vm408_vm2, %v264_v45, -inf  ;;  %v972_v49 = vpop.f32.mrb[9].mxu0  ;;  %v978_v50 = vpop.f32.mrb[9].mxu1 }
  0xef   :  { %425 = vmax.xlane.f32.xlu1 %v424_v47  ;;  %422 = vmax.xlane.f32.xlu0 %v421_v48  ;;  %v267_v51 = vpop.f32.mrb[10].mxu0  ;;  %v313_v52 = vpop.f32.mrb[10].mxu1  ;;  %v34_v48 = vld [vmem:[%s1330_s2 + $0x6] sm:$0x3]  ;;  %v35_v50 = vld [vmem:[%s1330_s2 + $0x8] sm:$0x3] }
  0xf0   :  { %v973_v53 = vpop.f32.mrb[11].mxu0  ;;  %v979_v54 = vpop.f32.mrb[11].mxu1  ;;  %v649_v49 = vsel %vm509_vm3, %v34_v48, 0  ;;  %v695_v51 = vsel %vm509_vm3, %v35_v50, 0  ;;  %v36_v52 = vld [vmem:[%s1330_s2 + $0xa] sm:$0x3] }
  0xf1   :  { %v741_v53 = vsel %vm509_vm3, %v36_v52, 0  ;;  %v37_v54 = vld [vmem:[%s1330_s2 + $0xc] sm:$0x3] }
  0xf5   :  { %v356_v55 = vpop.f32.mrb[12].mxu0  ;;  %v402_v56 = vpop.f32.mrb[12].mxu1 }
  0xf6   :  { %v430_v57 = vsel %vm408_vm2, %v402_v56, -inf  ;;  %v427_v58 = vsel %vm408_vm2, %v356_v55, -inf  ;;  %v984_v59 = vpop.f32.mrb[13].mxu0  ;;  %v990_v60 = vpop.f32.mrb[13].mxu1 }
  0xf7   :  { %431 = vmax.xlane.f32.xlu1 %v430_v57  ;;  %428 = vmax.xlane.f32.xlu0 %v427_v58  ;;  %v359_v61 = vpop.f32.mrb[14].mxu0  ;;  %v405_v62 = vpop.f32.mrb[14].mxu1 }
  0xf8   :  { %v985_v63 = vpop.f32.mrb[15].mxu0  ;;  %v991_v1 = vpop.f32.mrb[15].mxu1 }
 0x16c   :  { %v411_v2 = vpop.xlane.xlu0 %410 }
 0x16d   :  { %v433_v3 = vsub.f32 %v80_v25, %v411_v2 }
 0x16f   :  { %v441_v4 = vmul.f32 1.442695, %v433_v3 }
 0x170   :  { %v414_v5 = vpop.xlane.xlu0 %413 }
 0x171   :  { %1042 = vpow2.f32 %v441_v4  ;;  %v434_v6 = vsub.f32 %v126_v26, %v414_v5 }
 0x173   :  { %v443_v7 = vmul.f32 1.442695, %v434_v6 }
 0x174   :  { %v417_v8 = vpop.xlane.xlu1 %416 }
 0x175   :  { %1044 = vpow2.f32 %v443_v7  ;;  %v435_v9 = vsub.f32 %v172_v35, %v417_v8 }
 0x177   :  { %v445_v10 = vmul.f32 1.442695, %v435_v9 }
 0x178   :  { %v420_v11 = vpop.xlane.xlu1 %419 }
 0x179   :  { %1046 = vpow2.f32 %v445_v10  ;;  %v436_v12 = vsub.f32 %v218_v36, %v420_v11 }
 0x17b   :  { %v1198_v13 = vpop.eup %1042  ;;  %v447_v14 = vmul.f32 1.442695, %v436_v12 }
 0x17c   :  { %v426_v15 = vpop.xlane.xlu1 %425  ;;  %v423_v16 = vpop.xlane.xlu0 %422  ;;  %v457_v17 = vsel %vm408_vm2, %v1198_v13, 0.0 }
 0x17d   :  { %1048 = vpow2.f32 %v447_v14  ;;  %v438_v18 = vsub.f32 %v310_v46, %v426_v15  ;;  %v437_v19 = vsub.f32 %v264_v45, %v423_v16  ;;  %458 = vadd.xlane.f32.xlu0 %v457_v17  ;;  %v557_v45 = vsel %vm509_vm3, %v32_v44, 0  ;;  %v33_v46 = vld [vmem:[%s1330_s2 + $0x4] sm:$0x3] }
 0x17e   :  { %999 = vmatpush3.bf16.msra.mxu1 %v557_v45  ;;  %v603_v47 = vsel %vm509_vm3, %v33_v46, 0 }
 0x17f   :  { %v1202_v20 = vpop.eup %1044  ;;  %v451_v21 = vmul.f32 1.442695, %v438_v18  ;;  %v449_v22 = vmul.f32 1.442695, %v437_v19  ;;  %1010 = vmatprep.subr.bf16.mxu1 %v1074_v0 }
 0x180   :  { %v460_v23 = vsel %vm408_vm2, %v1202_v20, 0.0 }
 0x181   :  { %1050 = vpow2.f32 %v451_v21  ;;  %461 = vadd.xlane.f32.xlu1 %v460_v23 }
 0x182   :  { %1052 = vpow2.f32 %v449_v22 }
 0x183   :  { %v1206_v24 = vpop.eup %1046 }
 0x184   :  { %v432_v25 = vpop.xlane.xlu1 %431  ;;  %v429_v26 = vpop.xlane.xlu0 %428  ;;  %v463_v27 = vsel %vm408_vm2, %v1206_v24, 0.0 }
 0x185   :  { %v440_v28 = vsub.f32 %v402_v56, %v432_v25  ;;  %v439_v29 = vsub.f32 %v356_v55, %v429_v26  ;;  %464 = vadd.xlane.f32.xlu0 %v463_v27  ;;  %v787_v55 = vsel %vm509_vm3, %v37_v54, 0  ;;  %v38_v56 = vld [vmem:[%s1330_s2 + $0xe] sm:$0x3] }
 0x186   :  { %v833_v57 = vsel %vm509_vm3, %v38_v56, 0 }
 0x187   :  { %v1210_v30 = vpop.eup %1048  ;;  %v455_v31 = vmul.f32 1.442695, %v440_v28  ;;  %v453_v32 = vmul.f32 1.442695, %v439_v29 }
 0x188   :  { %v466_v33 = vsel %vm408_vm2, %v1210_v30, 0.0 }
 0x189   :  { %1054 = vpow2.f32 %v455_v31  ;;  %467 = vadd.xlane.f32.xlu1 %v466_v33 }
 0x18a   :  { %1056 = vpow2.f32 %v453_v32 }
 0x18b   :  { %v1214_v34 = vpop.eup %1050 }
 0x18c   :  { %v1216_v35 = vpop.eup %1052  ;;  %v472_v36 = vsel %vm408_vm2, %v1214_v34, 0.0 }
 0x18d   :  { %473 = vadd.xlane.f32.xlu1 %v472_v36  ;;  %v469_v37 = vsel %vm408_vm2, %v1216_v35, 0.0 }
 0x18e   :  { %470 = vadd.xlane.f32.xlu0 %v469_v37 }
 0x193   :  { %v1222_v38 = vpop.eup %1054 }
 0x194   :  { %v1224_v39 = vpop.eup %1056  ;;  %v478_v40 = vsel %vm408_vm2, %v1222_v38, 0.0 }
 0x195   :  { %479 = vadd.xlane.f32.xlu1 %v478_v40  ;;  %v475_v41 = vsel %vm408_vm2, %v1224_v39, 0.0 }
 0x196   :  { %476 = vadd.xlane.f32.xlu0 %v475_v41 }
 0x20a   :  { %v459_v58 = vpop.xlane.xlu0 %458 }
 0x20b   :  { %1058 = vrcp.f32 %v459_v58 }
 0x20e   :  { %v462_v59 = vpop.xlane.xlu1 %461 }
 0x20f   :  { %1060 = vrcp.f32 %v462_v59 }
 0x212   :  { %v465_v60 = vpop.xlane.xlu0 %464 }
 0x213   :  { %1062 = vrcp.f32 %v465_v60 }
 0x215   :  { %v1059_v61 = vpop.eup %1058 }
 0x216   :  { %v489_v62 = vmul.f32 %v1059_v61, %v1198_v13  ;;  %v468_v63 = vpop.xlane.xlu1 %467 }
 0x217   :  { %1064 = vrcp.f32 %v468_v63 }
 0x218   :  { %v497_v1 = vpack.c.bf16 %v489_v62, %v489_v62 }
 0x219   :  { %v1061_v2 = vpop.eup %1060 }
 0x21a   :  { %v490_v3 = vmul.f32 %v1061_v2, %v1202_v20  ;;  %v474_v4 = vpop.xlane.xlu1 %473  ;;  %995 = vmatmul.mubr.msk.bf16.vlgmr.msra.gmra.mrb[16].mxu0 %vm505_vm4, %v497_v1 }
 0x21b   :  { %1066 = vrcp.f32 %v474_v4  ;;  %v471_v5 = vpop.xlane.xlu0 %470  ;;  %1005 = vmatpush3.bf16.msra.mxu0 %v603_v47  ;;  %1006 = vmatprep.mubr.msk.bf16.mxu0 %vm1075_vm1, %v1074_v0 }
 0x21c   :  { %1068 = vrcp.f32 %v471_v5  ;;  %v498_v6 = vpack.c.bf16 %v490_v3, %v490_v3  ;;  %1016 = vmatprep.subr.bf16.mxu0 %v1074_v0 }
 0x21d   :  { %v1063_v7 = vpop.eup %1062 }
 0x21e   :  { %v491_v8 = vmul.f32 %v1063_v7, %v1206_v24  ;;  %1001 = vmatmul.mubr.msk.bf16.vlgmr.msra.gmra.mrb[16].mxu1 %vm505_vm4, %v498_v6 }
 0x21f   :  { %1011 = vmatpush3.bf16.msra.mxu1 %v649_v49  ;;  %1012 = vmatprep.mubr.msk.bf16.mxu1 %vm1075_vm1, %v1074_v0 }
 0x220   :  { %v499_v9 = vpack.c.bf16 %v491_v8, %v491_v8  ;;  %1022 = vmatprep.subr.bf16.mxu1 %v1074_v0 }
 0x221   :  { %v1065_v10 = vpop.eup %1064 }
 0x222   :  { %v492_v11 = vmul.f32 %v1065_v10, %v1210_v30  ;;  %v480_v12 = vpop.xlane.xlu1 %479  ;;  %1007 = vmatmul.mubr.msk.bf16.vlgmr.msra.gmra.mrb[20].mxu0 %vm505_vm4, %v499_v9 }
 0x223   :  { %1070 = vrcp.f32 %v480_v12  ;;  %v477_v13 = vpop.xlane.xlu0 %476  ;;  %1017 = vmatpush3.bf16.msra.mxu0 %v695_v51  ;;  %1018 = vmatprep.mubr.msk.bf16.mxu0 %vm1075_vm1, %v1074_v0 }
 0x224   :  { %1072 = vrcp.f32 %v477_v13  ;;  %v500_v14 = vpack.c.bf16 %v492_v11, %v492_v11  ;;  %1028 = vmatprep.subr.bf16.mxu0 %v1074_v0 }
 0x225   :  { %v1067_v15 = vpop.eup %1066 }
 0x226   :  { %v1069_v16 = vpop.eup %1068  ;;  %1013 = vmatmul.mubr.msk.bf16.vlgmr.msra.gmra.mrb[20].mxu1 %vm505_vm4, %v500_v14  ;;  %v494_v18 = vmul.f32 %v1067_v15, %v1214_v34 }
 0x227   :  { %v493_v17 = vmul.f32 %v1069_v16, %v1216_v35  ;;  %1023 = vmatpush3.bf16.msra.mxu1 %v741_v53  ;;  %1024 = vmatprep.mubr.msk.bf16.mxu1 %vm1075_vm1, %v1074_v0 }
 0x228   :  { %1034 = vmatprep.subr.bf16.mxu1 %v1074_v0  ;;  %v502_v20 = vpack.c.bf16 %v494_v18, %v494_v18 }
 0x229   :  { %v501_v19 = vpack.c.bf16 %v493_v17, %v493_v17 }
 0x22b   :  { %1019 = vmatmul.mubr.msk.bf16.vlgmr.msra.gmra.mrb[24].mxu0 %vm505_vm4, %v501_v19 }
 0x22c   :  { %1029 = vmatpush3.bf16.msra.mxu0 %v787_v55  ;;  %1030 = vmatprep.mubr.msk.bf16.mxu0 %vm1075_vm1, %v1074_v0 }
 0x22d   :  { %v1071_v21 = vpop.eup %1070 }
 0x22e   :  { %v1073_v22 = vpop.eup %1072  ;;  %1025 = vmatmul.mubr.msk.bf16.vlgmr.msra.gmra.mrb[24].mxu1 %vm505_vm4, %v502_v20  ;;  %v496_v24 = vmul.f32 %v1071_v21, %v1222_v38 }
 0x22f   :  { %v495_v23 = vmul.f32 %v1073_v22, %v1224_v39  ;;  %1035 = vmatpush3.bf16.msra.mxu1 %v833_v57  ;;  %1036 = vmatprep.mubr.msk.bf16.mxu1 %vm1075_vm1, %v1074_v0 }
 0x230   :  { %v504_v26 = vpack.c.bf16 %v496_v24, %v496_v24 }
 0x231   :  { %v503_v25 = vpack.c.bf16 %v495_v23, %v495_v23 }
 0x233   :  { %1031 = vmatmul.mubr.msk.bf16.vlgmr.msra.gmra.mrb[28].mxu0 %vm505_vm4, %v503_v25 }
 0x236   :  { %1037 = vmatmul.mubr.msk.bf16.vlgmr.msra.gmra.mrb[28].mxu1 %vm505_vm4, %v504_v26 }
 0x2ed   :  { %v547_v27 = vpop.f32.mrb[16].mxu0 }
 0x2ee   :  { %v875_v28 = vpack.c.bf16 %v547_v27, %v547_v27  ;;  %v996_v29 = vpop.f32.mrb[17].mxu0 }
 0x2ef   :  { %v550_v30 = vpop.f32.mrb[18].mxu0 }
 0x2f0   :  { %884 = vst.msk [vmem:[%s1331_s3] sm:$0x3] %vm883_vm5, %v875_v28  ;;  %v997_v31 = vpop.f32.mrb[19].mxu0 }
 0x2f1   :  { %v593_v0 = vpop.f32.mrb[16].mxu1 }
 0x2f2   :  { %v876_v32 = vpack.c.bf16 %v593_v0, %v593_v0  ;;  %v1002_v33 = vpop.f32.mrb[17].mxu1 }
 0x2f3   :  { %v596_v34 = vpop.f32.mrb[18].mxu1 }
 0x2f4   :  { %885 = vst.msk [vmem:[%s1331_s3 + $0x2] sm:$0x3] %vm883_vm5, %v876_v32  ;;  %v1003_v35 = vpop.f32.mrb[19].mxu1 }
 0x2f5   :  { %v639_v36 = vpop.f32.mrb[20].mxu0 }
 0x2f6   :  { %v877_v37 = vpack.c.bf16 %v639_v36, %v639_v36  ;;  %v1008_v38 = vpop.f32.mrb[21].mxu0 }
 0x2f7   :  { %v642_v39 = vpop.f32.mrb[22].mxu0 }
 0x2f8   :  { %886 = vst.msk [vmem:[%s1331_s3 + $0x4] sm:$0x3] %vm883_vm5, %v877_v37  ;;  %v1009_v40 = vpop.f32.mrb[23].mxu0 }
 0x2f9   :  { %v685_v41 = vpop.f32.mrb[20].mxu1 }
 0x2fa   :  { %v878_v42 = vpack.c.bf16 %v685_v41, %v685_v41  ;;  %v1014_v43 = vpop.f32.mrb[21].mxu1 }
 0x2fb   :  { %v688_v44 = vpop.f32.mrb[22].mxu1 }
 0x2fc   :  { %887 = vst.msk [vmem:[%s1331_s3 + $0x6] sm:$0x3] %vm883_vm5, %v878_v42  ;;  %v1015_v45 = vpop.f32.mrb[23].mxu1 }
 0x2fe   :  { %v731_v46 = vpop.f32.mrb[24].mxu0 }
 0x2ff   :  { %v879_v47 = vpack.c.bf16 %v731_v46, %v731_v46  ;;  %v1020_v48 = vpop.f32.mrb[25].mxu0 }
 0x300   :  { %v734_v49 = vpop.f32.mrb[26].mxu0 }
 0x301   :  { %888 = vst.msk [vmem:[%s1331_s3 + $0x8] sm:$0x3] %vm883_vm5, %v879_v47  ;;  %v1021_v50 = vpop.f32.mrb[27].mxu0  ;;  %v777_v51 = vpop.f32.mrb[24].mxu1 }
 0x302   :  { %v880_v52 = vpack.c.bf16 %v777_v51, %v777_v51  ;;  %v1026_v53 = vpop.f32.mrb[25].mxu1 }
 0x303   :  { %v780_v54 = vpop.f32.mrb[26].mxu1 }
 0x304   :  { %889 = vst.msk [vmem:[%s1331_s3 + $0xa] sm:$0x3] %vm883_vm5, %v880_v52  ;;  %v1027_v55 = vpop.f32.mrb[27].mxu1 }
 0x306   :  { %v823_v56 = vpop.f32.mrb[28].mxu0 }
 0x307   :  { %v881_v57 = vpack.c.bf16 %v823_v56, %v823_v56  ;;  %v1032_v58 = vpop.f32.mrb[29].mxu0 }
 0x308   :  { %v826_v59 = vpop.f32.mrb[30].mxu0 }
 0x309   :  { %890 = vst.msk [vmem:[%s1331_s3 + $0xc] sm:$0x3] %vm883_vm5, %v881_v57  ;;  %v1033_v60 = vpop.f32.mrb[31].mxu0  ;;  %v869_v61 = vpop.f32.mrb[28].mxu1 }
 0x30a   :  { %v882_v62 = vpack.c.bf16 %v869_v61, %v869_v61  ;;  %v1038_v63 = vpop.f32.mrb[29].mxu1 }
 0x30b   :  { %v872_v1 = vpop.f32.mrb[30].mxu1 }
 0x30c   :  { %891 = vst.msk [vmem:[%s1331_s3 + $0xe] sm:$0x3] %vm883_vm5, %v882_v62  ;;  %v1039_v2 = vpop.f32.mrb[31].mxu1 }

// kernel: _lambda_.33
= control target key start
LH: loop header
LB: loop body
LE: loop exit
PB: predicated region body
PF: predicated region fallthrough
CT: control target
= control target key end

     0   :  { %vm22_vm0 = vcmask 261120   ;;  %vm54_vm1 = vcmask 257024   ;;  %s104_s0 = inlined_call_operand.vmem [shape: bf16[8,32], index: 0, kind: input, shape index: {}]   ;;  %s105_s1 = inlined_call_operand.vmem [shape: bf16[8,32], index: 1, kind: input, shape index: {}]   ;;  %s106_s2 = inlined_call_operand.vmem [shape: f32[1,32], index: 2, kind: input, shape index: {}]   ;;  %s107_s3 = inlined_call_operand.vmem [shape: f32[1,32], index: 3, kind: input, shape index: {}]   ;;  %s108_s4 = inlined_call_operand.vmem [shape: bf16[8,32], index: 4, kind: output, shape index: {}]  }
   0x1   :  { %v17_v0 = vld [vmem:[%s104_s0] sm:$0xf] }
   0x2   :  { %v19_v1 = vld [vmem:[%s105_s1] sm:$0xf]  ;;  %v18_v2 = vunpack.c.l.bf16 %v17_v0 }
   0x3   :  { %v20_v3 = vunpack.c.l.bf16 %v19_v1  ;;  %v60_v15 = vld [vmem:[%s106_s2] ss:$0 sm:$0xff] }
   0x4   :  { %v61_v17 = vld [vmem:[%s107_s3] ss:$0 sm:$0xff] }
   0x5   :  { %v21_v4 = vadd.f32 %v20_v3, %v18_v2 }
   0x7   :  { %v23_v5 = vsel %vm22_vm0, %v21_v4, 0.0 }
   0x8   :  { %24 = vadd.xlane.f32.xlu0 %v23_v5 }
  0x95   :  { %v25_v6 = vpop.xlane.xlu0 %24 }
  0x96   :  { %v27_v7 = vmul.f32 0.03125, %v25_v6 }
  0x98   :  { %v28_v8 = vsub.f32 %v21_v4, %v27_v7 }
  0x9a   :  { %v29_v9 = vmul.f32 %v28_v8, %v28_v8 }
  0x9c   :  { %v30_v10 = vsel %vm22_vm0, %v29_v9, 0.0 }
  0x9d   :  { %31 = vadd.xlane.f32.xlu0 %v30_v10 }
 0x12a   :  { %v32_v11 = vpop.xlane.xlu0 %31 }
 0x12b   :  { %v33_v12 = vmul.f32 0.03125, %v32_v11 }
 0x12d   :  { %v34_v13 = vadd.f32 1e-05, %v33_v12 }
 0x12f   :  { %62 = vrsqrt.f32 %v34_v13 }
 0x139   :  { %v63_v14 = vpop.eup %62 }
 0x13a   :  { %v36_v16 = vmul.f32 %v63_v14, %v28_v8 }
 0x13c   :  { %v44_v18 = vmul.f32 %v60_v15, %v36_v16 }
 0x13e   :  { %v52_v19 = vadd.f32 %v61_v17, %v44_v18 }
 0x140   :  { %v53_v20 = vpack.c.bf16 %v52_v19, %v52_v19 }
 0x142   :  { %55 = vst.msk [vmem:[%s108_s4] sm:$0xf] %vm54_vm1, %v53_v20 }

// kernel: _lambda_.34
= control target key start
LH: loop header
LB: loop body
LE: loop exit
PB: predicated region body
PF: predicated region fallthrough
CT: control target
= control target key end

     0   :  { %v123_v0 = vmov 0.0   ;;  %vm124_vm0 = vmmov 0   ;;  %vm35_vm1 = vcmask 261120   ;;  %vm97_vm2 = vcmask 257024   ;;  %s168_s1 = inlined_call_operand.vmem [shape: bf16[32,32], index: 1, kind: input, shape index: {}]   ;;  %s169_s0 = inlined_call_operand.vmem [shape: bf16[8,32], index: 0, kind: input, shape index: {}]   ;;  %s170_s2 = inlined_call_operand.vmem [shape: f32[1,32], index: 2, kind: input, shape index: {}]   ;;  %s171_s3 = inlined_call_operand.vmem [shape: f32[1,32], index: 3, kind: input, shape index: {}]   ;;  %s172_s4 = inlined_call_operand.vmem [shape: bf16[8,32], index: 4, kind: output, shape index: {}]  }
   0x1   :  { %111 = vmatprep.subr.bf16.mxu0 %v123_v0  ;;  %v121_v1 = vld [vmem:[%s168_s1] sm:$0xff]   ;;  %115 = vmatprep.mubr.msk.bf16.mxu0 %vm124_vm0, %v123_v0  ;;  %v122_v2 = vld [vmem:[%s168_s1 + $0x8] sm:$0xff]  }
   0x2   :  { %112 = vmatpush3.bf16.msra.mxu0 %v121_v1  ;;  %v18_v3 = vld [vmem:[%s169_s0] sm:$0xf] }
   0x3   :  { %113 = vmatprep.subr.bf16.mxu0 %v123_v0  ;;  %v106_v4 = vld [vmem:[%s170_s2] ss:$0 sm:$0xff] }
   0x4   :  { %v107_v6 = vld [vmem:[%s171_s3] ss:$0 sm:$0xff] }
   0x6   :  { %114 = vmatpush3.bf16.msra.mxu0 %v122_v2 }
   0x9   :  { %116 = vmatmul.mubr.msk.bf16.vlgmr.msra.gmra.mrb[0].mxu0 %vm35_vm1, %v18_v3 }
  0xdc   :  { %v73_v5 = vpop.f32.mrb[0].mxu0 }
  0xdd   :  { %v86_v7 = vmul.f32 %v106_v4, %v73_v5  ;;  %v117_v8 = vpop.f32.mrb[1].mxu0 }
  0xde   :  { %v76_v9 = vpop.f32.mrb[2].mxu0 }
  0xdf   :  { %v94_v10 = vadd.f32 %v107_v6, %v86_v7  ;;  %v118_v11 = vpop.f32.mrb[3].mxu0 }
  0xe1   :  { %v95_v12 = vmax.f32 %v94_v10, 0.0 }
  0xe3   :  { %v96_v13 = vpack.c.bf16 %v95_v12, %v95_v12 }
  0xe5   :  { %98 = vst.msk [vmem:[%s172_s4] sm:$0xf] %vm97_vm2, %v96_v13 }

// kernel: _lambda_.41
= control target key start
LH: loop header
LB: loop body
LE: loop exit
PB: predicated region body
PF: predicated region fallthrough
CT: control target
= control target key end

     0   :  { %9 = vsyncpa [#allocation3], 0  ;;  %s264_s0 = inlined_call_operand.vmem [shape: bf16[8,32], index: 0, kind: input, shape index: {}]   ;;  %s265_s1 = inlined_call_operand.vmem [shape: bf16[32,32], index: 1, kind: input, shape index: {}]   ;;  %s266_s2 = inlined_call_operand.hbm [shape: f32[1,32], index: 2, kind: input, shape index: {}]   ;;  %s267_s3 = inlined_call_operand.hbm [shape: f32[1,32], index: 3, kind: input, shape index: {}]   ;;  %s268_s4 = inlined_call_operand.vmem [shape: bf16[8,32], index: 4, kind: output, shape index: {}]  }
   0x1   :  { %10 = vsyncpa [#allocation5], 0  ;;  %s199_s15 = smov [#allocation2]   ;;  %s200_s17 = smov [#allocation4]  }
   0x2   :  { %s21_s16 = sshll.u32 %s199_s15, 4  ;;  %s31_s18 = sshll.u32 %s200_s17, 4  ;;  %s22_s16 = int_to_ptr.vmem [resolvable:$true] %s21_s16  ;;  %s32_s18 = int_to_ptr.vmem [resolvable:$true] %s31_s18 }
   0x3   :  { %s151_s21 = scalar_lea.hbm %s266_s2, 16 }
   0x4   :  { %p152_p0 = scmp.ne.s32.totalorder %s266_s2, %s151_s21  ;;  %p155_p1 = scmp.lt.u32.totalorder %s151_s21, %s266_s2 }
   0x6   :  { %p157_p2 = pnand %p155_p1, %p152_p0 }
   0x8   :  { %160 = shalt.err (!%p157_p2)
}
   0x9   :  { %s161_s26 = scalar_lea.vmem %s22_s16, 16  ;;  %s165_s27 = scalar_lea.vmem %s22_s16, 32 }
   0xa   :  { %p162_p3 = scmp.ne.s32.totalorder %s22_s16, %s161_s26  ;;  %p166_p4 = scmp.lt.s32.totalorder %s22_s16, %s22_s16 }
   0xb   :  { %p167_p5 = scmp.lt.s32.totalorder %s165_s27, %s161_s26 }
   0xd   :  { %p168_p6 = por %p167_p5, %p166_p4 }
   0xf   :  { %p169_p7 = pnand %p168_p6, %p162_p3 }
  0x11   :  { %172 = shalt.err (!%p169_p7)
}
  0x12   :  { %24 = dma.hbm_to_vmem [thread:$0]  %s266_s2, 16, %s22_s16, [#allocation3]  }
  0x13   :  { %s173_s6 = scalar_lea.hbm %s267_s3, 16 }
  0x14   :  { %p174_p8 = scmp.ne.s32.totalorder %s267_s3, %s173_s6  ;;  %p177_p9 = scmp.lt.u32.totalorder %s173_s6, %s267_s3 }
  0x16   :  { %p179_p10 = pnand %p177_p9, %p174_p8 }
  0x18   :  { %182 = shalt.err (!%p179_p10)
}
  0x19   :  { %s183_s11 = scalar_lea.vmem %s32_s18, 16  ;;  %s187_s12 = scalar_lea.vmem %s32_s18, 32 }
  0x1a   :  { %p184_p11 = scmp.ne.s32.totalorder %s32_s18, %s183_s11  ;;  %p188_p12 = scmp.lt.s32.totalorder %s32_s18, %s32_s18 }
  0x1b   :  { %p189_p13 = scmp.lt.s32.totalorder %s187_s12, %s183_s11 }
  0x1d   :  { %p190_p0 = por %p189_p13, %p188_p12 }
  0x1f   :  { %p191_p1 = pnand %p190_p0, %p184_p11 }
  0x21   :  { %194 = shalt.err (!%p191_p1)
}
  0x22   :  { %34 = dma.hbm_to_vmem [thread:$0]  %s267_s3, 16, %s32_s18, [#allocation5]  }
  0x23   :  { %195 = dma.done.wait [#allocation3], 16  }
  0x24   :  { %196 = vsyncadd [#allocation3], 4294967280 }
  0x25   :  { %197 = dma.done.wait [#allocation5], 16  }
  0x26   :  { %198 = vsyncadd [#allocation5], 4294967280  ;;  %v201_v0 = vmov 0.0   ;;  %vm202_vm0 = vmmov 0   ;;  %v149_v1 = vld [vmem:[%s265_s1] sm:$0xff]   ;;  %v150_v2 = vld [vmem:[%s265_s1 + $0x8] sm:$0xff]  }
  0x27   :  { %137 = vmatprep.subr.bf16.mxu0 %v201_v0  ;;  %141 = vmatprep.mubr.msk.bf16.mxu0 %vm202_vm0, %v201_v0  ;;  %v42_v3 = vld [vmem:[%s264_s0] sm:$0xf]  ;;  %vm59_vm1 = vcmask 261120   ;;  %vm121_vm2 = vcmask 257024  }
  0x28   :  { %138 = vmatpush3.bf16.msra.mxu0 %v149_v1  ;;  %v132_v4 = vld [vmem:[#allocation2] ss:$0 sm:$0xff]  ;;  %v133_v6 = vld [vmem:[#allocation4] ss:$0 sm:$0xff] }
  0x29   :  { %139 = vmatprep.subr.bf16.mxu0 %v201_v0 }
  0x2c   :  { %140 = vmatpush3.bf16.msra.mxu0 %v150_v2 }
  0x2f   :  { %142 = vmatmul.mubr.msk.bf16.vlgmr.msra.gmra.mrb[0].mxu0 %vm59_vm1, %v42_v3 }
 0x102   :  { %v97_v5 = vpop.f32.mrb[0].mxu0 }
 0x103   :  { %v110_v7 = vmul.f32 %v132_v4, %v97_v5  ;;  %v143_v8 = vpop.f32.mrb[1].mxu0 }
 0x104   :  { %v100_v9 = vpop.f32.mrb[2].mxu0 }
 0x105   :  { %v118_v10 = vadd.f32 %v133_v6, %v110_v7  ;;  %v144_v11 = vpop.f32.mrb[3].mxu0 }
 0x107   :  { %v119_v12 = vmax.f32 %v118_v10, 0.0 }
 0x109   :  { %v120_v13 = vpack.c.bf16 %v119_v12, %v119_v12 }
 0x10b   :  { %122 = vst.msk [vmem:[%s268_s4] sm:$0xf] %vm121_vm2, %v120_v13 }
 0x10c   :  { %127 = vsyncpa [#allocation3], 1 }
 0x10d   :  { %128 = vsyncpa [#allocation5], 1 }

// kernel: _lambda_.44
= control target key start
LH: loop header
LB: loop body
LE: loop exit
PB: predicated region body
PF: predicated region fallthrough
CT: control target
= control target key end

     0   :  { %9 = vsyncpa [#allocation3], 0  ;;  %s263_s0 = inlined_call_operand.vmem [shape: bf16[8,32], index: 0, kind: input, shape index: {}]   ;;  %s264_s1 = inlined_call_operand.vmem [shape: bf16[32,96], index: 1, kind: input, shape index: {}]   ;;  %s265_s2 = inlined_call_operand.hbm [shape: f32[1,96], index: 2, kind: input, shape index: {}]   ;;  %s266_s3 = inlined_call_operand.hbm [shape: f32[1,96], index: 3, kind: input, shape index: {}]   ;;  %s267_s4 = inlined_call_operand.vmem [shape: bf16[8,96], index: 4, kind: output, shape index: {}]  }
   0x1   :  { %10 = vsyncpa [#allocation5], 0  ;;  %s198_s15 = smov [#allocation2]   ;;  %s199_s17 = smov [#allocation4]  }
   0x2   :  { %s21_s16 = sshll.u32 %s198_s15, 4  ;;  %s31_s18 = sshll.u32 %s199_s17, 4  ;;  %s22_s16 = int_to_ptr.vmem [resolvable:$true] %s21_s16  ;;  %s32_s18 = int_to_ptr.vmem [resolvable:$true] %s31_s18 }
   0x3   :  { %s150_s21 = scalar_lea.hbm %s265_s2, 16 }
   0x4   :  { %p151_p0 = scmp.ne.s32.totalorder %s265_s2, %s150_s21  ;;  %p154_p1 = scmp.lt.u32.totalorder %s150_s21, %s265_s2 }
   0x6   :  { %p156_p2 = pnand %p154_p1, %p151_p0 }
   0x8   :  { %159 = shalt.err (!%p156_p2)
}
   0x9   :  { %s160_s26 = scalar_lea.vmem %s22_s16, 16  ;;  %s164_s27 = scalar_lea.vmem %s22_s16, 32 }
   0xa   :  { %p161_p3 = scmp.ne.s32.totalorder %s22_s16, %s160_s26  ;;  %p165_p4 = scmp.lt.s32.totalorder %s22_s16, %s22_s16 }
   0xb   :  { %p166_p5 = scmp.lt.s32.totalorder %s164_s27, %s160_s26 }
   0xd   :  { %p167_p6 = por %p166_p5, %p165_p4 }
   0xf   :  { %p168_p7 = pnand %p167_p6, %p161_p3 }
  0x11   :  { %171 = shalt.err (!%p168_p7)
}
  0x12   :  { %24 = dma.hbm_to_vmem [thread:$0]  %s265_s2, 16, %s22_s16, [#allocation3]  }
  0x13   :  { %s172_s6 = scalar_lea.hbm %s266_s3, 16 }
  0x14   :  { %p173_p8 = scmp.ne.s32.totalorder %s266_s3, %s172_s6  ;;  %p176_p9 = scmp.lt.u32.totalorder %s172_s6, %s266_s3 }
  0x16   :  { %p178_p10 = pnand %p176_p9, %p173_p8 }
  0x18   :  { %181 = shalt.err (!%p178_p10)
}
  0x19   :  { %s182_s11 = scalar_lea.vmem %s32_s18, 16  ;;  %s186_s12 = scalar_lea.vmem %s32_s18, 32 }
  0x1a   :  { %p183_p11 = scmp.ne.s32.totalorder %s32_s18, %s182_s11  ;;  %p187_p12 = scmp.lt.s32.totalorder %s32_s18, %s32_s18 }
  0x1b   :  { %p188_p13 = scmp.lt.s32.totalorder %s186_s12, %s182_s11 }
  0x1d   :  { %p189_p0 = por %p188_p13, %p187_p12 }
  0x1f   :  { %p190_p1 = pnand %p189_p0, %p183_p11 }
  0x21   :  { %193 = shalt.err (!%p190_p1)
}
  0x22   :  { %34 = dma.hbm_to_vmem [thread:$0]  %s266_s3, 16, %s32_s18, [#allocation5]  }
  0x23   :  { %194 = dma.done.wait [#allocation3], 16  }
  0x24   :  { %195 = vsyncadd [#allocation3], 4294967280 }
  0x25   :  { %196 = dma.done.wait [#allocation5], 16  }
  0x26   :  { %197 = vsyncadd [#allocation5], 4294967280  ;;  %v200_v0 = vmov 0.0   ;;  %vm201_vm0 = vmmov 0   ;;  %v148_v1 = vld [vmem:[%s264_s1] sm:$0xff]   ;;  %v149_v2 = vld [vmem:[%s264_s1 + $0x8] sm:$0xff]  }
  0x27   :  { %136 = vmatprep.subr.bf16.mxu0 %v200_v0  ;;  %140 = vmatprep.mubr.msk.bf16.mxu0 %vm201_vm0, %v200_v0  ;;  %v42_v3 = vld [vmem:[%s263_s0] sm:$0xf]  ;;  %vm59_vm1 = vcmask 261120   ;;  %vm120_vm2 = vcmask 781312  }
  0x28   :  { %137 = vmatpush3.bf16.msra.mxu0 %v148_v1  ;;  %v131_v4 = vld [vmem:[#allocation2] ss:$0 sm:$0xff]  ;;  %v132_v6 = vld [vmem:[#allocation4] ss:$0 sm:$0xff] }
  0x29   :  { %138 = vmatprep.subr.bf16.mxu0 %v200_v0 }
  0x2c   :  { %139 = vmatpush3.bf16.msra.mxu0 %v149_v2 }
  0x2f   :  { %141 = vmatmul.mubr.msk.bf16.vlgmr.msra.gmra.mrb[0].mxu0 %vm59_vm1, %v42_v3 }
 0x102   :  { %v97_v5 = vpop.f32.mrb[0].mxu0 }
 0x103   :  { %v110_v7 = vmul.f32 %v131_v4, %v97_v5  ;;  %v142_v8 = vpop.f32.mrb[1].mxu0 }
 0x104   :  { %v100_v9 = vpop.f32.mrb[2].mxu0 }
 0x105   :  { %v118_v10 = vadd.f32 %v132_v6, %v110_v7  ;;  %v143_v11 = vpop.f32.mrb[3].mxu0 }
 0x107   :  { %v119_v12 = vpack.c.bf16 %v118_v10, %v118_v10 }
 0x109   :  { %121 = vst.msk [vmem:[%s267_s4] sm:$0xf] %vm120_vm2, %v119_v12 }
 0x10a   :  { %126 = vsyncpa [#allocation3], 1 }
 0x10b   :  { %127 = vsyncpa [#allocation5], 1 }

// kernel: _lambda_.39
= control target key start
LH: loop header
LB: loop body
LE: loop exit
PB: predicated region body
PF: predicated region fallthrough
CT: control target
= control target key end

     0   :  { %9 = vsyncpa [#allocation3], 0  ;;  %s263_s0 = inlined_call_operand.vmem [shape: bf16[8,32], index: 0, kind: input, shape index: {}]   ;;  %s264_s1 = inlined_call_operand.vmem [shape: bf16[32,32], index: 1, kind: input, shape index: {}]   ;;  %s265_s2 = inlined_call_operand.hbm [shape: f32[1,32], index: 2, kind: input, shape index: {}]   ;;  %s266_s3 = inlined_call_operand.hbm [shape: f32[1,32], index: 3, kind: input, shape index: {}]   ;;  %s267_s4 = inlined_call_operand.vmem [shape: bf16[8,32], index: 4, kind: output, shape index: {}]  }
   0x1   :  { %10 = vsyncpa [#allocation5], 0  ;;  %s198_s15 = smov [#allocation2]   ;;  %s199_s17 = smov [#allocation4]  }
   0x2   :  { %s21_s16 = sshll.u32 %s198_s15, 4  ;;  %s31_s18 = sshll.u32 %s199_s17, 4  ;;  %s22_s16 = int_to_ptr.vmem [resolvable:$true] %s21_s16  ;;  %s32_s18 = int_to_ptr.vmem [resolvable:$true] %s31_s18 }
   0x3   :  { %s150_s21 = scalar_lea.hbm %s265_s2, 16 }
   0x4   :  { %p151_p0 = scmp.ne.s32.totalorder %s265_s2, %s150_s21  ;;  %p154_p1 = scmp.lt.u32.totalorder %s150_s21, %s265_s2 }
   0x6   :  { %p156_p2 = pnand %p154_p1, %p151_p0 }
   0x8   :  { %159 = shalt.err (!%p156_p2)
}
   0x9   :  { %s160_s26 = scalar_lea.vmem %s22_s16, 16  ;;  %s164_s27 = scalar_lea.vmem %s22_s16, 32 }
   0xa   :  { %p161_p3 = scmp.ne.s32.totalorder %s22_s16, %s160_s26  ;;  %p165_p4 = scmp.lt.s32.totalorder %s22_s16, %s22_s16 }
   0xb   :  { %p166_p5 = scmp.lt.s32.totalorder %s164_s27, %s160_s26 }
   0xd   :  { %p167_p6 = por %p166_p5, %p165_p4 }
   0xf   :  { %p168_p7 = pnand %p167_p6, %p161_p3 }
  0x11   :  { %171 = shalt.err (!%p168_p7)
}
  0x12   :  { %24 = dma.hbm_to_vmem [thread:$0]  %s265_s2, 16, %s22_s16, [#allocation3]  }
  0x13   :  { %s172_s6 = scalar_lea.hbm %s266_s3, 16 }
  0x14   :  { %p173_p8 = scmp.ne.s32.totalorder %s266_s3, %s172_s6  ;;  %p176_p9 = scmp.lt.u32.totalorder %s172_s6, %s266_s3 }
  0x16   :  { %p178_p10 = pnand %p176_p9, %p173_p8 }
  0x18   :  { %181 = shalt.err (!%p178_p10)
}
  0x19   :  { %s182_s11 = scalar_lea.vmem %s32_s18, 16  ;;  %s186_s12 = scalar_lea.vmem %s32_s18, 32 }
  0x1a   :  { %p183_p11 = scmp.ne.s32.totalorder %s32_s18, %s182_s11  ;;  %p187_p12 = scmp.lt.s32.totalorder %s32_s18, %s32_s18 }
  0x1b   :  { %p188_p13 = scmp.lt.s32.totalorder %s186_s12, %s182_s11 }
  0x1d   :  { %p189_p0 = por %p188_p13, %p187_p12 }
  0x1f   :  { %p190_p1 = pnand %p189_p0, %p183_p11 }
  0x21   :  { %193 = shalt.err (!%p190_p1)
}
  0x22   :  { %34 = dma.hbm_to_vmem [thread:$0]  %s266_s3, 16, %s32_s18, [#allocation5]  }
  0x23   :  { %194 = dma.done.wait [#allocation3], 16  }
  0x24   :  { %195 = vsyncadd [#allocation3], 4294967280 }
  0x25   :  { %196 = dma.done.wait [#allocation5], 16  }
  0x26   :  { %197 = vsyncadd [#allocation5], 4294967280  ;;  %v200_v0 = vmov 0.0   ;;  %vm201_vm0 = vmmov 0   ;;  %v148_v1 = vld [vmem:[%s264_s1] sm:$0xff]   ;;  %v149_v2 = vld [vmem:[%s264_s1 + $0x8] sm:$0xff]  }
  0x27   :  { %136 = vmatprep.subr.bf16.mxu0 %v200_v0  ;;  %140 = vmatprep.mubr.msk.bf16.mxu0 %vm201_vm0, %v200_v0  ;;  %v42_v3 = vld [vmem:[%s263_s0] sm:$0xf]  ;;  %vm59_vm1 = vcmask 261120   ;;  %vm120_vm2 = vcmask 257024  }
  0x28   :  { %137 = vmatpush3.bf16.msra.mxu0 %v148_v1  ;;  %v131_v4 = vld [vmem:[#allocation2] ss:$0 sm:$0xff]  ;;  %v132_v6 = vld [vmem:[#allocation4] ss:$0 sm:$0xff] }
  0x29   :  { %138 = vmatprep.subr.bf16.mxu0 %v200_v0 }
  0x2c   :  { %139 = vmatpush3.bf16.msra.mxu0 %v149_v2 }
  0x2f   :  { %141 = vmatmul.mubr.msk.bf16.vlgmr.msra.gmra.mrb[0].mxu0 %vm59_vm1, %v42_v3 }
 0x102   :  { %v97_v5 = vpop.f32.mrb[0].mxu0 }
 0x103   :  { %v110_v7 = vmul.f32 %v131_v4, %v97_v5  ;;  %v142_v8 = vpop.f32.mrb[1].mxu0 }
 0x104   :  { %v100_v9 = vpop.f32.mrb[2].mxu0 }
 0x105   :  { %v118_v10 = vadd.f32 %v132_v6, %v110_v7  ;;  %v143_v11 = vpop.f32.mrb[3].mxu0 }
 0x107   :  { %v119_v12 = vpack.c.bf16 %v118_v10, %v118_v10 }
 0x109   :  { %121 = vst.msk [vmem:[%s267_s4] sm:$0xf] %vm120_vm2, %v119_v12 }
 0x10a   :  { %126 = vsyncpa [#allocation3], 1 }
 0x10b   :  { %127 = vsyncpa [#allocation5], 1 }

// kernel: _lambda_.51
= control target key start
LH: loop header
LB: loop body
LE: loop exit
PB: predicated region body
PF: predicated region fallthrough
CT: control target
= control target key end

     0   :  { %vm1758_vm0 = vcmask 261120   ;;  %s4209_s1 = inlined_call_operand.vmem [shape: bf16[288,2048], index: 1, kind: input, shape index: {}]   ;;  %s4210_s0 = inlined_call_operand.vmem [shape: bf16[8,288], index: 0, kind: input, shape index: {}]   ;;  %s4211_s2 = inlined_call_operand.vmem [shape: f32[1,2048], index: 2, kind: input, shape index: {}]   ;;  %s4212_s3 = inlined_call_operand.vmem [shape: f32[1,2048], index: 3, kind: input, shape index: {}]   ;;  %s4213_s4 = inlined_call_operand.vmem [shape: bf16[8,2048], index: 4, kind: output, shape index: {}]  }
   0x1   :  { %v20_v0 = vld [vmem:[%s4209_s1] sm:$0xff]  ;;  %v21_v2 = vld [vmem:[%s4209_s1 + $0x8] sm:$0xff] }
   0x2   :  { %v28_v1 = vld [vmem:[%s4209_s1 + $0x40] sm:$0xff]  ;;  %v29_v4 = vld [vmem:[%s4209_s1 + $0x48] sm:$0xff] }
   0x3   :  { %v2778_v3 = vcombine.high %v20_v0, %v28_v1  ;;  %v2777_v5 = vcombine.low %v20_v0, %v28_v1  ;;  %v36_v6 = vld [vmem:[%s4209_s1 + $0x80] sm:$0xff]  ;;  %v2780_v8 = vcombine.high %v21_v2, %v29_v4  ;;  %v2779_v9 = vcombine.low %v21_v2, %v29_v4  ;;  %v37_v11 = vld [vmem:[%s4209_s1 + $0x88] sm:$0xff] }
   0x4   :  { %v44_v7 = vld [vmem:[%s4209_s1 + $0xc0] sm:$0xff]  ;;  %v45_v12 = vld [vmem:[%s4209_s1 + $0xc8] sm:$0xff] }
   0x5   :  { %v2794_v10 = vcombine.high %v36_v6, %v44_v7  ;;  %v52_v13 = vld [vmem:[%s4209_s1 + $0x100] sm:$0xff]  ;;  %1762 = vmatprep.subr.bf16.mxu0 %v2778_v3  ;;  %v2796_v14 = vcombine.high %v37_v11, %v45_v12  ;;  %v53_v16 = vld [vmem:[%s4209_s1 + $0x108] sm:$0xff]  ;;  %1844 = vmatprep.subr.bf16.mxu1 %v2780_v8  ;;  %v2793_v18 = vcombine.low %v36_v6, %v44_v7 }
   0x6   :  { %v60_v15 = vld [vmem:[%s4209_s1 + $0x140] sm:$0xff]  ;;  %v61_v17 = vld [vmem:[%s4209_s1 + $0x148] sm:$0xff]  ;;  %1763 = vmatpush1.bf16.msra.mxu0 %v2777_v5  ;;  %1845 = vmatpush1.bf16.msra.mxu1 %v2779_v9  ;;  %v2795_v19 = vcombine.low %v37_v11, %v45_v12 }
   0x7   :  { %1764 = vmatprep.subr.bf16.mxu0 %v2794_v10  ;;  %v2810_v20 = vcombine.high %v52_v13, %v60_v15  ;;  %1846 = vmatprep.subr.bf16.mxu1 %v2796_v14  ;;  %v2812_v21 = vcombine.high %v53_v16, %v61_v17  ;;  %v68_v22 = vld [vmem:[%s4209_s1 + $0x180] sm:$0xff]  ;;  %v69_v24 = vld [vmem:[%s4209_s1 + $0x188] sm:$0xff]  ;;  %v2809_v26 = vcombine.low %v52_v13, %v60_v15 }
   0x8   :  { %v76_v23 = vld [vmem:[%s4209_s1 + $0x1c0] sm:$0xff]  ;;  %v77_v25 = vld [vmem:[%s4209_s1 + $0x1c8] sm:$0xff]  ;;  %v2811_v27 = vcombine.low %v53_v16, %v61_v17 }
   0x9   :  { %v2826_v28 = vcombine.high %v68_v22, %v76_v23  ;;  %v2828_v29 = vcombine.high %v69_v24, %v77_v25  ;;  %v84_v30 = vld [vmem:[%s4209_s1 + $0x200] sm:$0xff]  ;;  %v85_v32 = vld [vmem:[%s4209_s1 + $0x208] sm:$0xff]  ;;  %v2825_v34 = vcombine.low %v68_v22, %v76_v23  ;;  %v2827_v35 = vcombine.low %v69_v24, %v77_v25 }
   0xa   :  { %1765 = vmatpush1.bf16.msra.mxu0 %v2793_v18  ;;  %1847 = vmatpush1.bf16.msra.mxu1 %v2795_v19  ;;  %v92_v31 = vld [vmem:[%s4209_s1 + $0x240] sm:$0xff]  ;;  %v93_v33 = vld [vmem:[%s4209_s1 + $0x248] sm:$0xff] }
   0xb   :  { %1766 = vmatprep.subr.bf16.mxu0 %v2810_v20  ;;  %1848 = vmatprep.subr.bf16.mxu1 %v2812_v21  ;;  %v2842_v36 = vcombine.high %v84_v30, %v92_v31  ;;  %v2844_v37 = vcombine.high %v85_v32, %v93_v33  ;;  %v100_v38 = vld [vmem:[%s4209_s1 + $0x280] sm:$0xff]  ;;  %v101_v40 = vld [vmem:[%s4209_s1 + $0x288] sm:$0xff]  ;;  %v2841_v42 = vcombine.low %v84_v30, %v92_v31 }
   0xc   :  { %v108_v39 = vld [vmem:[%s4209_s1 + $0x2c0] sm:$0xff]  ;;  %v109_v41 = vld [vmem:[%s4209_s1 + $0x2c8] sm:$0xff]  ;;  %v2843_v43 = vcombine.low %v85_v32, %v93_v33 }
   0xd   :  { %v2858_v44 = vcombine.high %v100_v38, %v108_v39  ;;  %v2860_v45 = vcombine.high %v101_v40, %v109_v41  ;;  %v116_v46 = vld [vmem:[%s4209_s1 + $0x300] sm:$0xff]  ;;  %v117_v48 = vld [vmem:[%s4209_s1 + $0x308] sm:$0xff]  ;;  %v2857_v50 = vcombine.low %v100_v38, %v108_v39  ;;  %v2859_v51 = vcombine.low %v101_v40, %v109_v41 }
   0xe   :  { %1767 = vmatpush1.bf16.msra.mxu0 %v2809_v26  ;;  %1849 = vmatpush1.bf16.msra.mxu1 %v2811_v27  ;;  %v124_v47 = vld [vmem:[%s4209_s1 + $0x340] sm:$0xff]  ;;  %v125_v49 = vld [vmem:[%s4209_s1 + $0x348] sm:$0xff] }
   0xf   :  { %1768 = vmatprep.subr.bf16.mxu0 %v2826_v28  ;;  %1850 = vmatprep.subr.bf16.mxu1 %v2828_v29  ;;  %v2874_v52 = vcombine.high %v116_v46, %v124_v47  ;;  %v3239_v53 = vld [vmem:[%s4210_s0] sm:$0xff]  ;;  %v2876_v54 = vcombine.high %v117_v48, %v125_v49  ;;  %v133_v58 = vld [vmem:[%s4209_s1 + $0x388] sm:$0xff]  ;;  %v2873_v60 = vcombine.low %v116_v46, %v124_v47 }
  0x10   :  { %v132_v55 = vld [vmem:[%s4209_s1 + $0x380] sm:$0xff]  ;;  %v3249_v57 = vcombine.high %v3239_v53, %v3239_v53  ;;  %v141_v59 = vld [vmem:[%s4209_s1 + $0x3c8] sm:$0xff]  ;;  %v2875_v61 = vcombine.low %v117_v48, %v125_v49 }
  0x11   :  { %v140_v56 = vld [vmem:[%s4209_s1 + $0x3c0] sm:$0xff]  ;;  %v2892_v63 = vcombine.high %v133_v58, %v141_v59  ;;  %v149_v2 = vld [vmem:[%s4209_s1 + $0x408] sm:$0xff]  ;;  %v2891_v5 = vcombine.low %v133_v58, %v141_v59 }
  0x12   :  { %1769 = vmatpush1.bf16.msra.mxu0 %v2825_v34  ;;  %1851 = vmatpush1.bf16.msra.mxu1 %v2827_v35  ;;  %v2890_v62 = vcombine.high %v132_v55, %v140_v56  ;;  %v148_v0 = vld [vmem:[%s4209_s1 + $0x400] sm:$0xff]  ;;  %v157_v3 = vld [vmem:[%s4209_s1 + $0x448] sm:$0xff]  ;;  %v2889_v4 = vcombine.low %v132_v55, %v140_v56 }
  0x13   :  { %1770 = vmatprep.subr.bf16.mxu0 %v2842_v36  ;;  %1852 = vmatprep.subr.bf16.mxu1 %v2844_v37  ;;  %v156_v1 = vld [vmem:[%s4209_s1 + $0x440] sm:$0xff]  ;;  %v2908_v7 = vcombine.high %v149_v2, %v157_v3  ;;  %v165_v10 = vld [vmem:[%s4209_s1 + $0x488] sm:$0xff]  ;;  %v2907_v13 = vcombine.low %v149_v2, %v157_v3 }
  0x14   :  { %1794 = vmatprep.mubr.bf16.mxu0 %v3249_v57  ;;  %1876 = vmatprep.mubr.bf16.mxu1 %v3249_v57  ;;  %v2906_v6 = vcombine.high %v148_v0, %v156_v1  ;;  %v164_v8 = vld [vmem:[%s4209_s1 + $0x480] sm:$0xff]  ;;  %v173_v11 = vld [vmem:[%s4209_s1 + $0x4c8] sm:$0xff]  ;;  %v2905_v12 = vcombine.low %v148_v0, %v156_v1 }
  0x15   :  { %v172_v9 = vld [vmem:[%s4209_s1 + $0x4c0] sm:$0xff]  ;;  %v2924_v15 = vcombine.high %v165_v10, %v173_v11  ;;  %v181_v18 = vld [vmem:[%s4209_s1 + $0x508] sm:$0xff]  ;;  %v2923_v21 = vcombine.low %v165_v10, %v173_v11 }
  0x16   :  { %1771 = vmatpush1.bf16.msra.mxu0 %v2841_v42  ;;  %1853 = vmatpush1.bf16.msra.mxu1 %v2843_v43  ;;  %v2922_v14 = vcombine.high %v164_v8, %v172_v9  ;;  %v180_v16 = vld [vmem:[%s4209_s1 + $0x500] sm:$0xff]  ;;  %v189_v19 = vld [vmem:[%s4209_s1 + $0x548] sm:$0xff]  ;;  %v2921_v20 = vcombine.low %v164_v8, %v172_v9 }
  0x17   :  { %1772 = vmatprep.subr.bf16.mxu0 %v2858_v44  ;;  %1854 = vmatprep.subr.bf16.mxu1 %v2860_v45  ;;  %v188_v17 = vld [vmem:[%s4209_s1 + $0x540] sm:$0xff]  ;;  %v2940_v23 = vcombine.high %v181_v18, %v189_v19  ;;  %v197_v26 = vld [vmem:[%s4209_s1 + $0x588] sm:$0xff]  ;;  %v2939_v29 = vcombine.low %v181_v18, %v189_v19  ;;  %v30_v19 = vld [vmem:[%s4209_s1 + $0x50] sm:$0xff] }
  0x18   :  { %v2938_v22 = vcombine.high %v180_v16, %v188_v17  ;;  %v196_v24 = vld [vmem:[%s4209_s1 + $0x580] sm:$0xff]  ;;  %v205_v27 = vld [vmem:[%s4209_s1 + $0x5c8] sm:$0xff]  ;;  %v2937_v28 = vcombine.low %v180_v16, %v188_v17 }
  0x19   :  { %v204_v25 = vld [vmem:[%s4209_s1 + $0x5c0] sm:$0xff]  ;;  %v2956_v31 = vcombine.high %v197_v26, %v205_v27  ;;  %v213_v34 = vld [vmem:[%s4209_s1 + $0x608] sm:$0xff]  ;;  %v2955_v37 = vcombine.low %v197_v26, %v205_v27  ;;  %v38_v27 = vld [vmem:[%s4209_s1 + $0x90] sm:$0xff] }
  0x1a   :  { %1773 = vmatpush1.bf16.msra.mxu0 %v2857_v50  ;;  %1855 = vmatpush1.bf16.msra.mxu1 %v2859_v51  ;;  %v2954_v30 = vcombine.high %v196_v24, %v204_v25  ;;  %v212_v32 = vld [vmem:[%s4209_s1 + $0x600] sm:$0xff]  ;;  %v221_v35 = vld [vmem:[%s4209_s1 + $0x648] sm:$0xff]  ;;  %v2953_v36 = vcombine.low %v196_v24, %v204_v25  ;;  %v3126_v25 = vmov 0  }
  0x1b   :  { %1774 = vmatprep.subr.bf16.mxu0 %v2874_v52  ;;  %1856 = vmatprep.subr.bf16.mxu1 %v2876_v54  ;;  %v220_v33 = vld [vmem:[%s4209_s1 + $0x640] sm:$0xff]  ;;  %v2972_v39 = vcombine.high %v213_v34, %v221_v35  ;;  %v229_v42 = vld [vmem:[%s4209_s1 + $0x688] sm:$0xff]  ;;  %v2971_v45 = vcombine.low %v213_v34, %v221_v35 }
  0x1c   :  { %v2970_v38 = vcombine.high %v212_v32, %v220_v33  ;;  %v228_v40 = vld [vmem:[%s4209_s1 + $0x680] sm:$0xff]  ;;  %v237_v43 = vld [vmem:[%s4209_s1 + $0x6c8] sm:$0xff]  ;;  %v2969_v44 = vcombine.low %v212_v32, %v220_v33 }
  0x1d   :  { %v236_v41 = vld [vmem:[%s4209_s1 + $0x6c0] sm:$0xff]  ;;  %v2988_v47 = vcombine.high %v229_v42, %v237_v43  ;;  %v245_v50 = vld [vmem:[%s4209_s1 + $0x708] sm:$0xff]  ;;  %v2987_v54 = vcombine.low %v229_v42, %v237_v43 }
  0x1e   :  { %1775 = vmatpush1.bf16.msra.mxu0 %v2873_v60  ;;  %1857 = vmatpush1.bf16.msra.mxu1 %v2875_v61  ;;  %v2986_v46 = vcombine.high %v228_v40, %v236_v41  ;;  %v244_v48 = vld [vmem:[%s4209_s1 + $0x700] sm:$0xff]  ;;  %v253_v51 = vld [vmem:[%s4209_s1 + $0x748] sm:$0xff]  ;;  %v2985_v52 = vcombine.low %v228_v40, %v236_v41 }
  0x1f   :  { %1776 = vmatprep.subr.bf16.mxu0 %v2890_v62  ;;  %1858 = vmatprep.subr.bf16.mxu1 %v2892_v63  ;;  %v252_v49 = vld [vmem:[%s4209_s1 + $0x740] sm:$0xff]  ;;  %v3004_v56 = vcombine.high %v245_v50, %v253_v51  ;;  %v261_v60 = vld [vmem:[%s4209_s1 + $0x788] sm:$0xff]  ;;  %v3003_v63 = vcombine.low %v245_v50, %v253_v51 }
  0x20   :  { %v3002_v55 = vcombine.high %v244_v48, %v252_v49  ;;  %v260_v58 = vld [vmem:[%s4209_s1 + $0x780] sm:$0xff]  ;;  %v269_v61 = vld [vmem:[%s4209_s1 + $0x7c8] sm:$0xff]  ;;  %v3001_v62 = vcombine.low %v244_v48, %v252_v49 }
  0x21   :  { %v268_v59 = vld [vmem:[%s4209_s1 + $0x7c0] sm:$0xff]  ;;  %v3020_v1 = vcombine.high %v261_v60, %v269_v61 }
  0x22   :  { %1777 = vmatpush1.bf16.msra.mxu0 %v2889_v4  ;;  %1859 = vmatpush1.bf16.msra.mxu1 %v2891_v5  ;;  %v3018_v0 = vcombine.high %v260_v58, %v268_v59  ;;  %v276_v2 = vld [vmem:[%s4209_s1 + $0x800] sm:$0xff]  ;;  %v277_v4 = vld [vmem:[%s4209_s1 + $0x808] sm:$0xff] }
  0x23   :  { %1778 = vmatprep.subr.bf16.mxu0 %v2906_v6  ;;  %1860 = vmatprep.subr.bf16.mxu1 %v2908_v7  ;;  %v284_v3 = vld [vmem:[%s4209_s1 + $0x840] sm:$0xff]  ;;  %v285_v5 = vld [vmem:[%s4209_s1 + $0x848] sm:$0xff]  ;;  %v3017_v6 = vcombine.low %v260_v58, %v268_v59  ;;  %v3019_v7 = vcombine.low %v261_v60, %v269_v61 }
  0x24   :  { %v3034_v8 = vcombine.high %v276_v2, %v284_v3  ;;  %v3036_v9 = vcombine.high %v277_v4, %v285_v5  ;;  %v292_v10 = vld [vmem:[%s4209_s1 + $0x880] sm:$0xff]  ;;  %v3035_v16 = vcombine.low %v277_v4, %v285_v5 }
  0x25   :  { %v300_v11 = vld [vmem:[%s4209_s1 + $0x8c0] sm:$0xff] }
  0x26   :  { %1779 = vmatpush1.bf16.msra.mxu0 %v2905_v12  ;;  %1861 = vmatpush1.bf16.msra.mxu1 %v2907_v13  ;;  %v3375_v12 = vcombine.low %v3239_v53, %v3239_v53  ;;  %v293_v13 = vld [vmem:[%s4209_s1 + $0x888] sm:$0xff]  ;;  %v3050_v17 = vcombine.high %v292_v10, %v300_v11  ;;  %v22_v53 = vld [vmem:[%s4209_s1 + $0x10] sm:$0xff] }
  0x27   :  { %1780 = vmatprep.subr.bf16.mxu0 %v2922_v14  ;;  %1862 = vmatprep.subr.bf16.mxu1 %v2924_v15  ;;  %v301_v14 = vld [vmem:[%s4209_s1 + $0x8c8] sm:$0xff]  ;;  %v3033_v15 = vcombine.low %v276_v2, %v284_v3  ;;  %v2782_v24 = vcombine.high %v22_v53, %v30_v19  ;;  %v2781_v32 = vcombine.low %v22_v53, %v30_v19 }
  0x28   :  { %v3052_v18 = vcombine.high %v293_v13, %v301_v14 }
  0x2a   :  { %1781 = vmatpush1.bf16.msra.mxu0 %v2921_v20  ;;  %1863 = vmatpush1.bf16.msra.mxu1 %v2923_v21  ;;  %v23_v20 = vld [vmem:[%s4209_s1 + $0x18] sm:$0xff] }
  0x2b   :  { %1782 = vmatprep.subr.bf16.mxu0 %v2938_v22  ;;  %1864 = vmatprep.subr.bf16.mxu1 %v2940_v23  ;;  %v31_v21 = vld [vmem:[%s4209_s1 + $0x58] sm:$0xff]  ;;  %v3049_v22 = vcombine.low %v292_v10, %v300_v11  ;;  %v3051_v23 = vcombine.low %v293_v13, %v301_v14 }
  0x2c   :  { %v2784_v26 = vcombine.high %v23_v20, %v31_v21  ;;  %v2783_v33 = vcombine.low %v23_v20, %v31_v21 }
  0x2e   :  { %1783 = vmatpush1.bf16.msra.mxu0 %v2937_v28  ;;  %1865 = vmatpush1.bf16.msra.mxu1 %v2939_v29  ;;  %v46_v28 = vld [vmem:[%s4209_s1 + $0xd0] sm:$0xff]  ;;  %v3408_v29 = vld [vmem:[%s4210_s0 + $0x8] ss:$0 sps:$4 sm:$0xff]  }
  0x2f   :  { %1784 = vmatprep.subr.bf16.mxu0 %v2954_v30  ;;  %1866 = vmatprep.subr.bf16.mxu1 %v2956_v31  ;;  %v39_v30 = vld [vmem:[%s4209_s1 + $0x98] sm:$0xff]  ;;  %v2798_v34 = vcombine.high %v38_v27, %v46_v28  ;;  %v2797_v40 = vcombine.low %v38_v27, %v46_v28 }
  0x30   :  { %v47_v31 = vld [vmem:[%s4209_s1 + $0xd8] sm:$0xff] }
  0x31   :  { %v2800_v35 = vcombine.high %v39_v30, %v47_v31  ;;  %v2799_v41 = vcombine.low %v39_v30, %v47_v31 }
  0x32   :  { %1785 = vmatpush1.bf16.msra.mxu0 %v2953_v36  ;;  %1867 = vmatpush1.bf16.msra.mxu1 %v2955_v37  ;;  %v54_v36 = vld [vmem:[%s4209_s1 + $0x110] sm:$0xff] }
  0x33   :  { %1786 = vmatprep.subr.bf16.mxu0 %v2970_v38  ;;  %1868 = vmatprep.subr.bf16.mxu1 %v2972_v39  ;;  %v62_v37 = vld [vmem:[%s4209_s1 + $0x150] sm:$0xff]  ;;  %v55_v38 = vld [vmem:[%s4209_s1 + $0x118] sm:$0xff] }
  0x34   :  { %v63_v39 = vld [vmem:[%s4209_s1 + $0x158] sm:$0xff]  ;;  %v2814_v42 = vcombine.high %v54_v36, %v62_v37  ;;  %v2813_v48 = vcombine.low %v54_v36, %v62_v37 }
  0x35   :  { %v2816_v43 = vcombine.high %v55_v38, %v63_v39  ;;  %v2815_v49 = vcombine.low %v55_v38, %v63_v39 }
  0x36   :  { %1787 = vmatpush1.bf16.msra.mxu0 %v2969_v44  ;;  %1869 = vmatpush1.bf16.msra.mxu1 %v2971_v45  ;;  %v70_v44 = vld [vmem:[%s4209_s1 + $0x190] sm:$0xff] }
  0x37   :  { %1788 = vmatprep.subr.bf16.mxu0 %v2986_v46  ;;  %1870 = vmatprep.subr.bf16.mxu1 %v2988_v47  ;;  %v78_v45 = vld [vmem:[%s4209_s1 + $0x1d0] sm:$0xff]  ;;  %v71_v46 = vld [vmem:[%s4209_s1 + $0x198] sm:$0xff] }
  0x38   :  { %v79_v47 = vld [vmem:[%s4209_s1 + $0x1d8] sm:$0xff]  ;;  %v2830_v50 = vcombine.high %v70_v44, %v78_v45  ;;  %v2829_v58 = vcombine.low %v70_v44, %v78_v45 }
  0x39   :  { %v2832_v51 = vcombine.high %v71_v46, %v79_v47  ;;  %v2831_v59 = vcombine.low %v71_v46, %v79_v47 }
  0x3a   :  { %1789 = vmatpush1.bf16.msra.mxu0 %v2985_v52  ;;  %1871 = vmatpush1.bf16.msra.mxu1 %v2987_v54  ;;  %v86_v52 = vld [vmem:[%s4209_s1 + $0x210] sm:$0xff] }
  0x3b   :  { %1790 = vmatprep.subr.bf16.mxu0 %v3002_v55  ;;  %1872 = vmatprep.subr.bf16.mxu1 %v3004_v56  ;;  %v94_v54 = vld [vmem:[%s4209_s1 + $0x250] sm:$0xff]  ;;  %v87_v55 = vld [vmem:[%s4209_s1 + $0x218] sm:$0xff] }
  0x3c   :  { %v95_v56 = vld [vmem:[%s4209_s1 + $0x258] sm:$0xff]  ;;  %v2846_v60 = vcombine.high %v86_v52, %v94_v54  ;;  %v2845_v2 = vcombine.low %v86_v52, %v94_v54 }
  0x3d   :  { %v2848_v61 = vcombine.high %v87_v55, %v95_v56  ;;  %v2847_v3 = vcombine.low %v87_v55, %v95_v56 }
  0x3e   :  { %1791 = vmatpush1.bf16.msra.mxu0 %v3001_v62  ;;  %1873 = vmatpush1.bf16.msra.mxu1 %v3003_v63  ;;  %v102_v62 = vld [vmem:[%s4209_s1 + $0x290] sm:$0xff] }
  0x3f   :  { %1792 = vmatprep.subr.bf16.mxu0 %v3018_v0  ;;  %1874 = vmatprep.subr.bf16.mxu1 %v3020_v1  ;;  %v110_v63 = vld [vmem:[%s4209_s1 + $0x2d0] sm:$0xff]  ;;  %v103_v0 = vld [vmem:[%s4209_s1 + $0x298] sm:$0xff] }
  0x40   :  { %v111_v1 = vld [vmem:[%s4209_s1 + $0x2d8] sm:$0xff]  ;;  %v2862_v4 = vcombine.high %v102_v62, %v110_v63  ;;  %v2861_v10 = vcombine.low %v102_v62, %v110_v63 }
  0x41   :  { %v2864_v5 = vcombine.high %v103_v0, %v111_v1  ;;  %v2863_v11 = vcombine.low %v103_v0, %v111_v1 }
  0x42   :  { %1793 = vmatpush1.bf16.msra.mxu0 %v3017_v6  ;;  %1875 = vmatpush1.bf16.msra.mxu1 %v3019_v7  ;;  %v118_v6 = vld [vmem:[%s4209_s1 + $0x310] sm:$0xff] }
  0x43   :  { %1803 = vmatprep.subr.bf16.mxu0 %v3034_v8  ;;  %1885 = vmatprep.subr.bf16.mxu1 %v3036_v9  ;;  %v126_v7 = vld [vmem:[%s4209_s1 + $0x350] sm:$0xff]  ;;  %v119_v8 = vld [vmem:[%s4209_s1 + $0x318] sm:$0xff] }
  0x44   :  { %v127_v9 = vld [vmem:[%s4209_s1 + $0x358] sm:$0xff]  ;;  %v2878_v13 = vcombine.high %v118_v6, %v126_v7  ;;  %v2877_v53 = vcombine.low %v118_v6, %v126_v7 }
  0x45   :  { %1795 = vmatmul.mubr.bf16.vlgmr.msra.gmra.mrb[0].mxu0 %v3375_v12  ;;  %1877 = vmatmul.mubr.bf16.vlgmr.msra.gmra.mrb[0].mxu1 %v3375_v12  ;;  %v2880_v14 = vcombine.high %v119_v8, %v127_v9  ;;  %v2879_v19 = vcombine.low %v119_v8, %v127_v9 }
  0x46   :  { %1804 = vmatpush1.bf16.msra.mxu0 %v3033_v15  ;;  %1886 = vmatpush1.bf16.msra.mxu1 %v3035_v16  ;;  %v134_v15 = vld [vmem:[%s4209_s1 + $0x390] sm:$0xff] }
  0x47   :  { %1805 = vmatprep.subr.bf16.mxu0 %v3050_v17  ;;  %1887 = vmatprep.subr.bf16.mxu1 %v3052_v18  ;;  %v142_v16 = vld [vmem:[%s4209_s1 + $0x3d0] sm:$0xff]  ;;  %v135_v17 = vld [vmem:[%s4209_s1 + $0x398] sm:$0xff] }
  0x48   :  { %1835 = vmatprep.mubr.bf16.mxu0 %v3126_v25  ;;  %1917 = vmatprep.mubr.bf16.mxu1 %v3126_v25  ;;  %v143_v18 = vld [vmem:[%s4209_s1 + $0x3d8] sm:$0xff]  ;;  %v2894_v20 = vcombine.high %v134_v15, %v142_v16  ;;  %v2893_v27 = vcombine.low %v134_v15, %v142_v16 }
  0x49   :  { %v2896_v21 = vcombine.high %v135_v17, %v143_v18  ;;  %v2895_v28 = vcombine.low %v135_v17, %v143_v18 }
  0x4a   :  { %1806 = vmatpush1.bf16.msra.mxu0 %v3049_v22  ;;  %1888 = vmatpush1.bf16.msra.mxu1 %v3051_v23  ;;  %v150_v22 = vld [vmem:[%s4209_s1 + $0x410] sm:$0xff] }
  0x4b   :  { %1926 = vmatprep.subr.bf16.mxu0 %v2782_v24  ;;  %2008 = vmatprep.subr.bf16.mxu1 %v2784_v26  ;;  %v158_v23 = vld [vmem:[%s4209_s1 + $0x450] sm:$0xff]  ;;  %v151_v24 = vld [vmem:[%s4209_s1 + $0x418] sm:$0xff] }
  0x4c   :  { %v159_v26 = vld [vmem:[%s4209_s1 + $0x458] sm:$0xff]  ;;  %v2910_v30 = vcombine.high %v150_v22, %v158_v23  ;;  %v2909_v36 = vcombine.low %v150_v22, %v158_v23 }
  0x4d   :  { %v2912_v31 = vcombine.high %v151_v24, %v159_v26  ;;  %v2911_v37 = vcombine.low %v151_v24, %v159_v26 }
  0x51   :  { %3065 = vmatmul.mubr.msk.bf16.vlgmr.msra.gmra.mrb[0].mxu0 %vm1758_vm0, %v3408_v29  ;;  %3066 = vmatmul.mubr.msk.bf16.vlgmr.msra.gmra.mrb[0].mxu1 %vm1758_vm0, %v3408_v29 }
  0x52   :  { %1927 = vmatpush1.bf16.msra.mxu0 %v2781_v32  ;;  %2009 = vmatpush1.bf16.msra.mxu1 %v2783_v33  ;;  %v166_v32 = vld [vmem:[%s4209_s1 + $0x490] sm:$0xff] }
  0x53   :  { %1928 = vmatprep.subr.bf16.mxu0 %v2798_v34  ;;  %2010 = vmatprep.subr.bf16.mxu1 %v2800_v35  ;;  %v174_v33 = vld [vmem:[%s4209_s1 + $0x4d0] sm:$0xff]  ;;  %v167_v34 = vld [vmem:[%s4209_s1 + $0x498] sm:$0xff] }
  0x54   :  { %1958 = vmatprep.mubr.bf16.mxu0 %v3249_v57  ;;  %2040 = vmatprep.mubr.bf16.mxu1 %v3249_v57  ;;  %v175_v35 = vld [vmem:[%s4209_s1 + $0x4d8] sm:$0xff]  ;;  %v2926_v38 = vcombine.high %v166_v32, %v174_v33  ;;  %v2925_v44 = vcombine.low %v166_v32, %v174_v33 }
  0x55   :  { %v2928_v39 = vcombine.high %v167_v34, %v175_v35  ;;  %v2927_v45 = vcombine.low %v167_v34, %v175_v35 }
  0x56   :  { %1929 = vmatpush1.bf16.msra.mxu0 %v2797_v40  ;;  %2011 = vmatpush1.bf16.msra.mxu1 %v2799_v41  ;;  %v182_v40 = vld [vmem:[%s4209_s1 + $0x510] sm:$0xff] }
  0x57   :  { %1930 = vmatprep.subr.bf16.mxu0 %v2814_v42  ;;  %2012 = vmatprep.subr.bf16.mxu1 %v2816_v43  ;;  %v190_v41 = vld [vmem:[%s4209_s1 + $0x550] sm:$0xff]  ;;  %v183_v42 = vld [vmem:[%s4209_s1 + $0x518] sm:$0xff] }
  0x58   :  { %v191_v43 = vld [vmem:[%s4209_s1 + $0x558] sm:$0xff]  ;;  %v2942_v46 = vcombine.high %v182_v40, %v190_v41  ;;  %v2941_v52 = vcombine.low %v182_v40, %v190_v41 }
  0x59   :  { %v2944_v47 = vcombine.high %v183_v42, %v191_v43  ;;  %v2943_v54 = vcombine.low %v183_v42, %v191_v43 }
  0x5a   :  { %1931 = vmatpush1.bf16.msra.mxu0 %v2813_v48  ;;  %2013 = vmatpush1.bf16.msra.mxu1 %v2815_v49  ;;  %v198_v48 = vld [vmem:[%s4209_s1 + $0x590] sm:$0xff] }
  0x5b   :  { %1932 = vmatprep.subr.bf16.mxu0 %v2830_v50  ;;  %2014 = vmatprep.subr.bf16.mxu1 %v2832_v51  ;;  %v206_v49 = vld [vmem:[%s4209_s1 + $0x5d0] sm:$0xff]  ;;  %v199_v50 = vld [vmem:[%s4209_s1 + $0x598] sm:$0xff] }
  0x5c   :  { %v207_v51 = vld [vmem:[%s4209_s1 + $0x5d8] sm:$0xff]  ;;  %v2958_v55 = vcombine.high %v198_v48, %v206_v49  ;;  %v2957_v62 = vcombine.low %v198_v48, %v206_v49 }
  0x5d   :  { %v2960_v56 = vcombine.high %v199_v50, %v207_v51  ;;  %v2959_v63 = vcombine.low %v199_v50, %v207_v51 }
  0x5e   :  { %1933 = vmatpush1.bf16.msra.mxu0 %v2829_v58  ;;  %2015 = vmatpush1.bf16.msra.mxu1 %v2831_v59  ;;  %v214_v58 = vld [vmem:[%s4209_s1 + $0x610] sm:$0xff] }
  0x5f   :  { %1934 = vmatprep.subr.bf16.mxu0 %v2846_v60  ;;  %2016 = vmatprep.subr.bf16.mxu1 %v2848_v61  ;;  %v222_v59 = vld [vmem:[%s4209_s1 + $0x650] sm:$0xff]  ;;  %v215_v60 = vld [vmem:[%s4209_s1 + $0x618] sm:$0xff] }
  0x60   :  { %v223_v61 = vld [vmem:[%s4209_s1 + $0x658] sm:$0xff]  ;;  %v2974_v0 = vcombine.high %v214_v58, %v222_v59  ;;  %v2973_v6 = vcombine.low %v214_v58, %v222_v59 }
  0x61   :  { %v2976_v1 = vcombine.high %v215_v60, %v223_v61  ;;  %v2975_v7 = vcombine.low %v215_v60, %v223_v61 }
  0x62   :  { %1935 = vmatpush1.bf16.msra.mxu0 %v2845_v2  ;;  %2017 = vmatpush1.bf16.msra.mxu1 %v2847_v3  ;;  %v230_v2 = vld [vmem:[%s4209_s1 + $0x690] sm:$0xff] }
  0x63   :  { %1936 = vmatprep.subr.bf16.mxu0 %v2862_v4  ;;  %2018 = vmatprep.subr.bf16.mxu1 %v2864_v5  ;;  %v238_v3 = vld [vmem:[%s4209_s1 + $0x6d0] sm:$0xff]  ;;  %v231_v4 = vld [vmem:[%s4209_s1 + $0x698] sm:$0xff] }
  0x64   :  { %v239_v5 = vld [vmem:[%s4209_s1 + $0x6d8] sm:$0xff]  ;;  %v2990_v8 = vcombine.high %v230_v2, %v238_v3  ;;  %v2989_v15 = vcombine.low %v230_v2, %v238_v3 }
  0x65   :  { %v2992_v9 = vcombine.high %v231_v4, %v239_v5  ;;  %v2991_v16 = vcombine.low %v231_v4, %v239_v5 }
  0x66   :  { %1937 = vmatpush1.bf16.msra.mxu0 %v2861_v10  ;;  %2019 = vmatpush1.bf16.msra.mxu1 %v2863_v11  ;;  %v246_v10 = vld [vmem:[%s4209_s1 + $0x710] sm:$0xff] }
  0x67   :  { %1938 = vmatprep.subr.bf16.mxu0 %v2878_v13  ;;  %2020 = vmatprep.subr.bf16.mxu1 %v2880_v14  ;;  %v254_v11 = vld [vmem:[%s4209_s1 + $0x750] sm:$0xff]  ;;  %v247_v13 = vld [vmem:[%s4209_s1 + $0x718] sm:$0xff] }
  0x68   :  { %v255_v14 = vld [vmem:[%s4209_s1 + $0x758] sm:$0xff]  ;;  %v3006_v17 = vcombine.high %v246_v10, %v254_v11  ;;  %v3005_v22 = vcombine.low %v246_v10, %v254_v11 }
  0x69   :  { %v3008_v18 = vcombine.high %v247_v13, %v255_v14  ;;  %v3007_v23 = vcombine.low %v247_v13, %v255_v14 }
  0x6a   :  { %1939 = vmatpush1.bf16.msra.mxu0 %v2877_v53  ;;  %2021 = vmatpush1.bf16.msra.mxu1 %v2879_v19  ;;  %v262_v53 = vld [vmem:[%s4209_s1 + $0x790] sm:$0xff] }
  0x6b   :  { %1940 = vmatprep.subr.bf16.mxu0 %v2894_v20  ;;  %2022 = vmatprep.subr.bf16.mxu1 %v2896_v21  ;;  %v270_v19 = vld [vmem:[%s4209_s1 + $0x7d0] sm:$0xff]  ;;  %v263_v20 = vld [vmem:[%s4209_s1 + $0x798] sm:$0xff] }
  0x6c   :  { %v271_v21 = vld [vmem:[%s4209_s1 + $0x7d8] sm:$0xff]  ;;  %v3022_v24 = vcombine.high %v262_v53, %v270_v19  ;;  %v3021_v32 = vcombine.low %v262_v53, %v270_v19 }
  0x6d   :  { %v3024_v26 = vcombine.high %v263_v20, %v271_v21  ;;  %v3023_v33 = vcombine.low %v263_v20, %v271_v21 }
  0x6e   :  { %1941 = vmatpush1.bf16.msra.mxu0 %v2893_v27  ;;  %2023 = vmatpush1.bf16.msra.mxu1 %v2895_v28  ;;  %v278_v27 = vld [vmem:[%s4209_s1 + $0x810] sm:$0xff] }
  0x6f   :  { %1942 = vmatprep.subr.bf16.mxu0 %v2910_v30  ;;  %2024 = vmatprep.subr.bf16.mxu1 %v2912_v31  ;;  %v286_v28 = vld [vmem:[%s4209_s1 + $0x850] sm:$0xff]  ;;  %v279_v30 = vld [vmem:[%s4209_s1 + $0x818] sm:$0xff] }
  0x70   :  { %v287_v31 = vld [vmem:[%s4209_s1 + $0x858] sm:$0xff]  ;;  %v3038_v34 = vcombine.high %v278_v27, %v286_v28  ;;  %v3037_v40 = vcombine.low %v278_v27, %v286_v28 }
  0x71   :  { %v3040_v35 = vcombine.high %v279_v30, %v287_v31  ;;  %v3039_v41 = vcombine.low %v279_v30, %v287_v31 }
  0x72   :  { %1943 = vmatpush1.bf16.msra.mxu0 %v2909_v36  ;;  %2025 = vmatpush1.bf16.msra.mxu1 %v2911_v37  ;;  %v294_v36 = vld [vmem:[%s4209_s1 + $0x890] sm:$0xff] }
  0x73   :  { %1944 = vmatprep.subr.bf16.mxu0 %v2926_v38  ;;  %2026 = vmatprep.subr.bf16.mxu1 %v2928_v39  ;;  %v302_v37 = vld [vmem:[%s4209_s1 + $0x8d0] sm:$0xff]  ;;  %v295_v38 = vld [vmem:[%s4209_s1 + $0x898] sm:$0xff] }
  0x74   :  { %v303_v39 = vld [vmem:[%s4209_s1 + $0x8d8] sm:$0xff]  ;;  %v3054_v42 = vcombine.high %v294_v36, %v302_v37  ;;  %v3053_v48 = vcombine.low %v294_v36, %v302_v37 }
  0x75   :  { %v3056_v43 = vcombine.high %v295_v38, %v303_v39  ;;  %v3055_v49 = vcombine.low %v295_v38, %v303_v39 }
  0x76   :  { %1945 = vmatpush1.bf16.msra.mxu0 %v2925_v44  ;;  %2027 = vmatpush1.bf16.msra.mxu1 %v2927_v45  ;;  %v24_v44 = vld [vmem:[%s4209_s1 + $0x20] sm:$0xff] }
  0x77   :  { %1946 = vmatprep.subr.bf16.mxu0 %v2942_v46  ;;  %2028 = vmatprep.subr.bf16.mxu1 %v2944_v47  ;;  %v32_v45 = vld [vmem:[%s4209_s1 + $0x60] sm:$0xff]  ;;  %v25_v46 = vld [vmem:[%s4209_s1 + $0x28] sm:$0xff] }
  0x78   :  { %v33_v47 = vld [vmem:[%s4209_s1 + $0x68] sm:$0xff]  ;;  %v2786_v50 = vcombine.high %v24_v44, %v32_v45  ;;  %v2785_v58 = vcombine.low %v24_v44, %v32_v45 }
  0x79   :  { %v2788_v51 = vcombine.high %v25_v46, %v33_v47  ;;  %v2787_v59 = vcombine.low %v25_v46, %v33_v47 }
  0x7a   :  { %1947 = vmatpush1.bf16.msra.mxu0 %v2941_v52  ;;  %2029 = vmatpush1.bf16.msra.mxu1 %v2943_v54  ;;  %v40_v52 = vld [vmem:[%s4209_s1 + $0xa0] sm:$0xff] }
  0x7b   :  { %1948 = vmatprep.subr.bf16.mxu0 %v2958_v55  ;;  %2030 = vmatprep.subr.bf16.mxu1 %v2960_v56  ;;  %v48_v54 = vld [vmem:[%s4209_s1 + $0xe0] sm:$0xff]  ;;  %v41_v55 = vld [vmem:[%s4209_s1 + $0xa8] sm:$0xff] }
  0x7c   :  { %v49_v56 = vld [vmem:[%s4209_s1 + $0xe8] sm:$0xff]  ;;  %v2802_v60 = vcombine.high %v40_v52, %v48_v54  ;;  %v2801_v2 = vcombine.low %v40_v52, %v48_v54 }
  0x7d   :  { %v2804_v61 = vcombine.high %v41_v55, %v49_v56  ;;  %v2803_v3 = vcombine.low %v41_v55, %v49_v56 }
  0x7e   :  { %1949 = vmatpush1.bf16.msra.mxu0 %v2957_v62  ;;  %2031 = vmatpush1.bf16.msra.mxu1 %v2959_v63  ;;  %v56_v62 = vld [vmem:[%s4209_s1 + $0x120] sm:$0xff] }
  0x7f   :  { %1950 = vmatprep.subr.bf16.mxu0 %v2974_v0  ;;  %2032 = vmatprep.subr.bf16.mxu1 %v2976_v1  ;;  %v64_v63 = vld [vmem:[%s4209_s1 + $0x160] sm:$0xff]  ;;  %v57_v0 = vld [vmem:[%s4209_s1 + $0x128] sm:$0xff] }
  0x80   :  { %v65_v1 = vld [vmem:[%s4209_s1 + $0x168] sm:$0xff]  ;;  %v2818_v4 = vcombine.high %v56_v62, %v64_v63  ;;  %v2817_v10 = vcombine.low %v56_v62, %v64_v63 }
  0x81   :  { %v2820_v5 = vcombine.high %v57_v0, %v65_v1  ;;  %v2819_v11 = vcombine.low %v57_v0, %v65_v1 }
  0x82   :  { %1951 = vmatpush1.bf16.msra.mxu0 %v2973_v6  ;;  %2033 = vmatpush1.bf16.msra.mxu1 %v2975_v7  ;;  %v72_v6 = vld [vmem:[%s4209_s1 + $0x1a0] sm:$0xff] }
  0x83   :  { %1952 = vmatprep.subr.bf16.mxu0 %v2990_v8  ;;  %2034 = vmatprep.subr.bf16.mxu1 %v2992_v9  ;;  %v80_v7 = vld [vmem:[%s4209_s1 + $0x1e0] sm:$0xff]  ;;  %v73_v8 = vld [vmem:[%s4209_s1 + $0x1a8] sm:$0xff] }
  0x84   :  { %v81_v9 = vld [vmem:[%s4209_s1 + $0x1e8] sm:$0xff]  ;;  %v2834_v13 = vcombine.high %v72_v6, %v80_v7  ;;  %v2833_v53 = vcombine.low %v72_v6, %v80_v7 }
  0x85   :  { %v2836_v14 = vcombine.high %v73_v8, %v81_v9  ;;  %v2835_v19 = vcombine.low %v73_v8, %v81_v9 }
  0x86   :  { %1953 = vmatpush1.bf16.msra.mxu0 %v2989_v15  ;;  %2035 = vmatpush1.bf16.msra.mxu1 %v2991_v16  ;;  %v88_v15 = vld [vmem:[%s4209_s1 + $0x220] sm:$0xff] }
  0x87   :  { %1954 = vmatprep.subr.bf16.mxu0 %v3006_v17  ;;  %2036 = vmatprep.subr.bf16.mxu1 %v3008_v18  ;;  %v96_v16 = vld [vmem:[%s4209_s1 + $0x260] sm:$0xff]  ;;  %v89_v17 = vld [vmem:[%s4209_s1 + $0x228] sm:$0xff] }
  0x88   :  { %v97_v18 = vld [vmem:[%s4209_s1 + $0x268] sm:$0xff]  ;;  %v2850_v20 = vcombine.high %v88_v15, %v96_v16  ;;  %v2849_v27 = vcombine.low %v88_v15, %v96_v16 }
  0x89   :  { %v2852_v21 = vcombine.high %v89_v17, %v97_v18  ;;  %v2851_v28 = vcombine.low %v89_v17, %v97_v18 }
  0x8a   :  { %1955 = vmatpush1.bf16.msra.mxu0 %v3005_v22  ;;  %2037 = vmatpush1.bf16.msra.mxu1 %v3007_v23  ;;  %v104_v22 = vld [vmem:[%s4209_s1 + $0x2a0] sm:$0xff] }
  0x8b   :  { %1956 = vmatprep.subr.bf16.mxu0 %v3022_v24  ;;  %2038 = vmatprep.subr.bf16.mxu1 %v3024_v26  ;;  %v112_v23 = vld [vmem:[%s4209_s1 + $0x2e0] sm:$0xff]  ;;  %v105_v24 = vld [vmem:[%s4209_s1 + $0x2a8] sm:$0xff] }
  0x8c   :  { %v113_v26 = vld [vmem:[%s4209_s1 + $0x2e8] sm:$0xff]  ;;  %v2866_v30 = vcombine.high %v104_v22, %v112_v23  ;;  %v2865_v36 = vcombine.low %v104_v22, %v112_v23 }
  0x8d   :  { %v2868_v31 = vcombine.high %v105_v24, %v113_v26  ;;  %v2867_v37 = vcombine.low %v105_v24, %v113_v26 }
  0x8e   :  { %1957 = vmatpush1.bf16.msra.mxu0 %v3021_v32  ;;  %2039 = vmatpush1.bf16.msra.mxu1 %v3023_v33  ;;  %v120_v32 = vld [vmem:[%s4209_s1 + $0x320] sm:$0xff] }
  0x8f   :  { %1967 = vmatprep.subr.bf16.mxu0 %v3038_v34  ;;  %2049 = vmatprep.subr.bf16.mxu1 %v3040_v35  ;;  %v128_v33 = vld [vmem:[%s4209_s1 + $0x360] sm:$0xff]  ;;  %v121_v34 = vld [vmem:[%s4209_s1 + $0x328] sm:$0xff] }
  0x90   :  { %v129_v35 = vld [vmem:[%s4209_s1 + $0x368] sm:$0xff]  ;;  %v2882_v38 = vcombine.high %v120_v32, %v128_v33  ;;  %v2881_v44 = vcombine.low %v120_v32, %v128_v33 }
  0x91   :  { %1959 = vmatmul.mubr.bf16.vlgmr.msra.gmra.mrb[4].mxu0 %v3375_v12  ;;  %2041 = vmatmul.mubr.bf16.vlgmr.msra.gmra.mrb[4].mxu1 %v3375_v12  ;;  %v2884_v39 = vcombine.high %v121_v34, %v129_v35  ;;  %v2883_v45 = vcombine.low %v121_v34, %v129_v35 }
  0x92   :  { %1968 = vmatpush1.bf16.msra.mxu0 %v3037_v40  ;;  %2050 = vmatpush1.bf16.msra.mxu1 %v3039_v41  ;;  %v136_v40 = vld [vmem:[%s4209_s1 + $0x3a0] sm:$0xff] }
  0x93   :  { %1969 = vmatprep.subr.bf16.mxu0 %v3054_v42  ;;  %2051 = vmatprep.subr.bf16.mxu1 %v3056_v43  ;;  %v144_v41 = vld [vmem:[%s4209_s1 + $0x3e0] sm:$0xff]  ;;  %v137_v42 = vld [vmem:[%s4209_s1 + $0x3a8] sm:$0xff] }
  0x94   :  { %1999 = vmatprep.mubr.bf16.mxu0 %v3126_v25  ;;  %2081 = vmatprep.mubr.bf16.mxu1 %v3126_v25  ;;  %v145_v43 = vld [vmem:[%s4209_s1 + $0x3e8] sm:$0xff]  ;;  %v2898_v46 = vcombine.high %v136_v40, %v144_v41  ;;  %v2897_v52 = vcombine.low %v136_v40, %v144_v41 }
  0x95   :  { %v2900_v47 = vcombine.high %v137_v42, %v145_v43  ;;  %v2899_v54 = vcombine.low %v137_v42, %v145_v43 }
  0x96   :  { %1970 = vmatpush1.bf16.msra.mxu0 %v3053_v48  ;;  %2052 = vmatpush1.bf16.msra.mxu1 %v3055_v49  ;;  %v152_v48 = vld [vmem:[%s4209_s1 + $0x420] sm:$0xff] }
  0x97   :  { %2090 = vmatprep.subr.bf16.mxu0 %v2786_v50  ;;  %2172 = vmatprep.subr.bf16.mxu1 %v2788_v51  ;;  %v160_v49 = vld [vmem:[%s4209_s1 + $0x460] sm:$0xff]  ;;  %v153_v50 = vld [vmem:[%s4209_s1 + $0x428] sm:$0xff] }
  0x98   :  { %v161_v51 = vld [vmem:[%s4209_s1 + $0x468] sm:$0xff]  ;;  %v2914_v55 = vcombine.high %v152_v48, %v160_v49  ;;  %v2913_v62 = vcombine.low %v152_v48, %v160_v49 }
  0x99   :  { %v2916_v56 = vcombine.high %v153_v50, %v161_v51  ;;  %v2915_v63 = vcombine.low %v153_v50, %v161_v51 }
  0x9d   :  { %3067 = vmatmul.mubr.msk.bf16.vlgmr.msra.gmra.mrb[4].mxu0 %vm1758_vm0, %v3408_v29  ;;  %3068 = vmatmul.mubr.msk.bf16.vlgmr.msra.gmra.mrb[4].mxu1 %vm1758_vm0, %v3408_v29 }
  0x9e   :  { %2091 = vmatpush1.bf16.msra.mxu0 %v2785_v58  ;;  %2173 = vmatpush1.bf16.msra.mxu1 %v2787_v59  ;;  %v168_v58 = vld [vmem:[%s4209_s1 + $0x4a0] sm:$0xff] }
  0x9f   :  { %2092 = vmatprep.subr.bf16.mxu0 %v2802_v60  ;;  %2174 = vmatprep.subr.bf16.mxu1 %v2804_v61  ;;  %v176_v59 = vld [vmem:[%s4209_s1 + $0x4e0] sm:$0xff]  ;;  %v169_v60 = vld [vmem:[%s4209_s1 + $0x4a8] sm:$0xff] }
  0xa0   :  { %2122 = vmatprep.mubr.bf16.mxu0 %v3249_v57  ;;  %2204 = vmatprep.mubr.bf16.mxu1 %v3249_v57  ;;  %v177_v61 = vld [vmem:[%s4209_s1 + $0x4e8] sm:$0xff]  ;;  %v2930_v0 = vcombine.high %v168_v58, %v176_v59  ;;  %v2929_v6 = vcombine.low %v168_v58, %v176_v59 }
  0xa1   :  { %v2932_v1 = vcombine.high %v169_v60, %v177_v61  ;;  %v2931_v7 = vcombine.low %v169_v60, %v177_v61 }
  0xa2   :  { %2093 = vmatpush1.bf16.msra.mxu0 %v2801_v2  ;;  %2175 = vmatpush1.bf16.msra.mxu1 %v2803_v3  ;;  %v184_v2 = vld [vmem:[%s4209_s1 + $0x520] sm:$0xff] }
  0xa3   :  { %2094 = vmatprep.subr.bf16.mxu0 %v2818_v4  ;;  %2176 = vmatprep.subr.bf16.mxu1 %v2820_v5  ;;  %v192_v3 = vld [vmem:[%s4209_s1 + $0x560] sm:$0xff]  ;;  %v185_v4 = vld [vmem:[%s4209_s1 + $0x528] sm:$0xff] }
  0xa4   :  { %v193_v5 = vld [vmem:[%s4209_s1 + $0x568] sm:$0xff]  ;;  %v2946_v8 = vcombine.high %v184_v2, %v192_v3  ;;  %v2945_v15 = vcombine.low %v184_v2, %v192_v3 }
  0xa5   :  { %v2948_v9 = vcombine.high %v185_v4, %v193_v5  ;;  %v2947_v16 = vcombine.low %v185_v4, %v193_v5 }
  0xa6   :  { %2095 = vmatpush1.bf16.msra.mxu0 %v2817_v10  ;;  %2177 = vmatpush1.bf16.msra.mxu1 %v2819_v11  ;;  %v200_v10 = vld [vmem:[%s4209_s1 + $0x5a0] sm:$0xff] }
  0xa7   :  { %2096 = vmatprep.subr.bf16.mxu0 %v2834_v13  ;;  %2178 = vmatprep.subr.bf16.mxu1 %v2836_v14  ;;  %v208_v11 = vld [vmem:[%s4209_s1 + $0x5e0] sm:$0xff]  ;;  %v201_v13 = vld [vmem:[%s4209_s1 + $0x5a8] sm:$0xff] }
  0xa8   :  { %v209_v14 = vld [vmem:[%s4209_s1 + $0x5e8] sm:$0xff]  ;;  %v2962_v17 = vcombine.high %v200_v10, %v208_v11  ;;  %v2961_v22 = vcombine.low %v200_v10, %v208_v11 }
  0xa9   :  { %v2964_v18 = vcombine.high %v201_v13, %v209_v14  ;;  %v2963_v23 = vcombine.low %v201_v13, %v209_v14 }
  0xaa   :  { %2097 = vmatpush1.bf16.msra.mxu0 %v2833_v53  ;;  %2179 = vmatpush1.bf16.msra.mxu1 %v2835_v19  ;;  %v216_v53 = vld [vmem:[%s4209_s1 + $0x620] sm:$0xff] }
  0xab   :  { %2098 = vmatprep.subr.bf16.mxu0 %v2850_v20  ;;  %2180 = vmatprep.subr.bf16.mxu1 %v2852_v21  ;;  %v224_v19 = vld [vmem:[%s4209_s1 + $0x660] sm:$0xff]  ;;  %v217_v20 = vld [vmem:[%s4209_s1 + $0x628] sm:$0xff] }
  0xac   :  { %v225_v21 = vld [vmem:[%s4209_s1 + $0x668] sm:$0xff]  ;;  %v2978_v24 = vcombine.high %v216_v53, %v224_v19  ;;  %v2977_v32 = vcombine.low %v216_v53, %v224_v19 }
  0xad   :  { %v2980_v26 = vcombine.high %v217_v20, %v225_v21  ;;  %v2979_v33 = vcombine.low %v217_v20, %v225_v21 }
  0xae   :  { %2099 = vmatpush1.bf16.msra.mxu0 %v2849_v27  ;;  %2181 = vmatpush1.bf16.msra.mxu1 %v2851_v28  ;;  %v232_v27 = vld [vmem:[%s4209_s1 + $0x6a0] sm:$0xff] }
  0xaf   :  { %2100 = vmatprep.subr.bf16.mxu0 %v2866_v30  ;;  %2182 = vmatprep.subr.bf16.mxu1 %v2868_v31  ;;  %v240_v28 = vld [vmem:[%s4209_s1 + $0x6e0] sm:$0xff]  ;;  %v233_v30 = vld [vmem:[%s4209_s1 + $0x6a8] sm:$0xff] }
  0xb0   :  { %v241_v31 = vld [vmem:[%s4209_s1 + $0x6e8] sm:$0xff]  ;;  %v2994_v34 = vcombine.high %v232_v27, %v240_v28  ;;  %v2993_v40 = vcombine.low %v232_v27, %v240_v28 }
  0xb1   :  { %v2996_v35 = vcombine.high %v233_v30, %v241_v31  ;;  %v2995_v41 = vcombine.low %v233_v30, %v241_v31 }
  0xb2   :  { %2101 = vmatpush1.bf16.msra.mxu0 %v2865_v36  ;;  %2183 = vmatpush1.bf16.msra.mxu1 %v2867_v37  ;;  %v248_v36 = vld [vmem:[%s4209_s1 + $0x720] sm:$0xff] }
  0xb3   :  { %2102 = vmatprep.subr.bf16.mxu0 %v2882_v38  ;;  %2184 = vmatprep.subr.bf16.mxu1 %v2884_v39  ;;  %v256_v37 = vld [vmem:[%s4209_s1 + $0x760] sm:$0xff]  ;;  %v249_v38 = vld [vmem:[%s4209_s1 + $0x728] sm:$0xff] }
  0xb4   :  { %v257_v39 = vld [vmem:[%s4209_s1 + $0x768] sm:$0xff]  ;;  %v3010_v42 = vcombine.high %v248_v36, %v256_v37  ;;  %v3009_v48 = vcombine.low %v248_v36, %v256_v37 }
  0xb5   :  { %v3012_v43 = vcombine.high %v249_v38, %v257_v39  ;;  %v3011_v49 = vcombine.low %v249_v38, %v257_v39  ;;  %v90_v39 = vld [vmem:[%s4209_s1 + $0x230] sm:$0xff] }
  0xb6   :  { %2103 = vmatpush1.bf16.msra.mxu0 %v2881_v44  ;;  %2185 = vmatpush1.bf16.msra.mxu1 %v2883_v45  ;;  %v264_v44 = vld [vmem:[%s4209_s1 + $0x7a0] sm:$0xff] }
  0xb7   :  { %2104 = vmatprep.subr.bf16.mxu0 %v2898_v46  ;;  %2186 = vmatprep.subr.bf16.mxu1 %v2900_v47  ;;  %v272_v45 = vld [vmem:[%s4209_s1 + $0x7e0] sm:$0xff]  ;;  %v265_v46 = vld [vmem:[%s4209_s1 + $0x7a8] sm:$0xff] }
  0xb8   :  { %v273_v47 = vld [vmem:[%s4209_s1 + $0x7e8] sm:$0xff]  ;;  %v3026_v50 = vcombine.high %v264_v44, %v272_v45  ;;  %v3025_v58 = vcombine.low %v264_v44, %v272_v45 }
  0xb9   :  { %v3028_v51 = vcombine.high %v265_v46, %v273_v47  ;;  %v3027_v59 = vcombine.low %v265_v46, %v273_v47  ;;  %v106_v46 = vld [vmem:[%s4209_s1 + $0x2b0] sm:$0xff] }
  0xba   :  { %2105 = vmatpush1.bf16.msra.mxu0 %v2897_v52  ;;  %2187 = vmatpush1.bf16.msra.mxu1 %v2899_v54  ;;  %v280_v52 = vld [vmem:[%s4209_s1 + $0x820] sm:$0xff]  ;;  %v114_v47 = vld [vmem:[%s4209_s1 + $0x2f0] sm:$0xff] }
  0xbb   :  { %2106 = vmatprep.subr.bf16.mxu0 %v2914_v55  ;;  %2188 = vmatprep.subr.bf16.mxu1 %v2916_v56  ;;  %v288_v54 = vld [vmem:[%s4209_s1 + $0x860] sm:$0xff]  ;;  %v281_v55 = vld [vmem:[%s4209_s1 + $0x828] sm:$0xff] }
  0xbc   :  { %v289_v56 = vld [vmem:[%s4209_s1 + $0x868] sm:$0xff]  ;;  %v3042_v60 = vcombine.high %v280_v52, %v288_v54  ;;  %v3041_v2 = vcombine.low %v280_v52, %v288_v54  ;;  %v2870_v52 = vcombine.high %v106_v46, %v114_v47 }
  0xbd   :  { %v3044_v61 = vcombine.high %v281_v55, %v289_v56  ;;  %v3043_v3 = vcombine.low %v281_v55, %v289_v56  ;;  %v122_v55 = vld [vmem:[%s4209_s1 + $0x330] sm:$0xff] }
  0xbe   :  { %2107 = vmatpush1.bf16.msra.mxu0 %v2913_v62  ;;  %2189 = vmatpush1.bf16.msra.mxu1 %v2915_v63  ;;  %v296_v62 = vld [vmem:[%s4209_s1 + $0x8a0] sm:$0xff]  ;;  %v130_v56 = vld [vmem:[%s4209_s1 + $0x370] sm:$0xff] }
  0xbf   :  { %2108 = vmatprep.subr.bf16.mxu0 %v2930_v0  ;;  %2190 = vmatprep.subr.bf16.mxu1 %v2932_v1  ;;  %v304_v63 = vld [vmem:[%s4209_s1 + $0x8e0] sm:$0xff]  ;;  %v297_v0 = vld [vmem:[%s4209_s1 + $0x8a8] sm:$0xff] }
  0xc0   :  { %v305_v1 = vld [vmem:[%s4209_s1 + $0x8e8] sm:$0xff]  ;;  %v3058_v4 = vcombine.high %v296_v62, %v304_v63  ;;  %v3057_v10 = vcombine.low %v296_v62, %v304_v63  ;;  %v2886_v62 = vcombine.high %v122_v55, %v130_v56 }
  0xc1   :  { %v3060_v5 = vcombine.high %v297_v0, %v305_v1  ;;  %v3059_v11 = vcombine.low %v297_v0, %v305_v1  ;;  %v138_v0 = vld [vmem:[%s4209_s1 + $0x3b0] sm:$0xff] }
  0xc2   :  { %2109 = vmatpush1.bf16.msra.mxu0 %v2929_v6  ;;  %2191 = vmatpush1.bf16.msra.mxu1 %v2931_v7  ;;  %v26_v6 = vld [vmem:[%s4209_s1 + $0x30] sm:$0xff] }
  0xc3   :  { %2110 = vmatprep.subr.bf16.mxu0 %v2946_v8  ;;  %2192 = vmatprep.subr.bf16.mxu1 %v2948_v9  ;;  %v34_v7 = vld [vmem:[%s4209_s1 + $0x70] sm:$0xff]  ;;  %v27_v8 = vld [vmem:[%s4209_s1 + $0x38] sm:$0xff] }
  0xc4   :  { %v35_v9 = vld [vmem:[%s4209_s1 + $0x78] sm:$0xff]  ;;  %v2790_v13 = vcombine.high %v26_v6, %v34_v7  ;;  %v2789_v53 = vcombine.low %v26_v6, %v34_v7  ;;  %v146_v1 = vld [vmem:[%s4209_s1 + $0x3f0] sm:$0xff] }
  0xc5   :  { %v2792_v14 = vcombine.high %v27_v8, %v35_v9  ;;  %v2791_v19 = vcombine.low %v27_v8, %v35_v9  ;;  %v2902_v6 = vcombine.high %v138_v0, %v146_v1  ;;  %v154_v8 = vld [vmem:[%s4209_s1 + $0x430] sm:$0xff] }
  0xc6   :  { %2111 = vmatpush1.bf16.msra.mxu0 %v2945_v15  ;;  %2193 = vmatpush1.bf16.msra.mxu1 %v2947_v16  ;;  %v42_v15 = vld [vmem:[%s4209_s1 + $0xb0] sm:$0xff] }
  0xc7   :  { %2112 = vmatprep.subr.bf16.mxu0 %v2962_v17  ;;  %2194 = vmatprep.subr.bf16.mxu1 %v2964_v18  ;;  %v50_v16 = vld [vmem:[%s4209_s1 + $0xf0] sm:$0xff]  ;;  %v43_v17 = vld [vmem:[%s4209_s1 + $0xb8] sm:$0xff] }
  0xc8   :  { %v51_v18 = vld [vmem:[%s4209_s1 + $0xf8] sm:$0xff]  ;;  %v2806_v20 = vcombine.high %v42_v15, %v50_v16  ;;  %v2805_v27 = vcombine.low %v42_v15, %v50_v16  ;;  %v162_v9 = vld [vmem:[%s4209_s1 + $0x470] sm:$0xff] }
  0xc9   :  { %v2808_v21 = vcombine.high %v43_v17, %v51_v18  ;;  %v2807_v28 = vcombine.low %v43_v17, %v51_v18  ;;  %v2918_v15 = vcombine.high %v154_v8, %v162_v9  ;;  %v170_v17 = vld [vmem:[%s4209_s1 + $0x4b0] sm:$0xff] }
  0xca   :  { %2113 = vmatpush1.bf16.msra.mxu0 %v2961_v22  ;;  %2195 = vmatpush1.bf16.msra.mxu1 %v2963_v23  ;;  %v58_v22 = vld [vmem:[%s4209_s1 + $0x130] sm:$0xff] }
  0xcb   :  { %2114 = vmatprep.subr.bf16.mxu0 %v2978_v24  ;;  %2196 = vmatprep.subr.bf16.mxu1 %v2980_v26  ;;  %v66_v23 = vld [vmem:[%s4209_s1 + $0x170] sm:$0xff]  ;;  %v59_v24 = vld [vmem:[%s4209_s1 + $0x138] sm:$0xff] }
  0xcc   :  { %v67_v26 = vld [vmem:[%s4209_s1 + $0x178] sm:$0xff]  ;;  %v2822_v30 = vcombine.high %v58_v22, %v66_v23  ;;  %v178_v18 = vld [vmem:[%s4209_s1 + $0x4f0] sm:$0xff] }
  0xcd   :  { %v2824_v31 = vcombine.high %v59_v24, %v67_v26  ;;  %v2823_v36 = vcombine.low %v59_v24, %v67_v26  ;;  %v186_v24 = vld [vmem:[%s4209_s1 + $0x530] sm:$0xff] }
  0xce   :  { %2115 = vmatpush1.bf16.msra.mxu0 %v2977_v32  ;;  %2197 = vmatpush1.bf16.msra.mxu1 %v2979_v33  ;;  %v74_v32 = vld [vmem:[%s4209_s1 + $0x1b0] sm:$0xff] }
  0xcf   :  { %2116 = vmatprep.subr.bf16.mxu0 %v2994_v34  ;;  %2198 = vmatprep.subr.bf16.mxu1 %v2996_v35  ;;  %v82_v33 = vld [vmem:[%s4209_s1 + $0x1f0] sm:$0xff]  ;;  %v83_v34 = vld [vmem:[%s4209_s1 + $0x1f8] sm:$0xff]  ;;  %v2821_v35 = vcombine.low %v58_v22, %v66_v23  ;;  %v2934_v22 = vcombine.high %v170_v17, %v178_v18 }
  0xd0   :  { %v2838_v37 = vcombine.high %v74_v32, %v82_v33  ;;  %v194_v26 = vld [vmem:[%s4209_s1 + $0x570] sm:$0xff] }
  0xd2   :  { %2117 = vmatpush1.bf16.msra.mxu0 %v2993_v40  ;;  %2199 = vmatpush1.bf16.msra.mxu1 %v2995_v41  ;;  %v98_v40 = vld [vmem:[%s4209_s1 + $0x270] sm:$0xff]  ;;  %v99_v41 = vld [vmem:[%s4209_s1 + $0x278] sm:$0xff] }
  0xd3   :  { %2118 = vmatprep.subr.bf16.mxu0 %v3010_v42  ;;  %2200 = vmatprep.subr.bf16.mxu1 %v3012_v43  ;;  %v2837_v42 = vcombine.low %v74_v32, %v82_v33  ;;  %v2854_v44 = vcombine.high %v90_v39, %v98_v40  ;;  %v2950_v32 = vcombine.high %v186_v24, %v194_v26 }
  0xd6   :  { %2119 = vmatpush1.bf16.msra.mxu0 %v3009_v48  ;;  %2201 = vmatpush1.bf16.msra.mxu1 %v3011_v49  ;;  %v107_v48 = vld [vmem:[%s4209_s1 + $0x2b8] sm:$0xff] }
  0xd7   :  { %2120 = vmatprep.subr.bf16.mxu0 %v3026_v50  ;;  %2202 = vmatprep.subr.bf16.mxu1 %v3028_v51  ;;  %v115_v49 = vld [vmem:[%s4209_s1 + $0x2f8] sm:$0xff]  ;;  %v2853_v50 = vcombine.low %v90_v39, %v98_v40 }
  0xd8   :  { %v2872_v54 = vcombine.high %v107_v48, %v115_v49 }
  0xda   :  { %2121 = vmatpush1.bf16.msra.mxu0 %v3025_v58  ;;  %2203 = vmatpush1.bf16.msra.mxu1 %v3027_v59  ;;  %v123_v58 = vld [vmem:[%s4209_s1 + $0x338] sm:$0xff] }
  0xdb   :  { %2131 = vmatprep.subr.bf16.mxu0 %v3042_v60  ;;  %2213 = vmatprep.subr.bf16.mxu1 %v3044_v61  ;;  %v131_v59 = vld [vmem:[%s4209_s1 + $0x378] sm:$0xff]  ;;  %v2869_v60 = vcombine.low %v106_v46, %v114_v47  ;;  %v2871_v61 = vcombine.low %v107_v48, %v115_v49  ;;  %v234_v48 = vld [vmem:[%s4209_s1 + $0x6b0] sm:$0xff] }
  0xdc   :  { %v2888_v63 = vcombine.high %v123_v58, %v131_v59  ;;  %v242_v49 = vld [vmem:[%s4209_s1 + $0x6f0] sm:$0xff] }
  0xdd   :  { %2123 = vmatmul.mubr.bf16.vlgmr.msra.gmra.mrb[8].mxu0 %v3375_v12  ;;  %2205 = vmatmul.mubr.bf16.vlgmr.msra.gmra.mrb[8].mxu1 %v3375_v12 }
  0xde   :  { %2132 = vmatpush1.bf16.msra.mxu0 %v3041_v2  ;;  %2214 = vmatpush1.bf16.msra.mxu1 %v3043_v3  ;;  %v139_v2 = vld [vmem:[%s4209_s1 + $0x3b8] sm:$0xff] }
  0xdf   :  { %2133 = vmatprep.subr.bf16.mxu0 %v3058_v4  ;;  %2215 = vmatprep.subr.bf16.mxu1 %v3060_v5  ;;  %v147_v3 = vld [vmem:[%s4209_s1 + $0x3f8] sm:$0xff]  ;;  %v2885_v4 = vcombine.low %v122_v55, %v130_v56  ;;  %v2887_v5 = vcombine.low %v123_v58, %v131_v59  ;;  %v2998_v56 = vcombine.high %v234_v48, %v242_v49  ;;  %v250_v59 = vld [vmem:[%s4209_s1 + $0x730] sm:$0xff] }
  0xe0   :  { %2163 = vmatprep.mubr.bf16.mxu0 %v3126_v25  ;;  %2245 = vmatprep.mubr.bf16.mxu1 %v3126_v25  ;;  %v2904_v7 = vcombine.high %v139_v2, %v147_v3 }
  0xe2   :  { %2134 = vmatpush1.bf16.msra.mxu0 %v3057_v10  ;;  %2216 = vmatpush1.bf16.msra.mxu1 %v3059_v11  ;;  %v155_v10 = vld [vmem:[%s4209_s1 + $0x438] sm:$0xff] }
  0xe3   :  { %2254 = vmatprep.subr.bf16.mxu0 %v2790_v13  ;;  %2336 = vmatprep.subr.bf16.mxu1 %v2792_v14  ;;  %v163_v11 = vld [vmem:[%s4209_s1 + $0x478] sm:$0xff]  ;;  %v2901_v13 = vcombine.low %v138_v0, %v146_v1  ;;  %v2903_v14 = vcombine.low %v139_v2, %v147_v3  ;;  %v2997_v0 = vcombine.low %v234_v48, %v242_v49 }
  0xe4   :  { %v2920_v16 = vcombine.high %v155_v10, %v163_v11 }
  0xe9   :  { %3069 = vmatmul.mubr.msk.bf16.vlgmr.msra.gmra.mrb[8].mxu0 %vm1758_vm0, %v3408_v29  ;;  %3070 = vmatmul.mubr.msk.bf16.vlgmr.msra.gmra.mrb[8].mxu1 %vm1758_vm0, %v3408_v29  ;;  %v75_v29 = vld [vmem:[%s4209_s1 + $0x1b8] sm:$0xff] }
  0xea   :  { %2255 = vmatpush1.bf16.msra.mxu0 %v2789_v53  ;;  %2337 = vmatpush1.bf16.msra.mxu1 %v2791_v19  ;;  %v2840_v38 = vcombine.high %v75_v29, %v83_v34  ;;  %v2839_v43 = vcombine.low %v75_v29, %v83_v34  ;;  %v171_v53 = vld [vmem:[%s4209_s1 + $0x4b8] sm:$0xff]  ;;  %v202_v29 = vld [vmem:[%s4209_s1 + $0x5b0] sm:$0xff] }
  0xeb   :  { %2256 = vmatprep.subr.bf16.mxu0 %v2806_v20  ;;  %2338 = vmatprep.subr.bf16.mxu1 %v2808_v21  ;;  %v179_v19 = vld [vmem:[%s4209_s1 + $0x4f8] sm:$0xff]  ;;  %v2917_v20 = vcombine.low %v154_v8, %v162_v9  ;;  %v2919_v21 = vcombine.low %v155_v10, %v163_v11  ;;  %v210_v34 = vld [vmem:[%s4209_s1 + $0x5f0] sm:$0xff]  ;;  %v4050_v10 = vld [vmem:[%s4211_s2] sm:$0xff] }
  0xec   :  { %2286 = vmatprep.mubr.bf16.mxu0 %v3249_v57  ;;  %2368 = vmatprep.mubr.bf16.mxu1 %v3249_v57  ;;  %v91_v57 = vld [vmem:[%s4209_s1 + $0x238] sm:$0xff]  ;;  %v2936_v23 = vcombine.high %v171_v53, %v179_v19  ;;  %v2966_v39 = vcombine.high %v202_v29, %v210_v34 }
  0xed   :  { %v2856_v45 = vcombine.high %v91_v57, %v99_v41  ;;  %v2855_v51 = vcombine.low %v91_v57, %v99_v41  ;;  %v218_v57 = vld [vmem:[%s4209_s1 + $0x630] sm:$0xff] }
  0xee   :  { %2257 = vmatpush1.bf16.msra.mxu0 %v2805_v27  ;;  %2339 = vmatpush1.bf16.msra.mxu1 %v2807_v28  ;;  %v187_v27 = vld [vmem:[%s4209_s1 + $0x538] sm:$0xff]  ;;  %v226_v41 = vld [vmem:[%s4209_s1 + $0x670] sm:$0xff] }
  0xef   :  { %2258 = vmatprep.subr.bf16.mxu0 %v2822_v30  ;;  %2340 = vmatprep.subr.bf16.mxu1 %v2824_v31  ;;  %v195_v28 = vld [vmem:[%s4209_s1 + $0x578] sm:$0xff]  ;;  %v2933_v30 = vcombine.low %v170_v17, %v178_v18  ;;  %v2935_v31 = vcombine.low %v171_v53, %v179_v19  ;;  %v2982_v46 = vcombine.high %v218_v57, %v226_v41  ;;  %v4064_v18 = vld [vmem:[%s4212_s3] sm:$0xff]  ;;  %v282_v53 = vld [vmem:[%s4209_s1 + $0x830] sm:$0xff] }
  0xf0   :  { %v2952_v33 = vcombine.high %v187_v27, %v195_v28  ;;  %v290_v19 = vld [vmem:[%s4209_s1 + $0x870] sm:$0xff] }
  0xf2   :  { %2259 = vmatpush1.bf16.msra.mxu0 %v2821_v35  ;;  %2341 = vmatpush1.bf16.msra.mxu1 %v2823_v36  ;;  %v203_v35 = vld [vmem:[%s4209_s1 + $0x5b8] sm:$0xff] }
  0xf3   :  { %2260 = vmatprep.subr.bf16.mxu0 %v2838_v37  ;;  %2342 = vmatprep.subr.bf16.mxu1 %v2840_v38  ;;  %v211_v36 = vld [vmem:[%s4209_s1 + $0x5f8] sm:$0xff]  ;;  %v2949_v37 = vcombine.low %v186_v24, %v194_v26  ;;  %v2951_v38 = vcombine.low %v187_v27, %v195_v28 }
  0xf4   :  { %v2968_v40 = vcombine.high %v203_v35, %v211_v36 }
  0xf6   :  { %2261 = vmatpush1.bf16.msra.mxu0 %v2837_v42  ;;  %2343 = vmatpush1.bf16.msra.mxu1 %v2839_v43  ;;  %v219_v42 = vld [vmem:[%s4209_s1 + $0x638] sm:$0xff] }
  0xf7   :  { %2262 = vmatprep.subr.bf16.mxu0 %v2854_v44  ;;  %2344 = vmatprep.subr.bf16.mxu1 %v2856_v45  ;;  %v227_v43 = vld [vmem:[%s4209_s1 + $0x678] sm:$0xff]  ;;  %v2965_v44 = vcombine.low %v202_v29, %v210_v34  ;;  %v2967_v45 = vcombine.low %v203_v35, %v211_v36  ;;  %v298_v35 = vld [vmem:[%s4209_s1 + $0x8b0] sm:$0xff] }
  0xf8   :  { %v2984_v47 = vcombine.high %v219_v42, %v227_v43  ;;  %v2983_v55 = vcombine.low %v219_v42, %v227_v43  ;;  %v306_v36 = vld [vmem:[%s4209_s1 + $0x8f0] sm:$0xff] }
  0xfa   :  { %2263 = vmatpush1.bf16.msra.mxu0 %v2853_v50  ;;  %2345 = vmatpush1.bf16.msra.mxu1 %v2855_v51  ;;  %v235_v50 = vld [vmem:[%s4209_s1 + $0x6b8] sm:$0xff] }
  0xfb   :  { %2264 = vmatprep.subr.bf16.mxu0 %v2870_v52  ;;  %2346 = vmatprep.subr.bf16.mxu1 %v2872_v54  ;;  %v243_v51 = vld [vmem:[%s4209_s1 + $0x6f8] sm:$0xff]  ;;  %v2422_v52 = vlaneseq  ;;  %v2981_v54 = vcombine.low %v218_v57, %v226_v41 }
  0xfc   :  { %v3000_v58 = vcombine.high %v235_v50, %v243_v51  ;;  %v2999_v1 = vcombine.low %v235_v50, %v243_v51  ;;  %v299_v57 = vld [vmem:[%s4209_s1 + $0x8b8] sm:$0xff] }
  0xfd   :  { %v307_v41 = vld [vmem:[%s4209_s1 + $0x8f8] sm:$0xff] }
  0xfe   :  { %2265 = vmatpush1.bf16.msra.mxu0 %v2869_v60  ;;  %2347 = vmatpush1.bf16.msra.mxu1 %v2871_v61  ;;  %v258_v60 = vld [vmem:[%s4209_s1 + $0x770] sm:$0xff]  ;;  %v251_v61 = vld [vmem:[%s4209_s1 + $0x738] sm:$0xff] }
  0xff   :  { %2266 = vmatprep.subr.bf16.mxu0 %v2886_v62  ;;  %2348 = vmatprep.subr.bf16.mxu1 %v2888_v63  ;;  %v259_v62 = vld [vmem:[%s4209_s1 + $0x778] sm:$0xff]  ;;  %v4030_v63 = vshrl.u32 %v2422_v52, 7  ;;  %v3014_v2 = vcombine.high %v250_v59, %v258_v60  ;;  %v3013_v9 = vcombine.low %v250_v59, %v258_v60  ;;  %v3062_v52 = vcombine.high %v298_v35, %v306_v36 }
 0x100   :  { %v3016_v3 = vcombine.high %v251_v61, %v259_v62 }
 0x101   :  { %v4045_v8 = vsub.s32 0, %v4030_v63  ;;  %v4053_v11 = vsub.s32 2, %v4030_v63 }
 0x102   :  { %2267 = vmatpush1.bf16.msra.mxu0 %v2885_v4  ;;  %2349 = vmatpush1.bf16.msra.mxu1 %v2887_v5  ;;  %v266_v4 = vld [vmem:[%s4209_s1 + $0x7b0] sm:$0xff] }
 0x103   :  { %2268 = vmatprep.subr.bf16.mxu0 %v2902_v6  ;;  %2350 = vmatprep.subr.bf16.mxu1 %v2904_v7  ;;  %v274_v5 = vld [vmem:[%s4209_s1 + $0x7f0] sm:$0xff]  ;;  %v267_v6 = vld [vmem:[%s4209_s1 + $0x7b8] sm:$0xff]  ;;  %v2433_v26 = vrot.slane %v4050_v10, %v4053_v11  ;;  %v2525_v28 = vrot.slane %v4064_v18, %v4045_v8 }
 0x104   :  { %v275_v7 = vld [vmem:[%s4209_s1 + $0x7f8] sm:$0xff] }
 0x105   :  { %v3032_v17 = vcombine.high %v267_v6, %v275_v7  ;;  %v3031_v24 = vcombine.low %v267_v6, %v275_v7 }
 0x106   :  { %2269 = vmatpush1.bf16.msra.mxu0 %v2901_v13  ;;  %2351 = vmatpush1.bf16.msra.mxu1 %v2903_v14  ;;  %v4056_v13 = vsub.s32 1, %v4030_v63  ;;  %v3015_v14 = vcombine.low %v251_v61, %v259_v62 }
 0x107   :  { %2270 = vmatprep.subr.bf16.mxu0 %v2918_v15  ;;  %2352 = vmatprep.subr.bf16.mxu1 %v2920_v16  ;;  %v3030_v15 = vcombine.high %v266_v4, %v274_v5  ;;  %v4059_v16 = vsub.s32 3, %v4030_v63 }
 0x108   :  { %v2429_v27 = vrot.slane %v4050_v10, %v4056_v13  ;;  %v2529_v29 = vrot.slane %v4064_v18, %v4056_v13 }
 0x10a   :  { %2271 = vmatpush1.bf16.msra.mxu0 %v2917_v20  ;;  %2353 = vmatpush1.bf16.msra.mxu1 %v2919_v21  ;;  %v2425_v20 = vrot.slane %v4050_v10, %v4045_v8  ;;  %v283_v21 = vld [vmem:[%s4209_s1 + $0x838] sm:$0xff] }
 0x10b   :  { %2272 = vmatprep.subr.bf16.mxu0 %v2934_v22  ;;  %2354 = vmatprep.subr.bf16.mxu1 %v2936_v23  ;;  %v291_v22 = vld [vmem:[%s4209_s1 + $0x878] sm:$0xff]  ;;  %v3029_v23 = vcombine.low %v266_v4, %v274_v5 }
 0x10c   :  { %v3048_v34 = vcombine.high %v283_v21, %v291_v22 }
 0x10e   :  { %2273 = vmatpush1.bf16.msra.mxu0 %v2933_v30  ;;  %2355 = vmatpush1.bf16.msra.mxu1 %v2935_v31  ;;  %v2437_v30 = vrot.slane %v4050_v10, %v4059_v16  ;;  %v3046_v31 = vcombine.high %v282_v53, %v290_v19 }
 0x10f   :  { %2274 = vmatprep.subr.bf16.mxu0 %v2950_v32  ;;  %2356 = vmatprep.subr.bf16.mxu1 %v2952_v33  ;;  %v2533_v33 = vrot.slane %v4064_v18, %v4053_v11 }
 0x112   :  { %2275 = vmatpush1.bf16.msra.mxu0 %v2949_v37  ;;  %2357 = vmatpush1.bf16.msra.mxu1 %v2951_v38 }
 0x113   :  { %2276 = vmatprep.subr.bf16.mxu0 %v2966_v39  ;;  %2358 = vmatprep.subr.bf16.mxu1 %v2968_v40  ;;  %v2537_v40 = vrot.slane %v4064_v18, %v4059_v16 }
 0x116   :  { %2277 = vmatpush1.bf16.msra.mxu0 %v2965_v44  ;;  %2359 = vmatpush1.bf16.msra.mxu1 %v2967_v45 }
 0x117   :  { %2278 = vmatprep.subr.bf16.mxu0 %v2982_v46  ;;  %2360 = vmatprep.subr.bf16.mxu1 %v2984_v47  ;;  %v3045_v46 = vcombine.low %v282_v53, %v290_v19  ;;  %v3047_v47 = vcombine.low %v283_v21, %v291_v22 }
 0x11a   :  { %2279 = vmatpush1.bf16.msra.mxu0 %v2981_v54  ;;  %2361 = vmatpush1.bf16.msra.mxu1 %v2983_v55 }
 0x11b   :  { %2280 = vmatprep.subr.bf16.mxu0 %v2998_v56  ;;  %2362 = vmatprep.subr.bf16.mxu1 %v3000_v58  ;;  %v3064_v58 = vcombine.high %v299_v57, %v307_v41 }
 0x11e   :  { %2281 = vmatpush1.bf16.msra.mxu0 %v2997_v0  ;;  %2363 = vmatpush1.bf16.msra.mxu1 %v2999_v1  ;;  %v3061_v0 = vcombine.low %v298_v35, %v306_v36 }
 0x11f   :  { %2282 = vmatprep.subr.bf16.mxu0 %v3014_v2  ;;  %2364 = vmatprep.subr.bf16.mxu1 %v3016_v3  ;;  %v3063_v3 = vcombine.low %v299_v57, %v307_v41 }
 0x122   :  { %2283 = vmatpush1.bf16.msra.mxu0 %v3013_v9  ;;  %2365 = vmatpush1.bf16.msra.mxu1 %v3015_v14 }
 0x123   :  { %2284 = vmatprep.subr.bf16.mxu0 %v3030_v15  ;;  %2366 = vmatprep.subr.bf16.mxu1 %v3032_v17 }
 0x124   :  { %v1837_v32 = vpop.f32.mrb[0].mxu0  ;;  %v1919_v38 = vpop.f32.mrb[0].mxu1 }
 0x125   :  { %v2502_v37 = vmul.f32 %v2425_v20, %v1837_v32  ;;  %v1839_v39 = vpop.f32.mrb[1].mxu0  ;;  %v2504_v42 = vmul.f32 %v2433_v26, %v1919_v38  ;;  %v1921_v44 = vpop.f32.mrb[1].mxu1 }
 0x126   :  { %2285 = vmatpush1.bf16.msra.mxu0 %v3029_v23  ;;  %v2503_v43 = vmul.f32 %v2429_v27, %v1839_v39  ;;  %v1841_v45 = vpop.f32.mrb[2].mxu0  ;;  %2367 = vmatpush1.bf16.msra.mxu1 %v3031_v24  ;;  %v2505_v49 = vmul.f32 %v2437_v30, %v1921_v44  ;;  %v1923_v50 = vpop.f32.mrb[2].mxu1  ;;  %v3125_v27 = vld [vmem:[%s4210_s0 + $0x8] ss:$0 sps:$4 sm:$0xff]   ;;  %v4128_v30 = vsub.s32 5, %v4030_v63 }
 0x127   :  { %v2602_v48 = vadd.f32 %v2525_v28, %v2502_v37  ;;  %2295 = vmatprep.subr.bf16.mxu0 %v3046_v31  ;;  %v1842_v51 = vpop.f32.mrb[3].mxu0  ;;  %v2604_v54 = vadd.f32 %v2533_v33, %v2504_v42  ;;  %2377 = vmatprep.subr.bf16.mxu1 %v3048_v34  ;;  %v1924_v56 = vpop.f32.mrb[3].mxu1  ;;  %v4125_v28 = vsub.s32 6, %v4030_v63  ;;  %v4131_v31 = vsub.s32 7, %v4030_v63 }
 0x128   :  { %v2603_v55 = vadd.f32 %v2529_v29, %v2503_v43  ;;  %v2605_v60 = vadd.f32 %v2537_v40, %v2505_v49  ;;  %v2445_v29 = vrot.slane %v4050_v10, %v4128_v30  ;;  %v2545_v37 = vrot.slane %v4064_v18, %v4128_v30 }
 0x129   :  { %v2618_v59 = vadd.f32 3.0, %v2602_v48  ;;  %2287 = vmatmul.mubr.bf16.vlgmr.msra.gmra.mrb[12].mxu0 %v3375_v12  ;;  %v2620_v61 = vadd.f32 3.0, %v2604_v54  ;;  %2369 = vmatmul.mubr.bf16.vlgmr.msra.gmra.mrb[12].mxu1 %v3375_v12  ;;  %v2449_v33 = vrot.slane %v4050_v10, %v4125_v28  ;;  %v2453_v35 = vrot.slane %v4050_v10, %v4131_v31 }
 0x12a   :  { %v2619_v62 = vadd.f32 3.0, %v2603_v55  ;;  %2296 = vmatpush1.bf16.msra.mxu0 %v3045_v46  ;;  %v2621_v2 = vadd.f32 3.0, %v2605_v60  ;;  %2378 = vmatpush1.bf16.msra.mxu1 %v3047_v47  ;;  %v2553_v57 = vrot.slane %v4064_v18, %v4131_v31 }
 0x12b   :  { %v2634_v1 = vmax.f32 %v2618_v59, 0.0  ;;  %2297 = vmatprep.subr.bf16.mxu0 %v3062_v52  ;;  %v2636_v4 = vmax.f32 %v2620_v61, 0.0  ;;  %2379 = vmatprep.subr.bf16.mxu1 %v3064_v58 }
 0x12c   :  { %v2635_v5 = vmax.f32 %v2619_v62, 0.0  ;;  %2327 = vmatprep.mubr.bf16.mxu0 %v3126_v25  ;;  %v2637_v7 = vmax.f32 %v2621_v2, 0.0  ;;  %2409 = vmatprep.mubr.bf16.mxu1 %v3126_v25  ;;  %v4122_v25 = vsub.s32 4, %v4030_v63  ;;  %v2549_v63 = vrot.slane %v4064_v18, %v4125_v28 }
 0x12d   :  { %v2650_v6 = vmin.f32 %v2634_v1, 6.0  ;;  %v2652_v9 = vmin.f32 %v2636_v4, 6.0 }
 0x12e   :  { %v2651_v14 = vmin.f32 %v2635_v5, 6.0  ;;  %2298 = vmatpush1.bf16.msra.mxu0 %v3061_v0  ;;  %v2653_v15 = vmin.f32 %v2637_v7, 6.0  ;;  %2380 = vmatpush1.bf16.msra.mxu1 %v3063_v3  ;;  %v2441_v32 = vrot.slane %v4050_v10, %v4122_v25  ;;  %v2541_v34 = vrot.slane %v4064_v18, %v4122_v25 }
 0x12f   :  { %v2666_v12 = vmul.f32 %v2650_v6, %v2602_v48  ;;  %v2668_v17 = vmul.f32 %v2652_v9, %v2604_v54 }
 0x130   :  { %v2667_v53 = vmul.f32 %v2651_v14, %v2603_v55  ;;  %v2669_v20 = vmul.f32 %v2653_v15, %v2605_v60 }
 0x131   :  { %v2682_v19 = vmul.f32 0.16666667, %v2666_v12  ;;  %v2684_v21 = vmul.f32 0.16666667, %v2668_v17  ;;  %v4158_v17 = vld [vmem:[%s4211_s2 + $0x8] sm:$0xff] }
 0x132   :  { %v2683_v22 = vmul.f32 0.16666667, %v2667_v53  ;;  %v2685_v23 = vmul.f32 0.16666667, %v2669_v20  ;;  %v4163_v53 = vld [vmem:[%s4212_s3 + $0x8] sm:$0xff]  ;;  %v2465_v20 = vrot.slane %v4158_v17, %v4053_v11 }
 0x134   :  { %v3081_v24 = vpack.c.bf16 %v2683_v22, %v2682_v19  ;;  %v3082_v26 = vpack.c.bf16 %v2685_v23, %v2684_v21  ;;  %v2457_v19 = vrot.slane %v4158_v17, %v4045_v8  ;;  %v2461_v21 = vrot.slane %v4158_v17, %v4056_v13 }
 0x135   :  { %3071 = vmatmul.mubr.msk.bf16.vlgmr.msra.gmra.mrb[12].mxu0 %vm1758_vm0, %v3125_v27  ;;  %3072 = vmatmul.mubr.msk.bf16.vlgmr.msra.gmra.mrb[12].mxu1 %vm1758_vm0, %v3125_v27  ;;  %v2557_v22 = vrot.slane %v4163_v53, %v4045_v8  ;;  %v2469_v23 = vrot.slane %v4158_v17, %v4059_v16  ;;  %v2561_v27 = vrot.slane %v4163_v53, %v4056_v13 }
 0x136   :  { %2762 = vst [vmem:[%s4213_s4] sm:$0xff] %v3081_v24  ;;  %2763 = vst [vmem:[%s4213_s4 + $0x8] sm:$0xff] %v3082_v26  ;;  %v2565_v26 = vrot.slane %v4163_v53, %v4053_v11 }
 0x170   :  { %v2001_v36 = vpop.f32.mrb[4].mxu0  ;;  %v2083_v39 = vpop.f32.mrb[4].mxu1 }
 0x171   :  { %v2506_v38 = vmul.f32 %v2441_v32, %v2001_v36  ;;  %v2003_v40 = vpop.f32.mrb[5].mxu0  ;;  %v2508_v41 = vmul.f32 %v2449_v33, %v2083_v39  ;;  %v2085_v43 = vpop.f32.mrb[5].mxu1 }
 0x172   :  { %v2507_v42 = vmul.f32 %v2445_v29, %v2003_v40  ;;  %v2005_v44 = vpop.f32.mrb[6].mxu0  ;;  %v2509_v46 = vmul.f32 %v2453_v35, %v2085_v43  ;;  %v2087_v10 = vpop.f32.mrb[6].mxu1 }
 0x173   :  { %v2606_v45 = vadd.f32 %v2541_v34, %v2506_v38  ;;  %v2006_v47 = vpop.f32.mrb[7].mxu0  ;;  %v2608_v48 = vadd.f32 %v2549_v63, %v2508_v41  ;;  %v2088_v50 = vpop.f32.mrb[7].mxu1  ;;  %v2569_v34 = vrot.slane %v4163_v53, %v4059_v16 }
 0x174   :  { %v2607_v49 = vadd.f32 %v2545_v37, %v2507_v42  ;;  %v2609_v52 = vadd.f32 %v2553_v57, %v2509_v46 }
 0x175   :  { %v2622_v51 = vadd.f32 3.0, %v2606_v45  ;;  %v2624_v54 = vadd.f32 3.0, %v2608_v48 }
 0x176   :  { %v2623_v55 = vadd.f32 3.0, %v2607_v49  ;;  %v2625_v58 = vadd.f32 3.0, %v2609_v52 }
 0x177   :  { %v2638_v56 = vmax.f32 %v2622_v51, 0.0  ;;  %v2640_v59 = vmax.f32 %v2624_v54, 0.0 }
 0x178   :  { %v2639_v60 = vmax.f32 %v2623_v55, 0.0  ;;  %v2641_v61 = vmax.f32 %v2625_v58, 0.0 }
 0x179   :  { %v2654_v18 = vmin.f32 %v2638_v56, 6.0  ;;  %v2656_v62 = vmin.f32 %v2640_v59, 6.0 }
 0x17a   :  { %v2655_v0 = vmin.f32 %v2639_v60, 6.0  ;;  %v2657_v2 = vmin.f32 %v2641_v61, 6.0 }
 0x17b   :  { %v2670_v1 = vmul.f32 %v2654_v18, %v2606_v45  ;;  %v2672_v3 = vmul.f32 %v2656_v62, %v2608_v48 }
 0x17c   :  { %v2671_v4 = vmul.f32 %v2655_v0, %v2607_v49  ;;  %v2673_v6 = vmul.f32 %v2657_v2, %v2609_v52  ;;  %v2473_v0 = vrot.slane %v4158_v17, %v4122_v25  ;;  %v2477_v2 = vrot.slane %v4158_v17, %v4128_v30 }
 0x17d   :  { %v2686_v5 = vmul.f32 0.16666667, %v2670_v1  ;;  %v2688_v7 = vmul.f32 0.16666667, %v2672_v3  ;;  %v2481_v1 = vrot.slane %v4158_v17, %v4125_v28  ;;  %v2573_v3 = vrot.slane %v4163_v53, %v4122_v25 }
 0x17e   :  { %v2687_v9 = vmul.f32 0.16666667, %v2671_v4  ;;  %v2689_v14 = vmul.f32 0.16666667, %v2673_v6  ;;  %v2485_v4 = vrot.slane %v4158_v17, %v4131_v31  ;;  %v2581_v6 = vrot.slane %v4163_v53, %v4125_v28 }
 0x180   :  { %v3083_v12 = vpack.c.bf16 %v2687_v9, %v2686_v5  ;;  %v3084_v15 = vpack.c.bf16 %v2689_v14, %v2688_v7  ;;  %v2577_v7 = vrot.slane %v4163_v53, %v4128_v30 }
 0x182   :  { %2764 = vst [vmem:[%s4213_s4 + $0x10] sm:$0xff] %v3083_v12  ;;  %2765 = vst [vmem:[%s4213_s4 + $0x18] sm:$0xff] %v3084_v15  ;;  %v2585_v15 = vrot.slane %v4163_v53, %v4131_v31 }
 0x1bc   :  { %v2165_v24 = vpop.f32.mrb[8].mxu0  ;;  %v2247_v33 = vpop.f32.mrb[8].mxu1 }
 0x1bd   :  { %v2510_v32 = vmul.f32 %v2457_v19, %v2165_v24  ;;  %v2167_v29 = vpop.f32.mrb[9].mxu0  ;;  %v2512_v35 = vmul.f32 %v2465_v20, %v2247_v33  ;;  %v2249_v63 = vpop.f32.mrb[9].mxu1 }
 0x1be   :  { %v2511_v36 = vmul.f32 %v2461_v21, %v2167_v29  ;;  %v2169_v8 = vpop.f32.mrb[10].mxu0  ;;  %v2513_v38 = vmul.f32 %v2469_v23, %v2249_v63  ;;  %v2251_v39 = vpop.f32.mrb[10].mxu1 }
 0x1bf   :  { %v2610_v37 = vadd.f32 %v2557_v22, %v2510_v32  ;;  %v2170_v40 = vpop.f32.mrb[11].mxu0  ;;  %v2612_v57 = vadd.f32 %v2565_v26, %v2512_v35  ;;  %v2252_v11 = vpop.f32.mrb[11].mxu1 }
 0x1c0   :  { %v2611_v41 = vadd.f32 %v2561_v27, %v2511_v36  ;;  %v2613_v43 = vadd.f32 %v2569_v34, %v2513_v38 }
 0x1c1   :  { %v2626_v42 = vadd.f32 3.0, %v2610_v37  ;;  %v2628_v13 = vadd.f32 3.0, %v2612_v57 }
 0x1c2   :  { %v2627_v44 = vadd.f32 3.0, %v2611_v41  ;;  %v2629_v46 = vadd.f32 3.0, %v2613_v43 }
 0x1c3   :  { %v2642_v45 = vmax.f32 %v2626_v42, 0.0  ;;  %v2644_v10 = vmax.f32 %v2628_v13, 0.0 }
 0x1c4   :  { %v2643_v47 = vmax.f32 %v2627_v44, 0.0  ;;  %v2645_v48 = vmax.f32 %v2629_v46, 0.0 }
 0x1c5   :  { %v2658_v16 = vmin.f32 %v2642_v45, 6.0  ;;  %v2660_v49 = vmin.f32 %v2644_v10, 6.0 }
 0x1c6   :  { %v2659_v50 = vmin.f32 %v2643_v47, 6.0  ;;  %v2661_v52 = vmin.f32 %v2645_v48, 6.0 }
 0x1c7   :  { %v2674_v51 = vmul.f32 %v2658_v16, %v2610_v37  ;;  %v2676_v54 = vmul.f32 %v2660_v49, %v2612_v57 }
 0x1c8   :  { %v2675_v55 = vmul.f32 %v2659_v50, %v2611_v41  ;;  %v2677_v58 = vmul.f32 %v2661_v52, %v2613_v43 }
 0x1c9   :  { %v2690_v56 = vmul.f32 0.16666667, %v2674_v51  ;;  %v2692_v59 = vmul.f32 0.16666667, %v2676_v54 }
 0x1ca   :  { %v2691_v60 = vmul.f32 0.16666667, %v2675_v55  ;;  %v2693_v18 = vmul.f32 0.16666667, %v2677_v58 }
 0x1cc   :  { %v3085_v61 = vpack.c.bf16 %v2691_v60, %v2690_v56  ;;  %v3086_v62 = vpack.c.bf16 %v2693_v18, %v2692_v59 }
 0x1ce   :  { %2766 = vst [vmem:[%s4213_s4 + $0x20] sm:$0xff] %v3085_v61  ;;  %2767 = vst [vmem:[%s4213_s4 + $0x28] sm:$0xff] %v3086_v62 }
 0x208   :  { %v2329_v5 = vpop.f32.mrb[12].mxu0  ;;  %v2411_v14 = vpop.f32.mrb[12].mxu1 }
 0x209   :  { %v2514_v9 = vmul.f32 %v2473_v0, %v2329_v5  ;;  %v2331_v12 = vpop.f32.mrb[13].mxu0  ;;  %v2516_v19 = vmul.f32 %v2481_v1, %v2411_v14  ;;  %v2413_v21 = vpop.f32.mrb[13].mxu1 }
 0x20a   :  { %v2515_v20 = vmul.f32 %v2477_v2, %v2331_v12  ;;  %v2333_v25 = vpop.f32.mrb[14].mxu0  ;;  %v2517_v23 = vmul.f32 %v2485_v4, %v2413_v21  ;;  %v2415_v17 = vpop.f32.mrb[14].mxu1 }
 0x20b   :  { %v2614_v22 = vadd.f32 %v2573_v3, %v2514_v9  ;;  %v2334_v24 = vpop.f32.mrb[15].mxu0  ;;  %v2616_v26 = vadd.f32 %v2581_v6, %v2516_v19  ;;  %v2416_v28 = vpop.f32.mrb[15].mxu1 }
 0x20c   :  { %v2615_v27 = vadd.f32 %v2577_v7, %v2515_v20  ;;  %v2617_v33 = vadd.f32 %v2585_v15, %v2517_v23 }
 0x20d   :  { %v2630_v32 = vadd.f32 3.0, %v2614_v22  ;;  %v2632_v30 = vadd.f32 3.0, %v2616_v26 }
 0x20e   :  { %v2631_v29 = vadd.f32 3.0, %v2615_v27  ;;  %v2633_v35 = vadd.f32 3.0, %v2617_v33 }
 0x20f   :  { %v2646_v34 = vmax.f32 %v2630_v32, 0.0  ;;  %v2648_v36 = vmax.f32 %v2632_v30, 0.0 }
 0x210   :  { %v2647_v63 = vmax.f32 %v2631_v29, 0.0  ;;  %v2649_v53 = vmax.f32 %v2633_v35, 0.0 }
 0x211   :  { %v2662_v31 = vmin.f32 %v2646_v34, 6.0  ;;  %v2664_v8 = vmin.f32 %v2648_v36, 6.0 }
 0x212   :  { %v2663_v37 = vmin.f32 %v2647_v63, 6.0  ;;  %v2665_v39 = vmin.f32 %v2649_v53, 6.0 }
 0x213   :  { %v2678_v38 = vmul.f32 %v2662_v31, %v2614_v22  ;;  %v2680_v40 = vmul.f32 %v2664_v8, %v2616_v26 }
 0x214   :  { %v2679_v57 = vmul.f32 %v2663_v37, %v2615_v27  ;;  %v2681_v11 = vmul.f32 %v2665_v39, %v2617_v33 }
 0x215   :  { %v2694_v41 = vmul.f32 0.16666667, %v2678_v38  ;;  %v2696_v42 = vmul.f32 0.16666667, %v2680_v40 }
 0x216   :  { %v2695_v43 = vmul.f32 0.16666667, %v2679_v57  ;;  %v2697_v13 = vmul.f32 0.16666667, %v2681_v11 }
 0x218   :  { %v3087_v44 = vpack.c.bf16 %v2695_v43, %v2694_v41  ;;  %v3088_v45 = vpack.c.bf16 %v2697_v13, %v2696_v42 }
 0x21a   :  { %2768 = vst [vmem:[%s4213_s4 + $0x30] sm:$0xff] %v3087_v44  ;;  %2769 = vst [vmem:[%s4213_s4 + $0x38] sm:$0xff] %v3088_v45 }

// kernel: _lambda_.52
= control target key start
LH: loop header
LB: loop body
LE: loop exit
PB: predicated region body
PF: predicated region fallthrough
CT: control target
= control target key end

     0   :  { %s4038_s1 = inlined_call_operand.vmem [shape: bf16[1152,256], index: 1, kind: input, shape index: {}]   ;;  %s4039_s0 = inlined_call_operand.vmem [shape: bf16[128,1152], index: 0, kind: input, shape index: {}]   ;;  %s4040_s2 = inlined_call_operand.vmem [shape: f32[1,256], index: 2, kind: input, shape index: {}]   ;;  %s4041_s3 = inlined_call_operand.vmem [shape: f32[1,256], index: 3, kind: input, shape index: {}]   ;;  %s4042_s4 = inlined_call_operand.vmem [shape: bf16[128,256], index: 4, kind: output, shape index: {}]  }
   0x1   :  { %v2668_v0 = vld [vmem:[%s4038_s1 + $0x4] ss:$8 sps:$4 sm:$0xff]   ;;  %v2672_v2 = vld [vmem:[%s4038_s1] ss:$8 sps:$4 sm:$0xff]   ;;  %v2674_v4 = vld [vmem:[%s4038_s1 + $0x14] ss:$8 sps:$4 sm:$0xff]  }
   0x2   :  { %v2670_v1 = vld [vmem:[%s4038_s1 + $0x204] ss:$8 sps:$4 sm:$0xff]   ;;  %1330 = vmatprep.subr.bf16.mxu1 %v2668_v0  ;;  %v2673_v3 = vld [vmem:[%s4038_s1 + $0x200] ss:$8 sps:$4 sm:$0xff]   ;;  %v2676_v5 = vld [vmem:[%s4038_s1 + $0x214] ss:$8 sps:$4 sm:$0xff]  }
   0x3   :  { %1556 = vmatprep.subr.bf16.mxu0 %v2670_v1  ;;  %1331 = vmatpush1.bf16.msra.mxu1 %v2672_v2  ;;  %v2678_v6 = vld [vmem:[%s4038_s1 + $0x10] ss:$8 sps:$4 sm:$0xff]   ;;  %v2680_v8 = vld [vmem:[%s4038_s1 + $0x24] ss:$8 sps:$4 sm:$0xff]   ;;  %v2684_v10 = vld [vmem:[%s4038_s1 + $0x20] ss:$8 sps:$4 sm:$0xff]  }
   0x4   :  { %1557 = vmatpush1.bf16.msra.mxu0 %v2673_v3  ;;  %1332 = vmatprep.subr.bf16.mxu1 %v2674_v4  ;;  %v2679_v7 = vld [vmem:[%s4038_s1 + $0x210] ss:$8 sps:$4 sm:$0xff]   ;;  %v2682_v9 = vld [vmem:[%s4038_s1 + $0x224] ss:$8 sps:$4 sm:$0xff]   ;;  %v2685_v11 = vld [vmem:[%s4038_s1 + $0x220] ss:$8 sps:$4 sm:$0xff]  }
   0x5   :  { %1558 = vmatprep.subr.bf16.mxu0 %v2676_v5  ;;  %v2686_v12 = vld [vmem:[%s4038_s1 + $0x34] ss:$8 sps:$4 sm:$0xff]   ;;  %v2690_v14 = vld [vmem:[%s4038_s1 + $0x30] ss:$8 sps:$4 sm:$0xff]   ;;  %v2692_v16 = vld [vmem:[%s4038_s1 + $0x44] ss:$8 sps:$4 sm:$0xff]  }
   0x6   :  { %v2688_v13 = vld [vmem:[%s4038_s1 + $0x234] ss:$8 sps:$4 sm:$0xff]   ;;  %v2691_v15 = vld [vmem:[%s4038_s1 + $0x230] ss:$8 sps:$4 sm:$0xff]   ;;  %v2694_v17 = vld [vmem:[%s4038_s1 + $0x244] ss:$8 sps:$4 sm:$0xff]  }
   0x7   :  { %1333 = vmatpush1.bf16.msra.mxu1 %v2678_v6  ;;  %v2696_v18 = vld [vmem:[%s4038_s1 + $0x40] ss:$8 sps:$4 sm:$0xff]   ;;  %v2698_v20 = vld [vmem:[%s4038_s1 + $0x54] ss:$8 sps:$4 sm:$0xff]   ;;  %v2702_v22 = vld [vmem:[%s4038_s1 + $0x50] ss:$8 sps:$4 sm:$0xff]  }
   0x8   :  { %1559 = vmatpush1.bf16.msra.mxu0 %v2679_v7  ;;  %1334 = vmatprep.subr.bf16.mxu1 %v2680_v8  ;;  %v2697_v19 = vld [vmem:[%s4038_s1 + $0x240] ss:$8 sps:$4 sm:$0xff]   ;;  %v2700_v21 = vld [vmem:[%s4038_s1 + $0x254] ss:$8 sps:$4 sm:$0xff]   ;;  %v2703_v23 = vld [vmem:[%s4038_s1 + $0x250] ss:$8 sps:$4 sm:$0xff]  }
   0x9   :  { %1560 = vmatprep.subr.bf16.mxu0 %v2682_v9  ;;  %v2704_v24 = vld [vmem:[%s4038_s1 + $0x64] ss:$8 sps:$4 sm:$0xff]   ;;  %v2708_v26 = vld [vmem:[%s4038_s1 + $0x60] ss:$8 sps:$4 sm:$0xff]   ;;  %v2710_v28 = vld [vmem:[%s4038_s1 + $0x74] ss:$8 sps:$4 sm:$0xff]  }
   0xa   :  { %v2706_v25 = vld [vmem:[%s4038_s1 + $0x264] ss:$8 sps:$4 sm:$0xff]   ;;  %v2709_v27 = vld [vmem:[%s4038_s1 + $0x260] ss:$8 sps:$4 sm:$0xff]   ;;  %v2712_v29 = vld [vmem:[%s4038_s1 + $0x274] ss:$8 sps:$4 sm:$0xff]  }
   0xb   :  { %1335 = vmatpush1.bf16.msra.mxu1 %v2684_v10  ;;  %v2714_v30 = vld [vmem:[%s4038_s1 + $0x70] ss:$8 sps:$4 sm:$0xff]   ;;  %v2716_v32 = vld [vmem:[%s4038_s1 + $0x84] ss:$8 sps:$4 sm:$0xff]   ;;  %v2720_v34 = vld [vmem:[%s4038_s1 + $0x80] ss:$8 sps:$4 sm:$0xff]  }
   0xc   :  { %1561 = vmatpush1.bf16.msra.mxu0 %v2685_v11  ;;  %1336 = vmatprep.subr.bf16.mxu1 %v2686_v12  ;;  %v2715_v31 = vld [vmem:[%s4038_s1 + $0x270] ss:$8 sps:$4 sm:$0xff]   ;;  %v2718_v33 = vld [vmem:[%s4038_s1 + $0x284] ss:$8 sps:$4 sm:$0xff]   ;;  %v2721_v35 = vld [vmem:[%s4038_s1 + $0x280] ss:$8 sps:$4 sm:$0xff]  }
   0xd   :  { %1562 = vmatprep.subr.bf16.mxu0 %v2688_v13  ;;  %v2722_v36 = vld [vmem:[%s4038_s1 + $0x94] ss:$8 sps:$4 sm:$0xff]   ;;  %v2726_v38 = vld [vmem:[%s4038_s1 + $0x90] ss:$8 sps:$4 sm:$0xff]   ;;  %v2728_v40 = vld [vmem:[%s4038_s1 + $0xa4] ss:$8 sps:$4 sm:$0xff]  }
   0xe   :  { %v2724_v37 = vld [vmem:[%s4038_s1 + $0x294] ss:$8 sps:$4 sm:$0xff]   ;;  %v2727_v39 = vld [vmem:[%s4038_s1 + $0x290] ss:$8 sps:$4 sm:$0xff]   ;;  %v2730_v41 = vld [vmem:[%s4038_s1 + $0x2a4] ss:$8 sps:$4 sm:$0xff]  }
   0xf   :  { %1337 = vmatpush1.bf16.msra.mxu1 %v2690_v14  ;;  %v2732_v42 = vld [vmem:[%s4038_s1 + $0xa0] ss:$8 sps:$4 sm:$0xff]   ;;  %v2734_v44 = vld [vmem:[%s4038_s1 + $0xb4] ss:$8 sps:$4 sm:$0xff]   ;;  %v2738_v46 = vld [vmem:[%s4038_s1 + $0xb0] ss:$8 sps:$4 sm:$0xff]  }
  0x10   :  { %1563 = vmatpush1.bf16.msra.mxu0 %v2691_v15  ;;  %1338 = vmatprep.subr.bf16.mxu1 %v2692_v16  ;;  %v2733_v43 = vld [vmem:[%s4038_s1 + $0x2a0] ss:$8 sps:$4 sm:$0xff]   ;;  %v2736_v45 = vld [vmem:[%s4038_s1 + $0x2b4] ss:$8 sps:$4 sm:$0xff]   ;;  %v2739_v47 = vld [vmem:[%s4038_s1 + $0x2b0] ss:$8 sps:$4 sm:$0xff]  }
  0x11   :  { %1564 = vmatprep.subr.bf16.mxu0 %v2694_v17  ;;  %v2740_v48 = vld [vmem:[%s4038_s1 + $0xc4] ss:$8 sps:$4 sm:$0xff]   ;;  %v2769_v51 = vld [vmem:[%s4039_s0 + $0x14] ss:$36 sps:$4 sm:$0xff]   ;;  %v2744_v52 = vld [vmem:[%s4038_s1 + $0xc0] ss:$8 sps:$4 sm:$0xff]  }
  0x12   :  { %v2766_v49 = vld [vmem:[%s4039_s0 + $0x4] ss:$36 sps:$4 sm:$0xff]   ;;  %1588 = vmatprep.mubr.bf16.mxu0 %v2769_v51  ;;  %v2746_v54 = vld [vmem:[%s4038_s1 + $0xd4] ss:$8 sps:$4 sm:$0xff]   ;;  %v2750_v56 = vld [vmem:[%s4038_s1 + $0xd0] ss:$8 sps:$4 sm:$0xff]  }
  0x13   :  { %1339 = vmatpush1.bf16.msra.mxu1 %v2696_v18  ;;  %v2742_v50 = vld [vmem:[%s4038_s1 + $0x2c4] ss:$8 sps:$4 sm:$0xff]   ;;  %1362 = vmatprep.mubr.bf16.mxu1 %v2766_v49  ;;  %v2745_v53 = vld [vmem:[%s4038_s1 + $0x2c0] ss:$8 sps:$4 sm:$0xff]   ;;  %v2748_v55 = vld [vmem:[%s4038_s1 + $0x2d4] ss:$8 sps:$4 sm:$0xff]  }
  0x14   :  { %1565 = vmatpush1.bf16.msra.mxu0 %v2697_v19  ;;  %1340 = vmatprep.subr.bf16.mxu1 %v2698_v20  ;;  %v2751_v57 = vld [vmem:[%s4038_s1 + $0x2d0] ss:$8 sps:$4 sm:$0xff]   ;;  %v2752_v58 = vld [vmem:[%s4038_s1 + $0xe4] ss:$8 sps:$4 sm:$0xff]   ;;  %v2756_v60 = vld [vmem:[%s4038_s1 + $0xe0] ss:$8 sps:$4 sm:$0xff]  }
  0x15   :  { %1566 = vmatprep.subr.bf16.mxu0 %v2700_v21  ;;  %v2754_v59 = vld [vmem:[%s4038_s1 + $0x2e4] ss:$8 sps:$4 sm:$0xff]   ;;  %v2757_v61 = vld [vmem:[%s4038_s1 + $0x2e0] ss:$8 sps:$4 sm:$0xff]   ;;  %v2758_v62 = vld [vmem:[%s4038_s1 + $0xf4] ss:$8 sps:$4 sm:$0xff]  }
  0x16   :  { %v2760_v63 = vld [vmem:[%s4038_s1 + $0x2f4] ss:$8 sps:$4 sm:$0xff]   ;;  %v2762_v0 = vld [vmem:[%s4038_s1 + $0xf0] ss:$8 sps:$4 sm:$0xff]   ;;  %v2772_v2 = vld [vmem:[%s4038_s1 + $0x104] ss:$8 sps:$4 sm:$0xff]  }
  0x17   :  { %1341 = vmatpush1.bf16.msra.mxu1 %v2702_v22  ;;  %v2763_v1 = vld [vmem:[%s4038_s1 + $0x2f0] ss:$8 sps:$4 sm:$0xff]   ;;  %v3218_v3 = vld [vmem:[%s4038_s1 + $0x304] ss:$8 sps:$4 sm:$0xff]   ;;  %v2770_v6 = vld [vmem:[%s4038_s1 + $0x100] ss:$8 sps:$4 sm:$0xff]  }
  0x18   :  { %1567 = vmatpush1.bf16.msra.mxu0 %v2703_v23  ;;  %1342 = vmatprep.subr.bf16.mxu1 %v2704_v24  ;;  %v2764_v4 = vld [vmem:[%s4039_s0] ss:$36 sps:$4 sm:$0xff]   ;;  %v2767_v5 = vld [vmem:[%s4039_s0 + $0x10] ss:$36 sps:$4 sm:$0xff]   ;;  %v2786_v16 = vld [vmem:[%s4039_s0 + $0x48] ss:$36 sps:$4 sm:$0xff]  }
  0x19   :  { %1568 = vmatprep.subr.bf16.mxu0 %v2706_v25  ;;  %v3232_v7 = vld [vmem:[%s4038_s1 + $0x300] ss:$8 sps:$4 sm:$0xff]   ;;  %v2778_v8 = vld [vmem:[%s4038_s1 + $0x114] ss:$8 sps:$4 sm:$0xff]   ;;  %v2782_v10 = vld [vmem:[%s4039_s0 + $0x4c] ss:$36 sps:$4 sm:$0xff]  }
  0x1a   :  { %v3241_v9 = vld [vmem:[%s4038_s1 + $0x314] ss:$8 sps:$4 sm:$0xff]   ;;  %v2776_v12 = vld [vmem:[%s4038_s1 + $0x110] ss:$8 sps:$4 sm:$0xff]   ;;  %v2789_v14 = vld [vmem:[%s4038_s1 + $0x124] ss:$8 sps:$4 sm:$0xff]  }
  0x1b   :  { %1343 = vmatpush1.bf16.msra.mxu1 %v2708_v26  ;;  %v2784_v11 = vld [vmem:[%s4039_s0 + $0x5c] ss:$36 sps:$4 sm:$0xff]   ;;  %v3256_v13 = vld [vmem:[%s4038_s1 + $0x310] ss:$8 sps:$4 sm:$0xff]   ;;  %v3265_v15 = vld [vmem:[%s4038_s1 + $0x324] ss:$8 sps:$4 sm:$0xff]  }
  0x1c   :  { %1569 = vmatpush1.bf16.msra.mxu0 %v2709_v27  ;;  %1344 = vmatprep.subr.bf16.mxu1 %v2710_v28  ;;  %v2787_v17 = vld [vmem:[%s4038_s1 + $0x120] ss:$8 sps:$4 sm:$0xff]   ;;  %v2790_v18 = vld [vmem:[%s4039_s0 + $0x58] ss:$36 sps:$4 sm:$0xff]   ;;  %v2807_v26 = vld [vmem:[%s4038_s1 + $0x144] ss:$8 sps:$4 sm:$0xff]  }
  0x1d   :  { %1570 = vmatprep.subr.bf16.mxu0 %v2712_v29  ;;  %v3279_v19 = vld [vmem:[%s4038_s1 + $0x320] ss:$8 sps:$4 sm:$0xff]   ;;  %v2796_v20 = vld [vmem:[%s4038_s1 + $0x134] ss:$8 sps:$4 sm:$0xff]   ;;  %v2794_v24 = vld [vmem:[%s4038_s1 + $0x130] ss:$8 sps:$4 sm:$0xff]  }
  0x1e   :  { %v3289_v21 = vld [vmem:[%s4038_s1 + $0x334] ss:$8 sps:$4 sm:$0xff]   ;;  %v2802_v23 = vld [vmem:[%s4039_s0 + $0xa4] ss:$36 sps:$4 sm:$0xff]   ;;  %v3304_v25 = vld [vmem:[%s4038_s1 + $0x330] ss:$8 sps:$4 sm:$0xff]  }
  0x1f   :  { %1345 = vmatpush1.bf16.msra.mxu1 %v2714_v30  ;;  %v2800_v22 = vld [vmem:[%s4039_s0 + $0x94] ss:$36 sps:$4 sm:$0xff]   ;;  %v3313_v27 = vld [vmem:[%s4038_s1 + $0x344] ss:$8 sps:$4 sm:$0xff]   ;;  %v2805_v29 = vld [vmem:[%s4038_s1 + $0x140] ss:$8 sps:$4 sm:$0xff]  }
  0x20   :  { %1571 = vmatpush1.bf16.msra.mxu0 %v2715_v31  ;;  %1346 = vmatprep.subr.bf16.mxu1 %v2716_v32  ;;  %v2804_v28 = vld [vmem:[%s4039_s0 + $0x90] ss:$36 sps:$4 sm:$0xff]   ;;  %v2808_v30 = vld [vmem:[%s4039_s0 + $0xa0] ss:$36 sps:$4 sm:$0xff]  }
  0x21   :  { %1572 = vmatprep.subr.bf16.mxu0 %v2718_v33  ;;  %v3327_v31 = vld [vmem:[%s4038_s1 + $0x340] ss:$8 sps:$4 sm:$0xff]   ;;  %v2814_v32 = vld [vmem:[%s4038_s1 + $0x154] ss:$8 sps:$4 sm:$0xff]   ;;  %v3400_v49 = vld [vmem:[%s4038_s1 + $0x370] ss:$8 sps:$4 sm:$0xff]  }
  0x22   :  { %v3337_v33 = vld [vmem:[%s4038_s1 + $0x354] ss:$8 sps:$4 sm:$0xff]   ;;  %v3409_v51 = vld [vmem:[%s4038_s1 + $0x384] ss:$8 sps:$4 sm:$0xff]  }
  0x23   :  { %1347 = vmatpush1.bf16.msra.mxu1 %v2720_v34  ;;  %v2818_v34 = vld [vmem:[%s4039_s0 + $0xdc] ss:$36 sps:$4 sm:$0xff]  }
  0x24   :  { %1573 = vmatpush1.bf16.msra.mxu0 %v2721_v35  ;;  %1348 = vmatprep.subr.bf16.mxu1 %v2722_v36  ;;  %v2820_v35 = vld [vmem:[%s4039_s0 + $0xec] ss:$36 sps:$4 sm:$0xff]  }
  0x25   :  { %1574 = vmatprep.subr.bf16.mxu0 %v2724_v37  ;;  %v2812_v36 = vld [vmem:[%s4038_s1 + $0x150] ss:$8 sps:$4 sm:$0xff]  }
  0x26   :  { %v3352_v37 = vld [vmem:[%s4038_s1 + $0x350] ss:$8 sps:$4 sm:$0xff]  }
  0x27   :  { %1349 = vmatpush1.bf16.msra.mxu1 %v2726_v38  ;;  %v2825_v38 = vld [vmem:[%s4038_s1 + $0x164] ss:$8 sps:$4 sm:$0xff]  }
  0x28   :  { %1575 = vmatpush1.bf16.msra.mxu0 %v2727_v39  ;;  %1350 = vmatprep.subr.bf16.mxu1 %v2728_v40  ;;  %v3361_v39 = vld [vmem:[%s4038_s1 + $0x364] ss:$8 sps:$4 sm:$0xff]   ;;  %v2822_v40 = vld [vmem:[%s4039_s0 + $0xd8] ss:$36 sps:$4 sm:$0xff]  }
  0x29   :  { %1576 = vmatprep.subr.bf16.mxu0 %v2730_v41  ;;  %v2823_v41 = vld [vmem:[%s4038_s1 + $0x160] ss:$8 sps:$4 sm:$0xff]  }
  0x2b   :  { %1351 = vmatpush1.bf16.msra.mxu1 %v2732_v42  ;;  %v2826_v42 = vld [vmem:[%s4039_s0 + $0xe8] ss:$36 sps:$4 sm:$0xff]  }
  0x2c   :  { %1577 = vmatpush1.bf16.msra.mxu0 %v2733_v43  ;;  %1352 = vmatprep.subr.bf16.mxu1 %v2734_v44  ;;  %v3375_v43 = vld [vmem:[%s4038_s1 + $0x360] ss:$8 sps:$4 sm:$0xff]   ;;  %v2832_v44 = vld [vmem:[%s4038_s1 + $0x174] ss:$8 sps:$4 sm:$0xff]  }
  0x2d   :  { %1578 = vmatprep.subr.bf16.mxu0 %v2736_v45  ;;  %v3385_v45 = vld [vmem:[%s4038_s1 + $0x374] ss:$8 sps:$4 sm:$0xff]  }
  0x2f   :  { %1353 = vmatpush1.bf16.msra.mxu1 %v2738_v46  ;;  %v2836_v46 = vld [vmem:[%s4039_s0 + $0x124] ss:$36 sps:$4 sm:$0xff]  }
  0x30   :  { %1579 = vmatpush1.bf16.msra.mxu0 %v2739_v47  ;;  %1354 = vmatprep.subr.bf16.mxu1 %v2740_v48  ;;  %v2838_v47 = vld [vmem:[%s4039_s0 + $0x134] ss:$36 sps:$4 sm:$0xff]  }
  0x31   :  { %1580 = vmatprep.subr.bf16.mxu0 %v2742_v50  ;;  %v2830_v48 = vld [vmem:[%s4038_s1 + $0x170] ss:$8 sps:$4 sm:$0xff]   ;;  %v2843_v50 = vld [vmem:[%s4038_s1 + $0x184] ss:$8 sps:$4 sm:$0xff]  }
  0x33   :  { %1355 = vmatpush1.bf16.msra.mxu1 %v2744_v52  ;;  %v2840_v52 = vld [vmem:[%s4039_s0 + $0x120] ss:$36 sps:$4 sm:$0xff]  }
  0x34   :  { %1581 = vmatpush1.bf16.msra.mxu0 %v2745_v53  ;;  %1356 = vmatprep.subr.bf16.mxu1 %v2746_v54  ;;  %v2841_v53 = vld [vmem:[%s4038_s1 + $0x180] ss:$8 sps:$4 sm:$0xff]   ;;  %v2844_v54 = vld [vmem:[%s4039_s0 + $0x130] ss:$36 sps:$4 sm:$0xff]  }
  0x35   :  { %1582 = vmatprep.subr.bf16.mxu0 %v2748_v55  ;;  %v3423_v55 = vld [vmem:[%s4038_s1 + $0x380] ss:$8 sps:$4 sm:$0xff]  }
  0x37   :  { %1357 = vmatpush1.bf16.msra.mxu1 %v2750_v56  ;;  %v2850_v56 = vld [vmem:[%s4038_s1 + $0x194] ss:$8 sps:$4 sm:$0xff]  }
  0x38   :  { %1583 = vmatpush1.bf16.msra.mxu0 %v2751_v57  ;;  %1358 = vmatprep.subr.bf16.mxu1 %v2752_v58  ;;  %v3433_v57 = vld [vmem:[%s4038_s1 + $0x394] ss:$8 sps:$4 sm:$0xff]   ;;  %v2854_v58 = vld [vmem:[%s4039_s0 + $0x16c] ss:$36 sps:$4 sm:$0xff]  }
  0x39   :  { %1584 = vmatprep.subr.bf16.mxu0 %v2754_v59  ;;  %v2856_v59 = vld [vmem:[%s4039_s0 + $0x17c] ss:$36 sps:$4 sm:$0xff]  }
  0x3b   :  { %1359 = vmatpush1.bf16.msra.mxu1 %v2756_v60  ;;  %v2848_v60 = vld [vmem:[%s4038_s1 + $0x190] ss:$8 sps:$4 sm:$0xff]  }
  0x3c   :  { %1585 = vmatpush1.bf16.msra.mxu0 %v2757_v61  ;;  %1360 = vmatprep.subr.bf16.mxu1 %v2758_v62  ;;  %v3448_v61 = vld [vmem:[%s4038_s1 + $0x390] ss:$8 sps:$4 sm:$0xff]   ;;  %v2861_v62 = vld [vmem:[%s4038_s1 + $0x1a4] ss:$8 sps:$4 sm:$0xff]  }
  0x3d   :  { %1586 = vmatprep.subr.bf16.mxu0 %v2760_v63  ;;  %v3457_v63 = vld [vmem:[%s4038_s1 + $0x3a4] ss:$8 sps:$4 sm:$0xff]  }
  0x3f   :  { %1361 = vmatpush1.bf16.msra.mxu1 %v2762_v0  ;;  %v2858_v0 = vld [vmem:[%s4039_s0 + $0x168] ss:$36 sps:$4 sm:$0xff]  }
  0x40   :  { %1587 = vmatpush1.bf16.msra.mxu0 %v2763_v1  ;;  %1443 = vmatprep.subr.bf16.mxu1 %v2772_v2  ;;  %v2859_v1 = vld [vmem:[%s4038_s1 + $0x1a0] ss:$8 sps:$4 sm:$0xff]   ;;  %v2862_v2 = vld [vmem:[%s4039_s0 + $0x178] ss:$36 sps:$4 sm:$0xff]  }
  0x41   :  { %1669 = vmatprep.subr.bf16.mxu0 %v3218_v3 }
  0x42   :  { %1363 = vmatmul.mubr.bf16.vlgmr.msra.gmra.mrb[0].mxu1 %v2764_v4  ;;  %v3471_v4 = vld [vmem:[%s4038_s1 + $0x3a0] ss:$8 sps:$4 sm:$0xff]  }
  0x43   :  { %1589 = vmatmul.mubr.bf16.vlgmr.msra.gmra.mrb[0].mxu0 %v2767_v5  ;;  %1444 = vmatpush1.bf16.msra.mxu1 %v2770_v6  ;;  %v2868_v5 = vld [vmem:[%s4038_s1 + $0x1b4] ss:$8 sps:$4 sm:$0xff]  }
  0x44   :  { %1670 = vmatpush1.bf16.msra.mxu0 %v3232_v7  ;;  %1445 = vmatprep.subr.bf16.mxu1 %v2778_v8  ;;  %v3481_v6 = vld [vmem:[%s4038_s1 + $0x3b4] ss:$8 sps:$4 sm:$0xff]  }
  0x45   :  { %1671 = vmatprep.subr.bf16.mxu0 %v3241_v9  ;;  %1372 = vmatprep.mubr.bf16.mxu1 %v2782_v10  ;;  %v2872_v8 = vld [vmem:[%s4039_s0 + $0x1b4] ss:$36 sps:$4 sm:$0xff]   ;;  %v2874_v10 = vld [vmem:[%s4039_s0 + $0x1c4] ss:$36 sps:$4 sm:$0xff]  }
  0x46   :  { %1598 = vmatprep.mubr.bf16.mxu0 %v2784_v11  ;;  %v2866_v11 = vld [vmem:[%s4038_s1 + $0x1b0] ss:$8 sps:$4 sm:$0xff]  }
  0x47   :  { %1446 = vmatpush1.bf16.msra.mxu1 %v2776_v12  ;;  %v3495_v12 = vld [vmem:[%s4038_s1 + $0x3b0] ss:$8 sps:$4 sm:$0xff]  }
  0x48   :  { %1672 = vmatpush1.bf16.msra.mxu0 %v3256_v13  ;;  %1447 = vmatprep.subr.bf16.mxu1 %v2789_v14  ;;  %v2879_v14 = vld [vmem:[%s4038_s1 + $0x1c4] ss:$8 sps:$4 sm:$0xff]  }
  0x49   :  { %1673 = vmatprep.subr.bf16.mxu0 %v3265_v15 }
  0x4a   :  { %1373 = vmatmul.mubr.bf16.gmra.mrb[4].mxu1 %v2786_v16  ;;  %v3505_v16 = vld [vmem:[%s4038_s1 + $0x3c4] ss:$8 sps:$4 sm:$0xff]  }
  0x4b   :  { %1599 = vmatmul.mubr.bf16.gmra.mrb[4].mxu0 %v2790_v18  ;;  %1448 = vmatpush1.bf16.msra.mxu1 %v2787_v17  ;;  %v2876_v17 = vld [vmem:[%s4039_s0 + $0x1b0] ss:$36 sps:$4 sm:$0xff]   ;;  %v2877_v18 = vld [vmem:[%s4038_s1 + $0x1c0] ss:$8 sps:$4 sm:$0xff]  }
  0x4c   :  { %1674 = vmatpush1.bf16.msra.mxu0 %v3279_v19  ;;  %1449 = vmatprep.subr.bf16.mxu1 %v2796_v20  ;;  %v2880_v20 = vld [vmem:[%s4039_s0 + $0x1c0] ss:$36 sps:$4 sm:$0xff]  }
  0x4d   :  { %1675 = vmatprep.subr.bf16.mxu0 %v3289_v21  ;;  %1382 = vmatprep.mubr.bf16.mxu1 %v2800_v22  ;;  %v3519_v22 = vld [vmem:[%s4038_s1 + $0x3c0] ss:$8 sps:$4 sm:$0xff]  }
  0x4e   :  { %1608 = vmatprep.mubr.bf16.mxu0 %v2802_v23  ;;  %v2886_v23 = vld [vmem:[%s4038_s1 + $0x1d4] ss:$8 sps:$4 sm:$0xff]  }
  0x4f   :  { %1450 = vmatpush1.bf16.msra.mxu1 %v2794_v24  ;;  %v3529_v24 = vld [vmem:[%s4038_s1 + $0x3d4] ss:$8 sps:$4 sm:$0xff]  }
  0x50   :  { %1676 = vmatpush1.bf16.msra.mxu0 %v3304_v25  ;;  %1451 = vmatprep.subr.bf16.mxu1 %v2807_v26  ;;  %v2890_v26 = vld [vmem:[%s4039_s0 + $0x1fc] ss:$36 sps:$4 sm:$0xff]  }
  0x51   :  { %1677 = vmatprep.subr.bf16.mxu0 %v3313_v27 }
  0x52   :  { %1383 = vmatmul.mubr.bf16.gmra.mrb[8].mxu1 %v2804_v28  ;;  %v2892_v28 = vld [vmem:[%s4039_s0 + $0x20c] ss:$36 sps:$4 sm:$0xff]  }
  0x53   :  { %1609 = vmatmul.mubr.bf16.gmra.mrb[8].mxu0 %v2808_v30  ;;  %1452 = vmatpush1.bf16.msra.mxu1 %v2805_v29  ;;  %v2884_v29 = vld [vmem:[%s4038_s1 + $0x1d0] ss:$8 sps:$4 sm:$0xff]  }
  0x54   :  { %1678 = vmatpush1.bf16.msra.mxu0 %v3327_v31  ;;  %1453 = vmatprep.subr.bf16.mxu1 %v2814_v32  ;;  %v3543_v30 = vld [vmem:[%s4038_s1 + $0x3d0] ss:$8 sps:$4 sm:$0xff]   ;;  %v2897_v32 = vld [vmem:[%s4038_s1 + $0x1e4] ss:$8 sps:$4 sm:$0xff]  }
  0x55   :  { %1679 = vmatprep.subr.bf16.mxu0 %v3337_v33  ;;  %1392 = vmatprep.mubr.bf16.mxu1 %v2818_v34  ;;  %v3553_v34 = vld [vmem:[%s4038_s1 + $0x3e4] ss:$8 sps:$4 sm:$0xff]  }
  0x56   :  { %1618 = vmatprep.mubr.bf16.mxu0 %v2820_v35  ;;  %v2894_v35 = vld [vmem:[%s4039_s0 + $0x1f8] ss:$36 sps:$4 sm:$0xff]  }
  0x57   :  { %1454 = vmatpush1.bf16.msra.mxu1 %v2812_v36  ;;  %v2895_v36 = vld [vmem:[%s4038_s1 + $0x1e0] ss:$8 sps:$4 sm:$0xff]  }
  0x58   :  { %1680 = vmatpush1.bf16.msra.mxu0 %v3352_v37  ;;  %1455 = vmatprep.subr.bf16.mxu1 %v2825_v38  ;;  %v2898_v38 = vld [vmem:[%s4039_s0 + $0x208] ss:$36 sps:$4 sm:$0xff]  }
  0x59   :  { %1681 = vmatprep.subr.bf16.mxu0 %v3361_v39 }
  0x5a   :  { %1393 = vmatmul.mubr.bf16.gmra.mrb[12].mxu1 %v2822_v40  ;;  %v3567_v40 = vld [vmem:[%s4038_s1 + $0x3e0] ss:$8 sps:$4 sm:$0xff]  }
  0x5b   :  { %1619 = vmatmul.mubr.bf16.gmra.mrb[12].mxu0 %v2826_v42  ;;  %1456 = vmatpush1.bf16.msra.mxu1 %v2823_v41  ;;  %v2904_v41 = vld [vmem:[%s4038_s1 + $0x1f4] ss:$8 sps:$4 sm:$0xff]  }
  0x5c   :  { %1682 = vmatpush1.bf16.msra.mxu0 %v3375_v43  ;;  %1457 = vmatprep.subr.bf16.mxu1 %v2832_v44  ;;  %v3577_v42 = vld [vmem:[%s4038_s1 + $0x3f4] ss:$8 sps:$4 sm:$0xff]   ;;  %v2910_v44 = vld [vmem:[%s4039_s0 + $0xc] ss:$36 sps:$4 sm:$0xff]  }
  0x5d   :  { %1683 = vmatprep.subr.bf16.mxu0 %v3385_v45  ;;  %1402 = vmatprep.mubr.bf16.mxu1 %v2836_v46  ;;  %v2913_v46 = vld [vmem:[%s4039_s0 + $0x1c] ss:$36 sps:$4 sm:$0xff]  }
  0x5e   :  { %1628 = vmatprep.mubr.bf16.mxu0 %v2838_v47  ;;  %v2902_v47 = vld [vmem:[%s4038_s1 + $0x1f0] ss:$8 sps:$4 sm:$0xff]  }
  0x5f   :  { %1458 = vmatpush1.bf16.msra.mxu1 %v2830_v48  ;;  %v3592_v48 = vld [vmem:[%s4038_s1 + $0x3f0] ss:$8 sps:$4 sm:$0xff]  }
  0x60   :  { %1684 = vmatpush1.bf16.msra.mxu0 %v3400_v49  ;;  %1459 = vmatprep.subr.bf16.mxu1 %v2843_v50  ;;  %v2916_v50 = vld [vmem:[%s4038_s1 + $0x404] ss:$8 sps:$4 sm:$0xff]  }
  0x61   :  { %1685 = vmatprep.subr.bf16.mxu0 %v3409_v51 }
  0x62   :  { %1403 = vmatmul.mubr.bf16.gmra.mrb[16].mxu1 %v2840_v52  ;;  %v2908_v52 = vld [vmem:[%s4039_s0 + $0x8] ss:$36 sps:$4 sm:$0xff]  }
  0x63   :  { %1629 = vmatmul.mubr.bf16.gmra.mrb[16].mxu0 %v2844_v54  ;;  %1460 = vmatpush1.bf16.msra.mxu1 %v2841_v53  ;;  %v2911_v53 = vld [vmem:[%s4039_s0 + $0x18] ss:$36 sps:$4 sm:$0xff]   ;;  %v2914_v54 = vld [vmem:[%s4038_s1 + $0x400] ss:$8 sps:$4 sm:$0xff]  }
  0x64   :  { %1686 = vmatpush1.bf16.msra.mxu0 %v3423_v55  ;;  %1461 = vmatprep.subr.bf16.mxu1 %v2850_v56  ;;  %v2919_v56 = vld [vmem:[%s4038_s1 + $0x414] ss:$8 sps:$4 sm:$0xff]  }
  0x65   :  { %1687 = vmatprep.subr.bf16.mxu0 %v3433_v57  ;;  %1412 = vmatprep.mubr.bf16.mxu1 %v2854_v58  ;;  %v2920_v58 = vld [vmem:[%s4039_s0 + $0x54] ss:$36 sps:$4 sm:$0xff]  }
  0x66   :  { %1638 = vmatprep.mubr.bf16.mxu0 %v2856_v59  ;;  %v2922_v59 = vld [vmem:[%s4039_s0 + $0x64] ss:$36 sps:$4 sm:$0xff]  }
  0x67   :  { %1462 = vmatpush1.bf16.msra.mxu1 %v2848_v60  ;;  %v2917_v60 = vld [vmem:[%s4038_s1 + $0x410] ss:$8 sps:$4 sm:$0xff]  }
  0x68   :  { %1688 = vmatpush1.bf16.msra.mxu0 %v3448_v61  ;;  %1463 = vmatprep.subr.bf16.mxu1 %v2861_v62  ;;  %v2924_v62 = vld [vmem:[%s4039_s0 + $0x50] ss:$36 sps:$4 sm:$0xff]  }
  0x69   :  { %1689 = vmatprep.subr.bf16.mxu0 %v3457_v63 }
  0x6a   :  { %1413 = vmatmul.mubr.bf16.gmra.mrb[20].mxu1 %v2858_v0  ;;  %v2931_v0 = vld [vmem:[%s4038_s1 + $0x434] ss:$8 sps:$4 sm:$0xff]  }
  0x6b   :  { %1639 = vmatmul.mubr.bf16.gmra.mrb[20].mxu0 %v2862_v2  ;;  %1464 = vmatpush1.bf16.msra.mxu1 %v2859_v1  ;;  %v2932_v1 = vld [vmem:[%s4039_s0 + $0x9c] ss:$36 sps:$4 sm:$0xff]   ;;  %v2940_v2 = vld [vmem:[%s4038_s1 + $0x444] ss:$8 sps:$4 sm:$0xff]  }
  0x6c   :  { %1690 = vmatpush1.bf16.msra.mxu0 %v3471_v4  ;;  %1465 = vmatprep.subr.bf16.mxu1 %v2868_v5  ;;  %v2936_v5 = vld [vmem:[%s4039_s0 + $0x98] ss:$36 sps:$4 sm:$0xff]  }
  0x6d   :  { %1691 = vmatprep.subr.bf16.mxu0 %v3481_v6  ;;  %1422 = vmatprep.mubr.bf16.mxu1 %v2872_v8  ;;  %v2943_v8 = vld [vmem:[%s4038_s1 + $0x454] ss:$8 sps:$4 sm:$0xff]  }
  0x6e   :  { %1648 = vmatprep.mubr.bf16.mxu0 %v2874_v10  ;;  %v2944_v10 = vld [vmem:[%s4039_s0 + $0xe4] ss:$36 sps:$4 sm:$0xff]  }
  0x6f   :  { %1466 = vmatpush1.bf16.msra.mxu1 %v2866_v11  ;;  %v2952_v11 = vld [vmem:[%s4038_s1 + $0x464] ss:$8 sps:$4 sm:$0xff]  }
  0x70   :  { %1692 = vmatpush1.bf16.msra.mxu0 %v3495_v12  ;;  %1467 = vmatprep.subr.bf16.mxu1 %v2879_v14  ;;  %v2948_v14 = vld [vmem:[%s4039_s0 + $0xe0] ss:$36 sps:$4 sm:$0xff]  }
  0x71   :  { %1693 = vmatprep.subr.bf16.mxu0 %v3505_v16 }
  0x72   :  { %1423 = vmatmul.mubr.bf16.gmra.mrb[24].mxu1 %v2876_v17  ;;  %v2955_v17 = vld [vmem:[%s4038_s1 + $0x474] ss:$8 sps:$4 sm:$0xff]  }
  0x73   :  { %1649 = vmatmul.mubr.bf16.gmra.mrb[24].mxu0 %v2880_v20  ;;  %1468 = vmatpush1.bf16.msra.mxu1 %v2877_v18  ;;  %v2956_v18 = vld [vmem:[%s4039_s0 + $0x12c] ss:$36 sps:$4 sm:$0xff]  }
  0x74   :  { %1694 = vmatpush1.bf16.msra.mxu0 %v3519_v22  ;;  %1469 = vmatprep.subr.bf16.mxu1 %v2886_v23  ;;  %v2958_v20 = vld [vmem:[%s4039_s0 + $0x128] ss:$36 sps:$4 sm:$0xff]  }
  0x75   :  { %1695 = vmatprep.subr.bf16.mxu0 %v3529_v24  ;;  %1432 = vmatprep.mubr.bf16.mxu1 %v2890_v26  ;;  %v2963_v23 = vld [vmem:[%s4039_s0 + $0x68] ss:$36 sps:$4 sm:$0xff]  }
  0x76   :  { %1658 = vmatprep.mubr.bf16.mxu0 %v2892_v28  ;;  %v2979_v26 = vld [vmem:[%s4039_s0 + $0x188] ss:$36 sps:$4 sm:$0xff]  }
  0x77   :  { %1470 = vmatpush1.bf16.msra.mxu1 %v2884_v29  ;;  %v2980_v28 = vld [vmem:[%s4039_s0 + $0x1cc] ss:$36 sps:$4 sm:$0xff]  }
  0x78   :  { %1696 = vmatpush1.bf16.msra.mxu0 %v3543_v30  ;;  %1471 = vmatprep.subr.bf16.mxu1 %v2897_v32  ;;  %v2982_v29 = vld [vmem:[%s4039_s0 + $0x1c8] ss:$36 sps:$4 sm:$0xff]   ;;  %v2984_v32 = vld [vmem:[%s4039_s0 + $0x214] ss:$36 sps:$4 sm:$0xff]  }
  0x79   :  { %1697 = vmatprep.subr.bf16.mxu0 %v3553_v34 }
  0x7a   :  { %1433 = vmatmul.mubr.bf16.gmra.mrb[28].mxu1 %v2894_v35  ;;  %v2987_v35 = vld [vmem:[%s4039_s0 + $0x218] ss:$36 sps:$4 sm:$0xff]  }
  0x7b   :  { %1659 = vmatmul.mubr.bf16.gmra.mrb[28].mxu0 %v2898_v38  ;;  %1472 = vmatpush1.bf16.msra.mxu1 %v2895_v36 }
  0x7c   :  { %1698 = vmatpush1.bf16.msra.mxu0 %v3567_v40  ;;  %1473 = vmatprep.subr.bf16.mxu1 %v2904_v41 }
  0x7d   :  { %1699 = vmatprep.subr.bf16.mxu0 %v3577_v42  ;;  %1475 = vmatprep.mubr.bf16.mxu1 %v2910_v44 }
  0x7e   :  { %1701 = vmatprep.mubr.bf16.mxu0 %v2913_v46 }
  0x7f   :  { %1474 = vmatpush1.bf16.msra.mxu1 %v2902_v47 }
  0x80   :  { %1700 = vmatpush1.bf16.msra.mxu0 %v3592_v48  ;;  %2507 = vmatprep.subr.bf16.mxu1 %v3218_v3  ;;  %v2928_v3 = vld [vmem:[%s4038_s1 + $0x424] ss:$8 sps:$4 sm:$0xff]  }
  0x81   :  { %1782 = vmatprep.subr.bf16.mxu0 %v2916_v50 }
  0x82   :  { %1476 = vmatmul.mubr.bf16.vlgmr.msra.gmra.mrb[0].mxu1 %v2908_v52 }
  0x83   :  { %1702 = vmatmul.mubr.bf16.vlgmr.msra.gmra.mrb[0].mxu0 %v2911_v53  ;;  %2523 = vmatpush1.bf16.msra.mxu1 %v3232_v7  ;;  %v2925_v7 = vld [vmem:[%s4039_s0 + $0x60] ss:$36 sps:$4 sm:$0xff]  }
  0x84   :  { %1783 = vmatpush1.bf16.msra.mxu0 %v2914_v54  ;;  %2508 = vmatprep.subr.bf16.mxu1 %v3241_v9  ;;  %v2926_v9 = vld [vmem:[%s4038_s1 + $0x420] ss:$8 sps:$4 sm:$0xff]  }
  0x85   :  { %1784 = vmatprep.subr.bf16.mxu0 %v2919_v56  ;;  %1485 = vmatprep.mubr.bf16.mxu1 %v2920_v58 }
  0x86   :  { %1711 = vmatprep.mubr.bf16.mxu0 %v2922_v59 }
  0x87   :  { %2524 = vmatpush1.bf16.msra.mxu1 %v3256_v13  ;;  %v2934_v13 = vld [vmem:[%s4039_s0 + $0xac] ss:$36 sps:$4 sm:$0xff]  }
  0x88   :  { %1785 = vmatpush1.bf16.msra.mxu0 %v2917_v60  ;;  %2509 = vmatprep.subr.bf16.mxu1 %v3265_v15  ;;  %v2929_v15 = vld [vmem:[%s4038_s1 + $0x430] ss:$8 sps:$4 sm:$0xff]  }
  0x89   :  { %1786 = vmatprep.subr.bf16.mxu0 %v2928_v3 }
  0x8a   :  { %1486 = vmatmul.mubr.bf16.gmra.mrb[4].mxu1 %v2924_v62 }
  0x8b   :  { %1712 = vmatmul.mubr.bf16.gmra.mrb[4].mxu0 %v2925_v7  ;;  %2525 = vmatpush1.bf16.msra.mxu1 %v3279_v19  ;;  %v2937_v19 = vld [vmem:[%s4039_s0 + $0xa8] ss:$36 sps:$4 sm:$0xff]  }
  0x8c   :  { %1787 = vmatpush1.bf16.msra.mxu0 %v2926_v9  ;;  %2510 = vmatprep.subr.bf16.mxu1 %v3289_v21  ;;  %v2938_v21 = vld [vmem:[%s4038_s1 + $0x440] ss:$8 sps:$4 sm:$0xff]  }
  0x8d   :  { %1788 = vmatprep.subr.bf16.mxu0 %v2931_v0  ;;  %1495 = vmatprep.mubr.bf16.mxu1 %v2932_v1 }
  0x8e   :  { %1721 = vmatprep.mubr.bf16.mxu0 %v2934_v13 }
  0x8f   :  { %2526 = vmatpush1.bf16.msra.mxu1 %v3304_v25  ;;  %v2946_v25 = vld [vmem:[%s4039_s0 + $0xf4] ss:$36 sps:$4 sm:$0xff]  }
  0x90   :  { %1789 = vmatpush1.bf16.msra.mxu0 %v2929_v15  ;;  %2511 = vmatprep.subr.bf16.mxu1 %v3313_v27  ;;  %v2941_v27 = vld [vmem:[%s4038_s1 + $0x450] ss:$8 sps:$4 sm:$0xff]  }
  0x91   :  { %1790 = vmatprep.subr.bf16.mxu0 %v2940_v2 }
  0x92   :  { %1496 = vmatmul.mubr.bf16.gmra.mrb[8].mxu1 %v2936_v5 }
  0x93   :  { %1722 = vmatmul.mubr.bf16.gmra.mrb[8].mxu0 %v2937_v19  ;;  %2527 = vmatpush1.bf16.msra.mxu1 %v3327_v31  ;;  %v2949_v31 = vld [vmem:[%s4039_s0 + $0xf0] ss:$36 sps:$4 sm:$0xff]  }
  0x94   :  { %1791 = vmatpush1.bf16.msra.mxu0 %v2938_v21  ;;  %2512 = vmatprep.subr.bf16.mxu1 %v3337_v33  ;;  %v2950_v33 = vld [vmem:[%s4038_s1 + $0x460] ss:$8 sps:$4 sm:$0xff]   ;;  %v1897_v21 = vlaneseq }
  0x95   :  { %1792 = vmatprep.subr.bf16.mxu0 %v2943_v8  ;;  %1505 = vmatprep.mubr.bf16.mxu1 %v2944_v10 }
  0x96   :  { %1731 = vmatprep.mubr.bf16.mxu0 %v2946_v25  ;;  %v1898_v8 = vshrl.u32 %v1897_v21, 7 }
  0x97   :  { %2528 = vmatpush1.bf16.msra.mxu1 %v3352_v37  ;;  %v2953_v37 = vld [vmem:[%s4038_s1 + $0x470] ss:$8 sps:$4 sm:$0xff]  }
  0x98   :  { %1793 = vmatpush1.bf16.msra.mxu0 %v2941_v27  ;;  %2513 = vmatprep.subr.bf16.mxu1 %v3361_v39  ;;  %v2988_v39 = vmov 0  }
  0x99   :  { %1794 = vmatprep.subr.bf16.mxu0 %v2952_v11 }
  0x9a   :  { %1506 = vmatmul.mubr.bf16.gmra.mrb[12].mxu1 %v2948_v14  ;;  %v1899_v14 = vsub.s32 0, %v1898_v8 }
  0x9b   :  { %1732 = vmatmul.mubr.bf16.gmra.mrb[12].mxu0 %v2949_v31  ;;  %2529 = vmatpush1.bf16.msra.mxu1 %v3375_v43  ;;  %v2959_v43 = vld [vmem:[%s4039_s0 + $0x20] ss:$36 sps:$4 sm:$0xff]  }
  0x9c   :  { %1795 = vmatpush1.bf16.msra.mxu0 %v2950_v33  ;;  %2514 = vmatprep.subr.bf16.mxu1 %v3385_v45  ;;  %v2960_v45 = vld [vmem:[%s4039_s0 + $0x174] ss:$36 sps:$4 sm:$0xff]   ;;  %v1895_v31 = vld [vmem:[%s4040_s2] sm:$0x3]  ;;  %v1903_v33 = vsub.s32 1, %v1898_v8 }
  0x9d   :  { %1796 = vmatprep.subr.bf16.mxu0 %v2955_v17  ;;  %1515 = vmatprep.mubr.bf16.mxu1 %v2956_v18  ;;  %v1939_v17 = vld [vmem:[%s4041_s3] sm:$0x3]  ;;  %v3848_v18 = vrot.slane %v1895_v31, %v1899_v14 }
  0x9e   :  { %1814 = vmatprep.mubr.bf16.mxu0 %v2988_v39 }
  0x9f   :  { %2530 = vmatpush1.bf16.msra.mxu1 %v3400_v49  ;;  %v2962_v49 = vld [vmem:[%s4039_s0 + $0x170] ss:$36 sps:$4 sm:$0xff]  }
  0xa0   :  { %1797 = vmatpush1.bf16.msra.mxu0 %v2953_v37  ;;  %2515 = vmatprep.subr.bf16.mxu1 %v3409_v51  ;;  %v2964_v51 = vld [vmem:[%s4039_s0 + $0x1bc] ss:$36 sps:$4 sm:$0xff]  }
  0xa2   :  { %1516 = vmatmul.mubr.bf16.gmra.mrb[16].mxu1 %v2958_v20  ;;  %v3850_v20 = vrot.slane %v1895_v31, %v1903_v33 }
  0xa3   :  { %1815 = vmatmul.mubr.bf16.vlgmr.msra.gmra.mrb[0].mxu0 %v2959_v43  ;;  %2531 = vmatpush1.bf16.msra.mxu1 %v3423_v55  ;;  %v2966_v55 = vld [vmem:[%s4039_s0 + $0x1b8] ss:$36 sps:$4 sm:$0xff]  }
  0xa4   :  { %1525 = vmatprep.mubr.bf16.mxu1 %v2960_v45  ;;  %2516 = vmatprep.subr.bf16.mxu1 %v3433_v57  ;;  %v2967_v57 = vld [vmem:[%s4039_s0 + $0xb0] ss:$36 sps:$4 sm:$0xff]  }
  0xa5   :  { %1824 = vmatprep.mubr.bf16.mxu0 %v2988_v39 }
  0xa7   :  { %2532 = vmatpush1.bf16.msra.mxu1 %v3448_v61  ;;  %v2968_v61 = vld [vmem:[%s4039_s0 + $0x204] ss:$36 sps:$4 sm:$0xff]  }
  0xa8   :  { %2517 = vmatprep.subr.bf16.mxu1 %v3457_v63  ;;  %v2970_v63 = vld [vmem:[%s4039_s0 + $0x200] ss:$36 sps:$4 sm:$0xff]  }
  0xaa   :  { %1526 = vmatmul.mubr.bf16.gmra.mrb[20].mxu1 %v2962_v49  ;;  %v3854_v49 = vrot.slane %v1939_v17, %v1899_v14 }
  0xab   :  { %1825 = vmatmul.mubr.bf16.gmra.mrb[4].mxu0 %v2963_v23  ;;  %2533 = vmatpush1.bf16.msra.mxu1 %v3471_v4  ;;  %v2971_v4 = vld [vmem:[%s4039_s0 + $0xf8] ss:$36 sps:$4 sm:$0xff]  }
  0xac   :  { %1535 = vmatprep.mubr.bf16.mxu1 %v2964_v51  ;;  %2518 = vmatprep.subr.bf16.mxu1 %v3481_v6  ;;  %v2974_v6 = vld [vmem:[%s4039_s0 + $0x13c] ss:$36 sps:$4 sm:$0xff]  }
  0xad   :  { %1834 = vmatprep.mubr.bf16.mxu0 %v2988_v39 }
  0xaf   :  { %2534 = vmatpush1.bf16.msra.mxu1 %v3495_v12  ;;  %v2972_v12 = vld [vmem:[%s4039_s0 + $0x138] ss:$36 sps:$4 sm:$0xff]  }
  0xb0   :  { %2519 = vmatprep.subr.bf16.mxu1 %v3505_v16  ;;  %v2975_v16 = vld [vmem:[%s4039_s0 + $0x140] ss:$36 sps:$4 sm:$0xff]  }
  0xb2   :  { %1536 = vmatmul.mubr.bf16.gmra.mrb[24].mxu1 %v2966_v55 }
  0xb3   :  { %1835 = vmatmul.mubr.bf16.gmra.mrb[8].mxu0 %v2967_v57  ;;  %2535 = vmatpush1.bf16.msra.mxu1 %v3519_v22  ;;  %v2976_v22 = vld [vmem:[%s4039_s0 + $0x184] ss:$36 sps:$4 sm:$0xff]  }
  0xb4   :  { %1545 = vmatprep.mubr.bf16.mxu1 %v2968_v61  ;;  %2520 = vmatprep.subr.bf16.mxu1 %v3529_v24  ;;  %v2978_v24 = vld [vmem:[%s4039_s0 + $0x180] ss:$36 sps:$4 sm:$0xff]   ;;  %v3858_v61 = vrot.slane %v1939_v17, %v1903_v33 }
  0xb5   :  { %1844 = vmatprep.mubr.bf16.mxu0 %v2988_v39 }
  0xb7   :  { %2536 = vmatpush1.bf16.msra.mxu1 %v3543_v30  ;;  %v2983_v30 = vld [vmem:[%s4039_s0 + $0x1d0] ss:$36 sps:$4 sm:$0xff]  }
  0xb8   :  { %2521 = vmatprep.subr.bf16.mxu1 %v3553_v34  ;;  %v2986_v34 = vld [vmem:[%s4039_s0 + $0x210] ss:$36 sps:$4 sm:$0xff]  }
  0xba   :  { %1546 = vmatmul.mubr.bf16.gmra.mrb[28].mxu1 %v2970_v63 }
  0xbb   :  { %1845 = vmatmul.mubr.bf16.gmra.mrb[12].mxu0 %v2971_v4  ;;  %2537 = vmatpush1.bf16.msra.mxu1 %v3567_v40 }
  0xbc   :  { %1741 = vmatprep.mubr.bf16.mxu1 %v2974_v6  ;;  %2522 = vmatprep.subr.bf16.mxu1 %v3577_v42 }
  0xbd   :  { %1854 = vmatprep.mubr.bf16.mxu0 %v2988_v39 }
  0xbf   :  { %2538 = vmatpush1.bf16.msra.mxu1 %v3592_v48 }
  0xc2   :  { %1742 = vmatmul.mubr.bf16.vlgmr.msra.gmra.mrb[32].mxu1 %v2972_v12 }
  0xc3   :  { %1855 = vmatmul.mubr.bf16.gmra.mrb[32].mxu0 %v2975_v16  ;;  %1751 = vmatprep.mubr.bf16.mxu1 %v2976_v22 }
  0xc4   :  { %1864 = vmatprep.mubr.bf16.mxu0 %v2988_v39 }
  0xca   :  { %1752 = vmatmul.mubr.bf16.gmra.mrb[36].mxu1 %v2978_v24 }
  0xcb   :  { %1865 = vmatmul.mubr.bf16.gmra.mrb[36].mxu0 %v2979_v26  ;;  %1761 = vmatprep.mubr.bf16.mxu1 %v2980_v28 }
  0xcc   :  { %1874 = vmatprep.mubr.bf16.mxu0 %v2988_v39 }
  0xd2   :  { %1762 = vmatmul.mubr.bf16.gmra.mrb[40].mxu1 %v2982_v29 }
  0xd3   :  { %1875 = vmatmul.mubr.bf16.gmra.mrb[40].mxu0 %v2983_v30  ;;  %1771 = vmatprep.mubr.bf16.mxu1 %v2984_v32 }
  0xd4   :  { %1884 = vmatprep.mubr.bf16.mxu0 %v2988_v39 }
  0xda   :  { %1772 = vmatmul.mubr.bf16.gmra.mrb[44].mxu1 %v2986_v34 }
  0xdb   :  { %1885 = vmatmul.mubr.bf16.gmra.mrb[44].mxu0 %v2987_v35 }
 0x136   :  { %v1630_v36 = vpop.f32.mrb[16].mxu0 }
 0x137   :  { %v1632_v38 = vpop.f32.mrb[17].mxu0 }
 0x138   :  { %v1634_v40 = vpop.f32.mrb[18].mxu0 }
 0x139   :  { %v1636_v41 = vpop.f32.mrb[19].mxu0 }
 0x13e   :  { %v3798_v42 = vpop.f32.mrb[20].mxu0 }
 0x13f   :  { %v3800_v44 = vpop.f32.mrb[21].mxu0 }
 0x140   :  { %v3802_v46 = vpop.f32.mrb[22].mxu0 }
 0x141   :  { %v3804_v47 = vpop.f32.mrb[23].mxu0 }
 0x146   :  { %v3806_v48 = vpop.f32.mrb[24].mxu0 }
 0x147   :  { %v3808_v50 = vpop.f32.mrb[25].mxu0 }
 0x148   :  { %v3810_v52 = vpop.f32.mrb[26].mxu0 }
 0x149   :  { %v3812_v53 = vpop.f32.mrb[27].mxu0 }
 0x14e   :  { %v3814_v54 = vpop.f32.mrb[28].mxu0 }
 0x14f   :  { %v3816_v56 = vpop.f32.mrb[29].mxu0 }
 0x150   :  { %v3818_v58 = vpop.f32.mrb[30].mxu0 }
 0x151   :  { %v3820_v59 = vpop.f32.mrb[31].mxu0 }
 0x155   :  { %v1477_v60 = vpop.f32.mrb[0].mxu1 }
 0x156   :  { %v1479_v3 = vpop.f32.mrb[1].mxu1 }
 0x157   :  { %v1481_v62 = vpop.f32.mrb[2].mxu1 }
 0x158   :  { %v1483_v7 = vpop.f32.mrb[3].mxu1 }
 0x15d   :  { %v1487_v9 = vpop.f32.mrb[4].mxu1 }
 0x15e   :  { %v1489_v0 = vpop.f32.mrb[5].mxu1 }
 0x15f   :  { %v3822_v1 = vpop.f32.mrb[6].mxu1 }
 0x160   :  { %v3824_v13 = vpop.f32.mrb[7].mxu1 }
 0x165   :  { %v3826_v15 = vpop.f32.mrb[8].mxu1 }
 0x166   :  { %v3828_v2 = vpop.f32.mrb[9].mxu1 }
 0x167   :  { %v3830_v5 = vpop.f32.mrb[10].mxu1 }
 0x168   :  { %v3832_v19 = vpop.f32.mrb[11].mxu1 }
 0x16d   :  { %v3834_v10 = vpop.f32.mrb[12].mxu1 }
 0x16e   :  { %v3836_v25 = vpop.f32.mrb[13].mxu1 }
 0x16f   :  { %v3838_v27 = vpop.f32.mrb[14].mxu1 }
 0x170   :  { %v3840_v11 = vpop.f32.mrb[15].mxu1 }
 0x175   :  { %v1517_v37 = vpop.f32.mrb[16].mxu1 }
 0x176   :  { %v1816_v39 = vpop.f32.mrb[0].mxu0  ;;  %v3852_v43 = vadd.f32 %v1630_v36, %v1517_v37  ;;  %v1519_v23 = vpop.f32.mrb[17].mxu1 }
 0x177   :  { %v2539_v45 = vadd.f32 %v1816_v39, %v1477_v60  ;;  %v1818_v51 = vpop.f32.mrb[1].mxu0  ;;  %v3856_v55 = vadd.f32 %v1632_v38, %v1519_v23  ;;  %v1521_v63 = vpop.f32.mrb[18].mxu1 }
 0x178   :  { %v2540_v57 = vadd.f32 %v1818_v51, %v1479_v3  ;;  %v1820_v4 = vpop.f32.mrb[2].mxu0  ;;  %v3861_v12 = vadd.f32 %v1634_v40, %v1521_v63  ;;  %v1523_v22 = vpop.f32.mrb[19].mxu1 }
 0x179   :  { %v1907_v6 = vmul.f32 %v2539_v45, %v3848_v18  ;;  %v2541_v16 = vadd.f32 %v1820_v4, %v1481_v62  ;;  %v1822_v24 = vpop.f32.mrb[3].mxu0  ;;  %v3864_v28 = vadd.f32 %v1636_v41, %v1523_v22 }
 0x17a   :  { %v1908_v26 = vmul.f32 %v2540_v57, %v3850_v20  ;;  %v2542_v29 = vadd.f32 %v1822_v24, %v1483_v7 }
 0x17b   :  { %v1951_v30 = vadd.f32 %v3854_v49, %v1907_v6  ;;  %v1909_v32 = vmul.f32 %v2541_v16, %v3848_v18 }
 0x17c   :  { %v1952_v34 = vadd.f32 %v3858_v61, %v1908_v26  ;;  %v1910_v35 = vmul.f32 %v2542_v29, %v3850_v20 }
 0x17d   :  { %v1983_v36 = vadd.f32 3.0, %v1951_v30  ;;  %v1953_v38 = vadd.f32 %v3854_v49, %v1909_v32  ;;  %v1527_v3 = vpop.f32.mrb[20].mxu1 }
 0x17e   :  { %v1984_v40 = vadd.f32 3.0, %v1952_v34  ;;  %v1954_v60 = vadd.f32 %v3858_v61, %v1910_v35  ;;  %v1826_v62 = vpop.f32.mrb[4].mxu0  ;;  %v3873_v7 = vadd.f32 %v3798_v42, %v1527_v3  ;;  %v1529_v14 = vpop.f32.mrb[21].mxu1 }
 0x17f   :  { %v2015_v21 = vmax.f32 %v1983_v36, 0.0  ;;  %v1985_v41 = vadd.f32 3.0, %v1953_v38  ;;  %v2543_v8 = vadd.f32 %v1826_v62, %v1487_v9  ;;  %v1828_v31 = vpop.f32.mrb[5].mxu0  ;;  %v3876_v37 = vadd.f32 %v3800_v44, %v1529_v14  ;;  %v1531_v45 = vpop.f32.mrb[22].mxu1 }
 0x180   :  { %v2016_v33 = vmax.f32 %v1984_v40, 0.0  ;;  %v1986_v17 = vadd.f32 3.0, %v1954_v60  ;;  %v2544_v39 = vadd.f32 %v1828_v31, %v1489_v0  ;;  %v1830_v23 = vpop.f32.mrb[6].mxu0  ;;  %v3880_v4 = vadd.f32 %v3802_v46, %v1531_v45  ;;  %v1533_v42 = vpop.f32.mrb[23].mxu1 }
 0x181   :  { %v2047_v51 = vmin.f32 %v2015_v21, 6.0  ;;  %v2017_v57 = vmax.f32 %v1985_v41, 0.0  ;;  %v1911_v63 = vmul.f32 %v2543_v8, %v3848_v18  ;;  %v1832_v6 = vpop.f32.mrb[7].mxu0  ;;  %v2545_v24 = vadd.f32 %v1830_v23, %v3822_v1 }
 0x182   :  { %v2048_v9 = vmin.f32 %v2016_v33, 6.0  ;;  %v2018_v16 = vmax.f32 %v1986_v17, 0.0  ;;  %v1912_v22 = vmul.f32 %v2544_v39, %v3850_v20  ;;  %v3886_v29 = vadd.f32 %v3804_v47, %v1533_v42 }
 0x183   :  { %v2079_v44 = vmul.f32 %v2047_v51, %v1951_v30  ;;  %v2049_v26 = vmin.f32 %v2017_v57, 6.0  ;;  %v1955_v0 = vadd.f32 %v3854_v49, %v1911_v63  ;;  %v1913_v36 = vmul.f32 %v2545_v24, %v3848_v18 }
 0x184   :  { %v2080_v32 = vmul.f32 %v2048_v9, %v1952_v34  ;;  %v2050_v35 = vmin.f32 %v2018_v16, 6.0  ;;  %v1956_v46 = vadd.f32 %v3858_v61, %v1912_v22  ;;  %v2546_v21 = vadd.f32 %v1832_v6, %v3824_v13 }
 0x185   :  { %v2111_v40 = vmul.f32 0.16666667, %v2079_v44  ;;  %v2081_v3 = vmul.f32 %v2049_v26, %v1953_v38  ;;  %v1987_v62 = vadd.f32 3.0, %v1955_v0  ;;  %v1957_v8 = vadd.f32 %v3854_v49, %v1913_v36  ;;  %v1537_v14 = vpop.f32.mrb[24].mxu1 }
 0x186   :  { %v2112_v41 = vmul.f32 0.16666667, %v2080_v32  ;;  %v2082_v1 = vmul.f32 %v2050_v35, %v1954_v60  ;;  %v1988_v30 = vadd.f32 3.0, %v1956_v46  ;;  %v1836_v31 = vpop.f32.mrb[8].mxu0  ;;  %v1914_v34 = vmul.f32 %v2546_v21, %v3850_v20  ;;  %v1539_v39 = vpop.f32.mrb[25].mxu1 }
 0x187   :  { %v2113_v47 = vmul.f32 0.16666667, %v2081_v3  ;;  %v2019_v33 = vmax.f32 %v1987_v62, 0.0  ;;  %v3894_v17 = vadd.f32 %v3806_v48, %v1537_v14  ;;  %v1838_v45 = vpop.f32.mrb[9].mxu0  ;;  %v1989_v13 = vadd.f32 3.0, %v1957_v8  ;;  %v1541_v57 = vpop.f32.mrb[26].mxu1 }
 0x188   :  { %v2491_v38 = vpack.c.bf16 %v2112_v41, %v2111_v40  ;;  %v2114_v23 = vmul.f32 0.16666667, %v2082_v1  ;;  %v2020_v51 = vmax.f32 %v1988_v30, 0.0  ;;  %v1840_v60 = vpop.f32.mrb[10].mxu0  ;;  %v1958_v42 = vadd.f32 %v3858_v61, %v1914_v34  ;;  %v1543_v16 = vpop.f32.mrb[27].mxu1 }
 0x189   :  { %v2051_v63 = vmin.f32 %v2019_v33, 6.0  ;;  %v2547_v6 = vadd.f32 %v1836_v31, %v3826_v15  ;;  %v3899_v9 = vadd.f32 %v3808_v50, %v1539_v39  ;;  %v1842_v22 = vpop.f32.mrb[11].mxu0  ;;  %v2021_v44 = vmax.f32 %v1989_v13, 0.0 }
 0x18a   :  { %2239 = vst [vmem:[%s4042_s4] sm:$0xff] %v2491_v38  ;;  %v2492_v48 = vpack.c.bf16 %v2114_v23, %v2113_v47  ;;  %v2052_v24 = vmin.f32 %v2020_v51, 6.0  ;;  %v2548_v26 = vadd.f32 %v1838_v45, %v3828_v2  ;;  %v1990_v35 = vadd.f32 3.0, %v1958_v42 }
 0x18b   :  { %v2083_v32 = vmul.f32 %v2051_v63, %v1955_v0  ;;  %v1915_v36 = vmul.f32 %v2547_v6, %v3848_v18  ;;  %v3907_v15 = vadd.f32 %v3810_v52, %v1541_v57  ;;  %v2053_v40 = vmin.f32 %v2021_v44, 6.0 }
 0x18c   :  { %2240 = vst [vmem:[%s4042_s4 + $0x8] sm:$0xff] %v2492_v48  ;;  %v2084_v50 = vmul.f32 %v2052_v24, %v1956_v46  ;;  %v1916_v3 = vmul.f32 %v2548_v26, %v3850_v20  ;;  %v2549_v62 = vadd.f32 %v1840_v60, %v3830_v5  ;;  %v2022_v41 = vmax.f32 %v1990_v35, 0.0 }
 0x18d   :  { %v2115_v21 = vmul.f32 0.16666667, %v2083_v32  ;;  %v1959_v2 = vadd.f32 %v3854_v49, %v1915_v36  ;;  %v3916_v0 = vadd.f32 %v3812_v53, %v1543_v16  ;;  %v2085_v52 = vmul.f32 %v2053_v40, %v1957_v8  ;;  %v1547_v31 = vpop.f32.mrb[28].mxu1 }
 0x18e   :  { %v2116_v1 = vmul.f32 0.16666667, %v2084_v50  ;;  %v1960_v30 = vadd.f32 %v3858_v61, %v1916_v3  ;;  %v1917_v14 = vmul.f32 %v2549_v62, %v3848_v18  ;;  %v1846_v46 = vpop.f32.mrb[12].mxu0  ;;  %v2054_v47 = vmin.f32 %v2022_v41, 6.0  ;;  %v1549_v39 = vpop.f32.mrb[29].mxu1 }
 0x18f   :  { %v1991_v33 = vadd.f32 3.0, %v1959_v2  ;;  %v2550_v34 = vadd.f32 %v1842_v22, %v3832_v19  ;;  %v3922_v5 = vadd.f32 %v3814_v54, %v1547_v31  ;;  %v1848_v45 = vpop.f32.mrb[13].mxu0  ;;  %v2117_v53 = vmul.f32 0.16666667, %v2085_v52  ;;  %v1551_v51 = vpop.f32.mrb[30].mxu1 }
 0x190   :  { %v2493_v38 = vpack.c.bf16 %v2116_v1, %v2115_v21  ;;  %v1992_v23 = vadd.f32 3.0, %v1960_v30  ;;  %v1961_v8 = vadd.f32 %v3854_v49, %v1917_v14  ;;  %v1850_v13 = vpop.f32.mrb[14].mxu0  ;;  %v2086_v57 = vmul.f32 %v2054_v47, %v1958_v42  ;;  %v1553_v16 = vpop.f32.mrb[31].mxu1 }
 0x191   :  { %v2023_v60 = vmax.f32 %v1991_v33, 0.0  ;;  %v1918_v63 = vmul.f32 %v2550_v34, %v3850_v20  ;;  %v2551_v6 = vadd.f32 %v1846_v46, %v3834_v10  ;;  %v1852_v19 = vpop.f32.mrb[15].mxu0  ;;  %v3931_v48 = vadd.f32 %v3816_v56, %v1549_v39 }
 0x192   :  { %2241 = vst [vmem:[%s4042_s4 + $0x10] sm:$0xff] %v2493_v38  ;;  %v2024_v54 = vmax.f32 %v1992_v23, 0.0  ;;  %v1993_v22 = vadd.f32 3.0, %v1961_v8  ;;  %v2552_v24 = vadd.f32 %v1848_v45, %v3836_v25  ;;  %v2118_v44 = vmul.f32 0.16666667, %v2086_v57 }
 0x193   :  { %v2055_v42 = vmin.f32 %v2023_v60, 6.0  ;;  %v1962_v26 = vadd.f32 %v3858_v61, %v1918_v63  ;;  %v1919_v32 = vmul.f32 %v2551_v6, %v3848_v18  ;;  %v3938_v50 = vadd.f32 %v3818_v58, %v1551_v51 }
 0x194   :  { %v2056_v10 = vmin.f32 %v2024_v54, 6.0  ;;  %v2025_v35 = vmax.f32 %v1993_v22, 0.0  ;;  %v1920_v36 = vmul.f32 %v2552_v24, %v3850_v20  ;;  %v2494_v40 = vpack.c.bf16 %v2118_v44, %v2117_v53 }
 0x195   :  { %v2087_v3 = vmul.f32 %v2055_v42, %v1959_v2  ;;  %v1994_v62 = vadd.f32 3.0, %v1962_v26  ;;  %v1963_v56 = vadd.f32 %v3854_v49, %v1919_v32  ;;  %v2553_v1 = vadd.f32 %v1850_v13, %v3838_v27  ;;  %v1743_v52 = vpop.f32.mrb[32].mxu1 }
 0x196   :  { %v2088_v21 = vmul.f32 %v2056_v10, %v1960_v30  ;;  %v2057_v25 = vmin.f32 %v2025_v35, 6.0  ;;  %v1964_v41 = vadd.f32 %v3858_v61, %v1920_v36  ;;  %v1856_v14 = vpop.f32.mrb[32].mxu0  ;;  %2242 = vst [vmem:[%s4042_s4 + $0x18] sm:$0xff] %v2494_v40  ;;  %v3947_v2 = vadd.f32 %v3820_v59, %v1553_v16  ;;  %v1745_v47 = vpop.f32.mrb[33].mxu1 }
 0x197   :  { %v2119_v31 = vmul.f32 0.16666667, %v2087_v3  ;;  %v2026_v58 = vmax.f32 %v1994_v62, 0.0  ;;  %v1995_v46 = vadd.f32 3.0, %v1963_v56  ;;  %v1858_v33 = vpop.f32.mrb[33].mxu0  ;;  %v1921_v45 = vmul.f32 %v2553_v1, %v3848_v18  ;;  %v1747_v27 = vpop.f32.mrb[34].mxu1 }
 0x198   :  { %v2120_v30 = vmul.f32 0.16666667, %v2088_v21  ;;  %v2089_v34 = vmul.f32 %v2057_v25, %v1961_v8  ;;  %v1996_v39 = vadd.f32 3.0, %v1964_v41  ;;  %v1860_v38 = vpop.f32.mrb[34].mxu0  ;;  %v2554_v51 = vadd.f32 %v1852_v19, %v3840_v11  ;;  %v1749_v57 = vpop.f32.mrb[35].mxu1 }
 0x199   :  { %v2058_v53 = vmin.f32 %v2026_v58, 6.0  ;;  %v2027_v23 = vmax.f32 %v1995_v46, 0.0  ;;  %v2556_v13 = vadd.f32 %v3852_v43, %v1743_v52  ;;  %v1862_v60 = vpop.f32.mrb[35].mxu0  ;;  %v1965_v16 = vadd.f32 %v3854_v49, %v1921_v45 }
 0x19a   :  { %v2495_v63 = vpack.c.bf16 %v2120_v30, %v2119_v31  ;;  %v2121_v59 = vmul.f32 0.16666667, %v2089_v34  ;;  %v2028_v6 = vmax.f32 %v1996_v39, 0.0  ;;  %v1922_v22 = vmul.f32 %v2554_v51, %v3850_v20 }
 0x19b   :  { %v2090_v54 = vmul.f32 %v2058_v53, %v1962_v26  ;;  %v2059_v8 = vmin.f32 %v2027_v23, 6.0  ;;  %v2557_v24 = vadd.f32 %v2556_v13, %v1856_v14  ;;  %v1997_v11 = vadd.f32 3.0, %v1965_v16 }
 0x19c   :  { %2243 = vst [vmem:[%s4042_s4 + $0x20] sm:$0xff] %v2495_v63  ;;  %v2060_v44 = vmin.f32 %v2028_v6, 6.0  ;;  %v2559_v43 = vadd.f32 %v3856_v55, %v1745_v47  ;;  %v2562_v19 = vadd.f32 %v3861_v12, %v1747_v27  ;;  %v1966_v10 = vadd.f32 %v3858_v61, %v1922_v22 }
 0x19d   :  { %v2122_v42 = vmul.f32 0.16666667, %v2090_v54  ;;  %v2091_v32 = vmul.f32 %v2059_v8, %v1963_v56  ;;  %v1923_v26 = vmul.f32 %v2557_v24, %v3848_v18  ;;  %v2029_v36 = vmax.f32 %v1997_v11, 0.0  ;;  %v1753_v62 = vpop.f32.mrb[36].mxu1 }
 0x19e   :  { %v2092_v35 = vmul.f32 %v2060_v44, %v1964_v41  ;;  %v2560_v40 = vadd.f32 %v2559_v43, %v1858_v33  ;;  %v2563_v3 = vadd.f32 %v2562_v19, %v1860_v38  ;;  %v1866_v21 = vpop.f32.mrb[36].mxu0  ;;  %v1998_v52 = vadd.f32 3.0, %v1966_v10  ;;  %v1755_v55 = vpop.f32.mrb[37].mxu1 }
 0x19f   :  { %v2496_v25 = vpack.c.bf16 %v2122_v42, %v2121_v59  ;;  %v2123_v1 = vmul.f32 0.16666667, %v2091_v32  ;;  %v1967_v14 = vadd.f32 %v3854_v49, %v1923_v26  ;;  %v1868_v31 = vpop.f32.mrb[37].mxu0  ;;  %v2061_v58 = vmin.f32 %v2029_v36, 6.0  ;;  %v1757_v47 = vpop.f32.mrb[38].mxu1 }
 0x1a0   :  { %v2124_v12 = vmul.f32 0.16666667, %v2092_v35  ;;  %v1924_v56 = vmul.f32 %v2560_v40, %v3850_v20  ;;  %v1925_v46 = vmul.f32 %v2563_v3, %v3848_v18  ;;  %v1870_v41 = vpop.f32.mrb[38].mxu0  ;;  %v2030_v33 = vmax.f32 %v1998_v52, 0.0  ;;  %v1759_v45 = vpop.f32.mrb[39].mxu1 }
 0x1a1   :  { %2244 = vst [vmem:[%s4042_s4 + $0x28] sm:$0xff] %v2496_v25  ;;  %v1999_v30 = vadd.f32 3.0, %v1967_v14  ;;  %v2565_v34 = vadd.f32 %v3864_v28, %v1749_v57  ;;  %v2568_v39 = vadd.f32 %v3873_v7, %v1753_v62  ;;  %v1872_v27 = vpop.f32.mrb[39].mxu0  ;;  %v2093_v53 = vmul.f32 %v2061_v58, %v1965_v16 }
 0x1a2   :  { %v2497_v38 = vpack.c.bf16 %v2124_v12, %v2123_v1  ;;  %v1968_v23 = vadd.f32 %v3858_v61, %v1924_v56  ;;  %v1969_v51 = vadd.f32 %v3854_v49, %v1925_v46  ;;  %v2062_v13 = vmin.f32 %v2030_v33, 6.0 }
 0x1a3   :  { %v2031_v63 = vmax.f32 %v1999_v30, 0.0  ;;  %v2566_v59 = vadd.f32 %v2565_v34, %v1862_v60  ;;  %v2569_v6 = vadd.f32 %v2568_v39, %v1866_v21  ;;  %v2125_v54 = vmul.f32 0.16666667, %v2093_v53 }
 0x1a4   :  { %2245 = vst [vmem:[%s4042_s4 + $0x30] sm:$0xff] %v2497_v38  ;;  %v2000_v28 = vadd.f32 3.0, %v1968_v23  ;;  %v2001_v57 = vadd.f32 3.0, %v1969_v51  ;;  %v2571_v7 = vadd.f32 %v3876_v37, %v1755_v55  ;;  %v2094_v8 = vmul.f32 %v2062_v13, %v1966_v10 }
 0x1a5   :  { %v2063_v22 = vmin.f32 %v2031_v63, 6.0  ;;  %v1926_v16 = vmul.f32 %v2566_v59, %v3850_v20  ;;  %v1927_v24 = vmul.f32 %v2569_v6, %v3848_v18  ;;  %v2574_v60 = vadd.f32 %v3880_v4, %v1757_v47  ;;  %v1763_v19 = vpop.f32.mrb[40].mxu1 }
 0x1a6   :  { %v2032_v44 = vmax.f32 %v2000_v28, 0.0  ;;  %v2033_v11 = vmax.f32 %v2001_v57, 0.0  ;;  %v2572_v43 = vadd.f32 %v2571_v7, %v1868_v31  ;;  %v1876_v42 = vpop.f32.mrb[40].mxu0  ;;  %v2126_v32 = vmul.f32 0.16666667, %v2094_v8  ;;  %v1765_v37 = vpop.f32.mrb[41].mxu1 }
 0x1a7   :  { %v2095_v26 = vmul.f32 %v2063_v22, %v1967_v14  ;;  %v1970_v35 = vadd.f32 %v3858_v61, %v1926_v16  ;;  %v1971_v36 = vadd.f32 %v3854_v49, %v1927_v24  ;;  %v1878_v10 = vpop.f32.mrb[41].mxu0  ;;  %v2575_v21 = vadd.f32 %v2574_v60, %v1870_v41  ;;  %v1767_v25 = vpop.f32.mrb[42].mxu1 }
 0x1a8   :  { %v2064_v40 = vmin.f32 %v2032_v44, 6.0  ;;  %v2065_v3 = vmin.f32 %v2033_v11, 6.0  ;;  %v1928_v62 = vmul.f32 %v2572_v43, %v3850_v20  ;;  %v1880_v1 = vpop.f32.mrb[42].mxu0  ;;  %v2498_v52 = vpack.c.bf16 %v2126_v32, %v2125_v54  ;;  %v1769_v12 = vpop.f32.mrb[43].mxu1 }
 0x1a9   :  { %v2127_v55 = vmul.f32 0.16666667, %v2095_v26  ;;  %v2002_v4 = vadd.f32 3.0, %v1970_v35  ;;  %v2003_v31 = vadd.f32 3.0, %v1971_v36  ;;  %v1882_v58 = vpop.f32.mrb[43].mxu0  ;;  %v1929_v47 = vmul.f32 %v2575_v21, %v3848_v18 }
 0x1aa   :  { %v2096_v14 = vmul.f32 %v2064_v40, %v1968_v23  ;;  %v2097_v56 = vmul.f32 %v2065_v3, %v1969_v51  ;;  %v1972_v46 = vadd.f32 %v3858_v61, %v1928_v62  ;;  %2246 = vst [vmem:[%s4042_s4 + $0x38] sm:$0xff] %v2498_v52  ;;  %v2577_v30 = vadd.f32 %v3886_v29, %v1759_v45 }
 0x1ab   :  { %v2034_v33 = vmax.f32 %v2002_v4, 0.0  ;;  %v2035_v41 = vmax.f32 %v2003_v31, 0.0  ;;  %v2580_v34 = vadd.f32 %v3894_v17, %v1763_v19  ;;  %v1973_v23 = vadd.f32 %v3854_v49, %v1929_v47 }
 0x1ac   :  { %v2128_v39 = vmul.f32 0.16666667, %v2096_v14  ;;  %v2129_v38 = vmul.f32 0.16666667, %v2097_v56  ;;  %v2004_v53 = vadd.f32 3.0, %v1972_v46  ;;  %v2578_v63 = vadd.f32 %v2577_v30, %v1872_v27 }
 0x1ad   :  { %v2066_v51 = vmin.f32 %v2034_v33, 6.0  ;;  %v2067_v13 = vmin.f32 %v2035_v41, 6.0  ;;  %v2581_v59 = vadd.f32 %v2580_v34, %v1876_v42  ;;  %v2005_v28 = vadd.f32 3.0, %v1973_v23  ;;  %v1773_v7 = vpop.f32.mrb[44].mxu1 }
 0x1ae   :  { %v2499_v6 = vpack.c.bf16 %v2128_v39, %v2127_v55  ;;  %v2036_v54 = vmax.f32 %v2004_v53, 0.0  ;;  %v2583_v57 = vadd.f32 %v3899_v9, %v1765_v37  ;;  %v1886_v8 = vpop.f32.mrb[44].mxu0  ;;  %v1930_v17 = vmul.f32 %v2578_v63, %v3850_v20  ;;  %v1775_v16 = vpop.f32.mrb[45].mxu1 }
 0x1af   :  { %v2098_v22 = vmul.f32 %v2066_v51, %v1970_v35  ;;  %v2099_v29 = vmul.f32 %v2067_v13, %v1971_v36  ;;  %v1931_v45 = vmul.f32 %v2581_v59, %v3848_v18  ;;  %v1888_v24 = vpop.f32.mrb[45].mxu0  ;;  %v2037_v44 = vmax.f32 %v2005_v28, 0.0  ;;  %v1777_v9 = vpop.f32.mrb[46].mxu1 }
 0x1b0   :  { %2247 = vst [vmem:[%s4042_s4 + $0x40] sm:$0xff] %v2499_v6  ;;  %v2068_v27 = vmin.f32 %v2036_v54, 6.0  ;;  %v2584_v11 = vadd.f32 %v2583_v57, %v1878_v10  ;;  %v2586_v43 = vadd.f32 %v3907_v15, %v1767_v25  ;;  %v1890_v60 = vpop.f32.mrb[46].mxu0  ;;  %v1974_v32 = vadd.f32 %v3858_v61, %v1930_v17  ;;  %v1779_v35 = vpop.f32.mrb[47].mxu1 }
 0x1b1   :  { %v2130_v19 = vmul.f32 0.16666667, %v2098_v22  ;;  %v2131_v42 = vmul.f32 0.16666667, %v2099_v29  ;;  %v1975_v26 = vadd.f32 %v3854_v49, %v1931_v45  ;;  %v1892_v36 = vpop.f32.mrb[47].mxu0  ;;  %v2069_v40 = vmin.f32 %v2037_v44, 6.0 }
 0x1b2   :  { %v2100_v37 = vmul.f32 %v2068_v27, %v1972_v46  ;;  %v1932_v3 = vmul.f32 %v2584_v11, %v3850_v20  ;;  %v2587_v62 = vadd.f32 %v2586_v43, %v1880_v1  ;;  %v2006_v52 = vadd.f32 3.0, %v1974_v32 }
 0x1b3   :  { %v2500_v21 = vpack.c.bf16 %v2130_v19, %v2129_v38  ;;  %v2007_v10 = vadd.f32 3.0, %v1975_v26  ;;  %v2589_v15 = vadd.f32 %v3916_v0, %v1769_v12  ;;  %v2101_v55 = vmul.f32 %v2069_v40, %v1973_v23 }
 0x1b4   :  { %v2132_v25 = vmul.f32 0.16666667, %v2100_v37  ;;  %v1976_v4 = vadd.f32 %v3858_v61, %v1932_v3  ;;  %v1933_v31 = vmul.f32 %v2587_v62, %v3848_v18  ;;  %v2038_v14 = vmax.f32 %v2006_v52, 0.0 }
 0x1b5   :  { %2248 = vst [vmem:[%s4042_s4 + $0x48] sm:$0xff] %v2500_v21  ;;  %v2039_v56 = vmax.f32 %v2007_v10, 0.0  ;;  %v2590_v46 = vadd.f32 %v2589_v15, %v1882_v58  ;;  %v2592_v1 = vadd.f32 %v3922_v5, %v1773_v7  ;;  %v2133_v33 = vmul.f32 0.16666667, %v2101_v55 }
 0x1b6   :  { %v2501_v47 = vpack.c.bf16 %v2132_v25, %v2131_v42  ;;  %v2008_v41 = vadd.f32 3.0, %v1976_v4  ;;  %v1977_v0 = vadd.f32 %v3854_v49, %v1933_v31  ;;  %v2070_v12 = vmin.f32 %v2038_v14, 6.0 }
 0x1b7   :  { %v2071_v30 = vmin.f32 %v2039_v56, 6.0  ;;  %v1934_v34 = vmul.f32 %v2590_v46, %v3850_v20  ;;  %v2593_v39 = vadd.f32 %v2592_v1, %v1886_v8  ;;  %v2595_v58 = vadd.f32 %v3931_v48, %v1775_v16 }
 0x1b8   :  { %2249 = vst [vmem:[%s4042_s4 + $0x50] sm:$0xff] %v2501_v47  ;;  %v2040_v38 = vmax.f32 %v2008_v41, 0.0  ;;  %v2009_v53 = vadd.f32 3.0, %v1977_v0  ;;  %v2598_v5 = vadd.f32 %v3938_v50, %v1777_v9  ;;  %v2102_v23 = vmul.f32 %v2070_v12, %v1974_v32 }
 0x1b9   :  { %v2103_v51 = vmul.f32 %v2071_v30, %v1975_v26  ;;  %v1978_v13 = vadd.f32 %v3858_v61, %v1934_v34  ;;  %v1935_v63 = vmul.f32 %v2593_v39, %v3848_v18  ;;  %v2596_v54 = vadd.f32 %v2595_v58, %v1888_v24 }
 0x1ba   :  { %v2072_v59 = vmin.f32 %v2040_v38, 6.0  ;;  %v2041_v6 = vmax.f32 %v2009_v53, 0.0  ;;  %v2599_v28 = vadd.f32 %v2598_v5, %v1890_v60  ;;  %v2134_v57 = vmul.f32 0.16666667, %v2102_v23 }
 0x1bb   :  { %v2135_v7 = vmul.f32 0.16666667, %v2103_v51  ;;  %v2010_v8 = vadd.f32 3.0, %v1978_v13  ;;  %v1979_v22 = vadd.f32 %v3854_v49, %v1935_v63  ;;  %v1936_v48 = vmul.f32 %v2596_v54, %v3850_v20 }
 0x1bc   :  { %v2104_v29 = vmul.f32 %v2072_v59, %v1976_v4  ;;  %v2073_v17 = vmin.f32 %v2041_v6, 6.0  ;;  %v1937_v50 = vmul.f32 %v2599_v28, %v3848_v18  ;;  %v2502_v45 = vpack.c.bf16 %v2134_v57, %v2133_v33 }
 0x1bd   :  { %v2042_v16 = vmax.f32 %v2010_v8, 0.0  ;;  %v2011_v27 = vadd.f32 3.0, %v1979_v22  ;;  %v2601_v44 = vadd.f32 %v3947_v2, %v1779_v35  ;;  %v1980_v24 = vadd.f32 %v3858_v61, %v1936_v48 }
 0x1be   :  { %v2136_v11 = vmul.f32 0.16666667, %v2104_v29  ;;  %v2105_v43 = vmul.f32 %v2073_v17, %v1977_v0  ;;  %v1981_v9 = vadd.f32 %v3854_v49, %v1937_v50  ;;  %2250 = vst [vmem:[%s4042_s4 + $0x58] sm:$0xff] %v2502_v45 }
 0x1bf   :  { %v2074_v60 = vmin.f32 %v2042_v16, 6.0  ;;  %v2043_v19 = vmax.f32 %v2011_v27, 0.0  ;;  %v2602_v42 = vadd.f32 %v2601_v44, %v1892_v36  ;;  %v2012_v18 = vadd.f32 3.0, %v1980_v24 }
 0x1c0   :  { %v2503_v32 = vpack.c.bf16 %v2136_v11, %v2135_v7  ;;  %v2013_v26 = vadd.f32 3.0, %v1981_v9  ;;  %v2137_v37 = vmul.f32 0.16666667, %v2105_v43 }
 0x1c1   :  { %v2106_v40 = vmul.f32 %v2074_v60, %v1978_v13  ;;  %v2075_v3 = vmin.f32 %v2043_v19, 6.0  ;;  %v1938_v2 = vmul.f32 %v2602_v42, %v3850_v20  ;;  %v2044_v49 = vmax.f32 %v2012_v18, 0.0 }
 0x1c2   :  { %2251 = vst [vmem:[%s4042_s4 + $0x60] sm:$0xff] %v2503_v32  ;;  %v2045_v35 = vmax.f32 %v2013_v26, 0.0 }
 0x1c3   :  { %v2138_v62 = vmul.f32 0.16666667, %v2106_v40  ;;  %v2107_v21 = vmul.f32 %v2075_v3, %v1979_v22  ;;  %v1982_v52 = vadd.f32 %v3858_v61, %v1938_v2  ;;  %v2076_v10 = vmin.f32 %v2044_v49, 6.0 }
 0x1c4   :  { %v2077_v36 = vmin.f32 %v2045_v35, 6.0 }
 0x1c5   :  { %v2504_v15 = vpack.c.bf16 %v2138_v62, %v2137_v37  ;;  %v2014_v25 = vadd.f32 3.0, %v1982_v52  ;;  %v2139_v55 = vmul.f32 0.16666667, %v2107_v21  ;;  %v2108_v4 = vmul.f32 %v2076_v10, %v1980_v24 }
 0x1c6   :  { %v2109_v20 = vmul.f32 %v2077_v36, %v1981_v9 }
 0x1c7   :  { %2252 = vst [vmem:[%s4042_s4 + $0x68] sm:$0xff] %v2504_v15  ;;  %v2046_v31 = vmax.f32 %v2014_v25, 0.0  ;;  %v2140_v14 = vmul.f32 0.16666667, %v2108_v4 }
 0x1c8   :  { %v2141_v1 = vmul.f32 0.16666667, %v2109_v20 }
 0x1c9   :  { %v2078_v56 = vmin.f32 %v2046_v31, 6.0  ;;  %v2505_v46 = vpack.c.bf16 %v2140_v14, %v2139_v55 }
 0x1cb   :  { %v2110_v47 = vmul.f32 %v2078_v56, %v1982_v52  ;;  %2253 = vst [vmem:[%s4042_s4 + $0x70] sm:$0xff] %v2505_v46 }
 0x1cd   :  { %v2142_v61 = vmul.f32 0.16666667, %v2110_v47 }
 0x1cf   :  { %v2506_v33 = vpack.c.bf16 %v2142_v61, %v2141_v1 }
 0x1d1   :  { %2254 = vst [vmem:[%s4042_s4 + $0x78] sm:$0xff] %v2506_v33 }

// kernel: _lambda_.53
= control target key start
LH: loop header
LB: loop body
LE: loop exit
PB: predicated region body
PF: predicated region fallthrough
CT: control target
= control target key end

     0   :  { %s2769_s15 = smov 0   ;;  %s3214_s0 = inlined_call_operand.vmem [shape: bf16[512,576], index: 0, kind: input, shape index: {}]   ;;  %s3215_s1 = inlined_call_operand.vmem [shape: bf16[576,128], index: 1, kind: input, shape index: {}]   ;;  %s3216_s2 = inlined_call_operand.vmem [shape: f32[1,128], index: 2, kind: input, shape index: {}]   ;;  %s3217_s3 = inlined_call_operand.vmem [shape: f32[1,128], index: 3, kind: input, shape index: {}]   ;;  %s3218_s4 = inlined_call_operand.vmem [shape: bf16[512,128], index: 4, kind: output, shape index: {}]  }
   0x1 LB: > { %s1975_s16 = sadd.s32 4294967295, %s2742_s15   ;;  %p1979_p0 = scmp.ge.s32.totalorder %s2742_s15, 1  ;;  %s2742_s15 = sphi %s2769_s15, %s14_s15  }
   0x2   : > { %p164_p1 = scmp.lt.s32.totalorder %s2742_s15, 3 }
   0x4   : > { %p165_p2 = pnand %p1979_p0, %p164_p1 }
   0x5   : > { %v2588_v0 = vld [vmem:[%s3215_s1 + $0x40] sm:$0xff] (!%p165_p2)   ;;  %s1980_s19 = sshll.u32 (!%p165_p2), %s1975_s16, 5  ;;  %v2590_v2 = vld [vmem:[%s3215_s1 + $0x48] sm:$0xff] (!%p165_p2)   ;;  %v2592_v4 = vld [vmem:[%s3215_s1 + $0x50] sm:$0xff] (!%p165_p2)   ;;  %vm989_vm0 = vcmask (!%p165_p2), 523264  }
   0x6   : > { %168 = sbr.rel (%p165_p2) target bundleno = 436 (0x1b4), region = 36  ;;  %v2589_v1 = vld [vmem:[%s3215_s1] sm:$0xff] (!%p165_p2)   ;;  %2279 = vmatprep.subr.bf16.mxu0 (!%p165_p2), %v2588_v0  ;;  %2563 = vmatprep.subr.bf16.mxu1 (!%p165_p2), %v2588_v0  ;;  %p192_p3 = scmp.lt.s32.totalorder (!%p165_p2), %s1980_s19, 63  ;;  %v2591_v3 = vld [vmem:[%s3215_s1 + $0x8] sm:$0xff] (!%p165_p2)   ;;  %v2593_v5 = vld [vmem:[%s3215_s1 + $0x10] sm:$0xff] (!%p165_p2)  }
   0x7   : > { %2280 = vmatpush3.bf16.msra.mxu0 (!%p165_p2), %v2589_v1  ;;  %2571 = vmatpush3.bf16.msra.mxu1 (!%p165_p2), %v2589_v1  ;;  %v2594_v6 = vld [vmem:[%s3215_s1 + $0x58] sm:$0xff] (!%p165_p2)   ;;  %v2596_v8 = vld [vmem:[%s3215_s1 + $0x60] sm:$0xff] (!%p165_p2)   ;;  %v2598_v10 = vld [vmem:[%s3215_s1 + $0x68] sm:$0xff] (!%p165_p2)  }
   0x8   : > { %2281 = vmatprep.subr.bf16.mxu0 (!%p165_p2), %v2590_v2  ;;  %2564 = vmatprep.subr.bf16.mxu1 (!%p165_p2), %v2590_v2  ;;  %v2595_v7 = vld [vmem:[%s3215_s1 + $0x18] sm:$0xff] (!%p165_p2)   ;;  %v2597_v9 = vld [vmem:[%s3215_s1 + $0x20] sm:$0xff] (!%p165_p2)   ;;  %v2599_v13 = vld [vmem:[%s3215_s1 + $0x28] sm:$0xff] (!%p165_p2)  }
   0x9   : > { %v2600_v14 = vld [vmem:[%s3215_s1 + $0x70] sm:$0xff] (!%p165_p2)   ;;  %v2602_v16 = vld [vmem:[%s3215_s1 + $0x78] sm:$0xff] (!%p165_p2)   ;;  %v2610_v18 = vld [vmem:[%s3215_s1 + $0xc0] sm:$0xff] (!%p165_p2)  }
   0xa   : > { %v2601_v15 = vld [vmem:[%s3215_s1 + $0x30] sm:$0xff] (!%p165_p2)   ;;  %v2603_v17 = vld [vmem:[%s3215_s1 + $0x38] sm:$0xff] (!%p165_p2)   ;;  %v2613_v19 = vld [vmem:[%s3215_s1 + $0x100] sm:$0xff] (!%p165_p2)  }
   0xb   : > { %2282 = vmatpush3.bf16.msra.mxu0 (!%p165_p2), %v2591_v3  ;;  %2572 = vmatpush3.bf16.msra.mxu1 (!%p165_p2), %v2591_v3  ;;  %v2611_v22 = vld [vmem:[%s3215_s1 + $0x80] sm:$0xff] (!%p165_p2)   ;;  %v2612_v23 = vld [vmem:[%s3215_s1 + $0xc8] sm:$0xff] (!%p165_p2)   ;;  %v2621_v28 = vld [vmem:[%s3215_s1 + $0xd0] sm:$0xff] (!%p165_p2)  }
   0xc   : > { %2283 = vmatprep.subr.bf16.mxu0 (!%p165_p2), %v2592_v4  ;;  %2565 = vmatprep.subr.bf16.mxu1 (!%p165_p2), %v2592_v4  ;;  %v2614_v26 = vld [vmem:[%s3215_s1 + $0x88] sm:$0xff] (!%p165_p2)   ;;  %v2622_v30 = vld [vmem:[%s3215_s1 + $0x90] sm:$0xff] (!%p165_p2)   ;;  %v2623_v31 = vld [vmem:[%s3215_s1 + $0xd8] sm:$0xff] (!%p165_p2)  }
   0xd   : > { %s3220_s19 = smov (!%p192_p3, %s1980_s19), 63  ;;  %v2624_v34 = vld [vmem:[%s3215_s1 + $0x98] sm:$0xff]   ;;  %v2644_v35 = vld [vmem:[%s3215_s1 + $0x108] sm:$0xff]   ;;  %v2631_v37 = vld [vmem:[%s3215_s1 + $0xe0] sm:$0xff]  }
   0xe   : > { %s2579_s6 = smul.u32 20, %s3220_s19  ;;  %v2632_v39 = vld [vmem:[%s3215_s1 + $0xa0] sm:$0xff]   ;;  %v2633_v40 = vld [vmem:[%s3215_s1 + $0xe8] sm:$0xff]   ;;  %v2641_v46 = vld [vmem:[%s3215_s1 + $0xf0] sm:$0xff]   ;;  %s1983_s27 = sshll.u32 %s3220_s19, 2 }
   0xf   : > { %2284 = vmatpush3.bf16.msra.mxu0 %v2593_v5  ;;  %2573 = vmatpush3.bf16.msra.mxu1 %v2593_v5  ;;  %v2634_v43 = vld [vmem:[%s3215_s1 + $0xa8] sm:$0xff]   ;;  %v2664_v47 = vld [vmem:[%s3215_s1 + $0x110] sm:$0xff]   ;;  %v2643_v49 = vld [vmem:[%s3215_s1 + $0xf8] sm:$0xff]   ;;  %s3101_s29 = scalar_lea.vmem %s3218_s4, %s1983_s27 }
  0x10   : > { %2285 = vmatprep.subr.bf16.mxu0 %v2594_v6  ;;  %2566 = vmatprep.subr.bf16.mxu1 %v2594_v6  ;;  %s2810_s13 = scalar_lea.vmem %s3214_s0, %s2579_s6  ;;  %v2642_v48 = vld [vmem:[%s3215_s1 + $0xb0] sm:$0xff]   ;;  %v2645_v52 = vld [vmem:[%s3215_s1 + $0xb8] sm:$0xff]  }
  0x11   : > { %v2606_v11 = vld [vmem:[%s2810_s13 + $0x4] ss:$20 sps:$4 sm:$0xff]   ;;  %v2604_v20 = vld [vmem:[%s2810_s13] ss:$20 sps:$4 sm:$0xff]   ;;  %v2619_v27 = vld [vmem:[%s2810_s13 + $0x28] ss:$20 sps:$4 sm:$0xff]  }
  0x12   : > { %v2609_v12 = vld [vmem:[%s2810_s13 + $0x1e4] ss:$20 sps:$4 sm:$0xff]   ;;  %1070 = vmatprep.mubr.bf16.mxu0 %v2606_v11  ;;  %v2607_v21 = vld [vmem:[%s2810_s13 + $0x1e0] ss:$20 sps:$4 sm:$0xff]   ;;  %v2620_v29 = vld [vmem:[%s2810_s13 + $0x208] ss:$20 sps:$4 sm:$0xff]  }
  0x13   : > { %2286 = vmatpush3.bf16.msra.mxu0 %v2595_v7  ;;  %2574 = vmatpush3.bf16.msra.mxu1 %v2595_v7  ;;  %v2615_v24 = vld [vmem:[%s2810_s13 + $0x2c] ss:$20 sps:$4 sm:$0xff]   ;;  %v2625_v32 = vld [vmem:[%s2810_s13 + $0x54] ss:$20 sps:$4 sm:$0xff]   ;;  %v2629_v36 = vld [vmem:[%s2810_s13 + $0x50] ss:$20 sps:$4 sm:$0xff]  }
  0x14   : > { %2287 = vmatprep.subr.bf16.mxu0 %v2596_v8  ;;  %2567 = vmatprep.subr.bf16.mxu1 %v2596_v8  ;;  %v2617_v25 = vld [vmem:[%s2810_s13 + $0x20c] ss:$20 sps:$4 sm:$0xff]   ;;  %v2627_v33 = vld [vmem:[%s2810_s13 + $0x234] ss:$20 sps:$4 sm:$0xff]   ;;  %v2630_v38 = vld [vmem:[%s2810_s13 + $0x230] ss:$20 sps:$4 sm:$0xff]  }
  0x15   : > { %1166 = vmatprep.mubr.bf16.mxu1 %v2609_v12  ;;  %v2635_v41 = vld [vmem:[%s2810_s13 + $0x7c] ss:$20 sps:$4 sm:$0xff]   ;;  %v2639_v44 = vld [vmem:[%s2810_s13 + $0x78] ss:$20 sps:$4 sm:$0xff]   ;;  %v2651_v54 = vld [vmem:[%s2810_s13 + $0xa0] ss:$20 sps:$4 sm:$0xff]  }
  0x16   : > { %v2637_v42 = vld [vmem:[%s2810_s13 + $0x25c] ss:$20 sps:$4 sm:$0xff]   ;;  %v2640_v45 = vld [vmem:[%s2810_s13 + $0x258] ss:$20 sps:$4 sm:$0xff]   ;;  %v2654_v57 = vld [vmem:[%s2810_s13 + $0x34] ss:$20 sps:$4 sm:$0xff]  }
  0x17   : > { %2288 = vmatpush3.bf16.msra.mxu0 %v2597_v9  ;;  %2575 = vmatpush3.bf16.msra.mxu1 %v2597_v9  ;;  %v2646_v50 = vld [vmem:[%s2810_s13 + $0xa4] ss:$20 sps:$4 sm:$0xff]   ;;  %v2650_v51 = vld [vmem:[%s2810_s13 + $0xc] ss:$20 sps:$4 sm:$0xff]   ;;  %v2648_v53 = vld [vmem:[%s2810_s13 + $0x8] ss:$20 sps:$4 sm:$0xff]  }
  0x18   : > { %2289 = vmatprep.subr.bf16.mxu0 %v2598_v10  ;;  %2568 = vmatprep.subr.bf16.mxu1 %v2598_v10  ;;  %v2652_v55 = vld [vmem:[%s2810_s13 + $0xcc] ss:$20 sps:$4 sm:$0xff]   ;;  %v2683_v56 = vld [vmem:[%s3215_s1 + $0x118] sm:$0xff]   ;;  %v2657_v59 = vld [vmem:[%s2810_s13 + $0x30] ss:$20 sps:$4 sm:$0xff]  }
  0x19   : > { %v2656_v58 = vld [vmem:[%s2810_s13 + $0xc8] ss:$20 sps:$4 sm:$0xff]   ;;  %v2662_v62 = vld [vmem:[%s2810_s13 + $0xf0] ss:$20 sps:$4 sm:$0xff]   ;;  %v2663_v63 = vld [vmem:[%s2810_s13 + $0x58] ss:$20 sps:$4 sm:$0xff]  }
  0x1a   : > { %v2658_v60 = vld [vmem:[%s2810_s13 + $0xf4] ss:$20 sps:$4 sm:$0xff]   ;;  %v2660_v61 = vld [vmem:[%s2810_s13 + $0x5c] ss:$20 sps:$4 sm:$0xff]   ;;  %v2667_v1 = vld [vmem:[%s2810_s13 + $0x84] ss:$20 sps:$4 sm:$0xff]  }
  0x1b   : > { %2290 = vmatpush3.bf16.msra.mxu0 %v2599_v13  ;;  %2576 = vmatpush3.bf16.msra.mxu1 %v2599_v13  ;;  %v2665_v0 = vld [vmem:[%s2810_s13 + $0x11c] ss:$20 sps:$4 sm:$0xff]   ;;  %v2669_v2 = vld [vmem:[%s2810_s13 + $0x118] ss:$20 sps:$4 sm:$0xff]   ;;  %v2670_v3 = vld [vmem:[%s2810_s13 + $0x80] ss:$20 sps:$4 sm:$0xff]  }
  0x1c   : > { %2291 = vmatprep.subr.bf16.mxu0 %v2600_v14  ;;  %2569 = vmatprep.subr.bf16.mxu1 %v2600_v14  ;;  %v2671_v4 = vld [vmem:[%s2810_s13 + $0x144] ss:$20 sps:$4 sm:$0xff]   ;;  %v2673_v5 = vld [vmem:[%s2810_s13 + $0xac] ss:$20 sps:$4 sm:$0xff]   ;;  %v2676_v7 = vld [vmem:[%s2810_s13 + $0xa8] ss:$20 sps:$4 sm:$0xff]  }
  0x1d   : > { %v2675_v6 = vld [vmem:[%s2810_s13 + $0x140] ss:$20 sps:$4 sm:$0xff]   ;;  %v2681_v10 = vld [vmem:[%s2810_s13 + $0x168] ss:$20 sps:$4 sm:$0xff]   ;;  %v2682_v11 = vld [vmem:[%s2810_s13 + $0xd0] ss:$20 sps:$4 sm:$0xff]  }
  0x1e   : > { %v2677_v8 = vld [vmem:[%s2810_s13 + $0x16c] ss:$20 sps:$4 sm:$0xff]   ;;  %v2679_v9 = vld [vmem:[%s2810_s13 + $0xd4] ss:$20 sps:$4 sm:$0xff]   ;;  %v2686_v13 = vld [vmem:[%s2810_s13 + $0xfc] ss:$20 sps:$4 sm:$0xff]  }
  0x1f   : > { %2292 = vmatpush3.bf16.msra.mxu0 %v2601_v15  ;;  %2577 = vmatpush3.bf16.msra.mxu1 %v2601_v15  ;;  %v2684_v12 = vld [vmem:[%s2810_s13 + $0x194] ss:$20 sps:$4 sm:$0xff]   ;;  %v2688_v14 = vld [vmem:[%s2810_s13 + $0x190] ss:$20 sps:$4 sm:$0xff]   ;;  %v2689_v15 = vld [vmem:[%s2810_s13 + $0xf8] ss:$20 sps:$4 sm:$0xff]  }
  0x20   : > { %2293 = vmatprep.subr.bf16.mxu0 %v2602_v16  ;;  %2570 = vmatprep.subr.bf16.mxu1 %v2602_v16  ;;  %v2690_v16 = vld [vmem:[%s2810_s13 + $0x1bc] ss:$20 sps:$4 sm:$0xff]  }
  0x23   : > { %2294 = vmatpush3.bf16.msra.mxu0 %v2603_v17  ;;  %2578 = vmatpush3.bf16.msra.mxu1 %v2603_v17  ;;  %v2692_v17 = vld [vmem:[%s2810_s13 + $0x124] ss:$20 sps:$4 sm:$0xff]  }
  0x24   : > { %2391 = vmatprep.subr.bf16.mxu1 %v2610_v18  ;;  %2523 = vmatprep.subr.bf16.mxu0 %v2613_v19  ;;  %v2694_v18 = vld [vmem:[%s2810_s13 + $0x1b8] ss:$20 sps:$4 sm:$0xff]  }
  0x26   : > { %1071 = vmatmul.mubr.bf16.vlgmr.msra.gmra.mrb[0].mxu0 %v2604_v20  ;;  %1167 = vmatmul.mubr.bf16.vlgmr.msra.gmra.mrb[0].mxu1 %v2607_v21  ;;  %v2696_v20 = vld [vmem:[%s2810_s13 + $0x14c] ss:$20 sps:$4 sm:$0xff]   ;;  %v2698_v21 = vld [vmem:[%s2810_s13 + $0x10] ss:$20 sps:$4 sm:$0xff]  }
  0x27   : > { %2392 = vmatpush3.bf16.msra.mxu1 %v2611_v22  ;;  %2524 = vmatpush3.bf16.msra.mxu0 %v2613_v19  ;;  %v2695_v19 = vld [vmem:[%s2810_s13 + $0x120] ss:$20 sps:$4 sm:$0xff]   ;;  %v2699_v22 = vld [vmem:[%s2810_s13 + $0x148] ss:$20 sps:$4 sm:$0xff]  }
  0x28   : > { %2393 = vmatprep.subr.bf16.mxu1 %v2612_v23  ;;  %1078 = vmatprep.mubr.bf16.mxu0 %v2615_v24  ;;  %v2700_v23 = vld [vmem:[%s2810_s13 + $0x38] ss:$20 sps:$4 sm:$0xff]   ;;  %v2701_v24 = vld [vmem:[%s2810_s13 + $0x174] ss:$20 sps:$4 sm:$0xff]  }
  0x29   : > { %1174 = vmatprep.mubr.bf16.mxu1 %v2617_v25  ;;  %2525 = vmatprep.subr.bf16.mxu0 %v2644_v35  ;;  %v2703_v25 = vld [vmem:[%s2810_s13 + $0x60] ss:$20 sps:$4 sm:$0xff]  }
  0x2b   : > { %2394 = vmatpush3.bf16.msra.mxu1 %v2614_v26  ;;  %2526 = vmatpush3.bf16.msra.mxu0 %v2644_v35  ;;  %v2704_v26 = vld [vmem:[%s2810_s13 + $0x170] ss:$20 sps:$4 sm:$0xff]   ;;  %v2715_v35 = vld [vmem:[%s2810_s13 + $0x128] ss:$20 sps:$4 sm:$0xff]  }
  0x2c   : > { %2395 = vmatprep.subr.bf16.mxu1 %v2621_v28  ;;  %2527 = vmatprep.subr.bf16.mxu0 %v2664_v47  ;;  %v2706_v28 = vld [vmem:[%s2810_s13 + $0x19c] ss:$20 sps:$4 sm:$0xff]  }
  0x2e   : > { %1079 = vmatmul.mubr.bf16.gmra.mrb[4].mxu0 %v2619_v27  ;;  %1175 = vmatmul.mubr.bf16.gmra.mrb[4].mxu1 %v2620_v29  ;;  %v2705_v27 = vld [vmem:[%s2810_s13 + $0x88] ss:$20 sps:$4 sm:$0xff]   ;;  %v2708_v29 = vld [vmem:[%s2810_s13 + $0xb0] ss:$20 sps:$4 sm:$0xff]  }
  0x2f   : > { %2396 = vmatpush3.bf16.msra.mxu1 %v2622_v30  ;;  %1086 = vmatprep.mubr.bf16.mxu0 %v2625_v32  ;;  %v2709_v30 = vld [vmem:[%s2810_s13 + $0x198] ss:$20 sps:$4 sm:$0xff]  }
  0x30   : > { %2397 = vmatprep.subr.bf16.mxu1 %v2623_v31  ;;  %1182 = vmatprep.mubr.bf16.mxu1 %v2627_v33  ;;  %v2710_v31 = vld [vmem:[%s2810_s13 + $0xd8] ss:$20 sps:$4 sm:$0xff]   ;;  %v2713_v33 = vld [vmem:[%s2810_s13 + $0x100] ss:$20 sps:$4 sm:$0xff]  }
  0x31   : > { %2528 = vmatpush3.bf16.msra.mxu0 %v2664_v47  ;;  %v2711_v32 = vld [vmem:[%s2810_s13 + $0x1c4] ss:$20 sps:$4 sm:$0xff]  }
  0x32   : > { %2529 = vmatprep.subr.bf16.mxu0 %v2683_v56  ;;  %v2730_v47 = vld [vmem:[%s2810_s13 + $0x218] ss:$20 sps:$4 sm:$0xff]  }
  0x33   : > { %2398 = vmatpush3.bf16.msra.mxu1 %v2624_v34  ;;  %v2714_v34 = vld [vmem:[%s2810_s13 + $0x1c0] ss:$20 sps:$4 sm:$0xff]  }
  0x34   : > { %2399 = vmatprep.subr.bf16.mxu1 %v2631_v37  ;;  %v2718_v37 = vld [vmem:[%s2810_s13 + $0x150] ss:$20 sps:$4 sm:$0xff]  }
  0x35   : > { %2530 = vmatpush3.bf16.msra.mxu0 %v2683_v56 }
  0x36   : > { %1087 = vmatmul.mubr.bf16.gmra.mrb[8].mxu0 %v2629_v36  ;;  %1183 = vmatmul.mubr.bf16.gmra.mrb[8].mxu1 %v2630_v38  ;;  %v2716_v36 = vld [vmem:[%s2810_s13 + $0x1ec] ss:$20 sps:$4 sm:$0xff]   ;;  %v2719_v38 = vld [vmem:[%s2810_s13 + $0x1e8] ss:$20 sps:$4 sm:$0xff]  }
  0x37   : > { %2400 = vmatpush3.bf16.msra.mxu1 %v2632_v39  ;;  %1094 = vmatprep.mubr.bf16.mxu0 %v2635_v41  ;;  %v2720_v39 = vld [vmem:[%s2810_s13 + $0x178] ss:$20 sps:$4 sm:$0xff]   ;;  %v2723_v41 = vld [vmem:[%s2810_s13 + $0x1a0] ss:$20 sps:$4 sm:$0xff]  }
  0x38   : > { %2401 = vmatprep.subr.bf16.mxu1 %v2633_v40  ;;  %1190 = vmatprep.mubr.bf16.mxu1 %v2637_v42  ;;  %v2721_v40 = vld [vmem:[%s2810_s13 + $0x214] ss:$20 sps:$4 sm:$0xff]   ;;  %v2724_v42 = vld [vmem:[%s2810_s13 + $0x210] ss:$20 sps:$4 sm:$0xff]  }
  0x3b   : > { %2402 = vmatpush3.bf16.msra.mxu1 %v2634_v43  ;;  %v2725_v43 = vld [vmem:[%s2810_s13 + $0x1c8] ss:$20 sps:$4 sm:$0xff]  }
  0x3c   : > { %2403 = vmatprep.subr.bf16.mxu1 %v2641_v46  ;;  %v2729_v46 = vld [vmem:[%s2810_s13 + $0x238] ss:$20 sps:$4 sm:$0xff]  }
  0x3e   : > { %1095 = vmatmul.mubr.bf16.gmra.mrb[12].mxu0 %v2639_v44  ;;  %1191 = vmatmul.mubr.bf16.gmra.mrb[12].mxu1 %v2640_v45  ;;  %v2726_v44 = vld [vmem:[%s2810_s13 + $0x23c] ss:$20 sps:$4 sm:$0xff]  }
  0x3f   : > { %2404 = vmatpush3.bf16.msra.mxu1 %v2642_v48  ;;  %1102 = vmatprep.mubr.bf16.mxu0 %v2646_v50  ;;  %v2728_v45 = vld [vmem:[%s2810_s13 + $0x1f0] ss:$20 sps:$4 sm:$0xff]   ;;  %v2734_v50 = vld [vmem:[%s2810_s13 + $0x260] ss:$20 sps:$4 sm:$0xff]  }
  0x40   : > { %2405 = vmatprep.subr.bf16.mxu1 %v2643_v49  ;;  %1231 = vmatprep.mubr.bf16.mxu1 %v2650_v51  ;;  %v2731_v48 = vld [vmem:[%s2810_s13 + $0x264] ss:$20 sps:$4 sm:$0xff]   ;;  %v2733_v49 = vld [vmem:[%s2810_s13 + $0x240] ss:$20 sps:$4 sm:$0xff]   ;;  %v2735_v51 = vld [vmem:[%s2810_s13 + $0x268] ss:$20 sps:$4 sm:$0xff]  }
  0x43   : > { %2406 = vmatpush3.bf16.msra.mxu1 %v2645_v52 }
  0x46   : > { %1103 = vmatmul.mubr.bf16.gmra.mrb[16].mxu0 %v2651_v54  ;;  %1232 = vmatmul.mubr.bf16.vlgmr.msra.gmra.mrb[16].mxu1 %v2648_v53 }
  0x47   : > { %1110 = vmatprep.mubr.bf16.mxu0 %v2652_v55  ;;  %1239 = vmatprep.mubr.bf16.mxu1 %v2654_v57 }
  0x4e   : > { %1111 = vmatmul.mubr.bf16.gmra.mrb[20].mxu0 %v2656_v58  ;;  %1240 = vmatmul.mubr.bf16.gmra.mrb[20].mxu1 %v2657_v59 }
  0x4f   : > { %1118 = vmatprep.mubr.bf16.mxu0 %v2658_v60  ;;  %1247 = vmatprep.mubr.bf16.mxu1 %v2660_v61 }
  0x56   : > { %1119 = vmatmul.mubr.bf16.gmra.mrb[24].mxu0 %v2662_v62  ;;  %1248 = vmatmul.mubr.bf16.gmra.mrb[24].mxu1 %v2663_v63 }
  0x57   : > { %1126 = vmatprep.mubr.bf16.mxu0 %v2665_v0  ;;  %1255 = vmatprep.mubr.bf16.mxu1 %v2667_v1 }
  0x5e   : > { %1127 = vmatmul.mubr.bf16.gmra.mrb[28].mxu0 %v2669_v2  ;;  %1256 = vmatmul.mubr.bf16.gmra.mrb[28].mxu1 %v2670_v3 }
  0x5f   : > { %1134 = vmatprep.mubr.bf16.mxu0 %v2671_v4  ;;  %1263 = vmatprep.mubr.bf16.mxu1 %v2673_v5 }
  0x66   : > { %1135 = vmatmul.mubr.bf16.gmra.mrb[32].mxu0 %v2675_v6  ;;  %1264 = vmatmul.mubr.bf16.gmra.mrb[32].mxu1 %v2676_v7 }
  0x67   : > { %1142 = vmatprep.mubr.bf16.mxu0 %v2677_v8  ;;  %1271 = vmatprep.mubr.bf16.mxu1 %v2679_v9 }
  0x6e   : > { %1143 = vmatmul.mubr.bf16.gmra.mrb[36].mxu0 %v2681_v10  ;;  %1272 = vmatmul.mubr.bf16.gmra.mrb[36].mxu1 %v2682_v11 }
  0x6f   : > { %1150 = vmatprep.mubr.bf16.mxu0 %v2684_v12  ;;  %1279 = vmatprep.mubr.bf16.mxu1 %v2686_v13 }
  0x76   : > { %1151 = vmatmul.mubr.bf16.gmra.mrb[40].mxu0 %v2688_v14  ;;  %1280 = vmatmul.mubr.bf16.gmra.mrb[40].mxu1 %v2689_v15 }
  0x77   : > { %1158 = vmatprep.mubr.bf16.mxu0 %v2690_v16  ;;  %1287 = vmatprep.mubr.bf16.mxu1 %v2692_v17 }
  0x7e   : > { %1159 = vmatmul.mubr.bf16.gmra.mrb[44].mxu0 %v2694_v18  ;;  %1288 = vmatmul.mubr.bf16.gmra.mrb[44].mxu1 %v2695_v19 }
  0x7f   : > { %1295 = vmatprep.mubr.bf16.mxu1 %v2696_v20  ;;  %2531 = vmatprep.mubr.msk.bf16.mxu0 %vm989_vm0, %v2698_v21 }
  0x86   : > { %1296 = vmatmul.mubr.bf16.gmra.mrb[48].mxu1 %v2699_v22  ;;  %2532 = vmatmul.mubr.msk.bf16.vlgmr.msra.gmra.mrb[48].mxu0 %vm989_vm0, %v2700_v23 }
  0x87   : > { %1303 = vmatprep.mubr.bf16.mxu1 %v2701_v24  ;;  %2535 = vmatprep.mubr.msk.bf16.mxu0 %vm989_vm0, %v2703_v25 }
  0x8e   : > { %1304 = vmatmul.mubr.bf16.gmra.mrb[52].mxu1 %v2704_v26  ;;  %2536 = vmatmul.mubr.msk.bf16.gmra.mrb[52].mxu0 %vm989_vm0, %v2705_v27 }
  0x8f   : > { %1311 = vmatprep.mubr.bf16.mxu1 %v2706_v28  ;;  %2539 = vmatprep.mubr.msk.bf16.mxu0 %vm989_vm0, %v2708_v29 }
  0x96   : > { %1312 = vmatmul.mubr.bf16.gmra.mrb[56].mxu1 %v2709_v30  ;;  %2540 = vmatmul.mubr.msk.bf16.gmra.mrb[56].mxu0 %vm989_vm0, %v2710_v31 }
  0x97   : > { %1319 = vmatprep.mubr.bf16.mxu1 %v2711_v32  ;;  %2543 = vmatprep.mubr.msk.bf16.mxu0 %vm989_vm0, %v2713_v33 }
  0x9e   : > { %1320 = vmatmul.mubr.bf16.gmra.mrb[60].mxu1 %v2714_v34  ;;  %2544 = vmatmul.mubr.msk.bf16.gmra.mrb[60].mxu0 %vm989_vm0, %v2715_v35 }
  0x9f   : > { %1327 = vmatprep.mubr.bf16.mxu1 %v2716_v36  ;;  %2547 = vmatprep.mubr.msk.bf16.mxu0 %vm989_vm0, %v2718_v37 }
  0xa6   : > { %1328 = vmatmul.mubr.bf16.gmra.mrb[64].mxu1 %v2719_v38  ;;  %2548 = vmatmul.mubr.msk.bf16.gmra.mrb[64].mxu0 %vm989_vm0, %v2720_v39 }
  0xa7   : > { %1335 = vmatprep.mubr.bf16.mxu1 %v2721_v40  ;;  %2551 = vmatprep.mubr.msk.bf16.mxu0 %vm989_vm0, %v2723_v41 }
  0xae   : > { %1336 = vmatmul.mubr.bf16.gmra.mrb[68].mxu1 %v2724_v42  ;;  %2552 = vmatmul.mubr.msk.bf16.gmra.mrb[68].mxu0 %vm989_vm0, %v2725_v43 }
  0xaf   : > { %1343 = vmatprep.mubr.bf16.mxu1 %v2726_v44  ;;  %2555 = vmatprep.mubr.msk.bf16.mxu0 %vm989_vm0, %v2728_v45 }
  0xb6   : > { %1344 = vmatmul.mubr.bf16.gmra.mrb[72].mxu1 %v2729_v46  ;;  %2556 = vmatmul.mubr.msk.bf16.gmra.mrb[72].mxu0 %vm989_vm0, %v2730_v47 }
  0xb7   : > { %1351 = vmatprep.mubr.bf16.mxu1 %v2731_v48  ;;  %2559 = vmatprep.mubr.msk.bf16.mxu0 %vm989_vm0, %v2733_v49 }
  0xbe   : > { %1352 = vmatmul.mubr.bf16.gmra.mrb[76].mxu1 %v2734_v50  ;;  %2560 = vmatmul.mubr.msk.bf16.gmra.mrb[76].mxu0 %vm989_vm0, %v2735_v51 }
  0xf9   : > { %v2367_v52 = vpop.f32.mrb[0].mxu1  ;;  %v2295_v53 = vpop.f32.mrb[0].mxu0 }
  0xfa   : > { %v2368_v54 = vpop.f32.mrb[1].mxu1  ;;  %v2296_v55 = vpop.f32.mrb[1].mxu0 }
  0xfb   : > { %v2989_v56 = vadd.f32 %v2368_v54, %v2367_v52  ;;  %v2370_v57 = vpop.f32.mrb[2].mxu1  ;;  %v2297_v58 = vadd.f32 %v2296_v55, %v2295_v53  ;;  %v2298_v59 = vpop.f32.mrb[2].mxu0 }
  0xfc   : > { %v2371_v60 = vpop.f32.mrb[3].mxu1  ;;  %v2299_v61 = vpop.f32.mrb[3].mxu0 }
  0xfd   : > { %v2991_v62 = vadd.f32 %v2371_v60, %v2370_v57  ;;  %v2300_v63 = vadd.f32 %v2299_v61, %v2298_v59 }
 0x101   : > { %v2373_v0 = vpop.f32.mrb[4].mxu1  ;;  %v2301_v1 = vpop.f32.mrb[4].mxu0 }
 0x102   : > { %v2374_v2 = vpop.f32.mrb[5].mxu1  ;;  %v2302_v3 = vpop.f32.mrb[5].mxu0 }
 0x103   : > { %v2993_v4 = vadd.f32 %v2374_v2, %v2373_v0  ;;  %v2376_v5 = vpop.f32.mrb[6].mxu1  ;;  %v2303_v6 = vadd.f32 %v2302_v3, %v2301_v1  ;;  %v2304_v7 = vpop.f32.mrb[6].mxu0 }
 0x104   : > { %v2377_v8 = vpop.f32.mrb[7].mxu1  ;;  %v2305_v9 = vpop.f32.mrb[7].mxu0 }
 0x105   : > { %v2995_v10 = vadd.f32 %v2377_v8, %v2376_v5  ;;  %v2306_v11 = vadd.f32 %v2305_v9, %v2304_v7 }
 0x109   : > { %v2379_v12 = vpop.f32.mrb[8].mxu1  ;;  %v2307_v13 = vpop.f32.mrb[8].mxu0 }
 0x10a   : > { %v2380_v14 = vpop.f32.mrb[9].mxu1  ;;  %v2308_v15 = vpop.f32.mrb[9].mxu0 }
 0x10b   : > { %v2997_v16 = vadd.f32 %v2380_v14, %v2379_v12  ;;  %v2382_v17 = vpop.f32.mrb[10].mxu1  ;;  %v2309_v18 = vadd.f32 %v2308_v15, %v2307_v13  ;;  %v2310_v19 = vpop.f32.mrb[10].mxu0 }
 0x10c   : > { %v2383_v20 = vpop.f32.mrb[11].mxu1  ;;  %v2311_v21 = vpop.f32.mrb[11].mxu0 }
 0x10d   : > { %v2999_v22 = vadd.f32 %v2383_v20, %v2382_v17  ;;  %v2312_v23 = vadd.f32 %v2311_v21, %v2310_v19 }
 0x111   : > { %v2385_v24 = vpop.f32.mrb[12].mxu1  ;;  %v2313_v25 = vpop.f32.mrb[12].mxu0 }
 0x112   : > { %v2386_v26 = vpop.f32.mrb[13].mxu1  ;;  %v2314_v27 = vpop.f32.mrb[13].mxu0 }
 0x113   : > { %v3001_v28 = vadd.f32 %v2386_v26, %v2385_v24  ;;  %v2388_v29 = vpop.f32.mrb[14].mxu1  ;;  %v2315_v30 = vadd.f32 %v2314_v27, %v2313_v25  ;;  %v2316_v31 = vpop.f32.mrb[14].mxu0 }
 0x114   : > { %v2389_v32 = vpop.f32.mrb[15].mxu1  ;;  %v2317_v33 = vpop.f32.mrb[15].mxu0 }
 0x115   : > { %v3003_v34 = vadd.f32 %v2389_v32, %v2388_v29  ;;  %v2318_v35 = vadd.f32 %v2317_v33, %v2316_v31 }
 0x119   : > { %v2407_v36 = vpop.f32.mrb[16].mxu1  ;;  %v2319_v37 = vpop.f32.mrb[16].mxu0 }
 0x11a   : > { %v2408_v38 = vpop.f32.mrb[17].mxu1  ;;  %v2320_v39 = vpop.f32.mrb[17].mxu0 }
 0x11b   : > { %v2409_v40 = vadd.f32 %v2408_v38, %v2407_v36  ;;  %v2410_v41 = vpop.f32.mrb[18].mxu1  ;;  %v2321_v42 = vadd.f32 %v2320_v39, %v2319_v37  ;;  %v2322_v43 = vpop.f32.mrb[18].mxu0 }
 0x11c   : > { %v2411_v44 = vpop.f32.mrb[19].mxu1  ;;  %v2323_v45 = vpop.f32.mrb[19].mxu0 }
 0x11d   : > { %v2412_v46 = vadd.f32 %v2411_v44, %v2410_v41  ;;  %v2324_v47 = vadd.f32 %v2323_v45, %v2322_v43  ;;  %v3005_v48 = vadd.f32 %v2409_v40, %v2297_v58 }
 0x11f   : > { %v3007_v49 = vadd.f32 %v2412_v46, %v2300_v63 }
 0x121   : > { %v2413_v50 = vpop.f32.mrb[20].mxu1  ;;  %v2325_v51 = vpop.f32.mrb[20].mxu0 }
 0x122   : > { %v2414_v52 = vpop.f32.mrb[21].mxu1  ;;  %v2326_v53 = vpop.f32.mrb[21].mxu0 }
 0x123   : > { %v2415_v54 = vadd.f32 %v2414_v52, %v2413_v50  ;;  %v2416_v55 = vpop.f32.mrb[22].mxu1  ;;  %v2327_v57 = vadd.f32 %v2326_v53, %v2325_v51  ;;  %v2328_v59 = vpop.f32.mrb[22].mxu0 }
 0x124   : > { %v2417_v60 = vpop.f32.mrb[23].mxu1  ;;  %v2329_v61 = vpop.f32.mrb[23].mxu0 }
 0x125   : > { %v2418_v0 = vadd.f32 %v2417_v60, %v2416_v55  ;;  %v2330_v1 = vadd.f32 %v2329_v61, %v2328_v59  ;;  %v3009_v2 = vadd.f32 %v2415_v54, %v2303_v6 }
 0x127   : > { %v3011_v3 = vadd.f32 %v2418_v0, %v2306_v11 }
 0x129   : > { %v2419_v58 = vpop.f32.mrb[24].mxu1  ;;  %v2331_v5 = vpop.f32.mrb[24].mxu0 }
 0x12a   : > { %v2420_v63 = vpop.f32.mrb[25].mxu1  ;;  %v2332_v7 = vpop.f32.mrb[25].mxu0 }
 0x12b   : > { %v2421_v8 = vadd.f32 %v2420_v63, %v2419_v58  ;;  %v2422_v9 = vpop.f32.mrb[26].mxu1  ;;  %v2333_v12 = vadd.f32 %v2332_v7, %v2331_v5  ;;  %v2334_v13 = vpop.f32.mrb[26].mxu0 }
 0x12c   : > { %v2423_v14 = vpop.f32.mrb[27].mxu1  ;;  %v2335_v15 = vpop.f32.mrb[27].mxu0 }
 0x12d   : > { %v2424_v17 = vadd.f32 %v2423_v14, %v2422_v9  ;;  %v2336_v19 = vadd.f32 %v2335_v15, %v2334_v13  ;;  %v3013_v20 = vadd.f32 %v2421_v8, %v2309_v18 }
 0x12f   : > { %v3015_v21 = vadd.f32 %v2424_v17, %v2312_v23 }
 0x131   : > { %v2425_v6 = vpop.f32.mrb[28].mxu1  ;;  %v2337_v24 = vpop.f32.mrb[28].mxu0 }
 0x132   : > { %v2426_v11 = vpop.f32.mrb[29].mxu1  ;;  %v2338_v25 = vpop.f32.mrb[29].mxu0 }
 0x133   : > { %v2427_v26 = vadd.f32 %v2426_v11, %v2425_v6  ;;  %v2428_v27 = vpop.f32.mrb[30].mxu1  ;;  %v2339_v29 = vadd.f32 %v2338_v25, %v2337_v24  ;;  %v2340_v31 = vpop.f32.mrb[30].mxu0 }
 0x134   : > { %v2429_v32 = vpop.f32.mrb[31].mxu1  ;;  %v2341_v33 = vpop.f32.mrb[31].mxu0 }
 0x135   : > { %v2430_v36 = vadd.f32 %v2429_v32, %v2428_v27  ;;  %v2342_v37 = vadd.f32 %v2341_v33, %v2340_v31  ;;  %v3017_v38 = vadd.f32 %v2427_v26, %v2315_v30 }
 0x137   : > { %v3019_v39 = vadd.f32 %v2430_v36, %v2318_v35 }
 0x139   : > { %v2431_v18 = vpop.f32.mrb[32].mxu1  ;;  %v2343_v40 = vpop.f32.mrb[32].mxu0 }
 0x13a   : > { %v2432_v23 = vpop.f32.mrb[33].mxu1  ;;  %v2344_v41 = vpop.f32.mrb[33].mxu0 }
 0x13b   : > { %v2433_v43 = vadd.f32 %v2432_v23, %v2431_v18  ;;  %v2434_v44 = vpop.f32.mrb[34].mxu1  ;;  %v3021_v45 = vadd.f32 %v2344_v41, %v2343_v40  ;;  %v2346_v46 = vpop.f32.mrb[34].mxu0 }
 0x13c   : > { %v2435_v50 = vpop.f32.mrb[35].mxu1  ;;  %v2347_v51 = vpop.f32.mrb[35].mxu0 }
 0x13d   : > { %v2436_v52 = vadd.f32 %v2435_v50, %v2434_v44  ;;  %v3023_v53 = vadd.f32 %v2347_v51, %v2346_v46  ;;  %v3025_v54 = vadd.f32 %v2433_v43, %v2321_v42 }
 0x13f   : > { %v3027_v30 = vadd.f32 %v2436_v52, %v2324_v47 }
 0x141   : > { %v2437_v35 = vpop.f32.mrb[36].mxu1  ;;  %v2349_v55 = vpop.f32.mrb[36].mxu0 }
 0x142   : > { %v2438_v59 = vpop.f32.mrb[37].mxu1  ;;  %v2350_v60 = vpop.f32.mrb[37].mxu0 }
 0x143   : > { %v2439_v61 = vadd.f32 %v2438_v59, %v2437_v35  ;;  %v2440_v0 = vpop.f32.mrb[38].mxu1  ;;  %v3029_v58 = vadd.f32 %v2350_v60, %v2349_v55  ;;  %v2352_v5 = vpop.f32.mrb[38].mxu0  ;;  %v3056_v59 = vld [vmem:[%s3216_s2] ss:$0 sm:$0xff] }
 0x144   : > { %v2441_v63 = vpop.f32.mrb[39].mxu1  ;;  %v2353_v7 = vpop.f32.mrb[39].mxu0 }
 0x145   : > { %v2442_v8 = vadd.f32 %v2441_v63, %v2440_v0  ;;  %v3031_v9 = vadd.f32 %v2353_v7, %v2352_v5  ;;  %v3033_v13 = vadd.f32 %v2439_v61, %v2327_v57  ;;  %v3062_v5 = vld [vmem:[%s3217_s3] ss:$0 sm:$0xff] }
 0x147   : > { %v3035_v42 = vadd.f32 %v2442_v8, %v2330_v1 }
 0x149   : > { %v2443_v47 = vpop.f32.mrb[40].mxu1  ;;  %v2355_v14 = vpop.f32.mrb[40].mxu0 }
 0x14a   : > { %v2444_v15 = vpop.f32.mrb[41].mxu1  ;;  %v2356_v17 = vpop.f32.mrb[41].mxu0 }
 0x14b   : > { %v2445_v6 = vadd.f32 %v2444_v15, %v2443_v47  ;;  %v2446_v24 = vpop.f32.mrb[42].mxu1  ;;  %v3037_v11 = vadd.f32 %v2356_v17, %v2355_v14  ;;  %v2358_v25 = vpop.f32.mrb[42].mxu0 }
 0x14c   : > { %v2447_v26 = vpop.f32.mrb[43].mxu1  ;;  %v2359_v27 = vpop.f32.mrb[43].mxu0 }
 0x14d   : > { %v2448_v31 = vadd.f32 %v2447_v26, %v2446_v24  ;;  %v3039_v32 = vadd.f32 %v2359_v27, %v2358_v25  ;;  %v3041_v33 = vadd.f32 %v2445_v6, %v2333_v12 }
 0x14f   : > { %v3043_v57 = vadd.f32 %v2448_v31, %v2336_v19 }
 0x151   : > { %v2449_v1 = vpop.f32.mrb[44].mxu1  ;;  %v2361_v36 = vpop.f32.mrb[44].mxu0 }
 0x152   : > { %v2450_v18 = vpop.f32.mrb[45].mxu1  ;;  %v2362_v40 = vpop.f32.mrb[45].mxu0 }
 0x153   : > { %v2451_v23 = vadd.f32 %v2450_v18, %v2449_v1  ;;  %v2452_v41 = vpop.f32.mrb[46].mxu1  ;;  %v3045_v43 = vadd.f32 %v2362_v40, %v2361_v36  ;;  %v2364_v44 = vpop.f32.mrb[46].mxu0 }
 0x154   : > { %v2453_v46 = vpop.f32.mrb[47].mxu1  ;;  %v2365_v50 = vpop.f32.mrb[47].mxu0 }
 0x155   : > { %v2454_v51 = vadd.f32 %v2453_v46, %v2452_v41  ;;  %v3047_v52 = vadd.f32 %v2365_v50, %v2364_v44  ;;  %v3049_v35 = vadd.f32 %v2451_v23, %v2339_v29 }
 0x157   : > { %v3051_v12 = vadd.f32 %v2454_v51, %v2342_v37 }
 0x159   : > { %v2455_v19 = vpop.f32.mrb[48].mxu1  ;;  %v2533_v55 = vpop.f32.mrb[48].mxu0 }
 0x15a   : > { %v1403_v60 = vadd.f32 %v2533_v55, %v3009_v2  ;;  %v2456_v61 = vpop.f32.mrb[49].mxu1  ;;  %v1394_v0 = vpop.f32.mrb[49].mxu0 }
 0x15b   : > { %v2457_v29 = vadd.f32 %v2456_v61, %v2455_v19  ;;  %v1395_v37 = vadd.f32 %v1394_v0, %v3005_v48  ;;  %v2458_v63 = vpop.f32.mrb[50].mxu1  ;;  %v2534_v7 = vpop.f32.mrb[50].mxu0 }
 0x15c   : > { %v1530_v8 = vmul.f32 %v3056_v59, %v1403_v60  ;;  %v1406_v47 = vadd.f32 %v2534_v7, %v3011_v3  ;;  %v2459_v14 = vpop.f32.mrb[51].mxu1  ;;  %v1397_v15 = vpop.f32.mrb[51].mxu0 }
 0x15d   : > { %v1528_v2 = vmul.f32 %v3056_v59, %v1395_v37  ;;  %v2460_v17 = vadd.f32 %v2459_v14, %v2458_v63  ;;  %v1398_v6 = vadd.f32 %v1397_v15, %v3007_v49  ;;  %v3070_v24 = vadd.f32 %v2457_v29, %v3021_v45 }
 0x15e   : > { %v1569_v25 = vadd.f32 %v3062_v5, %v1530_v8  ;;  %v1531_v48 = vmul.f32 %v3056_v59, %v1406_v47 }
 0x15f   : > { %v1567_v26 = vadd.f32 %v3062_v5, %v1528_v2  ;;  %v1529_v27 = vmul.f32 %v3056_v59, %v1398_v6  ;;  %v3077_v3 = vadd.f32 %v2460_v17, %v3023_v53 }
 0x160   : > { %v1601_v31 = vadd.f32 3.0, %v1569_v25  ;;  %v1570_v1 = vadd.f32 %v3062_v5, %v1531_v48 }
 0x161   : > { %v1599_v36 = vadd.f32 3.0, %v1567_v26  ;;  %v1568_v49 = vadd.f32 %v3062_v5, %v1529_v27  ;;  %v2461_v18 = vpop.f32.mrb[52].mxu1  ;;  %v2537_v45 = vpop.f32.mrb[52].mxu0 }
 0x162   : > { %v1633_v40 = vmax.f32 %v1601_v31, 0.0  ;;  %v1602_v23 = vadd.f32 3.0, %v1570_v1  ;;  %v1419_v41 = vadd.f32 %v2537_v45, %v3017_v38  ;;  %v2462_v44 = vpop.f32.mrb[53].mxu1  ;;  %v1410_v46 = vpop.f32.mrb[53].mxu0 }
 0x163   : > { %v1631_v50 = vmax.f32 %v1599_v36, 0.0  ;;  %v1600_v51 = vadd.f32 3.0, %v1568_v49  ;;  %v3082_v19 = vadd.f32 %v2462_v44, %v2461_v18  ;;  %v1411_v53 = vadd.f32 %v1410_v46, %v3013_v20  ;;  %v2464_v55 = vpop.f32.mrb[54].mxu1  ;;  %v2538_v60 = vpop.f32.mrb[54].mxu0 }
 0x164   : > { %v1665_v61 = vmin.f32 %v1633_v40, 6.0  ;;  %v1634_v0 = vmax.f32 %v1602_v23, 0.0  ;;  %v1534_v29 = vmul.f32 %v3056_v59, %v1419_v41  ;;  %v1422_v37 = vadd.f32 %v2538_v60, %v3019_v39  ;;  %v2465_v63 = vpop.f32.mrb[55].mxu1  ;;  %v1413_v7 = vpop.f32.mrb[55].mxu0 }
 0x165   : > { %v1663_v38 = vmin.f32 %v1631_v50, 6.0  ;;  %v1632_v8 = vmax.f32 %v1600_v51, 0.0  ;;  %v1532_v47 = vmul.f32 %v3056_v59, %v1411_v53  ;;  %v3088_v14 = vadd.f32 %v2465_v63, %v2464_v55 }
 0x166   : > { %v1697_v15 = vmul.f32 %v1665_v61, %v1569_v25  ;;  %v1666_v2 = vmin.f32 %v1634_v0, 6.0  ;;  %v1573_v20 = vadd.f32 %v3062_v5, %v1534_v29  ;;  %v1535_v17 = vmul.f32 %v3056_v59, %v1422_v37 }
 0x167   : > { %v1695_v6 = vmul.f32 %v1663_v38, %v1567_v26  ;;  %v1664_v48 = vmin.f32 %v1632_v8, 6.0  ;;  %v1571_v27 = vadd.f32 %v3062_v5, %v1532_v47  ;;  %v1414_v39 = vadd.f32 %v1413_v7, %v3015_v21 }
 0x168   : > { %v1729_v31 = vmul.f32 0.16666667, %v1697_v15  ;;  %v1698_v36 = vmul.f32 %v1666_v2, %v1570_v1  ;;  %v1605_v18 = vadd.f32 3.0, %v1573_v20  ;;  %v1574_v45 = vadd.f32 %v3062_v5, %v1535_v17 }
 0x169   : > { %v1727_v40 = vmul.f32 0.16666667, %v1695_v6  ;;  %v1696_v23 = vmul.f32 %v1664_v48, %v1568_v49  ;;  %v1603_v25 = vadd.f32 3.0, %v1571_v27  ;;  %v1533_v41 = vmul.f32 %v3056_v59, %v1414_v39  ;;  %v2467_v44 = vpop.f32.mrb[56].mxu1  ;;  %v2541_v46 = vpop.f32.mrb[56].mxu0 }
 0x16a   : > { %v1730_v50 = vmul.f32 0.16666667, %v1698_v36  ;;  %v1637_v26 = vmax.f32 %v1605_v18, 0.0  ;;  %v1606_v51 = vadd.f32 3.0, %v1574_v45  ;;  %v1435_v53 = vadd.f32 %v2541_v46, %v3033_v13  ;;  %v2468_v55 = vpop.f32.mrb[57].mxu1  ;;  %v1426_v21 = vpop.f32.mrb[57].mxu0 }
 0x16b   : > { %v1728_v1 = vmul.f32 0.16666667, %v1696_v23  ;;  %v1635_v49 = vmax.f32 %v1603_v25, 0.0  ;;  %v1572_v60 = vadd.f32 %v3062_v5, %v1533_v41  ;;  %v3104_v61 = vadd.f32 %v2468_v55, %v2467_v44  ;;  %v2470_v0 = vpop.f32.mrb[58].mxu1  ;;  %v2542_v29 = vpop.f32.mrb[58].mxu0 }
 0x16c   : > { %v2192_v37 = vpack.c.bf16 %v1730_v50, %v1729_v31  ;;  %v1669_v63 = vmin.f32 %v1637_v26, 6.0  ;;  %v1638_v13 = vmax.f32 %v1606_v51, 0.0  ;;  %v1538_v7 = vmul.f32 %v3056_v59, %v1435_v53  ;;  %v2471_v38 = vpop.f32.mrb[59].mxu1  ;;  %v1429_v8 = vpop.f32.mrb[59].mxu0 }
 0x16d   : > { %v2187_v47 = vpack.c.bf16 %v1728_v1, %v1727_v40  ;;  %v1667_v15 = vmin.f32 %v1635_v49, 6.0  ;;  %v1604_v2 = vadd.f32 3.0, %v1572_v60  ;;  %v1427_v17 = vadd.f32 %v1426_v21, %v3025_v54 }
 0x16e   : > { %2264 = vst [vmem:[%s3101_s29 + $0x8] sm:$0xff] %v2192_v37   ;;  %v1701_v6 = vmul.f32 %v1669_v63, %v1573_v20  ;;  %v1670_v48 = vmin.f32 %v1638_v13, 6.0  ;;  %v1577_v39 = vadd.f32 %v3062_v5, %v1538_v7  ;;  %v1438_v36 = vadd.f32 %v2542_v29, %v3035_v42 }
 0x16f   : > { %2188 = vst [vmem:[%s3101_s29] sm:$0xff] %v2187_v47   ;;  %v1699_v31 = vmul.f32 %v1667_v15, %v1571_v27  ;;  %v1636_v18 = vmax.f32 %v1604_v2, 0.0  ;;  %v1536_v23 = vmul.f32 %v3056_v59, %v1427_v17  ;;  %v3113_v25 = vadd.f32 %v2471_v38, %v2470_v0 }
 0x170   : > { %v1733_v41 = vmul.f32 0.16666667, %v1701_v6  ;;  %v1702_v40 = vmul.f32 %v1670_v48, %v1574_v45  ;;  %v1609_v44 = vadd.f32 3.0, %v1577_v39  ;;  %v1539_v46 = vmul.f32 %v3056_v59, %v1438_v36 }
 0x171   : > { %v1731_v54 = vmul.f32 0.16666667, %v1699_v31  ;;  %v1668_v50 = vmin.f32 %v1636_v18, 6.0  ;;  %v1575_v20 = vadd.f32 %v3062_v5, %v1536_v23  ;;  %v1430_v26 = vadd.f32 %v1429_v8, %v3027_v30  ;;  %v2473_v51 = vpop.f32.mrb[60].mxu1  ;;  %v2545_v42 = vpop.f32.mrb[60].mxu0 }
 0x172   : > { %v1734_v53 = vmul.f32 0.16666667, %v1702_v40  ;;  %v1641_v27 = vmax.f32 %v1609_v44, 0.0  ;;  %v1578_v55 = vadd.f32 %v3062_v5, %v1539_v46  ;;  %v1451_v21 = vadd.f32 %v2545_v42, %v3049_v35  ;;  %v2474_v1 = vpop.f32.mrb[61].mxu1  ;;  %v1442_v49 = vpop.f32.mrb[61].mxu0 }
 0x173   : > { %v1700_v45 = vmul.f32 %v1668_v50, %v1572_v60  ;;  %v1607_v0 = vadd.f32 3.0, %v1575_v20  ;;  %v1537_v29 = vmul.f32 %v3056_v59, %v1430_v26  ;;  %v3121_v37 = vadd.f32 %v2474_v1, %v2473_v51  ;;  %v2476_v63 = vpop.f32.mrb[62].mxu1  ;;  %v2546_v13 = vpop.f32.mrb[62].mxu0 }
 0x174   : > { %v2202_v30 = vpack.c.bf16 %v1734_v53, %v1733_v41  ;;  %v1673_v7 = vmin.f32 %v1641_v27, 6.0  ;;  %v1610_v38 = vadd.f32 3.0, %v1578_v55  ;;  %v1542_v8 = vmul.f32 %v3056_v59, %v1451_v21  ;;  %v2477_v47 = vpop.f32.mrb[63].mxu1  ;;  %v1445_v15 = vpop.f32.mrb[63].mxu0 }
 0x175   : > { %v1732_v2 = vmul.f32 0.16666667, %v1700_v45  ;;  %v1639_v35 = vmax.f32 %v1607_v0, 0.0  ;;  %v1576_v60 = vadd.f32 %v3062_v5, %v1537_v29  ;;  %v1443_v17 = vadd.f32 %v1442_v49, %v3041_v33 }
 0x176   : > { %2266 = vst [vmem:[%s3101_s29 + $0x18] sm:$0xff] %v2202_v30   ;;  %v1705_v6 = vmul.f32 %v1673_v7, %v1577_v39  ;;  %v1642_v48 = vmax.f32 %v1610_v38, 0.0  ;;  %v1581_v36 = vadd.f32 %v3062_v5, %v1542_v8  ;;  %v1454_v31 = vadd.f32 %v2546_v13, %v3051_v12 }
 0x177   : > { %v2197_v18 = vpack.c.bf16 %v1732_v2, %v1731_v54  ;;  %v1671_v23 = vmin.f32 %v1639_v35, 6.0  ;;  %v1608_v41 = vadd.f32 3.0, %v1576_v60  ;;  %v1540_v40 = vmul.f32 %v3056_v59, %v1443_v17 }
 0x178   : > { %v1737_v44 = vmul.f32 0.16666667, %v1705_v6  ;;  %v1674_v46 = vmin.f32 %v1642_v48, 6.0  ;;  %v1613_v50 = vadd.f32 3.0, %v1581_v36  ;;  %v1543_v26 = vmul.f32 %v3056_v59, %v1454_v31 }
 0x179   : > { %2265 = vst [vmem:[%s3101_s29 + $0x10] sm:$0xff] %v2197_v18   ;;  %v1703_v51 = vmul.f32 %v1671_v23, %v1575_v20  ;;  %v1640_v33 = vmax.f32 %v1608_v41, 0.0  ;;  %v1579_v39 = vadd.f32 %v3062_v5, %v1540_v40  ;;  %v3133_v42 = vadd.f32 %v2477_v47, %v2476_v63  ;;  %v2479_v53 = vpop.f32.mrb[64].mxu1  ;;  %v2549_v27 = vpop.f32.mrb[64].mxu0 }
 0x17a   : > { %v1706_v12 = vmul.f32 %v1674_v46, %v1578_v55  ;;  %v1645_v54 = vmax.f32 %v1613_v50, 0.0  ;;  %v1582_v21 = vadd.f32 %v3062_v5, %v1543_v26  ;;  %v1446_v1 = vadd.f32 %v1445_v15, %v3043_v57  ;;  %v2480_v49 = vpop.f32.mrb[65].mxu1  ;;  %v1458_v45 = vpop.f32.mrb[65].mxu0 }
 0x17b   : > { %v1735_v0 = vmul.f32 0.16666667, %v1703_v51  ;;  %v1672_v29 = vmin.f32 %v1640_v33, 6.0  ;;  %v1611_v13 = vadd.f32 3.0, %v1579_v39  ;;  %v1306_v20 = vadd.f32 %v3082_v19, %v3029_v58  ;;  %v2482_v30 = vpop.f32.mrb[66].mxu1  ;;  %v2550_v7 = vpop.f32.mrb[66].mxu0 }
 0x17c   : > { %v1738_v63 = vmul.f32 0.16666667, %v1706_v12  ;;  %v1677_v38 = vmin.f32 %v1645_v54, 6.0  ;;  %v1614_v8 = vadd.f32 3.0, %v1582_v21  ;;  %v1541_v55 = vmul.f32 %v3056_v59, %v1446_v1  ;;  %v2483_v47 = vpop.f32.mrb[67].mxu1  ;;  %v1461_v2 = vpop.f32.mrb[67].mxu0 }
 0x17d   : > { %v1704_v35 = vmul.f32 %v1672_v29, %v1576_v60  ;;  %v1643_v57 = vmax.f32 %v1611_v13, 0.0  ;;  %v1467_v15 = vadd.f32 %v2549_v27, %v1306_v20  ;;  %v3140_v17 = vadd.f32 %v2480_v49, %v2479_v53 }
 0x17e   : > { %v2212_v6 = vpack.c.bf16 %v1738_v63, %v1737_v44  ;;  %v1709_v48 = vmul.f32 %v1677_v38, %v1581_v36  ;;  %v1646_v31 = vmax.f32 %v1614_v8, 0.0  ;;  %v1580_v58 = vadd.f32 %v3062_v5, %v1541_v55 }
 0x17f   : > { %v1736_v19 = vmul.f32 0.16666667, %v1704_v35  ;;  %v1675_v18 = vmin.f32 %v1643_v57, 6.0  ;;  %v1546_v23 = vmul.f32 %v3056_v59, %v1467_v15  ;;  %v1459_v41 = vadd.f32 %v1458_v45, %v3070_v24 }
 0x180   : > { %2268 = vst [vmem:[%s3101_s29 + $0x28] sm:$0xff] %v2212_v6   ;;  %v1741_v40 = vmul.f32 0.16666667, %v1709_v48  ;;  %v1678_v46 = vmin.f32 %v1646_v31, 6.0  ;;  %v1612_v60 = vadd.f32 3.0, %v1580_v58  ;;  %v1309_v50 = vadd.f32 %v3088_v14, %v3031_v9 }
 0x181   : > { %v2207_v26 = vpack.c.bf16 %v1736_v19, %v1735_v0  ;;  %v1707_v44 = vmul.f32 %v1675_v18, %v1579_v39  ;;  %v1585_v36 = vadd.f32 %v3062_v5, %v1546_v23  ;;  %v1544_v51 = vmul.f32 %v3056_v59, %v1459_v41  ;;  %v2485_v33 = vpop.f32.mrb[68].mxu1  ;;  %v2553_v53 = vpop.f32.mrb[68].mxu0 }
 0x182   : > { %v1710_v27 = vmul.f32 %v1678_v46, %v1582_v21  ;;  %v1644_v12 = vmax.f32 %v1612_v60, 0.0  ;;  %v1470_v54 = vadd.f32 %v2550_v7, %v1309_v50  ;;  %v3150_v24 = vadd.f32 %v2483_v47, %v2482_v30  ;;  %v2486_v1 = vpop.f32.mrb[69].mxu1  ;;  %v1474_v49 = vpop.f32.mrb[69].mxu0 }
 0x183   : > { %2267 = vst [vmem:[%s3101_s29 + $0x20] sm:$0xff] %v2207_v26   ;;  %v1739_v45 = vmul.f32 0.16666667, %v1707_v44  ;;  %v1617_v29 = vadd.f32 3.0, %v1585_v36  ;;  %v1583_v9 = vadd.f32 %v3062_v5, %v1544_v51  ;;  %v1462_v14 = vadd.f32 %v1461_v2, %v3077_v3  ;;  %v2488_v39 = vpop.f32.mrb[70].mxu1  ;;  %v2554_v0 = vpop.f32.mrb[70].mxu0 }
 0x184   : > { %v1742_v13 = vmul.f32 0.16666667, %v1710_v27  ;;  %v1676_v20 = vmin.f32 %v1644_v12, 6.0  ;;  %v1547_v63 = vmul.f32 %v3056_v59, %v1470_v54  ;;  %v1322_v21 = vadd.f32 %v3121_v37, %v3045_v43  ;;  %v2489_v30 = vpop.f32.mrb[71].mxu1  ;;  %v1477_v7 = vpop.f32.mrb[71].mxu0 }
 0x185   : > { %v1649_v38 = vmax.f32 %v1617_v29, 0.0  ;;  %v1615_v8 = vadd.f32 3.0, %v1583_v9  ;;  %v1545_v55 = vmul.f32 %v3056_v59, %v1462_v14  ;;  %v2487_v47 = vadd.f32 %v2486_v1, %v2485_v33 }
 0x186   : > { %v2222_v35 = vpack.c.bf16 %v1742_v13, %v1741_v40  ;;  %v1708_v57 = vmul.f32 %v1676_v20, %v1580_v58  ;;  %v1586_v3 = vadd.f32 %v3062_v5, %v1547_v63  ;;  %v1483_v2 = vadd.f32 %v2553_v53, %v1322_v21 }
 0x187   : > { %v1681_v15 = vmin.f32 %v1649_v38, 6.0  ;;  %v1647_v6 = vmax.f32 %v1615_v8, 0.0  ;;  %v1584_v48 = vadd.f32 %v3062_v5, %v1545_v55  ;;  %v1314_v31 = vadd.f32 %v3104_v61, %v3037_v11 }
 0x188   : > { %2270 = vst [vmem:[%s3101_s29 + $0x38] sm:$0xff] %v2222_v35   ;;  %v1740_v43 = vmul.f32 0.16666667, %v1708_v57  ;;  %v1618_v37 = vadd.f32 3.0, %v1586_v3  ;;  %v1550_v19 = vmul.f32 %v3056_v59, %v1483_v2  ;;  %v1325_v18 = vadd.f32 %v3133_v42, %v3047_v52 }
 0x189   : > { %v1713_v23 = vmul.f32 %v1681_v15, %v1585_v36  ;;  %v1679_v58 = vmin.f32 %v1647_v6, 6.0  ;;  %v1616_v41 = vadd.f32 3.0, %v1584_v48  ;;  %v1475_v40 = vadd.f32 %v1474_v49, %v1314_v31  ;;  %v2491_v46 = vpop.f32.mrb[72].mxu1  ;;  %v2557_v60 = vpop.f32.mrb[72].mxu0 }
 0x18a   : > { %v2217_v50 = vpack.c.bf16 %v1740_v43, %v1739_v45  ;;  %v1650_v26 = vmax.f32 %v1618_v37, 0.0  ;;  %v1589_v44 = vadd.f32 %v3062_v5, %v1550_v19  ;;  %v1486_v11 = vadd.f32 %v2554_v0, %v1325_v18  ;;  %v2492_v61 = vpop.f32.mrb[73].mxu1  ;;  %v1490_v51 = vpop.f32.mrb[73].mxu0 }
 0x18b   : > { %v1745_v33 = vmul.f32 0.16666667, %v1713_v23  ;;  %v1711_v53 = vmul.f32 %v1679_v58, %v1583_v9  ;;  %v1648_v27 = vmax.f32 %v1616_v41, 0.0  ;;  %v1548_v12 = vmul.f32 %v3056_v59, %v1475_v40  ;;  %v2494_v52 = vpop.f32.mrb[74].mxu1  ;;  %v2558_v42 = vpop.f32.mrb[74].mxu0 }
 0x18c   : > { %2269 = vst [vmem:[%s3101_s29 + $0x30] sm:$0xff] %v2217_v50   ;;  %v1682_v36 = vmin.f32 %v1650_v26, 6.0  ;;  %v1621_v54 = vadd.f32 3.0, %v1589_v44  ;;  %v1551_v1 = vmul.f32 %v3056_v59, %v1486_v11  ;;  %v2490_v49 = vadd.f32 %v2489_v30, %v2488_v39  ;;  %v2495_v45 = vpop.f32.mrb[75].mxu1  ;;  %v1493_v29 = vpop.f32.mrb[75].mxu0 }
 0x18d   : > { %v1743_v14 = vmul.f32 0.16666667, %v1711_v53  ;;  %v1680_v13 = vmin.f32 %v1648_v27, 6.0  ;;  %v1587_v0 = vadd.f32 %v3062_v5, %v1548_v12  ;;  %v1317_v9 = vadd.f32 %v3113_v25, %v3039_v32 }
 0x18e   : > { %v1714_v20 = vmul.f32 %v1682_v36, %v1586_v3  ;;  %v1653_v63 = vmax.f32 %v1621_v54, 0.0  ;;  %v1590_v21 = vadd.f32 %v3062_v5, %v1551_v1  ;;  %v1338_v38 = vadd.f32 %v2487_v47, %v2993_v4 }
 0x18f   : > { %v1712_v8 = vmul.f32 %v1680_v13, %v1584_v48  ;;  %v1619_v55 = vadd.f32 3.0, %v1587_v0  ;;  %v1478_v35 = vadd.f32 %v1477_v7, %v1317_v9  ;;  %v2493_v57 = vadd.f32 %v2492_v61, %v2491_v46 }
 0x190   : > { %v1746_v39 = vmul.f32 0.16666667, %v1714_v20  ;;  %v1685_v30 = vmin.f32 %v1653_v63, 6.0  ;;  %v1622_v2 = vadd.f32 3.0, %v1590_v21  ;;  %v1499_v15 = vadd.f32 %v2557_v60, %v1338_v38 }
 0x191   : > { %v1744_v6 = vmul.f32 0.16666667, %v1712_v8  ;;  %v1651_v31 = vmax.f32 %v1619_v55, 0.0  ;;  %v1549_v43 = vmul.f32 %v3056_v59, %v1478_v35  ;;  %v1330_v32 = vadd.f32 %v3140_v17, %v2989_v56  ;;  %v2497_v25 = vpop.f32.mrb[76].mxu1  ;;  %v2561_v3 = vpop.f32.mrb[76].mxu0 }
 0x192   : > { %v2232_v37 = vpack.c.bf16 %v1746_v39, %v1745_v33  ;;  %v1717_v4 = vmul.f32 %v1685_v30, %v1589_v44  ;;  %v1654_v47 = vmax.f32 %v1622_v2, 0.0  ;;  %v1554_v7 = vmul.f32 %v3056_v59, %v1499_v15  ;;  %v2498_v48 = vpop.f32.mrb[77].mxu1  ;;  %v1506_v19 = vpop.f32.mrb[77].mxu0 }
 0x193   : > { %v2227_v18 = vpack.c.bf16 %v1744_v6, %v1743_v14  ;;  %v1683_v23 = vmin.f32 %v1651_v31, 6.0  ;;  %v1588_v58 = vadd.f32 %v3062_v5, %v1549_v43  ;;  %v1491_v41 = vadd.f32 %v1490_v51, %v1330_v32  ;;  %v2500_v40 = vpop.f32.mrb[78].mxu1  ;;  %v2562_v46 = vpop.f32.mrb[78].mxu0 }
 0x194   : > { %2272 = vst [vmem:[%s3101_s29 + $0x48] sm:$0xff] %v2232_v37   ;;  %v1686_v60 = vmin.f32 %v1654_v47, 6.0  ;;  %v1593_v56 = vadd.f32 %v3062_v5, %v1554_v7  ;;  %v1341_v17 = vadd.f32 %v2490_v49, %v2995_v10  ;;  %v2501_v50 = vpop.f32.mrb[79].mxu1  ;;  %v1509_v26 = vpop.f32.mrb[79].mxu0  ;;  %v1749_v44 = vmul.f32 0.16666667, %v1717_v4 }
 0x195   : > { %2271 = vst [vmem:[%s3101_s29 + $0x40] sm:$0xff] %v2227_v18   ;;  %v1620_v11 = vadd.f32 3.0, %v1588_v58  ;;  %v1552_v61 = vmul.f32 %v3056_v59, %v1491_v41  ;;  %v2496_v33 = vadd.f32 %v2495_v45, %v2494_v52  ;;  %v1333_v51 = vadd.f32 %v3150_v24, %v2991_v62 }
 0x196   : > { %v1718_v53 = vmul.f32 %v1686_v60, %v1590_v21  ;;  %v1625_v27 = vadd.f32 3.0, %v1593_v56  ;;  %v1502_v12 = vadd.f32 %v2558_v42, %v1341_v17  ;;  %v1715_v36 = vmul.f32 %v1683_v23, %v1587_v0 }
 0x197   : > { %v1652_v54 = vmax.f32 %v1620_v11, 0.0  ;;  %v1591_v1 = vadd.f32 %v3062_v5, %v1552_v61  ;;  %v2499_v14 = vadd.f32 %v2498_v48, %v2497_v25  ;;  %v1494_v9 = vadd.f32 %v1493_v29, %v1333_v51 }
 0x198   : > { %v1750_v10 = vmul.f32 0.16666667, %v1718_v53  ;;  %v1657_v49 = vmax.f32 %v1625_v27, 0.0  ;;  %v1555_v13 = vmul.f32 %v3056_v59, %v1502_v12  ;;  %v1346_v42 = vadd.f32 %v2493_v57, %v2997_v16 }
 0x199   : > { %v1684_v20 = vmin.f32 %v1652_v54, 6.0  ;;  %v1623_v63 = vadd.f32 3.0, %v1591_v1  ;;  %v1354_v52 = vadd.f32 %v2499_v14, %v3001_v28  ;;  %v1553_v24 = vmul.f32 %v3056_v59, %v1494_v9 }
 0x19a   : > { %v2242_v45 = vpack.c.bf16 %v1750_v10, %v1749_v44  ;;  %v1689_v21 = vmin.f32 %v1657_v49, 6.0  ;;  %v1594_v62 = vadd.f32 %v3062_v5, %v1555_v13  ;;  %v1507_v55 = vadd.f32 %v1506_v19, %v1346_v42 }
 0x19b   : > { %v1716_v0 = vmul.f32 %v1684_v20, %v1588_v58  ;;  %v1655_v38 = vmax.f32 %v1623_v63, 0.0  ;;  %v1515_v8 = vadd.f32 %v2561_v3, %v1354_v52  ;;  %v1747_v35 = vmul.f32 0.16666667, %v1715_v36 }
 0x19c   : > { %2274 = vst [vmem:[%s3101_s29 + $0x58] sm:$0xff] %v2242_v45   ;;  %v1626_v39 = vadd.f32 3.0, %v1594_v62  ;;  %v1592_v29 = vadd.f32 %v3062_v5, %v1553_v24  ;;  %v2502_v30 = vadd.f32 %v2501_v50, %v2500_v40  ;;  %v1556_v57 = vmul.f32 %v3056_v59, %v1507_v55 }
 0x19d   : > { %v1748_v28 = vmul.f32 0.16666667, %v1716_v0  ;;  %v1687_v2 = vmin.f32 %v1655_v38, 6.0  ;;  %v1558_v16 = vmul.f32 %v3056_v59, %v1515_v8  ;;  %v1721_v32 = vmul.f32 %v1689_v21, %v1593_v56 }
 0x19e   : > { %v1658_v15 = vmax.f32 %v1626_v39, 0.0  ;;  %v1624_v6 = vadd.f32 3.0, %v1592_v29  ;;  %v1357_v31 = vadd.f32 %v2502_v30, %v3003_v34  ;;  %v1595_v3 = vadd.f32 %v3062_v5, %v1556_v57 }
 0x19f   : > { %v2237_v43 = vpack.c.bf16 %v1748_v28, %v1747_v35  ;;  %v1597_v25 = vadd.f32 %v3062_v5, %v1558_v16  ;;  %v1349_v7 = vadd.f32 %v2496_v33, %v2999_v22  ;;  %v1719_v48 = vmul.f32 %v1687_v2, %v1591_v1 }
 0x1a0   : > { %v1690_v37 = vmin.f32 %v1658_v15, 6.0  ;;  %v1656_v4 = vmax.f32 %v1624_v6, 0.0  ;;  %v1518_v47 = vadd.f32 %v2562_v46, %v1357_v31  ;;  %v1627_v18 = vadd.f32 3.0, %v1595_v3 }
 0x1a1   : > { %2273 = vst [vmem:[%s3101_s29 + $0x50] sm:$0xff] %v2237_v43   ;;  %v1629_v19 = vadd.f32 3.0, %v1597_v25  ;;  %v1510_v41 = vadd.f32 %v1509_v26, %v1349_v7  ;;  %v1753_v40 = vmul.f32 0.16666667, %v1721_v32  ;;  %v1751_v44 = vmul.f32 0.16666667, %v1719_v48 }
 0x1a2   : > { %v1722_v23 = vmul.f32 %v1690_v37, %v1594_v62  ;;  %v1688_v58 = vmin.f32 %v1656_v4, 6.0  ;;  %v1559_v34 = vmul.f32 %v3056_v59, %v1518_v47  ;;  %v1659_v56 = vmax.f32 %v1627_v18, 0.0 }
 0x1a3   : > { %v1661_v60 = vmax.f32 %v1629_v19, 0.0  ;;  %v1557_v22 = vmul.f32 %v3056_v59, %v1510_v41 }
 0x1a4   : > { %v1754_v17 = vmul.f32 0.16666667, %v1722_v23  ;;  %v1720_v50 = vmul.f32 %v1688_v58, %v1592_v29  ;;  %v1598_v46 = vadd.f32 %v3062_v5, %v1559_v34  ;;  %v1691_v26 = vmin.f32 %v1659_v56, 6.0 }
 0x1a5   : > { %v1693_v11 = vmin.f32 %v1661_v60, 6.0  ;;  %v1596_v27 = vadd.f32 %v3062_v5, %v1557_v22 }
 0x1a6   : > { %v2252_v61 = vpack.c.bf16 %v1754_v17, %v1753_v40  ;;  %v1752_v33 = vmul.f32 0.16666667, %v1720_v50  ;;  %v1630_v53 = vadd.f32 3.0, %v1598_v46  ;;  %v1723_v10 = vmul.f32 %v1691_v26, %v1595_v3 }
 0x1a7   : > { %v1628_v36 = vadd.f32 3.0, %v1596_v27  ;;  %v1725_v54 = vmul.f32 %v1693_v11, %v1597_v25 }
 0x1a8   : > { %2276 = vst [vmem:[%s3101_s29 + $0x68] sm:$0xff] %v2252_v61   ;;  %v2247_v12 = vpack.c.bf16 %v1752_v33, %v1751_v44  ;;  %v1662_v51 = vmax.f32 %v1630_v53, 0.0  ;;  %v1755_v63 = vmul.f32 0.16666667, %v1723_v10 }
 0x1a9   : > { %v1660_v14 = vmax.f32 %v1628_v36, 0.0  ;;  %v1757_v13 = vmul.f32 0.16666667, %v1725_v54 }
 0x1aa   : > { %2275 = vst [vmem:[%s3101_s29 + $0x60] sm:$0xff] %v2247_v12   ;;  %v1694_v1 = vmin.f32 %v1662_v51, 6.0 }
 0x1ab   : > { %v1692_v49 = vmin.f32 %v1660_v14, 6.0 }
 0x1ac   : > { %v1726_v59 = vmul.f32 %v1694_v1, %v1598_v46 }
 0x1ad   : > { %v1724_v20 = vmul.f32 %v1692_v49, %v1596_v27 }
 0x1ae   : > { %v1758_v9 = vmul.f32 0.16666667, %v1726_v59 }
 0x1af   : > { %v1756_v5 = vmul.f32 0.16666667, %v1724_v20 }
 0x1b0   : > { %v2262_v52 = vpack.c.bf16 %v1758_v9, %v1757_v13 }
 0x1b1   : > { %v2257_v42 = vpack.c.bf16 %v1756_v5, %v1755_v63 }
 0x1b2   : > { %2278 = vst [vmem:[%s3101_s29 + $0x78] sm:$0xff] %v2262_v52  }
 0x1b3   : > { %2277 = vst [vmem:[%s3101_s29 + $0x70] sm:$0xff] %v2257_v42  }
 0x1b4 PF: > { %s14_s15 = sadd.s32 1, %s2742_s15  }
 0x1b5   : > { %p11_p4 = scmp.ge.s32.totalorder %s14_s15, 4  }
 0x1b7   :  { %13 = sbr.rel (!%p11_p4) target bundleno = 1 (0x1), region = 66 }

</bundles_post_ra>
